<compile_context>
chip_gen: v6e
topology: v6e:2x2x1
jax: 0.10.0
libtpu: 0.0.40
codegen_flags: <defaults>
</compile_context>

<pallas_src>
import functools

import jax
import jax.numpy as jnp
from jax.experimental import pallas as pl
from jax.experimental.pallas import tpu as pltpu

TILE_CANDIDATES = (512, 256, 128)
VMEM_LIMIT = 48 * 1024 * 1024   # below v7x's 64 MiB physical VMEM, with headroom


def _pick_block(dim, candidates=TILE_CANDIDATES):
    """Largest candidate tile that evenly divides `dim`; otherwise the full
    extent (a block equal to the full array dim is always legal), so no
    zero-pad staging arrays are ever materialized in HBM."""
    for c in candidates:
        if dim % c == 0:
            return c
    return dim


# ----------------------------------------------------------------------------
# Fused matmul:  out = a @ w + bias [+ residual]
#   a, w are fed to the MXU in bf16; accumulation is f32 in VMEM scratch;
#   the epilogue (bias / residual add, final cast) is f32 on the VPU.
# ----------------------------------------------------------------------------
def _mm_kernel(*refs, has_res):
    if has_res:
        a_ref, b_ref, bias_ref, r_ref, o_ref, acc_ref = refs
    else:
        a_ref, b_ref, bias_ref, o_ref, acc_ref = refs
        r_ref = None

    k = pl.program_id(2)

    @pl.when(k == 0)
    def _():
        acc_ref[...] = jnp.zeros_like(acc_ref)

    acc_ref[...] += jnp.dot(a_ref[...], b_ref[...],
                            preferred_element_type=jnp.float32)

    @pl.when(k == pl.num_programs(2) - 1)
    def _():
        out = acc_ref[...] + bias_ref[...].astype(jnp.float32)
        if r_ref is not None:
            out = out + r_ref[...].astype(jnp.float32)
        o_ref[...] = out.astype(o_ref.dtype)


def matmul_bias(a, w, b, residual=None, out_dtype=jnp.float32):
    """a:(M,K) @ w:(K,N) + b:(N,) [+ residual:(M,N)] — bf16 MXU, f32 accumulator."""
    M, K = a.shape
    K2, N = w.shape
    assert K == K2
    bm = _pick_block(M)
    bn = _pick_block(N)
    bk = _pick_block(K)
    grid = (M // bm, N // bn, K // bk)

    a = a.astype(jnp.bfloat16)
    w = w.astype(jnp.bfloat16)
    bias2 = b.reshape(1, N).astype(jnp.float32)

    in_specs = [
        pl.BlockSpec((bm, bk), lambda i, j, k: (i, k)),
        pl.BlockSpec((bk, bn), lambda i, j, k: (k, j)),
        pl.BlockSpec((1, bn), lambda i, j, k: (0, j)),
    ]
    args = [a, w, bias2]
    if residual is not None:
        in_specs.append(pl.BlockSpec((bm, bn), lambda i, j, k: (i, j)))
        args.append(residual)

    return pl.pallas_call(
        functools.partial(_mm_kernel, has_res=residual is not None),
        out_shape=jax.ShapeDtypeStruct((M, N), out_dtype),
        grid_spec=pltpu.PrefetchScalarGridSpec(
            num_scalar_prefetch=0,
            grid=grid,
            in_specs=in_specs,
            out_specs=pl.BlockSpec((bm, bn), lambda i, j, k: (i, j)),
            scratch_shapes=[pltpu.VMEM((bm, bn), jnp.float32)],
        ),
        compiler_params=pltpu.CompilerParams(
            dimension_semantics=("parallel", "parallel", "arbitrary"),
            vmem_limit_bytes=VMEM_LIMIT),
    )(*args)


# ----------------------------------------------------------------------------
# Attention core: softmax(q k^T / sqrt(hd)) v over the sequence axis.
# q/k/v: (BH, S, hd) bf16; head_dim stays unpadded (full-dim lane block).
# ----------------------------------------------------------------------------
def _attn_kernel(q_ref, k_ref, v_ref, o_ref, *, scale):
    q = q_ref[...]                     # (GB, S, hd) bf16
    k = k_ref[...]
    v = v_ref[...]
    s = jnp.einsum("bqd,bkd->bqk", q, k,
                   preferred_element_type=jnp.float32) * scale
    m = jnp.max(s, axis=-1, keepdims=True)
    p = jnp.exp(s - m)
    denom = jnp.sum(p, axis=-1, keepdims=True)
    p = p * pl.reciprocal(denom, approx=True)        # divide on the EUP slot
    o = jnp.einsum("bqk,bkd->bqd", p.astype(v.dtype), v,
                   preferred_element_type=jnp.float32)
    o_ref[...] = o.astype(o_ref.dtype)


def _pick_gb(bh):
    """Batch-heads per grid step; keep the parallel grid >= 2 (v7x megacore)."""
    best = 1
    for c in (2, 4, 8):
        if bh % c == 0 and bh // c >= 2:
            best = c
    return best


def attention_core(q, k, v, head_dim):
    BH, S, hd = q.shape
    GB = _pick_gb(BH)
    scale = 1.0 / (float(head_dim) ** 0.5)
    # TODO(synk): for large S = B*H*W add an S_kv grid axis with online softmax
    # so the (GB, S, S) score block stays within VMEM on v7x.
    return pl.pallas_call(
        functools.partial(_attn_kernel, scale=scale),
        out_shape=jax.ShapeDtypeStruct((BH, S, hd), jnp.bfloat16),
        grid_spec=pltpu.PrefetchScalarGridSpec(
            num_scalar_prefetch=0,
            grid=(BH // GB,),
            in_specs=[pl.BlockSpec((GB, S, hd), lambda i: (i, 0, 0))] * 3,
            out_specs=pl.BlockSpec((GB, S, hd), lambda i: (i, 0, 0)),
        ),
        compiler_params=pltpu.CompilerParams(
            dimension_semantics=("parallel",),
            vmem_limit_bytes=VMEM_LIMIT),
    )(q, k, v)


# ----------------------------------------------------------------------------
# Module: TemporalSelfAttention
# ----------------------------------------------------------------------------
def get_num_heads(in_channels):
    num_heads = min(in_channels, 8)
    while in_channels % num_heads != 0 and num_heads > 1:
        num_heads -= 1
    if in_channels % num_heads != 0:
        num_heads = 1
    return num_heads


def build_params(in_channels, seed=0):
    heads = get_num_heads(in_channels)
    key = jax.random.PRNGKey(seed)
    k1, k2, k3, k4 = jax.random.split(key, 4)
    scale = in_channels ** -0.5
    return dict(
        heads=heads,
        head_dim=in_channels // heads,
        # weights stored directly in the (K, N) layout the matmul kernel uses
        w_in=jax.random.normal(k1, (in_channels, 3 * in_channels), jnp.float32) * scale,
        b_in=jax.random.normal(k2, (3 * in_channels,), jnp.float32) * 0.01,
        w_out=jax.random.normal(k3, (in_channels, in_channels), jnp.float32) * scale,
        b_out=jax.random.normal(k4, (in_channels,), jnp.float32) * 0.01,
    )


def temporal_self_attention(x, p):
    """x: (B, C, T, H, W) f32 -> (B, C, T, H, W) f32 (matches the PyTorch module)."""
    B, C, T, H, W = x.shape
    heads, hd = p["heads"], p["head_dim"]
    L, N = B * H * W, T                  # batch_first=False: seq = B*H*W, batch = T

    # permute(0,3,4,2,1).reshape(B*H*W, T, C), flattened to (L*N, C)
    x2 = jnp.transpose(x, (0, 3, 4, 2, 1)).reshape(L * N, C)

    # QKV projection: bf16 MXU matmul, bias fused -> (L*N, 3C) bf16 activations
    qkv = matmul_bias(x2, p["w_in"], p["b_in"], out_dtype=jnp.bfloat16)
    q, k, v = jnp.split(qkv, 3, axis=-1)

    def to_heads(t):                     # (L*N, C) -> (N*heads, L, hd)
        return (t.reshape(L, N, heads, hd)
                 .transpose(1, 2, 0, 3)
                 .reshape(N * heads, L, hd))
    # TODO(synk): fold the head split/merge transposes into attention BlockSpec
    # index_maps to avoid these XLA copies on large activations.

    oh = attention_core(to_heads(q), to_heads(k), to_heads(v), hd)  # (N*h, L, hd)
    o = (oh.reshape(N, heads, L, hd)
           .transpose(2, 0, 1, 3)
           .reshape(L * N, C))

    # Output projection with bias AND the residual (x in the same layout) fused
    # into the matmul epilogue -> no separate residual-add kernel.
    out2 = matmul_bias(o, p["w_out"], p["b_out"], residual=x2,
                       out_dtype=jnp.float32)

    # view(B,H,W,T,C).permute(0,4,3,1,2) -> (B, C, T, H, W)
    return jnp.transpose(out2.reshape(B, H, W, T, C), (0, 4, 3, 1, 2))


# ----------------------------------------------------------------------------
# Pure-JAX reference (f32) for correctness checking
# ----------------------------------------------------------------------------
def temporal_self_attention_ref(x, p):
    B, C, T, H, W = x.shape
    heads, hd = p["heads"], p["head_dim"]
    L, N = B * H * W, T
    x2 = jnp.transpose(x, (0, 3, 4, 2, 1)).reshape(L * N, C)
    qkv = x2 @ p["w_in"] + p["b_in"]
    q, k, v = jnp.split(qkv, 3, axis=-1)

    def to_heads(t):
        return t.reshape(L, N, heads, hd).transpose(1, 2, 0, 3).reshape(N * heads, L, hd)

    qh, kh, vh = to_heads(q), to_heads(k), to_heads(v)
    s = jnp.einsum("bqd,bkd->bqk", qh, kh) / jnp.sqrt(float(hd))
    pm = jax.nn.softmax(s, axis=-1)
    oh = jnp.einsum("bqk,bkd->bqd", pm, vh)
    o = oh.reshape(N, heads, L, hd).transpose(2, 0, 1, 3).reshape(L * N, C)
    attn = (o @ p["w_out"] + p["b_out"] + x2).reshape(B, H, W, T, C)
    return jnp.transpose(attn, (0, 4, 3, 1, 2))


# ----------------------------------------------------------------------------
if __name__ == "__main__":
    # heads = 8, head_dim = 8, sequence = B*H*W = 128, "batch" = T = 4
    B, C, T, H, W = 2, 64, 4, 8, 8
    key = jax.random.PRNGKey(0)
    x = jax.random.normal(key, (B, C, T, H, W), jnp.float32)

    params = build_params(C, seed=0)

    fwd = jax.jit(lambda v: temporal_self_attention(v, params))
    out = jax.block_until_ready(fwd(x))

    assert out.shape == (B, C, T, H, W), out.shape
    assert bool(jnp.all(jnp.isfinite(out)))

    ref = temporal_self_attention_ref(x, params)
    err = jnp.max(jnp.abs(out - ref) / (jnp.abs(ref) + 1.0))
    assert bool(err < 5e-2), float(err)   # bf16 MXU operands, f32 accumulation

    print("KERNEL_OK")
</pallas_src>

<mosaic_0001>
module attributes {stable_mosaic.version = 11 : i64} {
  func.func @_mm_kernel(%arg0: i32, %arg1: i32, %arg2: i32, %arg3: memref<512x64xbf16, #tpu.memory_space<vmem>>, %arg4: memref<64x192xbf16, #tpu.memory_space<vmem>>, %arg5: memref<1x192xf32, #tpu.memory_space<vmem>>, %arg6: memref<512x192xbf16, #tpu.memory_space<vmem>>, %arg7: memref<512x192xf32, #tpu.memory_space<vmem>>) attributes {dimension_semantics = [#tpu.dimension_semantics<parallel>, #tpu.dimension_semantics<parallel>, #tpu.dimension_semantics<arbitrary>], iteration_bounds = array<i64: 1, 1, 1>, scalar_prefetch = 0 : i64, scratch_operands = 1 : i64, tpu.core_type = #tpu.core_type<tc>, window_params = [{transform_indices = @transform_0, window_bounds = array<i64: 512, 64>}, {transform_indices = @transform_1, window_bounds = array<i64: 64, 192>}, {transform_indices = @transform_2, window_bounds = array<i64: 1, 192>}, {transform_indices = @transform_3, window_bounds = array<i64: 512, 192>}]} {
    %c0_i32 = arith.constant 0 : i32
    %0 = arith.cmpi eq, %arg2, %c0_i32 : i32
    %1 = arith.extui %0 : i1 to i32
    %c0_i32_0 = arith.constant 0 : i32
    %2 = arith.cmpi ne, %1, %c0_i32_0 : i32
    scf.if %2 {
      %cst_10 = arith.constant 0.000000e+00 : f32
      %12 = vector.broadcast %cst_10 : f32 to vector<512x192xf32>
      %c0_11 = arith.constant 0 : index
      %c0_12 = arith.constant 0 : index
      %13 = vector.load %arg7[%c0_11, %c0_12] : memref<512x192xf32, #tpu.memory_space<vmem>>, vector<512x192xf32>
      tpu.vector_store %arg7[%c0_11, %c0_12], %12 {strides = array<i32>} : memref<512x192xf32, #tpu.memory_space<vmem>>, vector<512x192xf32>,
    } else {
    }
    %c0 = arith.constant 0 : index
    %c0_1 = arith.constant 0 : index
    %3 = vector.load %arg7[%c0, %c0_1] : memref<512x192xf32, #tpu.memory_space<vmem>>, vector<512x192xf32>
    %c0_2 = arith.constant 0 : index
    %c0_3 = arith.constant 0 : index
    %4 = vector.load %arg3[%c0_2, %c0_3] : memref<512x64xbf16, #tpu.memory_space<vmem>>, vector<512x64xbf16>
    %c0_4 = arith.constant 0 : index
    %c0_5 = arith.constant 0 : index
    %5 = vector.load %arg4[%c0_4, %c0_5] : memref<64x192xbf16, #tpu.memory_space<vmem>>, vector<64x192xbf16>
    %cst = arith.constant dense<0.000000e+00> : vector<512x192xf32>
    %6 = tpu.matmul %4, %5, %cst {dimension_numbers = #tpu.dot_dimension_numbers<[1], [0], [0], [1], [0, 0, 1, 1], [], []>} : vector<512x64xbf16>, vector<64x192xbf16>, vector<512x192xf32> -> vector<512x192xf32>
    %7 = arith.addf %3, %6 : vector<512x192xf32>
    %c0_6 = arith.constant 0 : index
    %c0_7 = arith.constant 0 : index
    %8 = vector.load %arg7[%c0_6, %c0_7] : memref<512x192xf32, #tpu.memory_space<vmem>>, vector<512x192xf32>
    tpu.vector_store %arg7[%c0_6, %c0_7], %7 {strides = array<i32>} : memref<512x192xf32, #tpu.memory_space<vmem>>, vector<512x192xf32>,
    %c0_i32_8 = arith.constant 0 : i32
    %9 = arith.cmpi eq, %arg2, %c0_i32_8 : i32
    %10 = arith.extui %9 : i1 to i32
    %c0_i32_9 = arith.constant 0 : i32
    %11 = arith.cmpi ne, %10, %c0_i32_9 : i32
    scf.if %11 {
      %c0_10 = arith.constant 0 : index
      %c0_11 = arith.constant 0 : index
      %12 = vector.load %arg7[%c0_10, %c0_11] : memref<512x192xf32, #tpu.memory_space<vmem>>, vector<512x192xf32>
      %c0_12 = arith.constant 0 : index
      %c0_13 = arith.constant 0 : index
      %13 = vector.load %arg5[%c0_12, %c0_13] : memref<1x192xf32, #tpu.memory_space<vmem>>, vector<1x192xf32>
      %14 = vector.broadcast %13 : vector<1x192xf32> to vector<512x192xf32>
      %15 = arith.addf %12, %14 : vector<512x192xf32>
      %16 = arith.truncf %15 : vector<512x192xf32> to vector<512x192xbf16>
      %c0_14 = arith.constant 0 : index
      %c0_15 = arith.constant 0 : index
      %17 = vector.load %arg6[%c0_14, %c0_15] : memref<512x192xbf16, #tpu.memory_space<vmem>>, vector<512x192xbf16>
      tpu.vector_store %arg6[%c0_14, %c0_15], %16 {strides = array<i32>} : memref<512x192xbf16, #tpu.memory_space<vmem>>, vector<512x192xbf16>,
    } else {
    }
    return
  }
  func.func @transform_0(%arg0: i32, %arg1: i32, %arg2: i32) -> (i32, i32) {
    %c0_i32 = arith.constant 0 : i32
    return %arg0, %arg2 : i32, i32
  }
  func.func @transform_1(%arg0: i32, %arg1: i32, %arg2: i32) -> (i32, i32) {
    %c0_i32 = arith.constant 0 : i32
    return %arg2, %arg1 : i32, i32
  }
  func.func @transform_2(%arg0: i32, %arg1: i32, %arg2: i32) -> (i32, i32) {
    %c0_i32 = arith.constant 0 : i32
    %c0_i32_0 = arith.constant 0 : i32
    return %c0_i32, %arg1 : i32, i32
  }
  func.func @transform_3(%arg0: i32, %arg1: i32, %arg2: i32) -> (i32, i32) {
    %c0_i32 = arith.constant 0 : i32
    return %arg0, %arg1 : i32, i32
  }
}

module attributes {stable_mosaic.version = 11 : i64} {
  func.func @_attn_kernel(%arg0: i32, %arg1: memref<8x128x8xbf16, #tpu.memory_space<vmem>>, %arg2: memref<8x128x8xbf16, #tpu.memory_space<vmem>>, %arg3: memref<8x128x8xbf16, #tpu.memory_space<vmem>>, %arg4: memref<8x128x8xbf16, #tpu.memory_space<vmem>>) attributes {dimension_semantics = [#tpu.dimension_semantics<parallel>], iteration_bounds = array<i64: 4>, scalar_prefetch = 0 : i64, scratch_operands = 0 : i64, tpu.core_type = #tpu.core_type<tc>, window_params = [{transform_indices = @transform_0, window_bounds = array<i64: 8, 128, 8>}, {transform_indices = @transform_1, window_bounds = array<i64: 8, 128, 8>}, {transform_indices = @transform_2, window_bounds = array<i64: 8, 128, 8>}, {transform_indices = @transform_3, window_bounds = array<i64: 8, 128, 8>}]} {
    %c0 = arith.constant 0 : index
    %c0_0 = arith.constant 0 : index
    %c0_1 = arith.constant 0 : index
    %0 = vector.load %arg1[%c0, %c0_0, %c0_1] : memref<8x128x8xbf16, #tpu.memory_space<vmem>>, vector<8x128x8xbf16>
    %c0_2 = arith.constant 0 : index
    %c0_3 = arith.constant 0 : index
    %c0_4 = arith.constant 0 : index
    %1 = vector.load %arg2[%c0_2, %c0_3, %c0_4] : memref<8x128x8xbf16, #tpu.memory_space<vmem>>, vector<8x128x8xbf16>
    %c0_5 = arith.constant 0 : index
    %c0_6 = arith.constant 0 : index
    %c0_7 = arith.constant 0 : index
    %2 = vector.load %arg3[%c0_5, %c0_6, %c0_7] : memref<8x128x8xbf16, #tpu.memory_space<vmem>>, vector<8x128x8xbf16>
    "tpu.trace_start"() <{level = 10 : i32, message = "bqd,bkd->bqk"}> : () -> ()
    %cst = arith.constant dense<0.000000e+00> : vector<8x128x128xf32>
    %3 = tpu.matmul %0, %1, %cst {dimension_numbers = #tpu.dot_dimension_numbers<[2], [2], [1], [1], [0, 0, 0, 1, 1, 1], [0], [0]>} : vector<8x128x8xbf16>, vector<8x128x8xbf16>, vector<8x128x128xf32> -> vector<8x128x128xf32>
    "tpu.trace_stop"() : () -> ()
    %cst_8 = arith.constant 0.353553385 : f32
    %4 = vector.broadcast %cst_8 : f32 to vector<8x128x128xf32>
    %5 = arith.mulf %3, %4 : vector<8x128x128xf32>
    %cst_9 = arith.constant dense<0xFF800000> : vector<8x128xf32>
    %6 = vector.multi_reduction <maximumf>, %5, %cst_9 [2] : vector<8x128x128xf32> to vector<8x128xf32>
    %7 = vector.shape_cast %6 : vector<8x128xf32> to vector<8x128x1xf32>
    %8 = vector.broadcast %7 : vector<8x128x1xf32> to vector<8x128x128xf32>
    %9 = arith.subf %5, %8 : vector<8x128x128xf32>
    %10 = math.exp %9 : vector<8x128x128xf32>
    %cst_10 = arith.constant dense<0.000000e+00> : vector<8x128xf32>
    %11 = vector.multi_reduction <add>, %10, %cst_10 [2] : vector<8x128x128xf32> to vector<8x128xf32>
    %12 = vector.shape_cast %11 : vector<8x128xf32> to vector<8x128x1xf32>
    %13 = tpu.reciprocal %12 {approx = true} : vector<8x128x1xf32> -> vector<8x128x1xf32>
    %14 = vector.broadcast %13 : vector<8x128x1xf32> to vector<8x128x128xf32>
    %15 = arith.mulf %10, %14 : vector<8x128x128xf32>
    %16 = arith.truncf %15 : vector<8x128x128xf32> to vector<8x128x128xbf16>
    "tpu.trace_start"() <{level = 10 : i32, message = "bqk,bkd->bqd"}> : () -> ()
    %cst_11 = arith.constant dense<0.000000e+00> : vector<8x128x8xf32>
    %17 = tpu.matmul %16, %2, %cst_11 {dimension_numbers = #tpu.dot_dimension_numbers<[2], [1], [1], [2], [0, 0, 0, 1, 1, 2], [0], [0]>} : vector<8x128x128xbf16>, vector<8x128x8xbf16>, vector<8x128x8xf32> -> vector<8x128x8xf32>
    "tpu.trace_stop"() : () -> ()
    %18 = arith.truncf %17 : vector<8x128x8xf32> to vector<8x128x8xbf16>
    %c0_12 = arith.constant 0 : index
    %c0_13 = arith.constant 0 : index
    %c0_14 = arith.constant 0 : index
    %19 = vector.load %arg4[%c0_12, %c0_13, %c0_14] : memref<8x128x8xbf16, #tpu.memory_space<vmem>>, vector<8x128x8xbf16>
    tpu.vector_store %arg4[%c0_12, %c0_13, %c0_14], %18 {strides = array<i32>} : memref<8x128x8xbf16, #tpu.memory_space<vmem>>, vector<8x128x8xbf16>,
    return
  }
  func.func @transform_0(%arg0: i32) -> (i32, i32, i32) {
    %c0_i32 = arith.constant 0 : i32
    %c0_i32_0 = arith.constant 0 : i32
    %c0_i32_1 = arith.constant 0 : i32
    return %arg0, %c0_i32, %c0_i32_0 : i32, i32, i32
  }
  func.func @transform_1(%arg0: i32) -> (i32, i32, i32) {
    %c0_i32 = arith.constant 0 : i32
    %c0_i32_0 = arith.constant 0 : i32
    %c0_i32_1 = arith.constant 0 : i32
    return %arg0, %c0_i32, %c0_i32_0 : i32, i32, i32
  }
  func.func @transform_2(%arg0: i32) -> (i32, i32, i32) {
    %c0_i32 = arith.constant 0 : i32
    %c0_i32_0 = arith.constant 0 : i32
    %c0_i32_1 = arith.constant 0 : i32
    return %arg0, %c0_i32, %c0_i32_0 : i32, i32, i32
  }
  func.func @transform_3(%arg0: i32) -> (i32, i32, i32) {
    %c0_i32 = arith.constant 0 : i32
    %c0_i32_0 = arith.constant 0 : i32
    %c0_i32_1 = arith.constant 0 : i32
    return %arg0, %c0_i32, %c0_i32_0 : i32, i32, i32
  }
}

module attributes {stable_mosaic.version = 11 : i64} {
  func.func @_mm_kernel(%arg0: i32, %arg1: i32, %arg2: i32, %arg3: memref<512x64xbf16, #tpu.memory_space<vmem>>, %arg4: memref<64x64xbf16, #tpu.memory_space<vmem>>, %arg5: memref<1x64xf32, #tpu.memory_space<vmem>>, %arg6: memref<512x64xf32, #tpu.memory_space<vmem>>, %arg7: memref<512x64xf32, #tpu.memory_space<vmem>>, %arg8: memref<512x64xf32, #tpu.memory_space<vmem>>) attributes {dimension_semantics = [#tpu.dimension_semantics<parallel>, #tpu.dimension_semantics<parallel>, #tpu.dimension_semantics<arbitrary>], iteration_bounds = array<i64: 1, 1, 1>, scalar_prefetch = 0 : i64, scratch_operands = 1 : i64, tpu.core_type = #tpu.core_type<tc>, window_params = [{transform_indices = @transform_0, window_bounds = array<i64: 512, 64>}, {transform_indices = @transform_1, window_bounds = array<i64: 64, 64>}, {transform_indices = @transform_2, window_bounds = array<i64: 1, 64>}, {transform_indices = @transform_3, window_bounds = array<i64: 512, 64>}, {transform_indices = @transform_4, window_bounds = array<i64: 512, 64>}]} {
    %c0_i32 = arith.constant 0 : i32
    %0 = arith.cmpi eq, %arg2, %c0_i32 : i32
    %1 = arith.extui %0 : i1 to i32
    %c0_i32_0 = arith.constant 0 : i32
    %2 = arith.cmpi ne, %1, %c0_i32_0 : i32
    scf.if %2 {
      %cst_10 = arith.constant 0.000000e+00 : f32
      %12 = vector.broadcast %cst_10 : f32 to vector<512x64xf32>
      %c0_11 = arith.constant 0 : index
      %c0_12 = arith.constant 0 : index
      %13 = vector.load %arg8[%c0_11, %c0_12] : memref<512x64xf32, #tpu.memory_space<vmem>>, vector<512x64xf32>
      tpu.vector_store %arg8[%c0_11, %c0_12], %12 {strides = array<i32>} : memref<512x64xf32, #tpu.memory_space<vmem>>, vector<512x64xf32>,
    } else {
    }
    %c0 = arith.constant 0 : index
    %c0_1 = arith.constant 0 : index
    %3 = vector.load %arg8[%c0, %c0_1] : memref<512x64xf32, #tpu.memory_space<vmem>>, vector<512x64xf32>
    %c0_2 = arith.constant 0 : index
    %c0_3 = arith.constant 0 : index
    %4 = vector.load %arg3[%c0_2, %c0_3] : memref<512x64xbf16, #tpu.memory_space<vmem>>, vector<512x64xbf16>
    %c0_4 = arith.constant 0 : index
    %c0_5 = arith.constant 0 : index
    %5 = vector.load %arg4[%c0_4, %c0_5] : memref<64x64xbf16, #tpu.memory_space<vmem>>, vector<64x64xbf16>
    %cst = arith.constant dense<0.000000e+00> : vector<512x64xf32>
    %6 = tpu.matmul %4, %5, %cst {dimension_numbers = #tpu.dot_dimension_numbers<[1], [0], [0], [1], [0, 0, 1, 1], [], []>} : vector<512x64xbf16>, vector<64x64xbf16>, vector<512x64xf32> -> vector<512x64xf32>
    %7 = arith.addf %3, %6 : vector<512x64xf32>
    %c0_6 = arith.constant 0 : index
    %c0_7 = arith.constant 0 : index
    %8 = vector.load %arg8[%c0_6, %c0_7] : memref<512x64xf32, #tpu.memory_space<vmem>>, vector<512x64xf32>
    tpu.vector_store %arg8[%c0_6, %c0_7], %7 {strides = array<i32>} : memref<512x64xf32, #tpu.memory_space<vmem>>, vector<512x64xf32>,
    %c0_i32_8 = arith.constant 0 : i32
    %9 = arith.cmpi eq, %arg2, %c0_i32_8 : i32
    %10 = arith.extui %9 : i1 to i32
    %c0_i32_9 = arith.constant 0 : i32
    %11 = arith.cmpi ne, %10, %c0_i32_9 : i32
    scf.if %11 {
      %c0_10 = arith.constant 0 : index
      %c0_11 = arith.constant 0 : index
      %12 = vector.load %arg8[%c0_10, %c0_11] : memref<512x64xf32, #tpu.memory_space<vmem>>, vector<512x64xf32>
      %c0_12 = arith.constant 0 : index
      %c0_13 = arith.constant 0 : index
      %13 = vector.load %arg5[%c0_12, %c0_13] : memref<1x64xf32, #tpu.memory_space<vmem>>, vector<1x64xf32>
      %14 = vector.broadcast %13 : vector<1x64xf32> to vector<512x64xf32>
      %15 = arith.addf %12, %14 : vector<512x64xf32>
      %c0_14 = arith.constant 0 : index
      %c0_15 = arith.constant 0 : index
      %16 = vector.load %arg6[%c0_14, %c0_15] : memref<512x64xf32, #tpu.memory_space<vmem>>, vector<512x64xf32>
      %17 = arith.addf %15, %16 : vector<512x64xf32>
      %c0_16 = arith.constant 0 : index
      %c0_17 = arith.constant 0 : index
      %18 = vector.load %arg7[%c0_16, %c0_17] : memref<512x64xf32, #tpu.memory_space<vmem>>, vector<512x64xf32>
      tpu.vector_store %arg7[%c0_16, %c0_17], %17 {strides = array<i32>} : memref<512x64xf32, #tpu.memory_space<vmem>>, vector<512x64xf32>,
    } else {
    }
    return
  }
  func.func @transform_0(%arg0: i32, %arg1: i32, %arg2: i32) -> (i32, i32) {
    %c0_i32 = arith.constant 0 : i32
    return %arg0, %arg2 : i32, i32
  }
  func.func @transform_1(%arg0: i32, %arg1: i32, %arg2: i32) -> (i32, i32) {
    %c0_i32 = arith.constant 0 : i32
    return %arg2, %arg1 : i32, i32
  }
  func.func @transform_2(%arg0: i32, %arg1: i32, %arg2: i32) -> (i32, i32) {
    %c0_i32 = arith.constant 0 : i32
    %c0_i32_0 = arith.constant 0 : i32
    return %c0_i32, %arg1 : i32, i32
  }
  func.func @transform_3(%arg0: i32, %arg1: i32, %arg2: i32) -> (i32, i32) {
    %c0_i32 = arith.constant 0 : i32
    return %arg0, %arg1 : i32, i32
  }
  func.func @transform_4(%arg0: i32, %arg1: i32, %arg2: i32) -> (i32, i32) {
    %c0_i32 = arith.constant 0 : i32
    return %arg0, %arg1 : i32, i32
  }
}

</mosaic_0001>

<bundles_post_ra>
// kernel: _lambda_.3
= control target key start
LH: loop header
LB: loop body
LE: loop exit
PB: predicated region body
PF: predicated region fallthrough
CT: control target
= control target key end

     0   :  { %v2234_v1 = vmov 0   ;;  %vm20_vm0 = vcmask 523264   ;;  %v2235_v9 = vmov 0.0   ;;  %v1387_v42 = vlaneseq  ;;  %s3185_s1 = inlined_call_operand.vmem [shape: bf16[64,192], index: 1, kind: input, shape index: {}]   ;;  %s3186_s0 = inlined_call_operand.vmem [shape: bf16[512,64], index: 0, kind: input, shape index: {}]   ;;  %s3187_s2 = inlined_call_operand.vmem [shape: f32[1,192], index: 2, kind: input, shape index: {}]   ;;  %s3188_s3 = inlined_call_operand.vmem [shape: bf16[512,192], index: 3, kind: output, shape index: {}]  }
   0x1   :  { %v2190_v0 = vld [vmem:[%s3185_s1 + $0x34] ss:$8 sps:$4 sm:$0xff]   ;;  %677 = vmatprep.mubr.bf16.mxu0 %v2234_v1  ;;  %837 = vmatprep.mubr.bf16.mxu1 %v2234_v1  ;;  %v2192_v2 = vld [vmem:[%s3185_s1 + $0x30] ss:$8 sps:$4 sm:$0xff]   ;;  %v2193_v3 = vld [vmem:[%s3185_s1 + $0x24] ss:$8 sps:$4 sm:$0xff]  }
   0x2   :  { %653 = vmatprep.subr.bf16.mxu0 %v2190_v0  ;;  %2180 = vmatprep.subr.bf16.mxu1 %v2190_v0  ;;  %v2195_v4 = vld [vmem:[%s3185_s1 + $0x20] ss:$8 sps:$4 sm:$0xff]   ;;  %v2196_v5 = vld [vmem:[%s3185_s1 + $0x14] ss:$8 sps:$4 sm:$0xff]   ;;  %v2198_v6 = vld [vmem:[%s3185_s1 + $0x10] ss:$8 sps:$4 sm:$0xff]  }
   0x3   :  { %654 = vmatpush1.bf16.msra.mxu0 %v2192_v2  ;;  %2184 = vmatpush1.bf16.msra.mxu1 %v2192_v2  ;;  %v2279_v7 = vld [vmem:[%s3185_s1 + $0x4] ss:$8 sps:$4 sm:$0xff]   ;;  %v2284_v8 = vld [vmem:[%s3185_s1] ss:$8 sps:$4 sm:$0xff]   ;;  %21 = vst.msk [vmem:[#allocation2 + $0x8] sm:$0xff] %vm20_vm0, %v2235_v9  ;;  %23 = vst.msk [vmem:[#allocation2 + $0x18] sm:$0xff] %vm20_vm0, %v2235_v9 }
   0x4   :  { %655 = vmatprep.subr.bf16.mxu0 %v2193_v3  ;;  %2181 = vmatprep.subr.bf16.mxu1 %v2193_v3  ;;  %25 = vst.msk [vmem:[#allocation2 + $0x28] sm:$0xff] %vm20_vm0, %v2235_v9  ;;  %27 = vst.msk [vmem:[#allocation2 + $0x38] sm:$0xff] %vm20_vm0, %v2235_v9  ;;  %v2202_v10 = vld [vmem:[%s3186_s0] sm:$0xff]   ;;  %v2204_v12 = vld [vmem:[%s3186_s0 + $0x8] sm:$0xff]   ;;  %v1388_v44 = vshrl.u32 %v1387_v42, 7  ;;  %vm1909_vm1 = vcmask 1043456  }
   0x5   :  { %29 = vst.msk [vmem:[#allocation2 + $0x48] sm:$0xff] %vm20_vm0, %v2235_v9  ;;  %31 = vst.msk [vmem:[#allocation2 + $0x58] sm:$0xff] %vm20_vm0, %v2235_v9  ;;  %v2203_v11 = vld [vmem:[%s3186_s0 + $0x80] sm:$0xff]   ;;  %v2205_v13 = vld [vmem:[%s3186_s0 + $0x88] sm:$0xff]   ;;  %vm1910_vm2 = vcmask 523268  }
   0x6   :  { %33 = vst.msk [vmem:[#allocation2 + $0x68] sm:$0xff] %vm20_vm0, %v2235_v9  ;;  %35 = vst.msk [vmem:[#allocation2 + $0x78] sm:$0xff] %vm20_vm0, %v2235_v9  ;;  %v2206_v14 = vld [vmem:[%s3186_s0 + $0x10] sm:$0xff]   ;;  %v2208_v16 = vld [vmem:[%s3186_s0 + $0x18] sm:$0xff]   ;;  %v1389_v52 = vsub.s32 0, %v1388_v44  ;;  %v1393_v58 = vsub.s32 1, %v1388_v44 }
   0x7   :  { %656 = vmatpush1.bf16.msra.mxu0 %v2195_v4  ;;  %2185 = vmatpush1.bf16.msra.mxu1 %v2195_v4  ;;  %37 = vst.msk [vmem:[#allocation2 + $0x88] sm:$0xff] %vm20_vm0, %v2235_v9  ;;  %39 = vst.msk [vmem:[#allocation2 + $0x98] sm:$0xff] %vm20_vm0, %v2235_v9  ;;  %v2207_v15 = vld [vmem:[%s3186_s0 + $0x90] sm:$0xff]   ;;  %v2209_v17 = vld [vmem:[%s3186_s0 + $0x98] sm:$0xff]  }
   0x8   :  { %657 = vmatprep.subr.bf16.mxu0 %v2196_v5  ;;  %2182 = vmatprep.subr.bf16.mxu1 %v2196_v5  ;;  %41 = vst.msk [vmem:[#allocation2 + $0xa8] sm:$0xff] %vm20_vm0, %v2235_v9  ;;  %43 = vst.msk [vmem:[#allocation2 + $0xb8] sm:$0xff] %vm20_vm0, %v2235_v9  ;;  %v2210_v18 = vld [vmem:[%s3186_s0 + $0x20] sm:$0xff]   ;;  %v2212_v20 = vld [vmem:[%s3186_s0 + $0x28] sm:$0xff]  }
   0x9   :  { %45 = vst.msk [vmem:[#allocation2 + $0xc8] sm:$0xff] %vm20_vm0, %v2235_v9  ;;  %47 = vst.msk [vmem:[#allocation2 + $0xd8] sm:$0xff] %vm20_vm0, %v2235_v9  ;;  %v2211_v19 = vld [vmem:[%s3186_s0 + $0xa0] sm:$0xff]   ;;  %v2213_v21 = vld [vmem:[%s3186_s0 + $0xa8] sm:$0xff]  }
   0xa   :  { %49 = vst.msk [vmem:[#allocation2 + $0xe8] sm:$0xff] %vm20_vm0, %v2235_v9  ;;  %51 = vst.msk [vmem:[#allocation2 + $0xf8] sm:$0xff] %vm20_vm0, %v2235_v9  ;;  %v2214_v22 = vld [vmem:[%s3186_s0 + $0x30] sm:$0xff]   ;;  %v2216_v24 = vld [vmem:[%s3186_s0 + $0x38] sm:$0xff]  }
   0xb   :  { %658 = vmatpush1.bf16.msra.mxu0 %v2198_v6  ;;  %2186 = vmatpush1.bf16.msra.mxu1 %v2198_v6  ;;  %53 = vst.msk [vmem:[#allocation2 + $0x108] sm:$0xff] %vm20_vm0, %v2235_v9  ;;  %55 = vst.msk [vmem:[#allocation2 + $0x118] sm:$0xff] %vm20_vm0, %v2235_v9  ;;  %v2215_v23 = vld [vmem:[%s3186_s0 + $0xb0] sm:$0xff]   ;;  %v2217_v25 = vld [vmem:[%s3186_s0 + $0xb8] sm:$0xff]  }
   0xc   :  { %57 = vst.msk [vmem:[#allocation2 + $0x128] sm:$0xff] %vm20_vm0, %v2235_v9  ;;  %59 = vst.msk [vmem:[#allocation2 + $0x138] sm:$0xff] %vm20_vm0, %v2235_v9  ;;  %659 = vmatprep.subr.bf16.mxu0 %v2279_v7  ;;  %2183 = vmatprep.subr.bf16.mxu1 %v2279_v7  ;;  %v2218_v26 = vld [vmem:[%s3186_s0 + $0x40] sm:$0xff]   ;;  %v2220_v28 = vld [vmem:[%s3186_s0 + $0x48] sm:$0xff]  }
   0xd   :  { %61 = vst.msk [vmem:[#allocation2 + $0x148] sm:$0xff] %vm20_vm0, %v2235_v9  ;;  %63 = vst.msk [vmem:[#allocation2 + $0x158] sm:$0xff] %vm20_vm0, %v2235_v9  ;;  %v2219_v27 = vld [vmem:[%s3186_s0 + $0xc0] sm:$0xff]   ;;  %v2221_v29 = vld [vmem:[%s3186_s0 + $0xc8] sm:$0xff]  }
   0xe   :  { %65 = vst.msk [vmem:[#allocation2 + $0x168] sm:$0xff] %vm20_vm0, %v2235_v9  ;;  %67 = vst.msk [vmem:[#allocation2 + $0x178] sm:$0xff] %vm20_vm0, %v2235_v9  ;;  %v2222_v30 = vld [vmem:[%s3186_s0 + $0x50] sm:$0xff]   ;;  %v2224_v32 = vld [vmem:[%s3186_s0 + $0x58] sm:$0xff]  }
   0xf   :  { %69 = vst.msk [vmem:[#allocation2 + $0x188] sm:$0xff] %vm20_vm0, %v2235_v9  ;;  %71 = vst.msk [vmem:[#allocation2 + $0x198] sm:$0xff] %vm20_vm0, %v2235_v9  ;;  %660 = vmatpush1.bf16.msra.mxu0 %v2284_v8  ;;  %2187 = vmatpush1.bf16.msra.mxu1 %v2284_v8  ;;  %v2223_v31 = vld [vmem:[%s3186_s0 + $0xd0] sm:$0xff]   ;;  %v2225_v33 = vld [vmem:[%s3186_s0 + $0xd8] sm:$0xff]  }
  0x10   :  { %73 = vst.msk [vmem:[#allocation2 + $0x1a8] sm:$0xff] %vm20_vm0, %v2235_v9  ;;  %75 = vst.msk [vmem:[#allocation2 + $0x1b8] sm:$0xff] %vm20_vm0, %v2235_v9  ;;  %v2226_v34 = vld [vmem:[%s3186_s0 + $0x60] sm:$0xff]   ;;  %v2228_v36 = vld [vmem:[%s3186_s0 + $0x68] sm:$0xff]  }
  0x11   :  { %77 = vst.msk [vmem:[#allocation2 + $0x1c8] sm:$0xff] %vm20_vm0, %v2235_v9  ;;  %79 = vst.msk [vmem:[#allocation2 + $0x1d8] sm:$0xff] %vm20_vm0, %v2235_v9  ;;  %v2227_v35 = vld [vmem:[%s3186_s0 + $0xe0] sm:$0xff]   ;;  %v2229_v37 = vld [vmem:[%s3186_s0 + $0xe8] sm:$0xff]  }
  0x12   :  { %81 = vst.msk [vmem:[#allocation2 + $0x1e8] sm:$0xff] %vm20_vm0, %v2235_v9  ;;  %83 = vst.msk [vmem:[#allocation2 + $0x1f8] sm:$0xff] %vm20_vm0, %v2235_v9  ;;  %2020 = vmatmul.mubr.msk.bf16.vlgmr.msra.gmra.mxu0 %vm20_vm0, %v2202_v10  ;;  %2036 = vmatmul.mubr.msk.bf16.vlgmr.msra.gmra.mxu1 %vm20_vm0, %v2203_v11  ;;  %v2230_v38 = vld [vmem:[%s3186_s0 + $0x70] sm:$0xff]   ;;  %v2232_v40 = vld [vmem:[%s3186_s0 + $0x78] sm:$0xff]  }
  0x13   :  { %85 = vst.msk [vmem:[#allocation2 + $0x208] sm:$0xff] %vm20_vm0, %v2235_v9  ;;  %87 = vst.msk [vmem:[#allocation2 + $0x218] sm:$0xff] %vm20_vm0, %v2235_v9  ;;  %687 = vmatprep.mubr.bf16.mxu0 %v2234_v1  ;;  %847 = vmatprep.mubr.bf16.mxu1 %v2234_v1  ;;  %v2231_v39 = vld [vmem:[%s3186_s0 + $0xf0] sm:$0xff]   ;;  %v2233_v41 = vld [vmem:[%s3186_s0 + $0xf8] sm:$0xff]  }
  0x14   :  { %89 = vst.msk [vmem:[#allocation2 + $0x228] sm:$0xff] %vm20_vm0, %v2235_v9  ;;  %91 = vst.msk [vmem:[#allocation2 + $0x238] sm:$0xff] %vm20_vm0, %v2235_v9  ;;  %v149_v46 = vld [vmem:[#allocation2 + $0x8] sm:$0xff]  ;;  %v151_v55 = vld [vmem:[#allocation2 + $0x18] sm:$0xff] }
  0x15   :  { %93 = vst.msk [vmem:[#allocation2 + $0x248] sm:$0xff] %vm20_vm0, %v2235_v9  ;;  %95 = vst.msk [vmem:[#allocation2 + $0x258] sm:$0xff] %vm20_vm0, %v2235_v9  ;;  %v1385_v57 = vld [vmem:[%s3187_s2] sm:$0x3]  ;;  %v153_v2 = vld [vmem:[#allocation2 + $0x28] sm:$0xff] }
  0x16   :  { %97 = vst.msk [vmem:[#allocation2 + $0x268] sm:$0xff] %vm20_vm0, %v2235_v9  ;;  %99 = vst.msk [vmem:[#allocation2 + $0x278] sm:$0xff] %vm20_vm0, %v2235_v9  ;;  %v2581_v63 = vrot.slane %v1385_v57, %v1389_v52  ;;  %v2583_v4 = vrot.slane %v1385_v57, %v1393_v58 }
  0x17   :  { %101 = vst.msk [vmem:[#allocation2 + $0x288] sm:$0xff] %vm20_vm0, %v2235_v9  ;;  %103 = vst.msk [vmem:[#allocation2 + $0x298] sm:$0xff] %vm20_vm0, %v2235_v9 }
  0x18   :  { %105 = vst.msk [vmem:[#allocation2 + $0x2a8] sm:$0xff] %vm20_vm0, %v2235_v9  ;;  %107 = vst.msk [vmem:[#allocation2 + $0x2b8] sm:$0xff] %vm20_vm0, %v2235_v9 }
  0x19   :  { %109 = vst.msk [vmem:[#allocation2 + $0x2c8] sm:$0xff] %vm20_vm0, %v2235_v9  ;;  %111 = vst.msk [vmem:[#allocation2 + $0x2d8] sm:$0xff] %vm20_vm0, %v2235_v9 }
  0x1a   :  { %113 = vst.msk [vmem:[#allocation2 + $0x2e8] sm:$0xff] %vm20_vm0, %v2235_v9  ;;  %115 = vst.msk [vmem:[#allocation2 + $0x2f8] sm:$0xff] %vm20_vm0, %v2235_v9  ;;  %2021 = vmatmul.mubr.msk.bf16.gmra.mxu0 %vm20_vm0, %v2204_v12  ;;  %2037 = vmatmul.mubr.msk.bf16.gmra.mxu1 %vm20_vm0, %v2205_v13  ;;  %v213_v47 = vld [vmem:[#allocation2 + $0x208] sm:$0xff]  ;;  %v215_v56 = vld [vmem:[#allocation2 + $0x218] sm:$0xff] }
  0x1b   :  { %117 = vst.msk [vmem:[#allocation2 + $0x308] sm:$0xff] %vm20_vm0, %v2235_v9  ;;  %119 = vst.msk [vmem:[#allocation2 + $0x318] sm:$0xff] %vm20_vm0, %v2235_v9  ;;  %697 = vmatprep.mubr.bf16.mxu0 %v2234_v1  ;;  %857 = vmatprep.mubr.bf16.mxu1 %v2234_v1  ;;  %v217_v3 = vld [vmem:[#allocation2 + $0x228] sm:$0xff] }
  0x1c   :  { %121 = vst.msk [vmem:[#allocation2 + $0x328] sm:$0xff] %vm20_vm0, %v2235_v9  ;;  %123 = vst.msk [vmem:[#allocation2 + $0x338] sm:$0xff] %vm20_vm0, %v2235_v9 }
  0x1d   :  { %125 = vst.msk [vmem:[#allocation2 + $0x348] sm:$0xff] %vm20_vm0, %v2235_v9  ;;  %127 = vst.msk [vmem:[#allocation2 + $0x358] sm:$0xff] %vm20_vm0, %v2235_v9 }
  0x1e   :  { %129 = vst.msk [vmem:[#allocation2 + $0x368] sm:$0xff] %vm20_vm0, %v2235_v9  ;;  %131 = vst.msk [vmem:[#allocation2 + $0x378] sm:$0xff] %vm20_vm0, %v2235_v9 }
  0x1f   :  { %133 = vst.msk [vmem:[#allocation2 + $0x388] sm:$0xff] %vm20_vm0, %v2235_v9  ;;  %135 = vst.msk [vmem:[#allocation2 + $0x398] sm:$0xff] %vm20_vm0, %v2235_v9 }
  0x20   :  { %137 = vst.msk [vmem:[#allocation2 + $0x3a8] sm:$0xff] %vm20_vm0, %v2235_v9  ;;  %139 = vst.msk [vmem:[#allocation2 + $0x3b8] sm:$0xff] %vm20_vm0, %v2235_v9 }
  0x21   :  { %141 = vst.msk [vmem:[#allocation2 + $0x3c8] sm:$0xff] %vm20_vm0, %v2235_v9  ;;  %143 = vst.msk [vmem:[#allocation2 + $0x3d8] sm:$0xff] %vm20_vm0, %v2235_v9 }
  0x22   :  { %145 = vst.msk [vmem:[#allocation2 + $0x3e8] sm:$0xff] %vm20_vm0, %v2235_v9  ;;  %147 = vst.msk [vmem:[#allocation2 + $0x3f8] sm:$0xff] %vm20_vm0, %v2235_v9  ;;  %2022 = vmatmul.mubr.msk.bf16.gmra.mxu0 %vm20_vm0, %v2206_v14  ;;  %2038 = vmatmul.mubr.msk.bf16.gmra.mxu1 %vm20_vm0, %v2207_v15 }
  0x23   :  { %707 = vmatprep.mubr.bf16.mxu0 %v2234_v1  ;;  %867 = vmatprep.mubr.bf16.mxu1 %v2234_v1  ;;  %vm2599_vm3 = vmor %vm1910_vm2, %vm1909_vm1 }
  0x2a   :  { %2023 = vmatmul.mubr.msk.bf16.gmra.mxu0 %vm20_vm0, %v2208_v16  ;;  %2039 = vmatmul.mubr.msk.bf16.gmra.mxu1 %vm20_vm0, %v2209_v17  ;;  %v155_v17 = vld [vmem:[#allocation2 + $0x38] sm:$0xff] }
  0x2b   :  { %717 = vmatprep.mubr.bf16.mxu0 %v2234_v1  ;;  %877 = vmatprep.mubr.bf16.mxu1 %v2234_v1 }
  0x32   :  { %2024 = vmatmul.mubr.msk.bf16.gmra.mxu0 %vm20_vm0, %v2210_v18  ;;  %2040 = vmatmul.mubr.msk.bf16.gmra.mxu1 %vm20_vm0, %v2211_v19  ;;  %v219_v18 = vld [vmem:[#allocation2 + $0x238] sm:$0xff] }
  0x33   :  { %727 = vmatprep.mubr.bf16.mxu0 %v2234_v1  ;;  %887 = vmatprep.mubr.bf16.mxu1 %v2234_v1 }
  0x3a   :  { %2025 = vmatmul.mubr.msk.bf16.gmra.mxu0 %vm20_vm0, %v2212_v20  ;;  %2041 = vmatmul.mubr.msk.bf16.gmra.mxu1 %vm20_vm0, %v2213_v21 }
  0x3b   :  { %737 = vmatprep.mubr.bf16.mxu0 %v2234_v1  ;;  %897 = vmatprep.mubr.bf16.mxu1 %v2234_v1 }
  0x42   :  { %2026 = vmatmul.mubr.msk.bf16.gmra.mxu0 %vm20_vm0, %v2214_v22  ;;  %2042 = vmatmul.mubr.msk.bf16.gmra.mxu1 %vm20_vm0, %v2215_v23 }
  0x43   :  { %747 = vmatprep.mubr.bf16.mxu0 %v2234_v1  ;;  %907 = vmatprep.mubr.bf16.mxu1 %v2234_v1 }
  0x4a   :  { %2027 = vmatmul.mubr.msk.bf16.gmra.mxu0 %vm20_vm0, %v2216_v24  ;;  %2043 = vmatmul.mubr.msk.bf16.gmra.mxu1 %vm20_vm0, %v2217_v25 }
  0x4b   :  { %757 = vmatprep.mubr.bf16.mxu0 %v2234_v1  ;;  %917 = vmatprep.mubr.bf16.mxu1 %v2234_v1 }
  0x52   :  { %2028 = vmatmul.mubr.msk.bf16.gmra.mxu0 %vm20_vm0, %v2218_v26  ;;  %2044 = vmatmul.mubr.msk.bf16.gmra.mxu1 %vm20_vm0, %v2219_v27 }
  0x53   :  { %767 = vmatprep.mubr.bf16.mxu0 %v2234_v1  ;;  %927 = vmatprep.mubr.bf16.mxu1 %v2234_v1 }
  0x5a   :  { %2029 = vmatmul.mubr.msk.bf16.gmra.mxu0 %vm20_vm0, %v2220_v28  ;;  %2045 = vmatmul.mubr.msk.bf16.gmra.mxu1 %vm20_vm0, %v2221_v29 }
  0x5b   :  { %777 = vmatprep.mubr.bf16.mxu0 %v2234_v1  ;;  %937 = vmatprep.mubr.bf16.mxu1 %v2234_v1 }
  0x62   :  { %2030 = vmatmul.mubr.msk.bf16.gmra.mxu0 %vm20_vm0, %v2222_v30  ;;  %2046 = vmatmul.mubr.msk.bf16.gmra.mxu1 %vm20_vm0, %v2223_v31 }
  0x63   :  { %787 = vmatprep.mubr.bf16.mxu0 %v2234_v1  ;;  %947 = vmatprep.mubr.bf16.mxu1 %v2234_v1 }
  0x6a   :  { %2031 = vmatmul.mubr.msk.bf16.gmra.mxu0 %vm20_vm0, %v2224_v32  ;;  %2047 = vmatmul.mubr.msk.bf16.gmra.mxu1 %vm20_vm0, %v2225_v33 }
  0x6b   :  { %797 = vmatprep.mubr.bf16.mxu0 %v2234_v1  ;;  %957 = vmatprep.mubr.bf16.mxu1 %v2234_v1 }
  0x72   :  { %2032 = vmatmul.mubr.msk.bf16.gmra.mxu0 %vm20_vm0, %v2226_v34  ;;  %2048 = vmatmul.mubr.msk.bf16.gmra.mxu1 %vm20_vm0, %v2227_v35  ;;  %v157_v34 = vld [vmem:[#allocation2 + $0x48] sm:$0xff] }
  0x73   :  { %807 = vmatprep.mubr.bf16.mxu0 %v2234_v1  ;;  %967 = vmatprep.mubr.bf16.mxu1 %v2234_v1  ;;  %v221_v35 = vld [vmem:[#allocation2 + $0x248] sm:$0xff] }
  0x7a   :  { %2033 = vmatmul.mubr.msk.bf16.gmra.mxu0 %vm20_vm0, %v2228_v36  ;;  %2049 = vmatmul.mubr.msk.bf16.gmra.mxu1 %vm20_vm0, %v2229_v37 }
  0x7b   :  { %817 = vmatprep.mubr.bf16.mxu0 %v2234_v1  ;;  %977 = vmatprep.mubr.bf16.mxu1 %v2234_v1 }
  0x82   :  { %2034 = vmatmul.mubr.msk.bf16.gmra.mxu0 %vm20_vm0, %v2230_v38  ;;  %2050 = vmatmul.mubr.msk.bf16.gmra.mxu1 %vm20_vm0, %v2231_v39 }
  0x83   :  { %827 = vmatprep.mubr.bf16.mxu0 %v2234_v1  ;;  %987 = vmatprep.mubr.bf16.mxu1 %v2234_v1 }
  0x8a   :  { %2035 = vmatmul.mubr.msk.bf16.gmra.mxu0 %vm20_vm0, %v2232_v40  ;;  %2051 = vmatmul.mubr.msk.bf16.gmra.mxu1 %vm20_vm0, %v2233_v41 }
  0xd2   :  { %v679_v43 = vpop.f32.mrf.mxu0  ;;  %v839_v45 = vpop.f32.mrf.mxu1 }
  0xd3   :  { %v1397_v9 = vadd.f32 %v2581_v63, %v679_v43  ;;  %v1461_v10 = vadd.f32 %v2581_v63, %v839_v45 }
  0xd4   :  { %v681_v48 = vpop.f32.mrf.mxu0  ;;  %v841_v49 = vpop.f32.mrf.mxu1 }
  0xd5   :  { %v999_v50 = vadd.f32 %v681_v48, %v149_v46  ;;  %v1063_v51 = vadd.f32 %v841_v49, %v213_v47 }
  0xd6   :  { %v683_v53 = vpop.f32.mrf.mxu0  ;;  %v843_v54 = vpop.f32.mrf.mxu1 }
  0xd7   :  { %1127 = vst.msk [vmem:[#allocation2 + $0x8] sm:$0xff] %vm20_vm0, %v999_v50  ;;  %1191 = vst.msk [vmem:[#allocation2 + $0x208] sm:$0xff] %vm20_vm0, %v1063_v51  ;;  %v1399_v24 = vadd.f32 %v2581_v63, %v683_v53  ;;  %v1463_v25 = vadd.f32 %v2581_v63, %v843_v54  ;;  %v159_v50 = vld [vmem:[#allocation2 + $0x58] sm:$0xff] }
  0xd8   :  { %v685_v59 = vpop.f32.mrf.mxu0  ;;  %v845_v60 = vpop.f32.mrf.mxu1  ;;  %v223_v51 = vld [vmem:[#allocation2 + $0x258] sm:$0xff] }
  0xd9   :  { %v1001_v61 = vadd.f32 %v685_v59, %v151_v55  ;;  %v1065_v62 = vadd.f32 %v845_v60, %v215_v56  ;;  %v161_v60 = vld [vmem:[#allocation2 + $0x68] sm:$0xff] }
  0xda   :  { %v689_v0 = vpop.f32.mrf.mxu0  ;;  %v849_v1 = vpop.f32.mrf.mxu1 }
  0xdb   :  { %1129 = vst.msk [vmem:[#allocation2 + $0x18] sm:$0xff] %vm20_vm0, %v1001_v61  ;;  %1193 = vst.msk [vmem:[#allocation2 + $0x218] sm:$0xff] %vm20_vm0, %v1065_v62  ;;  %v1401_v40 = vadd.f32 %v2581_v63, %v689_v0  ;;  %v1465_v41 = vadd.f32 %v2581_v63, %v849_v1  ;;  %v225_v61 = vld [vmem:[#allocation2 + $0x268] sm:$0xff] }
  0xdc   :  { %v691_v5 = vpop.f32.mrf.mxu0  ;;  %v851_v6 = vpop.f32.mrf.mxu1 }
  0xdd   :  { %v1003_v7 = vadd.f32 %v691_v5, %v153_v2  ;;  %v1067_v8 = vadd.f32 %v851_v6, %v217_v3 }
  0xde   :  { %v1258_v11 = vld [vmem:[#allocation2 + $0x8] sm:$0xff]  ;;  %v2589_v13 = vpop.f32.mrf.mxu0  ;;  %v2591_v14 = vpop.f32.mrf.mxu1 }
  0xdf   :  { %v1322_v12 = vld [vmem:[#allocation2 + $0x208] sm:$0xff]  ;;  %v1398_v15 = vadd.f32 %v2583_v4, %v1258_v11  ;;  %1131 = vst.msk [vmem:[#allocation2 + $0x28] sm:$0xff] %vm20_vm0, %v1003_v7  ;;  %1195 = vst.msk [vmem:[#allocation2 + $0x228] sm:$0xff] %vm20_vm0, %v1067_v8  ;;  %v1403_v1 = vadd.f32 %v2581_v63, %v2589_v13  ;;  %v1467_v2 = vadd.f32 %v2581_v63, %v2591_v14  ;;  %v163_v13 = vld [vmem:[#allocation2 + $0x78] sm:$0xff] }
  0xe0   :  { %v1462_v16 = vadd.f32 %v2583_v4, %v1322_v12  ;;  %v695_v20 = vpop.f32.mrf.mxu0  ;;  %v855_v21 = vpop.f32.mrf.mxu1 }
  0xe1   :  { %v2116_v22 = vpack.c.bf16 %v1398_v15, %v1397_v9  ;;  %v1005_v28 = vadd.f32 %v695_v20, %v155_v17  ;;  %v1069_v29 = vadd.f32 %v855_v21, %v219_v18 }
  0xe2   :  { %v2148_v23 = vpack.c.bf16 %v1462_v16, %v1461_v10  ;;  %v1260_v26 = vld [vmem:[#allocation2 + $0x18] sm:$0xff]  ;;  %v2605_v30 = vpop.f32.mrf.mxu0  ;;  %v2607_v31 = vpop.f32.mrf.mxu1 }
  0xe3   :  { %v1324_v27 = vld [vmem:[#allocation2 + $0x218] sm:$0xff]  ;;  %1912 = vst.msk [vmem:[%s3188_s3] sm:$0xff] %vm2599_vm3, %v2116_v22  ;;  %v1400_v32 = vadd.f32 %v2583_v4, %v1260_v26  ;;  %v1405_v18 = vadd.f32 %v2581_v63, %v2605_v30  ;;  %v1469_v20 = vadd.f32 %v2581_v63, %v2607_v31 }
  0xe4   :  { %1944 = vst.msk [vmem:[%s3188_s3 + $0x100] sm:$0xff] %vm2599_vm3, %v2148_v23  ;;  %v1464_v33 = vadd.f32 %v2583_v4, %v1324_v27  ;;  %v701_v36 = vpop.f32.mrf.mxu0  ;;  %v861_v37 = vpop.f32.mrf.mxu1  ;;  %v227_v16 = vld [vmem:[#allocation2 + $0x278] sm:$0xff] }
  0xe5   :  { %1133 = vst.msk [vmem:[#allocation2 + $0x38] sm:$0xff] %vm20_vm0, %v1005_v28  ;;  %1197 = vst.msk [vmem:[#allocation2 + $0x238] sm:$0xff] %vm20_vm0, %v1069_v29  ;;  %v2117_v38 = vpack.c.bf16 %v1400_v32, %v1399_v24  ;;  %v1007_v44 = vadd.f32 %v701_v36, %v157_v34  ;;  %v1071_v45 = vadd.f32 %v861_v37, %v221_v35  ;;  %v229_v34 = vld [vmem:[#allocation2 + $0x288] sm:$0xff] }
  0xe6   :  { %v2149_v39 = vpack.c.bf16 %v1464_v33, %v1463_v25  ;;  %v1262_v42 = vld [vmem:[#allocation2 + $0x28] sm:$0xff]  ;;  %v2625_v46 = vpop.f32.mrf.mxu0  ;;  %v2627_v47 = vpop.f32.mrf.mxu1 }
  0xe7   :  { %v1326_v43 = vld [vmem:[#allocation2 + $0x228] sm:$0xff]  ;;  %1913 = vst.msk [vmem:[%s3188_s3 + $0x8] sm:$0xff] %vm2599_vm3, %v2117_v38  ;;  %v1402_v48 = vadd.f32 %v2583_v4, %v1262_v42  ;;  %v1407_v30 = vadd.f32 %v2581_v63, %v2625_v46  ;;  %v1471_v31 = vadd.f32 %v2581_v63, %v2627_v47 }
  0xe8   :  { %1945 = vst.msk [vmem:[%s3188_s3 + $0x108] sm:$0xff] %vm2599_vm3, %v2149_v39  ;;  %v1466_v49 = vadd.f32 %v2583_v4, %v1326_v43  ;;  %v705_v52 = vpop.f32.mrf.mxu0  ;;  %v865_v53 = vpop.f32.mrf.mxu1  ;;  %v165_v33 = vld [vmem:[#allocation2 + $0x88] sm:$0xff] }
  0xe9   :  { %1135 = vst.msk [vmem:[#allocation2 + $0x48] sm:$0xff] %vm20_vm0, %v1007_v44  ;;  %1199 = vst.msk [vmem:[#allocation2 + $0x248] sm:$0xff] %vm20_vm0, %v1071_v45  ;;  %v2118_v54 = vpack.c.bf16 %v1402_v48, %v1401_v40  ;;  %v1009_v56 = vadd.f32 %v705_v52, %v159_v50  ;;  %v1073_v57 = vadd.f32 %v865_v53, %v223_v51  ;;  %v167_v53 = vld [vmem:[#allocation2 + $0x98] sm:$0xff] }
  0xea   :  { %v2150_v55 = vpack.c.bf16 %v1466_v49, %v1465_v41  ;;  %v709_v58 = vpop.f32.mrf.mxu0  ;;  %v869_v59 = vpop.f32.mrf.mxu1 }
  0xeb   :  { %1914 = vst.msk [vmem:[%s3188_s3 + $0x10] sm:$0xff] %vm2599_vm3, %v2118_v54  ;;  %v1409_v45 = vadd.f32 %v2581_v63, %v709_v58  ;;  %v1473_v48 = vadd.f32 %v2581_v63, %v869_v59  ;;  %v231_v54 = vld [vmem:[#allocation2 + $0x298] sm:$0xff] }
  0xec   :  { %1946 = vst.msk [vmem:[%s3188_s3 + $0x110] sm:$0xff] %vm2599_vm3, %v2150_v55  ;;  %v1264_v62 = vld [vmem:[#allocation2 + $0x38] sm:$0xff]  ;;  %v711_v6 = vpop.f32.mrf.mxu0  ;;  %v871_v7 = vpop.f32.mrf.mxu1 }
  0xed   :  { %v1328_v0 = vld [vmem:[#allocation2 + $0x238] sm:$0xff]  ;;  %v1404_v3 = vadd.f32 %v2583_v4, %v1264_v62  ;;  %1137 = vst.msk [vmem:[#allocation2 + $0x58] sm:$0xff] %vm20_vm0, %v1009_v56  ;;  %1201 = vst.msk [vmem:[#allocation2 + $0x258] sm:$0xff] %vm20_vm0, %v1073_v57  ;;  %v1011_v8 = vadd.f32 %v711_v6, %v161_v60  ;;  %v1075_v9 = vadd.f32 %v871_v7, %v225_v61  ;;  %v169_v7 = vld [vmem:[#allocation2 + $0xa8] sm:$0xff] }
  0xee   :  { %v1468_v5 = vadd.f32 %v2583_v4, %v1328_v0  ;;  %v713_v12 = vpop.f32.mrf.mxu0  ;;  %v873_v15 = vpop.f32.mrf.mxu1 }
  0xef   :  { %v2119_v10 = vpack.c.bf16 %v1404_v3, %v1403_v1  ;;  %1139 = vst.msk [vmem:[#allocation2 + $0x68] sm:$0xff] %vm20_vm0, %v1011_v8  ;;  %1203 = vst.msk [vmem:[#allocation2 + $0x268] sm:$0xff] %vm20_vm0, %v1075_v9  ;;  %v1411_v59 = vadd.f32 %v2581_v63, %v713_v12  ;;  %v1475_v60 = vadd.f32 %v2581_v63, %v873_v15  ;;  %v233_v8 = vld [vmem:[#allocation2 + $0x2a8] sm:$0xff] }
  0xf0   :  { %v2151_v11 = vpack.c.bf16 %v1468_v5, %v1467_v2  ;;  %v1266_v17 = vld [vmem:[#allocation2 + $0x48] sm:$0xff]  ;;  %v715_v23 = vpop.f32.mrf.mxu0  ;;  %v875_v24 = vpop.f32.mrf.mxu1 }
  0xf1   :  { %v1330_v14 = vld [vmem:[#allocation2 + $0x248] sm:$0xff]  ;;  %1915 = vst.msk [vmem:[%s3188_s3 + $0x18] sm:$0xff] %vm2599_vm3, %v2119_v10  ;;  %v1406_v21 = vadd.f32 %v2583_v4, %v1266_v17  ;;  %v1013_v25 = vadd.f32 %v715_v23, %v163_v13  ;;  %v1077_v26 = vadd.f32 %v875_v24, %v227_v16  ;;  %v171_v24 = vld [vmem:[#allocation2 + $0xb8] sm:$0xff] }
  0xf2   :  { %1947 = vst.msk [vmem:[%s3188_s3 + $0x118] sm:$0xff] %vm2599_vm3, %v2151_v11  ;;  %v1470_v22 = vadd.f32 %v2583_v4, %v1330_v14  ;;  %v719_v29 = vpop.f32.mrf.mxu0  ;;  %v879_v32 = vpop.f32.mrf.mxu1 }
  0xf3   :  { %v2120_v27 = vpack.c.bf16 %v1406_v21, %v1405_v18  ;;  %1141 = vst.msk [vmem:[#allocation2 + $0x78] sm:$0xff] %vm20_vm0, %v1013_v25  ;;  %1205 = vst.msk [vmem:[#allocation2 + $0x278] sm:$0xff] %vm20_vm0, %v1077_v26  ;;  %v1413_v15 = vadd.f32 %v2581_v63, %v719_v29  ;;  %v1477_v13 = vadd.f32 %v2581_v63, %v879_v32  ;;  %v235_v25 = vld [vmem:[#allocation2 + $0x2b8] sm:$0xff] }
  0xf4   :  { %v2152_v28 = vpack.c.bf16 %v1470_v22, %v1469_v20  ;;  %v1268_v35 = vld [vmem:[#allocation2 + $0x58] sm:$0xff]  ;;  %v721_v39 = vpop.f32.mrf.mxu0  ;;  %v881_v40 = vpop.f32.mrf.mxu1 }
  0xf5   :  { %v1332_v36 = vld [vmem:[#allocation2 + $0x258] sm:$0xff]  ;;  %1916 = vst.msk [vmem:[%s3188_s3 + $0x20] sm:$0xff] %vm2599_vm3, %v2120_v27  ;;  %v1408_v37 = vadd.f32 %v2583_v4, %v1268_v35  ;;  %v1015_v41 = vadd.f32 %v721_v39, %v165_v33  ;;  %v1079_v42 = vadd.f32 %v881_v40, %v229_v34 }
  0xf6   :  { %1948 = vst.msk [vmem:[%s3188_s3 + $0x120] sm:$0xff] %vm2599_vm3, %v2152_v28  ;;  %v1472_v38 = vadd.f32 %v2583_v4, %v1332_v36  ;;  %v1270_v49 = vld [vmem:[#allocation2 + $0x68] sm:$0xff]  ;;  %v2699_v46 = vpop.f32.mrf.mxu0  ;;  %v2701_v51 = vpop.f32.mrf.mxu1 }
  0xf7   :  { %v2121_v43 = vpack.c.bf16 %v1408_v37, %v1407_v30  ;;  %v1334_v50 = vld [vmem:[#allocation2 + $0x268] sm:$0xff]  ;;  %v1410_v47 = vadd.f32 %v2583_v4, %v1270_v49  ;;  %1143 = vst.msk [vmem:[#allocation2 + $0x88] sm:$0xff] %vm20_vm0, %v1015_v41  ;;  %1207 = vst.msk [vmem:[#allocation2 + $0x288] sm:$0xff] %vm20_vm0, %v1079_v42  ;;  %v1479_v39 = vadd.f32 %v2581_v63, %v2701_v51 }
  0xf8   :  { %v2153_v44 = vpack.c.bf16 %v1472_v38, %v1471_v31  ;;  %v1474_v52 = vadd.f32 %v2583_v4, %v1334_v50  ;;  %v725_v55 = vpop.f32.mrf.mxu0  ;;  %v885_v56 = vpop.f32.mrf.mxu1  ;;  %v173_v36 = vld [vmem:[#allocation2 + $0xc8] sm:$0xff]  ;;  %v1415_v38 = vadd.f32 %v2581_v63, %v2699_v46  ;;  %v175_v46 = vld [vmem:[#allocation2 + $0xd8] sm:$0xff] }
  0xf9   :  { %1917 = vst.msk [vmem:[%s3188_s3 + $0x28] sm:$0xff] %vm2599_vm3, %v2121_v43  ;;  %v2122_v57 = vpack.c.bf16 %v1410_v47, %v1409_v45  ;;  %v1017_v0 = vadd.f32 %v725_v55, %v167_v53  ;;  %v1081_v1 = vadd.f32 %v885_v56, %v231_v54  ;;  %v237_v30 = vld [vmem:[#allocation2 + $0x2c8] sm:$0xff] }
  0xfa   :  { %1949 = vst.msk [vmem:[%s3188_s3 + $0x128] sm:$0xff] %vm2599_vm3, %v2153_v44  ;;  %v2154_v58 = vpack.c.bf16 %v1474_v52, %v1473_v48  ;;  %v1272_v61 = vld [vmem:[#allocation2 + $0x78] sm:$0xff]  ;;  %v2719_v2 = vpop.f32.mrf.mxu0  ;;  %v2721_v3 = vpop.f32.mrf.mxu1 }
  0xfb   :  { %v1336_v62 = vld [vmem:[#allocation2 + $0x278] sm:$0xff]  ;;  %1918 = vst.msk [vmem:[%s3188_s3 + $0x30] sm:$0xff] %vm2599_vm3, %v2122_v57  ;;  %v1412_v5 = vadd.f32 %v2583_v4, %v1272_v61  ;;  %v1417_v54 = vadd.f32 %v2581_v63, %v2719_v2  ;;  %v1481_v55 = vadd.f32 %v2581_v63, %v2721_v3 }
  0xfc   :  { %1950 = vst.msk [vmem:[%s3188_s3 + $0x130] sm:$0xff] %vm2599_vm3, %v2154_v58  ;;  %v1476_v6 = vadd.f32 %v2583_v4, %v1336_v62  ;;  %v731_v9 = vpop.f32.mrf.mxu0  ;;  %v891_v10 = vpop.f32.mrf.mxu1  ;;  %v239_v52 = vld [vmem:[#allocation2 + $0x2d8] sm:$0xff] }
  0xfd   :  { %1145 = vst.msk [vmem:[#allocation2 + $0x98] sm:$0xff] %vm20_vm0, %v1017_v0  ;;  %1209 = vst.msk [vmem:[#allocation2 + $0x298] sm:$0xff] %vm20_vm0, %v1081_v1  ;;  %v2123_v11 = vpack.c.bf16 %v1412_v5, %v1411_v59  ;;  %v1019_v14 = vadd.f32 %v731_v9, %v169_v7  ;;  %v1083_v18 = vadd.f32 %v891_v10, %v233_v8  ;;  %v241_v7 = vld [vmem:[#allocation2 + $0x2e8] sm:$0xff] }
  0xfe   :  { %v2155_v12 = vpack.c.bf16 %v1476_v6, %v1475_v60  ;;  %v1274_v16 = vld [vmem:[#allocation2 + $0x88] sm:$0xff]  ;;  %v2739_v20 = vpop.f32.mrf.mxu0  ;;  %v2741_v21 = vpop.f32.mrf.mxu1 }
  0xff   :  { %v1338_v17 = vld [vmem:[#allocation2 + $0x288] sm:$0xff]  ;;  %1919 = vst.msk [vmem:[%s3188_s3 + $0x38] sm:$0xff] %vm2599_vm3, %v2123_v11  ;;  %v1414_v22 = vadd.f32 %v2583_v4, %v1274_v16  ;;  %v1419_v2 = vadd.f32 %v2581_v63, %v2739_v20  ;;  %v1483_v3 = vadd.f32 %v2581_v63, %v2741_v21 }
 0x100   :  { %1951 = vst.msk [vmem:[%s3188_s3 + $0x138] sm:$0xff] %vm2599_vm3, %v2155_v12  ;;  %v1478_v23 = vadd.f32 %v2583_v4, %v1338_v17  ;;  %v735_v26 = vpop.f32.mrf.mxu0  ;;  %v895_v27 = vpop.f32.mrf.mxu1  ;;  %v177_v6 = vld [vmem:[#allocation2 + $0xe8] sm:$0xff] }
 0x101   :  { %1147 = vst.msk [vmem:[#allocation2 + $0xa8] sm:$0xff] %vm20_vm0, %v1019_v14  ;;  %1211 = vst.msk [vmem:[#allocation2 + $0x2a8] sm:$0xff] %vm20_vm0, %v1083_v18  ;;  %v2124_v28 = vpack.c.bf16 %v1414_v22, %v1413_v15  ;;  %v1021_v32 = vadd.f32 %v735_v26, %v171_v24  ;;  %v1085_v33 = vadd.f32 %v895_v27, %v235_v25  ;;  %v179_v27 = vld [vmem:[#allocation2 + $0xf8] sm:$0xff] }
 0x102   :  { %v2156_v29 = vpack.c.bf16 %v1478_v23, %v1477_v13  ;;  %v739_v34 = vpop.f32.mrf.mxu0  ;;  %v899_v35 = vpop.f32.mrf.mxu1 }
 0x103   :  { %1920 = vst.msk [vmem:[%s3188_s3 + $0x40] sm:$0xff] %vm2599_vm3, %v2124_v28  ;;  %v1421_v18 = vadd.f32 %v2581_v63, %v739_v34  ;;  %v1485_v22 = vadd.f32 %v2581_v63, %v899_v35  ;;  %v243_v28 = vld [vmem:[#allocation2 + $0x2f8] sm:$0xff] }
 0x104   :  { %1952 = vst.msk [vmem:[%s3188_s3 + $0x140] sm:$0xff] %vm2599_vm3, %v2156_v29  ;;  %v1276_v31 = vld [vmem:[#allocation2 + $0x98] sm:$0xff]  ;;  %v741_v42 = vpop.f32.mrf.mxu0  ;;  %v901_v43 = vpop.f32.mrf.mxu1 }
 0x105   :  { %v1340_v37 = vld [vmem:[#allocation2 + $0x298] sm:$0xff]  ;;  %v1416_v40 = vadd.f32 %v2583_v4, %v1276_v31  ;;  %1149 = vst.msk [vmem:[#allocation2 + $0xb8] sm:$0xff] %vm20_vm0, %v1021_v32  ;;  %1213 = vst.msk [vmem:[#allocation2 + $0x2b8] sm:$0xff] %vm20_vm0, %v1085_v33  ;;  %v1023_v44 = vadd.f32 %v741_v42, %v173_v36  ;;  %v1087_v45 = vadd.f32 %v901_v43, %v237_v30  ;;  %v181_v43 = vld [vmem:[#allocation2 + $0x108] sm:$0xff] }
 0x106   :  { %v1480_v41 = vadd.f32 %v2583_v4, %v1340_v37  ;;  %v743_v50 = vpop.f32.mrf.mxu0  ;;  %v903_v47 = vpop.f32.mrf.mxu1 }
 0x107   :  { %v2125_v48 = vpack.c.bf16 %v1416_v40, %v1415_v38  ;;  %1151 = vst.msk [vmem:[#allocation2 + $0xc8] sm:$0xff] %vm20_vm0, %v1023_v44  ;;  %1215 = vst.msk [vmem:[#allocation2 + $0x2c8] sm:$0xff] %vm20_vm0, %v1087_v45  ;;  %v1423_v35 = vadd.f32 %v2581_v63, %v743_v50  ;;  %v1487_v36 = vadd.f32 %v2581_v63, %v903_v47  ;;  %v245_v44 = vld [vmem:[#allocation2 + $0x308] sm:$0xff] }
 0x108   :  { %v2157_v49 = vpack.c.bf16 %v1480_v41, %v1479_v39  ;;  %v1278_v53 = vld [vmem:[#allocation2 + $0xa8] sm:$0xff]  ;;  %v745_v58 = vpop.f32.mrf.mxu0  ;;  %v905_v59 = vpop.f32.mrf.mxu1 }
 0x109   :  { %v1342_v51 = vld [vmem:[#allocation2 + $0x2a8] sm:$0xff]  ;;  %1921 = vst.msk [vmem:[%s3188_s3 + $0x48] sm:$0xff] %vm2599_vm3, %v2125_v48  ;;  %v1418_v56 = vadd.f32 %v2583_v4, %v1278_v53  ;;  %v1025_v60 = vadd.f32 %v745_v58, %v175_v46  ;;  %v1089_v61 = vadd.f32 %v905_v59, %v239_v52  ;;  %v183_v59 = vld [vmem:[#allocation2 + $0x118] sm:$0xff] }
 0x10a   :  { %1953 = vst.msk [vmem:[%s3188_s3 + $0x148] sm:$0xff] %vm2599_vm3, %v2157_v49  ;;  %v1482_v57 = vadd.f32 %v2583_v4, %v1342_v51  ;;  %v749_v1 = vpop.f32.mrf.mxu0  ;;  %v909_v5 = vpop.f32.mrf.mxu1 }
 0x10b   :  { %v2126_v62 = vpack.c.bf16 %v1418_v56, %v1417_v54  ;;  %1153 = vst.msk [vmem:[#allocation2 + $0xd8] sm:$0xff] %vm20_vm0, %v1025_v60  ;;  %1217 = vst.msk [vmem:[#allocation2 + $0x2d8] sm:$0xff] %vm20_vm0, %v1089_v61  ;;  %v1425_v47 = vadd.f32 %v2581_v63, %v749_v1  ;;  %v1489_v46 = vadd.f32 %v2581_v63, %v909_v5  ;;  %v247_v60 = vld [vmem:[#allocation2 + $0x318] sm:$0xff] }
 0x10c   :  { %v2158_v0 = vpack.c.bf16 %v1482_v57, %v1481_v55  ;;  %v1280_v8 = vld [vmem:[#allocation2 + $0xb8] sm:$0xff]  ;;  %v751_v12 = vpop.f32.mrf.mxu0  ;;  %v911_v15 = vpop.f32.mrf.mxu1 }
 0x10d   :  { %v1344_v9 = vld [vmem:[#allocation2 + $0x2b8] sm:$0xff]  ;;  %1922 = vst.msk [vmem:[%s3188_s3 + $0x50] sm:$0xff] %vm2599_vm3, %v2126_v62  ;;  %v1420_v10 = vadd.f32 %v2583_v4, %v1280_v8  ;;  %v1027_v13 = vadd.f32 %v751_v12, %v177_v6  ;;  %v1091_v16 = vadd.f32 %v911_v15, %v241_v7 }
 0x10e   :  { %1954 = vst.msk [vmem:[%s3188_s3 + $0x150] sm:$0xff] %vm2599_vm3, %v2158_v0  ;;  %v1484_v11 = vadd.f32 %v2583_v4, %v1344_v9  ;;  %v1282_v23 = vld [vmem:[#allocation2 + $0xc8] sm:$0xff]  ;;  %v2813_v20 = vpop.f32.mrf.mxu0  ;;  %v2815_v25 = vpop.f32.mrf.mxu1 }
 0x10f   :  { %v2127_v17 = vpack.c.bf16 %v1420_v10, %v1419_v2  ;;  %v1346_v24 = vld [vmem:[#allocation2 + $0x2c8] sm:$0xff]  ;;  %v1422_v21 = vadd.f32 %v2583_v4, %v1282_v23  ;;  %1155 = vst.msk [vmem:[#allocation2 + $0xe8] sm:$0xff] %vm20_vm0, %v1027_v13  ;;  %1219 = vst.msk [vmem:[#allocation2 + $0x2e8] sm:$0xff] %vm20_vm0, %v1091_v16  ;;  %v1491_v12 = vadd.f32 %v2581_v63, %v2815_v25 }
 0x110   :  { %v2159_v14 = vpack.c.bf16 %v1484_v11, %v1483_v3  ;;  %v1486_v26 = vadd.f32 %v2583_v4, %v1346_v24  ;;  %v755_v29 = vpop.f32.mrf.mxu0  ;;  %v915_v32 = vpop.f32.mrf.mxu1  ;;  %v185_v9 = vld [vmem:[#allocation2 + $0x128] sm:$0xff]  ;;  %v1427_v11 = vadd.f32 %v2581_v63, %v2813_v20  ;;  %v187_v20 = vld [vmem:[#allocation2 + $0x138] sm:$0xff] }
 0x111   :  { %1923 = vst.msk [vmem:[%s3188_s3 + $0x58] sm:$0xff] %vm2599_vm3, %v2127_v17  ;;  %v2128_v33 = vpack.c.bf16 %v1422_v21, %v1421_v18  ;;  %v1029_v37 = vadd.f32 %v755_v29, %v179_v27  ;;  %v1093_v38 = vadd.f32 %v915_v32, %v243_v28  ;;  %v249_v2 = vld [vmem:[#allocation2 + $0x328] sm:$0xff] }
 0x112   :  { %1955 = vst.msk [vmem:[%s3188_s3 + $0x158] sm:$0xff] %vm2599_vm3, %v2159_v14  ;;  %v2160_v34 = vpack.c.bf16 %v1486_v26, %v1485_v22  ;;  %v1284_v30 = vld [vmem:[#allocation2 + $0xd8] sm:$0xff]  ;;  %v2833_v39 = vpop.f32.mrf.mxu0  ;;  %v2835_v40 = vpop.f32.mrf.mxu1 }
 0x113   :  { %v1348_v31 = vld [vmem:[#allocation2 + $0x2d8] sm:$0xff]  ;;  %1924 = vst.msk [vmem:[%s3188_s3 + $0x60] sm:$0xff] %vm2599_vm3, %v2128_v33  ;;  %v1424_v41 = vadd.f32 %v2583_v4, %v1284_v30  ;;  %v1429_v28 = vadd.f32 %v2581_v63, %v2833_v39  ;;  %v1493_v29 = vadd.f32 %v2581_v63, %v2835_v40 }
 0x114   :  { %1956 = vst.msk [vmem:[%s3188_s3 + $0x160] sm:$0xff] %vm2599_vm3, %v2160_v34  ;;  %v1488_v42 = vadd.f32 %v2583_v4, %v1348_v31  ;;  %v761_v45 = vpop.f32.mrf.mxu0  ;;  %v921_v48 = vpop.f32.mrf.mxu1  ;;  %v251_v26 = vld [vmem:[#allocation2 + $0x338] sm:$0xff] }
 0x115   :  { %1157 = vst.msk [vmem:[#allocation2 + $0xf8] sm:$0xff] %vm20_vm0, %v1029_v37  ;;  %1221 = vst.msk [vmem:[#allocation2 + $0x2f8] sm:$0xff] %vm20_vm0, %v1093_v38  ;;  %v2129_v49 = vpack.c.bf16 %v1424_v41, %v1423_v35  ;;  %v1031_v51 = vadd.f32 %v761_v45, %v181_v43  ;;  %v1095_v54 = vadd.f32 %v921_v48, %v245_v44  ;;  %v253_v43 = vld [vmem:[#allocation2 + $0x348] sm:$0xff] }
 0x116   :  { %v2161_v50 = vpack.c.bf16 %v1488_v42, %v1487_v36  ;;  %v1286_v52 = vld [vmem:[#allocation2 + $0xe8] sm:$0xff]  ;;  %v2853_v55 = vpop.f32.mrf.mxu0  ;;  %v2855_v56 = vpop.f32.mrf.mxu1 }
 0x117   :  { %v1350_v53 = vld [vmem:[#allocation2 + $0x2e8] sm:$0xff]  ;;  %1925 = vst.msk [vmem:[%s3188_s3 + $0x68] sm:$0xff] %vm2599_vm3, %v2129_v49  ;;  %v1426_v57 = vadd.f32 %v2583_v4, %v1286_v52  ;;  %v1431_v39 = vadd.f32 %v2581_v63, %v2853_v55  ;;  %v1495_v40 = vadd.f32 %v2581_v63, %v2855_v56 }
 0x118   :  { %1957 = vst.msk [vmem:[%s3188_s3 + $0x168] sm:$0xff] %vm2599_vm3, %v2161_v50  ;;  %v1490_v58 = vadd.f32 %v2583_v4, %v1350_v53  ;;  %v765_v61 = vpop.f32.mrf.mxu0  ;;  %v925_v62 = vpop.f32.mrf.mxu1  ;;  %v189_v42 = vld [vmem:[#allocation2 + $0x148] sm:$0xff] }
 0x119   :  { %1159 = vst.msk [vmem:[#allocation2 + $0x108] sm:$0xff] %vm20_vm0, %v1031_v51  ;;  %1223 = vst.msk [vmem:[#allocation2 + $0x308] sm:$0xff] %vm20_vm0, %v1095_v54  ;;  %v2130_v0 = vpack.c.bf16 %v1426_v57, %v1425_v47  ;;  %v1033_v5 = vadd.f32 %v765_v61, %v183_v59  ;;  %v1097_v6 = vadd.f32 %v925_v62, %v247_v60  ;;  %v191_v62 = vld [vmem:[#allocation2 + $0x158] sm:$0xff] }
 0x11a   :  { %v2162_v1 = vpack.c.bf16 %v1490_v58, %v1489_v46  ;;  %v769_v7 = vpop.f32.mrf.mxu0  ;;  %v929_v8 = vpop.f32.mrf.mxu1 }
 0x11b   :  { %1926 = vst.msk [vmem:[%s3188_s3 + $0x70] sm:$0xff] %vm2599_vm3, %v2130_v0  ;;  %v1433_v54 = vadd.f32 %v2581_v63, %v769_v7  ;;  %v1497_v57 = vadd.f32 %v2581_v63, %v929_v8  ;;  %v255_v0 = vld [vmem:[#allocation2 + $0x358] sm:$0xff] }
 0x11c   :  { %1958 = vst.msk [vmem:[%s3188_s3 + $0x170] sm:$0xff] %vm2599_vm3, %v2162_v1  ;;  %v1288_v3 = vld [vmem:[#allocation2 + $0xf8] sm:$0xff]  ;;  %v771_v16 = vpop.f32.mrf.mxu0  ;;  %v931_v17 = vpop.f32.mrf.mxu1 }
 0x11d   :  { %v1352_v10 = vld [vmem:[#allocation2 + $0x2f8] sm:$0xff]  ;;  %v1428_v15 = vadd.f32 %v2583_v4, %v1288_v3  ;;  %1161 = vst.msk [vmem:[#allocation2 + $0x118] sm:$0xff] %vm20_vm0, %v1033_v5  ;;  %1225 = vst.msk [vmem:[#allocation2 + $0x318] sm:$0xff] %vm20_vm0, %v1097_v6  ;;  %v1035_v14 = vadd.f32 %v771_v16, %v185_v9  ;;  %v1099_v18 = vadd.f32 %v931_v17, %v249_v2  ;;  %v193_v17 = vld [vmem:[#allocation2 + $0x168] sm:$0xff] }
 0x11e   :  { %v1492_v13 = vadd.f32 %v2583_v4, %v1352_v10  ;;  %v773_v24 = vpop.f32.mrf.mxu0  ;;  %v933_v21 = vpop.f32.mrf.mxu1 }
 0x11f   :  { %v2131_v22 = vpack.c.bf16 %v1428_v15, %v1427_v11  ;;  %1163 = vst.msk [vmem:[#allocation2 + $0x128] sm:$0xff] %vm20_vm0, %v1035_v14  ;;  %1227 = vst.msk [vmem:[#allocation2 + $0x328] sm:$0xff] %vm20_vm0, %v1099_v18  ;;  %v1435_v8 = vadd.f32 %v2581_v63, %v773_v24  ;;  %v1499_v9 = vadd.f32 %v2581_v63, %v933_v21  ;;  %v257_v14 = vld [vmem:[#allocation2 + $0x368] sm:$0xff] }
 0x120   :  { %v2163_v23 = vpack.c.bf16 %v1492_v13, %v1491_v12  ;;  %v1290_v27 = vld [vmem:[#allocation2 + $0x108] sm:$0xff]  ;;  %v775_v34 = vpop.f32.mrf.mxu0  ;;  %v935_v35 = vpop.f32.mrf.mxu1 }
 0x121   :  { %v1354_v25 = vld [vmem:[#allocation2 + $0x308] sm:$0xff]  ;;  %1927 = vst.msk [vmem:[%s3188_s3 + $0x78] sm:$0xff] %vm2599_vm3, %v2131_v22  ;;  %v1430_v32 = vadd.f32 %v2583_v4, %v1290_v27  ;;  %v1037_v36 = vadd.f32 %v775_v34, %v187_v20  ;;  %v1101_v30 = vadd.f32 %v935_v35, %v251_v26  ;;  %v195_v35 = vld [vmem:[#allocation2 + $0x178] sm:$0xff] }
 0x122   :  { %1959 = vst.msk [vmem:[%s3188_s3 + $0x178] sm:$0xff] %vm2599_vm3, %v2163_v23  ;;  %v1494_v33 = vadd.f32 %v2583_v4, %v1354_v25  ;;  %v779_v38 = vpop.f32.mrf.mxu0  ;;  %v939_v41 = vpop.f32.mrf.mxu1 }
 0x123   :  { %v2132_v31 = vpack.c.bf16 %v1430_v32, %v1429_v28  ;;  %1165 = vst.msk [vmem:[#allocation2 + $0x138] sm:$0xff] %vm20_vm0, %v1037_v36  ;;  %1229 = vst.msk [vmem:[#allocation2 + $0x338] sm:$0xff] %vm20_vm0, %v1101_v30  ;;  %v1437_v21 = vadd.f32 %v2581_v63, %v779_v38  ;;  %v1501_v20 = vadd.f32 %v2581_v63, %v939_v41  ;;  %v259_v36 = vld [vmem:[#allocation2 + $0x378] sm:$0xff] }
 0x124   :  { %v2164_v37 = vpack.c.bf16 %v1494_v33, %v1493_v29  ;;  %v1292_v44 = vld [vmem:[#allocation2 + $0x118] sm:$0xff]  ;;  %v781_v50 = vpop.f32.mrf.mxu0  ;;  %v941_v47 = vpop.f32.mrf.mxu1 }
 0x125   :  { %v1356_v45 = vld [vmem:[#allocation2 + $0x318] sm:$0xff]  ;;  %1928 = vst.msk [vmem:[%s3188_s3 + $0x80] sm:$0xff] %vm2599_vm3, %v2132_v31  ;;  %v1432_v48 = vadd.f32 %v2583_v4, %v1292_v44  ;;  %v1039_v46 = vadd.f32 %v781_v50, %v189_v42  ;;  %v1103_v52 = vadd.f32 %v941_v47, %v253_v43 }
 0x126   :  { %1960 = vst.msk [vmem:[%s3188_s3 + $0x180] sm:$0xff] %vm2599_vm3, %v2164_v37  ;;  %v1496_v49 = vadd.f32 %v2583_v4, %v1356_v45  ;;  %v1294_v58 = vld [vmem:[#allocation2 + $0x128] sm:$0xff]  ;;  %v2927_v55 = vpop.f32.mrf.mxu0  ;;  %v2929_v60 = vpop.f32.mrf.mxu1 }
 0x127   :  { %v2133_v53 = vpack.c.bf16 %v1432_v48, %v1431_v39  ;;  %v1358_v59 = vld [vmem:[#allocation2 + $0x328] sm:$0xff]  ;;  %v1434_v56 = vadd.f32 %v2583_v4, %v1294_v58  ;;  %1167 = vst.msk [vmem:[#allocation2 + $0x148] sm:$0xff] %vm20_vm0, %v1039_v46  ;;  %1231 = vst.msk [vmem:[#allocation2 + $0x348] sm:$0xff] %vm20_vm0, %v1103_v52  ;;  %v1503_v50 = vadd.f32 %v2581_v63, %v2929_v60 }
 0x128   :  { %v2165_v51 = vpack.c.bf16 %v1496_v49, %v1495_v40  ;;  %v1498_v61 = vadd.f32 %v2583_v4, %v1358_v59  ;;  %v785_v1 = vpop.f32.mrf.mxu0  ;;  %v945_v5 = vpop.f32.mrf.mxu1  ;;  %v197_v45 = vld [vmem:[#allocation2 + $0x188] sm:$0xff]  ;;  %v1439_v49 = vadd.f32 %v2581_v63, %v2927_v55  ;;  %v199_v55 = vld [vmem:[#allocation2 + $0x198] sm:$0xff] }
 0x129   :  { %1929 = vst.msk [vmem:[%s3188_s3 + $0x88] sm:$0xff] %vm2599_vm3, %v2133_v53  ;;  %v2134_v6 = vpack.c.bf16 %v1434_v56, %v1433_v54  ;;  %v1041_v10 = vadd.f32 %v785_v1, %v191_v62  ;;  %v1105_v11 = vadd.f32 %v945_v5, %v255_v0  ;;  %v261_v39 = vld [vmem:[#allocation2 + $0x388] sm:$0xff] }
 0x12a   :  { %1961 = vst.msk [vmem:[%s3188_s3 + $0x188] sm:$0xff] %vm2599_vm3, %v2165_v51  ;;  %v2166_v7 = vpack.c.bf16 %v1498_v61, %v1497_v57  ;;  %v1296_v2 = vld [vmem:[#allocation2 + $0x138] sm:$0xff]  ;;  %v2947_v12 = vpop.f32.mrf.mxu0  ;;  %v2949_v15 = vpop.f32.mrf.mxu1 }
 0x12b   :  { %v1360_v3 = vld [vmem:[#allocation2 + $0x338] sm:$0xff]  ;;  %1930 = vst.msk [vmem:[%s3188_s3 + $0x90] sm:$0xff] %vm2599_vm3, %v2134_v6  ;;  %v1436_v13 = vadd.f32 %v2583_v4, %v1296_v2  ;;  %v1441_v0 = vadd.f32 %v2581_v63, %v2947_v12  ;;  %v1505_v1 = vadd.f32 %v2581_v63, %v2949_v15 }
 0x12c   :  { %1962 = vst.msk [vmem:[%s3188_s3 + $0x190] sm:$0xff] %vm2599_vm3, %v2166_v7  ;;  %v1500_v16 = vadd.f32 %v2583_v4, %v1360_v3  ;;  %v791_v18 = vpop.f32.mrf.mxu0  ;;  %v951_v22 = vpop.f32.mrf.mxu1  ;;  %v263_v61 = vld [vmem:[#allocation2 + $0x398] sm:$0xff] }
 0x12d   :  { %1169 = vst.msk [vmem:[#allocation2 + $0x158] sm:$0xff] %vm20_vm0, %v1041_v10  ;;  %1233 = vst.msk [vmem:[#allocation2 + $0x358] sm:$0xff] %vm20_vm0, %v1105_v11  ;;  %v2135_v23 = vpack.c.bf16 %v1436_v13, %v1435_v8  ;;  %v1043_v25 = vadd.f32 %v791_v18, %v193_v17  ;;  %v1107_v28 = vadd.f32 %v951_v22, %v257_v14  ;;  %v265_v17 = vld [vmem:[#allocation2 + $0x3a8] sm:$0xff] }
 0x12e   :  { %v2167_v24 = vpack.c.bf16 %v1500_v16, %v1499_v9  ;;  %v1298_v26 = vld [vmem:[#allocation2 + $0x148] sm:$0xff]  ;;  %v2967_v29 = vpop.f32.mrf.mxu0  ;;  %v2969_v32 = vpop.f32.mrf.mxu1 }
 0x12f   :  { %v1362_v27 = vld [vmem:[#allocation2 + $0x348] sm:$0xff]  ;;  %1931 = vst.msk [vmem:[%s3188_s3 + $0x98] sm:$0xff] %vm2599_vm3, %v2135_v23  ;;  %v1438_v33 = vadd.f32 %v2583_v4, %v1298_v26  ;;  %v1443_v12 = vadd.f32 %v2581_v63, %v2967_v29  ;;  %v1507_v15 = vadd.f32 %v2581_v63, %v2969_v32 }
 0x130   :  { %1963 = vst.msk [vmem:[%s3188_s3 + $0x198] sm:$0xff] %vm2599_vm3, %v2167_v24  ;;  %v1502_v34 = vadd.f32 %v2583_v4, %v1362_v27  ;;  %v795_v30 = vpop.f32.mrf.mxu0  ;;  %v955_v31 = vpop.f32.mrf.mxu1  ;;  %v201_v16 = vld [vmem:[#allocation2 + $0x1a8] sm:$0xff] }
 0x131   :  { %1171 = vst.msk [vmem:[#allocation2 + $0x168] sm:$0xff] %vm20_vm0, %v1043_v25  ;;  %1235 = vst.msk [vmem:[#allocation2 + $0x368] sm:$0xff] %vm20_vm0, %v1107_v28  ;;  %v2136_v37 = vpack.c.bf16 %v1438_v33, %v1437_v21  ;;  %v1045_v41 = vadd.f32 %v795_v30, %v195_v35  ;;  %v1109_v42 = vadd.f32 %v955_v31, %v259_v36  ;;  %v203_v31 = vld [vmem:[#allocation2 + $0x1b8] sm:$0xff] }
 0x132   :  { %v2168_v38 = vpack.c.bf16 %v1502_v34, %v1501_v20  ;;  %v799_v43 = vpop.f32.mrf.mxu0  ;;  %v959_v44 = vpop.f32.mrf.mxu1 }
 0x133   :  { %1932 = vst.msk [vmem:[%s3188_s3 + $0xa0] sm:$0xff] %vm2599_vm3, %v2136_v37  ;;  %v1445_v28 = vadd.f32 %v2581_v63, %v799_v43  ;;  %v1509_v33 = vadd.f32 %v2581_v63, %v959_v44  ;;  %v267_v37 = vld [vmem:[#allocation2 + $0x3b8] sm:$0xff] }
 0x134   :  { %1964 = vst.msk [vmem:[%s3188_s3 + $0x1a0] sm:$0xff] %vm2599_vm3, %v2168_v38  ;;  %v1300_v40 = vld [vmem:[#allocation2 + $0x158] sm:$0xff]  ;;  %v801_v52 = vpop.f32.mrf.mxu0  ;;  %v961_v53 = vpop.f32.mrf.mxu1 }
 0x135   :  { %v1364_v48 = vld [vmem:[#allocation2 + $0x358] sm:$0xff]  ;;  %v1440_v47 = vadd.f32 %v2583_v4, %v1300_v40  ;;  %1173 = vst.msk [vmem:[#allocation2 + $0x178] sm:$0xff] %vm20_vm0, %v1045_v41  ;;  %1237 = vst.msk [vmem:[#allocation2 + $0x378] sm:$0xff] %vm20_vm0, %v1109_v42  ;;  %v1047_v51 = vadd.f32 %v801_v52, %v197_v45  ;;  %v1111_v54 = vadd.f32 %v961_v53, %v261_v39  ;;  %v205_v53 = vld [vmem:[#allocation2 + $0x1c8] sm:$0xff] }
 0x136   :  { %v1504_v46 = vadd.f32 %v2583_v4, %v1364_v48  ;;  %v803_v59 = vpop.f32.mrf.mxu0  ;;  %v963_v56 = vpop.f32.mrf.mxu1 }
 0x137   :  { %v2137_v57 = vpack.c.bf16 %v1440_v47, %v1439_v49  ;;  %1175 = vst.msk [vmem:[#allocation2 + $0x188] sm:$0xff] %vm20_vm0, %v1047_v51  ;;  %1239 = vst.msk [vmem:[#allocation2 + $0x388] sm:$0xff] %vm20_vm0, %v1111_v54  ;;  %v1447_v44 = vadd.f32 %v2581_v63, %v803_v59  ;;  %v1511_v45 = vadd.f32 %v2581_v63, %v963_v56  ;;  %v269_v51 = vld [vmem:[#allocation2 + $0x3c8] sm:$0xff] }
 0x138   :  { %v2169_v58 = vpack.c.bf16 %v1504_v46, %v1503_v50  ;;  %v1302_v62 = vld [vmem:[#allocation2 + $0x168] sm:$0xff]  ;;  %v805_v7 = vpop.f32.mrf.mxu0  ;;  %v965_v8 = vpop.f32.mrf.mxu1 }
 0x139   :  { %v1366_v60 = vld [vmem:[#allocation2 + $0x368] sm:$0xff]  ;;  %1933 = vst.msk [vmem:[%s3188_s3 + $0xa8] sm:$0xff] %vm2599_vm3, %v2137_v57  ;;  %v1442_v5 = vadd.f32 %v2583_v4, %v1302_v62  ;;  %v1049_v9 = vadd.f32 %v805_v7, %v199_v55  ;;  %v1113_v2 = vadd.f32 %v965_v8, %v263_v61  ;;  %v207_v8 = vld [vmem:[#allocation2 + $0x1d8] sm:$0xff] }
 0x13a   :  { %1965 = vst.msk [vmem:[%s3188_s3 + $0x1a8] sm:$0xff] %vm2599_vm3, %v2169_v58  ;;  %v1506_v6 = vadd.f32 %v2583_v4, %v1366_v60  ;;  %v809_v11 = vpop.f32.mrf.mxu0  ;;  %v969_v13 = vpop.f32.mrf.mxu1 }
 0x13b   :  { %v2138_v3 = vpack.c.bf16 %v1442_v5, %v1441_v0  ;;  %1177 = vst.msk [vmem:[#allocation2 + $0x198] sm:$0xff] %vm20_vm0, %v1049_v9  ;;  %1241 = vst.msk [vmem:[#allocation2 + $0x398] sm:$0xff] %vm20_vm0, %v1113_v2  ;;  %v1449_v56 = vadd.f32 %v2581_v63, %v809_v11  ;;  %v1513_v55 = vadd.f32 %v2581_v63, %v969_v13  ;;  %v271_v9 = vld [vmem:[#allocation2 + $0x3d8] sm:$0xff] }
 0x13c   :  { %v2170_v10 = vpack.c.bf16 %v1506_v6, %v1505_v1  ;;  %v1304_v14 = vld [vmem:[#allocation2 + $0x178] sm:$0xff]  ;;  %v811_v24 = vpop.f32.mrf.mxu0  ;;  %v971_v21 = vpop.f32.mrf.mxu1 }
 0x13d   :  { %v1368_v18 = vld [vmem:[#allocation2 + $0x378] sm:$0xff]  ;;  %1934 = vst.msk [vmem:[%s3188_s3 + $0xb0] sm:$0xff] %vm2599_vm3, %v2138_v3  ;;  %v1444_v22 = vadd.f32 %v2583_v4, %v1304_v14  ;;  %v1051_v20 = vadd.f32 %v811_v24, %v201_v16  ;;  %v1115_v26 = vadd.f32 %v971_v21, %v265_v17 }
 0x13e   :  { %1966 = vst.msk [vmem:[%s3188_s3 + $0x1b0] sm:$0xff] %vm2599_vm3, %v2170_v10  ;;  %v1508_v23 = vadd.f32 %v2583_v4, %v1368_v18  ;;  %v1306_v34 = vld [vmem:[#allocation2 + $0x188] sm:$0xff]  ;;  %v3041_v29 = vpop.f32.mrf.mxu0  ;;  %v3043_v36 = vpop.f32.mrf.mxu1 }
 0x13f   :  { %v2139_v27 = vpack.c.bf16 %v1444_v22, %v1443_v12  ;;  %v1370_v35 = vld [vmem:[#allocation2 + $0x388] sm:$0xff]  ;;  %v1446_v32 = vadd.f32 %v2583_v4, %v1306_v34  ;;  %1179 = vst.msk [vmem:[#allocation2 + $0x1a8] sm:$0xff] %vm20_vm0, %v1051_v20  ;;  %1243 = vst.msk [vmem:[#allocation2 + $0x3a8] sm:$0xff] %vm20_vm0, %v1115_v26  ;;  %v1515_v24 = vadd.f32 %v2581_v63, %v3043_v36 }
 0x140   :  { %v2171_v25 = vpack.c.bf16 %v1508_v23, %v1507_v15  ;;  %v1510_v30 = vadd.f32 %v2583_v4, %v1370_v35  ;;  %v815_v38 = vpop.f32.mrf.mxu0  ;;  %v975_v41 = vpop.f32.mrf.mxu1  ;;  %v209_v18 = vld [vmem:[#allocation2 + $0x1e8] sm:$0xff]  ;;  %v1451_v23 = vadd.f32 %v2581_v63, %v3041_v29  ;;  %v211_v29 = vld [vmem:[#allocation2 + $0x1f8] sm:$0xff] }
 0x141   :  { %1935 = vst.msk [vmem:[%s3188_s3 + $0xb8] sm:$0xff] %vm2599_vm3, %v2139_v27  ;;  %v2140_v42 = vpack.c.bf16 %v1446_v32, %v1445_v28  ;;  %v1053_v48 = vadd.f32 %v815_v38, %v203_v31  ;;  %v1117_v49 = vadd.f32 %v975_v41, %v267_v37  ;;  %v273_v12 = vld [vmem:[#allocation2 + $0x3e8] sm:$0xff] }
 0x142   :  { %1967 = vst.msk [vmem:[%s3188_s3 + $0x1b8] sm:$0xff] %vm2599_vm3, %v2171_v25  ;;  %v2172_v43 = vpack.c.bf16 %v1510_v30, %v1509_v33  ;;  %v1308_v39 = vld [vmem:[#allocation2 + $0x198] sm:$0xff]  ;;  %v3061_v50 = vpop.f32.mrf.mxu0  ;;  %v3063_v47 = vpop.f32.mrf.mxu1 }
 0x143   :  { %v1372_v40 = vld [vmem:[#allocation2 + $0x398] sm:$0xff]  ;;  %1936 = vst.msk [vmem:[%s3188_s3 + $0xc0] sm:$0xff] %vm2599_vm3, %v2140_v42  ;;  %v1448_v46 = vadd.f32 %v2583_v4, %v1308_v39  ;;  %v1453_v37 = vadd.f32 %v2581_v63, %v3061_v50  ;;  %v1517_v38 = vadd.f32 %v2581_v63, %v3063_v47 }
 0x144   :  { %1968 = vst.msk [vmem:[%s3188_s3 + $0x1c0] sm:$0xff] %vm2599_vm3, %v2172_v43  ;;  %v1512_v52 = vadd.f32 %v2583_v4, %v1372_v40  ;;  %v821_v54 = vpop.f32.mrf.mxu0  ;;  %v981_v57 = vpop.f32.mrf.mxu1  ;;  %v275_v30 = vld [vmem:[#allocation2 + $0x3f8] sm:$0xff] }
 0x145   :  { %1181 = vst.msk [vmem:[#allocation2 + $0x1b8] sm:$0xff] %vm20_vm0, %v1053_v48  ;;  %1245 = vst.msk [vmem:[#allocation2 + $0x3b8] sm:$0xff] %vm20_vm0, %v1117_v49  ;;  %v2141_v58 = vpack.c.bf16 %v1448_v46, %v1447_v44  ;;  %v1055_v60 = vadd.f32 %v821_v54, %v205_v53  ;;  %v1119_v0 = vadd.f32 %v981_v57, %v269_v51 }
 0x146   :  { %v2173_v59 = vpack.c.bf16 %v1512_v52, %v1511_v45  ;;  %v1310_v61 = vld [vmem:[#allocation2 + $0x1a8] sm:$0xff]  ;;  %v823_v1 = vpop.f32.mrf.mxu0  ;;  %v983_v5 = vpop.f32.mrf.mxu1 }
 0x147   :  { %v1374_v62 = vld [vmem:[#allocation2 + $0x3a8] sm:$0xff]  ;;  %1937 = vst.msk [vmem:[%s3188_s3 + $0xc8] sm:$0xff] %vm2599_vm3, %v2141_v58  ;;  %v1450_v6 = vadd.f32 %v2583_v4, %v1310_v61  ;;  %v1455_v50 = vadd.f32 %v2581_v63, %v823_v1  ;;  %v1519_v47 = vadd.f32 %v2581_v63, %v983_v5 }
 0x148   :  { %1969 = vst.msk [vmem:[%s3188_s3 + $0x1c8] sm:$0xff] %vm2599_vm3, %v2173_v59  ;;  %v1514_v7 = vadd.f32 %v2583_v4, %v1374_v62  ;;  %v825_v2 = vpop.f32.mrf.mxu0  ;;  %v985_v3 = vpop.f32.mrf.mxu1 }
 0x149   :  { %1183 = vst.msk [vmem:[#allocation2 + $0x1c8] sm:$0xff] %vm20_vm0, %v1055_v60  ;;  %1247 = vst.msk [vmem:[#allocation2 + $0x3c8] sm:$0xff] %vm20_vm0, %v1119_v0  ;;  %v2142_v10 = vpack.c.bf16 %v1450_v6, %v1449_v56  ;;  %v1057_v13 = vadd.f32 %v825_v2, %v207_v8  ;;  %v1121_v16 = vadd.f32 %v985_v3, %v271_v9 }
 0x14a   :  { %v2174_v11 = vpack.c.bf16 %v1514_v7, %v1513_v55  ;;  %v829_v17 = vpop.f32.mrf.mxu0  ;;  %v989_v14 = vpop.f32.mrf.mxu1 }
 0x14b   :  { %1938 = vst.msk [vmem:[%s3188_s3 + $0xd0] sm:$0xff] %vm2599_vm3, %v2142_v10  ;;  %v1457_v59 = vadd.f32 %v2581_v63, %v829_v17  ;;  %v1521_v56 = vadd.f32 %v2581_v63, %v989_v14 }
 0x14c   :  { %1970 = vst.msk [vmem:[%s3188_s3 + $0x1d0] sm:$0xff] %vm2599_vm3, %v2174_v11  ;;  %v1312_v15 = vld [vmem:[#allocation2 + $0x1b8] sm:$0xff]  ;;  %v831_v26 = vpop.f32.mrf.mxu0  ;;  %v991_v27 = vpop.f32.mrf.mxu1 }
 0x14d   :  { %v1376_v22 = vld [vmem:[#allocation2 + $0x3b8] sm:$0xff]  ;;  %v1452_v21 = vadd.f32 %v2583_v4, %v1312_v15  ;;  %1185 = vst.msk [vmem:[#allocation2 + $0x1d8] sm:$0xff] %vm20_vm0, %v1057_v13  ;;  %1249 = vst.msk [vmem:[#allocation2 + $0x3d8] sm:$0xff] %vm20_vm0, %v1121_v16  ;;  %v1059_v25 = vadd.f32 %v831_v26, %v209_v18  ;;  %v1123_v28 = vadd.f32 %v991_v27, %v273_v12 }
 0x14e   :  { %v1516_v20 = vadd.f32 %v2583_v4, %v1376_v22  ;;  %v833_v35 = vpop.f32.mrf.mxu0  ;;  %v993_v32 = vpop.f32.mrf.mxu1 }
 0x14f   :  { %v2143_v33 = vpack.c.bf16 %v1452_v21, %v1451_v23  ;;  %1187 = vst.msk [vmem:[#allocation2 + $0x1e8] sm:$0xff] %vm20_vm0, %v1059_v25  ;;  %1251 = vst.msk [vmem:[#allocation2 + $0x3e8] sm:$0xff] %vm20_vm0, %v1123_v28  ;;  %v1459_v5 = vadd.f32 %v2581_v63, %v833_v35  ;;  %v1523_v6 = vadd.f32 %v2581_v63, %v993_v32 }
 0x150   :  { %v2175_v34 = vpack.c.bf16 %v1516_v20, %v1515_v24  ;;  %v1314_v31 = vld [vmem:[#allocation2 + $0x1c8] sm:$0xff]  ;;  %v835_v43 = vpop.f32.mrf.mxu0  ;;  %v995_v44 = vpop.f32.mrf.mxu1 }
 0x151   :  { %v1378_v36 = vld [vmem:[#allocation2 + $0x3c8] sm:$0xff]  ;;  %1939 = vst.msk [vmem:[%s3188_s3 + $0xd8] sm:$0xff] %vm2599_vm3, %v2143_v33  ;;  %v1454_v41 = vadd.f32 %v2583_v4, %v1314_v31  ;;  %v1061_v45 = vadd.f32 %v835_v43, %v211_v29  ;;  %v1125_v39 = vadd.f32 %v995_v44, %v275_v30 }
 0x152   :  { %1971 = vst.msk [vmem:[%s3188_s3 + $0x1d8] sm:$0xff] %vm2599_vm3, %v2175_v34  ;;  %v1518_v42 = vadd.f32 %v2583_v4, %v1378_v36 }
 0x153   :  { %v2144_v40 = vpack.c.bf16 %v1454_v41, %v1453_v37  ;;  %1189 = vst.msk [vmem:[#allocation2 + $0x1f8] sm:$0xff] %vm20_vm0, %v1061_v45  ;;  %1253 = vst.msk [vmem:[#allocation2 + $0x3f8] sm:$0xff] %vm20_vm0, %v1125_v39 }
 0x154   :  { %v2176_v48 = vpack.c.bf16 %v1518_v42, %v1517_v38  ;;  %v1316_v49 = vld [vmem:[#allocation2 + $0x1d8] sm:$0xff] }
 0x155   :  { %v1380_v46 = vld [vmem:[#allocation2 + $0x3d8] sm:$0xff]  ;;  %1940 = vst.msk [vmem:[%s3188_s3 + $0xe0] sm:$0xff] %vm2599_vm3, %v2144_v40  ;;  %v1456_v52 = vadd.f32 %v2583_v4, %v1316_v49 }
 0x156   :  { %1972 = vst.msk [vmem:[%s3188_s3 + $0x1e0] sm:$0xff] %vm2599_vm3, %v2176_v48  ;;  %v1520_v53 = vadd.f32 %v2583_v4, %v1380_v46  ;;  %v1318_v57 = vld [vmem:[#allocation2 + $0x1e8] sm:$0xff] }
 0x157   :  { %v2145_v51 = vpack.c.bf16 %v1456_v52, %v1455_v50  ;;  %v1382_v58 = vld [vmem:[#allocation2 + $0x3e8] sm:$0xff]  ;;  %v1458_v55 = vadd.f32 %v2583_v4, %v1318_v57 }
 0x158   :  { %v2177_v54 = vpack.c.bf16 %v1520_v53, %v1519_v47  ;;  %v1522_v61 = vadd.f32 %v2583_v4, %v1382_v58 }
 0x159   :  { %1941 = vst.msk [vmem:[%s3188_s3 + $0xe8] sm:$0xff] %vm2599_vm3, %v2145_v51  ;;  %v2146_v62 = vpack.c.bf16 %v1458_v55, %v1457_v59 }
 0x15a   :  { %1973 = vst.msk [vmem:[%s3188_s3 + $0x1e8] sm:$0xff] %vm2599_vm3, %v2177_v54  ;;  %v2178_v60 = vpack.c.bf16 %v1522_v61, %v1521_v56  ;;  %v1320_v0 = vld [vmem:[#allocation2 + $0x1f8] sm:$0xff] }
 0x15b   :  { %v1384_v1 = vld [vmem:[#allocation2 + $0x3f8] sm:$0xff]  ;;  %1942 = vst.msk [vmem:[%s3188_s3 + $0xf0] sm:$0xff] %vm2599_vm3, %v2146_v62  ;;  %v1460_v7 = vadd.f32 %v2583_v4, %v1320_v0 }
 0x15c   :  { %1974 = vst.msk [vmem:[%s3188_s3 + $0x1f0] sm:$0xff] %vm2599_vm3, %v2178_v60  ;;  %v1524_v8 = vadd.f32 %v2583_v4, %v1384_v1 }
 0x15d   :  { %v2147_v9 = vpack.c.bf16 %v1460_v7, %v1459_v5 }
 0x15e   :  { %v2179_v2 = vpack.c.bf16 %v1524_v8, %v1523_v6 }
 0x15f   :  { %1943 = vst.msk [vmem:[%s3188_s3 + $0xf8] sm:$0xff] %vm2599_vm3, %v2147_v9 }
 0x160   :  { %1975 = vst.msk [vmem:[%s3188_s3 + $0x1f8] sm:$0xff] %vm2599_vm3, %v2179_v2 }

// kernel: _lambda_.4
= control target key start
LH: loop header
LB: loop body
LE: loop exit
PB: predicated region body
PF: predicated region fallthrough
CT: control target
= control target key end

     0   :  { %s7749_s12 = smov 0   ;;  %s9861_s0 = inlined_call_operand.vmem [shape: bf16[32,128,8], index: 0, kind: input, shape index: {}]   ;;  %s9862_s1 = inlined_call_operand.vmem [shape: bf16[32,128,8], index: 1, kind: input, shape index: {}]   ;;  %s9863_s2 = inlined_call_operand.vmem [shape: bf16[32,128,8], index: 2, kind: input, shape index: {}]   ;;  %s9864_s3 = inlined_call_operand.vmem [shape: bf16[32,128,8], index: 3, kind: output, shape index: {}]  }
   0x1 LB: > { %s5642_s13 = sadd.s32 4294967295, %s7727_s12   ;;  %p5646_p0 = scmp.ge.s32.totalorder %s7727_s12, 1  ;;  %s7727_s12 = sphi %s7749_s12, %s13_s12  }
   0x2   : > { %p163_p1 = scmp.lt.s32.totalorder %s7727_s12, 5 }
   0x4   : > { %p164_p2 = pnand %p5646_p0, %p163_p1 }
   0x6   : > { %167 = sbr.rel (%p164_p2) target bundleno = 1148 (0x47c), region = 32 }
   0xb   : > { %s5647_s14 = sshll.u32 %s5642_s13, 3  ;;  %vm694_vm0 = vcmask 64512   ;;  %vm5431_vm1 = vcmask 60416  }
   0xc   : > { %p202_p3 = scmp.lt.s32.totalorder %s5647_s14, 31 }
   0xe   : > { %s10388_s14 = smov (!%p202_p3, %s5647_s14), 31 }
   0xf   : > { %s7757_s15 = sshll.u32 %s10388_s14, 6 }
  0x10   : > { %s7763_s18 = scalar_lea.vmem %s9862_s1, %s7757_s15  ;;  %s7785_s21 = scalar_lea.vmem %s9861_s0, %s7757_s15 }
  0x11   : > { %v7017_v0 = vld [vmem:[%s7763_s18 + $0x38] sm:$0xff]   ;;  %v7019_v3 = vld [vmem:[%s7763_s18 + $0x30] sm:$0xff]   ;;  %v7021_v7 = vld [vmem:[%s7763_s18 + $0x28] sm:$0xff]   ;;  %s8484_s24 = scalar_lea.vmem %s9863_s2, %s7757_s15  ;;  %s9528_s27 = scalar_lea.vmem %s9864_s3, %s7757_s15 }
  0x12   : > { %v7018_v1 = vld [vmem:[%s7763_s18 + $0x78] sm:$0xff]   ;;  %6945 = vmatprep.subr.msk.bf16.mxu0 %vm694_vm0, %v7017_v0  ;;  %v741_v2 = vsel %vm694_vm0, %v7017_v0, 0  ;;  %v7020_v5 = vld [vmem:[%s7763_s18 + $0x70] sm:$0xff]   ;;  %v738_v6 = vsel %vm694_vm0, %v7019_v3, 0  ;;  %v7022_v9 = vld [vmem:[%s7763_s18 + $0x68] sm:$0xff]   ;;  %v735_v12 = vsel %vm694_vm0, %v7021_v7, 0 }
  0x13   : > { %6953 = vmatprep.subr.msk.bf16.mxu1 %vm694_vm0, %v7018_v1  ;;  %6434 = vmatpush3.bf16.xpose.msra.mxu0 %v741_v2  ;;  %v966_v4 = vsel %vm694_vm0, %v7018_v1, 0  ;;  %v963_v8 = vsel %vm694_vm0, %v7020_v5, 0  ;;  %v7023_v10 = vld [vmem:[%s7763_s18 + $0x20] sm:$0xff]   ;;  %v960_v14 = vsel %vm694_vm0, %v7022_v9, 0  ;;  %v7025_v17 = vld [vmem:[%s7763_s18 + $0x18] sm:$0xff]   ;;  %v7027_v21 = vld [vmem:[%s7763_s18 + $0x10] sm:$0xff]  }
  0x14   : > { %6466 = vmatpush3.bf16.xpose.msra.mxu1 %v966_v4  ;;  %6946 = vmatprep.subr.msk.bf16.mxu0 %vm694_vm0, %v7019_v3  ;;  %v7024_v11 = vld [vmem:[%s7763_s18 + $0x60] sm:$0xff]   ;;  %v732_v16 = vsel %vm694_vm0, %v7023_v10, 0  ;;  %v7026_v19 = vld [vmem:[%s7763_s18 + $0x58] sm:$0xff]   ;;  %v729_v20 = vsel %vm694_vm0, %v7025_v17, 0  ;;  %v7028_v23 = vld [vmem:[%s7763_s18 + $0x50] sm:$0xff]   ;;  %v726_v24 = vsel %vm694_vm0, %v7027_v21, 0 }
  0x15   : > { %6954 = vmatprep.subr.msk.bf16.mxu1 %vm694_vm0, %v7020_v5  ;;  %v7033_v13 = vld [vmem:[%s7785_s21] sm:$0xff]   ;;  %v957_v18 = vsel %vm694_vm0, %v7024_v11, 0  ;;  %v954_v22 = vsel %vm694_vm0, %v7026_v19, 0  ;;  %v7029_v25 = vld [vmem:[%s7763_s18 + $0x8] sm:$0xff]   ;;  %v951_v26 = vsel %vm694_vm0, %v7028_v23, 0  ;;  %v7037_v33 = vld [vmem:[%s7763_s18 + $0xb8] sm:$0xff]  }
  0x16   : > { %v7034_v15 = vld [vmem:[%s7785_s21 + $0x40] sm:$0xff]   ;;  %6449 = vmatprep.mubr.msk.bf16.mxu0 %vm694_vm0, %v7033_v13  ;;  %v7030_v27 = vld [vmem:[%s7763_s18 + $0x48] sm:$0xff]   ;;  %v723_v28 = vsel %vm694_vm0, %v7029_v25, 0  ;;  %v7038_v35 = vld [vmem:[%s7763_s18 + $0xf8] sm:$0xff]   ;;  %v1191_v39 = vsel %vm694_vm0, %v7037_v33, 0 }
  0x17   : > { %6481 = vmatprep.mubr.msk.bf16.mxu1 %vm694_vm0, %v7034_v15  ;;  %v7031_v29 = vld [vmem:[%s7763_s18] sm:$0xff]   ;;  %v948_v30 = vsel %vm694_vm0, %v7030_v27, 0  ;;  %v7035_v36 = vld [vmem:[%s7785_s21 + $0x8] sm:$0xff]   ;;  %v7039_v38 = vld [vmem:[%s7763_s18 + $0xb0] sm:$0xff]   ;;  %v1416_v41 = vsel %vm694_vm0, %v7038_v35, 0 }
  0x18   : > { %v7032_v31 = vld [vmem:[%s7763_s18 + $0x40] sm:$0xff]   ;;  %v720_v32 = vsel %vm694_vm0, %v7031_v29, 0  ;;  %v7036_v37 = vld [vmem:[%s7785_s21 + $0x48] sm:$0xff]   ;;  %v7040_v40 = vld [vmem:[%s7763_s18 + $0xf0] sm:$0xff]   ;;  %v1188_v47 = vsel %vm694_vm0, %v7039_v38, 0 }
  0x19   : > { %v945_v34 = vsel %vm694_vm0, %v7032_v31, 0  ;;  %v7041_v42 = vld [vmem:[%s7785_s21 + $0x50] sm:$0xff]   ;;  %v7042_v44 = vld [vmem:[%s7785_s21 + $0x58] sm:$0xff]   ;;  %v7045_v46 = vld [vmem:[%s7763_s18 + $0xa8] sm:$0xff]   ;;  %v1413_v49 = vsel %vm694_vm0, %v7040_v40, 0 }
  0x1a   : > { %v7043_v43 = vld [vmem:[%s7785_s21 + $0x10] sm:$0xff]   ;;  %v7044_v45 = vld [vmem:[%s7785_s21 + $0x18] sm:$0xff]   ;;  %v7046_v48 = vld [vmem:[%s7763_s18 + $0xe8] sm:$0xff]   ;;  %v1185_v55 = vsel %vm694_vm0, %v7045_v46, 0 }
  0x1b   : > { %6436 = vmatpush3.bf16.xpose.msra.mxu0 %v738_v6  ;;  %v7049_v50 = vld [vmem:[%s7785_s21 + $0x20] sm:$0xff]   ;;  %v7050_v53 = vld [vmem:[%s7785_s21 + $0x28] sm:$0xff]   ;;  %v1410_v57 = vsel %vm694_vm0, %v7046_v48, 0  ;;  %v7057_v58 = vld [vmem:[%s7785_s21 + $0x30] sm:$0xff]  }
  0x1c   : > { %6468 = vmatpush3.bf16.xpose.msra.mxu1 %v963_v8  ;;  %6947 = vmatprep.subr.msk.bf16.mxu0 %vm694_vm0, %v7021_v7  ;;  %v7051_v51 = vld [vmem:[%s7785_s21 + $0x60] sm:$0xff]   ;;  %v7052_v54 = vld [vmem:[%s7785_s21 + $0x68] sm:$0xff]   ;;  %v7059_v59 = vld [vmem:[%s7785_s21 + $0x70] sm:$0xff]  }
  0x1d   : > { %6955 = vmatprep.subr.msk.bf16.mxu1 %vm694_vm0, %v7022_v9  ;;  %v7047_v52 = vld [vmem:[%s7763_s18 + $0xa0] sm:$0xff]   ;;  %v7053_v60 = vld [vmem:[%s7763_s18 + $0x98] sm:$0xff]   ;;  %v7055_v4 = vld [vmem:[%s7763_s18 + $0x90] sm:$0xff]  }
  0x1e   : > { %v7048_v56 = vld [vmem:[%s7763_s18 + $0xe0] sm:$0xff]   ;;  %v7058_v61 = vld [vmem:[%s7785_s21 + $0x38] sm:$0xff]   ;;  %v1182_v63 = vsel %vm694_vm0, %v7047_v52, 0  ;;  %v7056_v5 = vld [vmem:[%s7763_s18 + $0xd0] sm:$0xff]   ;;  %v1179_v8 = vsel %vm694_vm0, %v7053_v60, 0 }
  0x1f   : > { %v7060_v62 = vld [vmem:[%s7785_s21 + $0x78] sm:$0xff]   ;;  %v1407_v1 = vsel %vm694_vm0, %v7048_v56, 0  ;;  %v7065_v2 = vld [vmem:[%s7785_s21 + $0x80] sm:$0xff]   ;;  %v7061_v6 = vld [vmem:[%s7763_s18 + $0x88] sm:$0xff]  }
  0x20   : > { %v7054_v0 = vld [vmem:[%s7763_s18 + $0xd8] sm:$0xff]   ;;  %v7066_v3 = vld [vmem:[%s7785_s21 + $0xc0] sm:$0xff]   ;;  %v7062_v7 = vld [vmem:[%s7763_s18 + $0xc8] sm:$0xff]  }
  0x21   : > { %v1404_v9 = vsel %vm694_vm0, %v7054_v0, 0  ;;  %v1398_v13 = vsel %vm694_vm0, %v7062_v7, 0  ;;  %v7064_v15 = vld [vmem:[%s7763_s18 + $0xc0] sm:$0xff]  }
  0x23   : > { %6438 = vmatpush3.bf16.xpose.msra.mxu0 %v735_v12  ;;  %v1173_v12 = vsel %vm694_vm0, %v7061_v6, 0 }
  0x24   : > { %6470 = vmatpush3.bf16.xpose.msra.mxu1 %v960_v14  ;;  %6948 = vmatprep.subr.msk.bf16.mxu0 %vm694_vm0, %v7023_v10  ;;  %v1176_v10 = vsel %vm694_vm0, %v7055_v4, 0  ;;  %v7063_v14 = vld [vmem:[%s7763_s18 + $0x80] sm:$0xff]  }
  0x25   : > { %6956 = vmatprep.subr.msk.bf16.mxu1 %vm694_vm0, %v7024_v11  ;;  %v1401_v11 = vsel %vm694_vm0, %v7056_v5, 0 }
  0x2b   : > { %6440 = vmatpush3.bf16.xpose.msra.mxu0 %v732_v16  ;;  %v1170_v16 = vsel %vm694_vm0, %v7063_v14, 0 }
  0x2c   : > { %6472 = vmatpush3.bf16.xpose.msra.mxu1 %v957_v18  ;;  %6949 = vmatprep.subr.msk.bf16.mxu0 %vm694_vm0, %v7025_v17  ;;  %v7069_v17 = vld [vmem:[%s7763_s18 + $0x138] sm:$0xff]   ;;  %v1395_v18 = vsel %vm694_vm0, %v7064_v15, 0 }
  0x2d   : > { %6957 = vmatprep.subr.msk.bf16.mxu1 %vm694_vm0, %v7026_v19  ;;  %v7070_v19 = vld [vmem:[%s7763_s18 + $0x178] sm:$0xff]  }
  0x33   : > { %6442 = vmatpush3.bf16.xpose.msra.mxu0 %v729_v20  ;;  %v7067_v20 = vld [vmem:[%s7785_s21 + $0x88] sm:$0xff]  }
  0x34   : > { %6474 = vmatpush3.bf16.xpose.msra.mxu1 %v954_v22  ;;  %6950 = vmatprep.subr.msk.bf16.mxu0 %vm694_vm0, %v7027_v21  ;;  %v7068_v21 = vld [vmem:[%s7785_s21 + $0xc8] sm:$0xff]   ;;  %v1641_v22 = vsel %vm694_vm0, %v7069_v17, 0 }
  0x35   : > { %6958 = vmatprep.subr.msk.bf16.mxu1 %vm694_vm0, %v7028_v23  ;;  %v7071_v23 = vld [vmem:[%s7763_s18 + $0x130] sm:$0xff]  }
  0x3b   : > { %6444 = vmatpush3.bf16.xpose.msra.mxu0 %v726_v24  ;;  %v1866_v24 = vsel %vm694_vm0, %v7070_v19, 0 }
  0x3c   : > { %6476 = vmatpush3.bf16.xpose.msra.mxu1 %v951_v26  ;;  %6951 = vmatprep.subr.msk.bf16.mxu0 %vm694_vm0, %v7029_v25  ;;  %v7072_v25 = vld [vmem:[%s7763_s18 + $0x170] sm:$0xff]  }
  0x3d   : > { %6959 = vmatprep.subr.msk.bf16.mxu1 %vm694_vm0, %v7030_v27  ;;  %v7073_v26 = vld [vmem:[%s7785_s21 + $0x90] sm:$0xff]  }
  0x3e   : > { %v7075_v27 = vld [vmem:[%s7785_s21 + $0xd0] sm:$0xff]  }
  0x43   : > { %6446 = vmatpush3.bf16.xpose.msra.mxu0 %v723_v28  ;;  %v7074_v28 = vld [vmem:[%s7785_s21 + $0x98] sm:$0xff]  }
  0x44   : > { %6478 = vmatpush3.bf16.xpose.msra.mxu1 %v948_v30  ;;  %6952 = vmatprep.subr.msk.bf16.mxu0 %vm694_vm0, %v7031_v29  ;;  %v7076_v29 = vld [vmem:[%s7785_s21 + $0xd8] sm:$0xff]   ;;  %v1638_v30 = vsel %vm694_vm0, %v7071_v23, 0 }
  0x45   : > { %6960 = vmatprep.subr.msk.bf16.mxu1 %vm694_vm0, %v7032_v31  ;;  %v7077_v31 = vld [vmem:[%s7763_s18 + $0x128] sm:$0xff]  }
  0x4b   : > { %6448 = vmatpush3.bf16.xpose.msra.mxu0 %v720_v32  ;;  %v1863_v32 = vsel %vm694_vm0, %v7072_v25, 0 }
  0x4c   : > { %6480 = vmatpush3.bf16.xpose.msra.mxu1 %v945_v34  ;;  %6961 = vmatprep.subr.msk.bf16.mxu0 %vm694_vm0, %v7037_v33  ;;  %v7078_v33 = vld [vmem:[%s7763_s18 + $0x168] sm:$0xff]   ;;  %v7081_v34 = vld [vmem:[%s7785_s21 + $0xa0] sm:$0xff]  }
  0x4d   : > { %6969 = vmatprep.subr.msk.bf16.mxu1 %vm694_vm0, %v7038_v35  ;;  %v7083_v35 = vld [vmem:[%s7785_s21 + $0xe0] sm:$0xff]  }
  0x52   : > { %6450 = vmatmul.mubr.msk.bf16.vlgmr.msra.gmra.mxu0 %vm694_vm0, %v7035_v36  ;;  %v7082_v36 = vld [vmem:[%s7785_s21 + $0xa8] sm:$0xff]  }
  0x53   : > { %6482 = vmatmul.mubr.msk.bf16.vlgmr.msra.gmra.mxu1 %vm694_vm0, %v7036_v37  ;;  %6498 = vmatpush3.bf16.xpose.msra.mxu0 %v1191_v39  ;;  %v7084_v37 = vld [vmem:[%s7785_s21 + $0xe8] sm:$0xff]   ;;  %v7079_v39 = vld [vmem:[%s7763_s18 + $0x120] sm:$0xff]  }
  0x54   : > { %6530 = vmatpush3.bf16.xpose.msra.mxu1 %v1416_v41  ;;  %6962 = vmatprep.subr.msk.bf16.mxu0 %vm694_vm0, %v7039_v38  ;;  %v1635_v38 = vsel %vm694_vm0, %v7077_v31, 0  ;;  %v7080_v41 = vld [vmem:[%s7763_s18 + $0x160] sm:$0xff]  }
  0x55   : > { %6970 = vmatprep.subr.msk.bf16.mxu1 %vm694_vm0, %v7040_v40  ;;  %6485 = vmatprep.mubr.msk.bf16.mxu1 %vm694_vm0, %v7041_v42  ;;  %v1860_v40 = vsel %vm694_vm0, %v7078_v33, 0  ;;  %v7089_v42 = vld [vmem:[%s7785_s21 + $0xb0] sm:$0xff]  }
  0x56   : > { %6453 = vmatprep.mubr.msk.bf16.mxu0 %vm694_vm0, %v7043_v43  ;;  %v7091_v43 = vld [vmem:[%s7785_s21 + $0xf0] sm:$0xff]  }
  0x5a   : > { %6454 = vmatmul.mubr.msk.bf16.gmra.mxu0 %vm694_vm0, %v7044_v45  ;;  %v7092_v45 = vld [vmem:[%s7785_s21 + $0xf8] sm:$0xff]  }
  0x5b   : > { %6500 = vmatpush3.bf16.xpose.msra.mxu0 %v1188_v47  ;;  %6486 = vmatmul.mubr.msk.bf16.gmra.mxu1 %vm694_vm0, %v7042_v44  ;;  %v7090_v44 = vld [vmem:[%s7785_s21 + $0xb8] sm:$0xff]  }
  0x5c   : > { %6532 = vmatpush3.bf16.xpose.msra.mxu1 %v1413_v49  ;;  %6963 = vmatprep.subr.msk.bf16.mxu0 %vm694_vm0, %v7045_v46  ;;  %v1632_v46 = vsel %vm694_vm0, %v7079_v39, 0  ;;  %v7085_v47 = vld [vmem:[%s7763_s18 + $0x118] sm:$0xff]  }
  0x5d   : > { %6971 = vmatprep.subr.msk.bf16.mxu1 %vm694_vm0, %v7046_v48  ;;  %6457 = vmatprep.mubr.msk.bf16.mxu0 %vm694_vm0, %v7049_v50  ;;  %v1857_v48 = vsel %vm694_vm0, %v7080_v41, 0  ;;  %v7086_v49 = vld [vmem:[%s7763_s18 + $0x158] sm:$0xff]   ;;  %v7097_v50 = vld [vmem:[%s7785_s21 + $0x100] sm:$0xff]  }
  0x5e   : > { %6489 = vmatprep.mubr.msk.bf16.mxu1 %vm694_vm0, %v7051_v51  ;;  %v7098_v51 = vld [vmem:[%s7785_s21 + $0x140] sm:$0xff]  }
  0x62   : > { %6458 = vmatmul.mubr.msk.bf16.gmra.mxu0 %vm694_vm0, %v7050_v53  ;;  %v7087_v53 = vld [vmem:[%s7763_s18 + $0x110] sm:$0xff]  }
  0x63   : > { %6502 = vmatpush3.bf16.xpose.msra.mxu0 %v1185_v55  ;;  %6490 = vmatmul.mubr.msk.bf16.gmra.mxu1 %vm694_vm0, %v7052_v54  ;;  %v1854_v54 = vsel %vm694_vm0, %v7086_v49, 0  ;;  %v7088_v55 = vld [vmem:[%s7763_s18 + $0x150] sm:$0xff]  }
  0x64   : > { %6534 = vmatpush3.bf16.xpose.msra.mxu1 %v1410_v57  ;;  %6964 = vmatprep.subr.msk.bf16.mxu0 %vm694_vm0, %v7047_v52  ;;  %v1629_v52 = vsel %vm694_vm0, %v7085_v47, 0  ;;  %v7093_v57 = vld [vmem:[%s7763_s18 + $0x108] sm:$0xff]  }
  0x65   : > { %6972 = vmatprep.subr.msk.bf16.mxu1 %vm694_vm0, %v7048_v56  ;;  %6461 = vmatprep.mubr.msk.bf16.mxu0 %vm694_vm0, %v7057_v58  ;;  %v1626_v56 = vsel %vm694_vm0, %v7087_v53, 0  ;;  %v1851_v58 = vsel %vm694_vm0, %v7088_v55, 0 }
  0x66   : > { %6493 = vmatprep.mubr.msk.bf16.mxu1 %vm694_vm0, %v7059_v59  ;;  %v7094_v59 = vld [vmem:[%s7763_s18 + $0x148] sm:$0xff]  }
  0x6a   : > { %6462 = vmatmul.mubr.msk.bf16.gmra.mxu0 %vm694_vm0, %v7058_v61  ;;  %v7095_v61 = vld [vmem:[%s7763_s18 + $0x100] sm:$0xff]  }
  0x6b   : > { %6504 = vmatpush3.bf16.xpose.msra.mxu0 %v1182_v63  ;;  %6494 = vmatmul.mubr.msk.bf16.gmra.mxu1 %vm694_vm0, %v7060_v62  ;;  %v1848_v62 = vsel %vm694_vm0, %v7094_v59, 0  ;;  %v7096_v63 = vld [vmem:[%s7763_s18 + $0x140] sm:$0xff]  }
  0x6c   : > { %6536 = vmatpush3.bf16.xpose.msra.mxu1 %v1407_v1  ;;  %6965 = vmatprep.subr.msk.bf16.mxu0 %vm694_vm0, %v7053_v60  ;;  %v1623_v60 = vsel %vm694_vm0, %v7093_v57, 0  ;;  %v7113_v1 = vld [vmem:[%s7763_s18 + $0x1b8] sm:$0xff]  }
  0x6d   : > { %6973 = vmatprep.subr.msk.bf16.mxu1 %vm694_vm0, %v7054_v0  ;;  %6513 = vmatprep.mubr.msk.bf16.mxu0 %vm694_vm0, %v7065_v2  ;;  %v1620_v0 = vsel %vm694_vm0, %v7095_v61, 0  ;;  %v1845_v2 = vsel %vm694_vm0, %v7096_v63, 0 }
  0x6e   : > { %6545 = vmatprep.mubr.msk.bf16.mxu1 %vm694_vm0, %v7066_v3  ;;  %v7114_v3 = vld [vmem:[%s7763_s18 + $0x1f8] sm:$0xff]  }
  0x73   : > { %6506 = vmatpush3.bf16.xpose.msra.mxu0 %v1179_v8  ;;  %v2091_v8 = vsel %vm694_vm0, %v7113_v1, 0 }
  0x74   : > { %6538 = vmatpush3.bf16.xpose.msra.mxu1 %v1404_v9  ;;  %6966 = vmatprep.subr.msk.bf16.mxu0 %vm694_vm0, %v7055_v4  ;;  %v7099_v4 = vld [vmem:[%s7785_s21 + $0x108] sm:$0xff]   ;;  %v7115_v9 = vld [vmem:[%s7763_s18 + $0x1b0] sm:$0xff]  }
  0x75   : > { %6974 = vmatprep.subr.msk.bf16.mxu1 %vm694_vm0, %v7056_v5  ;;  %v7100_v5 = vld [vmem:[%s7785_s21 + $0x148] sm:$0xff]  }
  0x7b   : > { %6508 = vmatpush3.bf16.xpose.msra.mxu0 %v1176_v10  ;;  %v2316_v10 = vsel %vm694_vm0, %v7114_v3, 0 }
  0x7c   : > { %6540 = vmatpush3.bf16.xpose.msra.mxu1 %v1401_v11  ;;  %6967 = vmatprep.subr.msk.bf16.mxu0 %vm694_vm0, %v7061_v6  ;;  %v7101_v6 = vld [vmem:[%s7785_s21 + $0x110] sm:$0xff]  }
  0x7d   : > { %6975 = vmatprep.subr.msk.bf16.mxu1 %vm694_vm0, %v7062_v7  ;;  %v7103_v7 = vld [vmem:[%s7785_s21 + $0x150] sm:$0xff]  }
  0x7e   : > { %v7116_v11 = vld [vmem:[%s7763_s18 + $0x1f0] sm:$0xff]  }
  0x83   : > { %6510 = vmatpush3.bf16.xpose.msra.mxu0 %v1173_v12  ;;  %v7102_v12 = vld [vmem:[%s7785_s21 + $0x118] sm:$0xff]  }
  0x84   : > { %6542 = vmatpush3.bf16.xpose.msra.mxu1 %v1398_v13  ;;  %6968 = vmatprep.subr.msk.bf16.mxu0 %vm694_vm0, %v7063_v14  ;;  %v7104_v13 = vld [vmem:[%s7785_s21 + $0x158] sm:$0xff]   ;;  %v7105_v14 = vld [vmem:[%s7785_s21 + $0x120] sm:$0xff]  }
  0x85   : > { %6976 = vmatprep.subr.msk.bf16.mxu1 %vm694_vm0, %v7064_v15  ;;  %v7107_v15 = vld [vmem:[%s7785_s21 + $0x160] sm:$0xff]  }
  0x8b   : > { %6512 = vmatpush3.bf16.xpose.msra.mxu0 %v1170_v16  ;;  %v2088_v16 = vsel %vm694_vm0, %v7115_v9, 0 }
  0x8c   : > { %6544 = vmatpush3.bf16.xpose.msra.mxu1 %v1395_v18  ;;  %6977 = vmatprep.subr.msk.bf16.mxu0 %vm694_vm0, %v7069_v17  ;;  %v7117_v17 = vld [vmem:[%s7763_s18 + $0x1a8] sm:$0xff]   ;;  %v2313_v18 = vsel %vm694_vm0, %v7116_v11, 0 }
  0x8d   : > { %6985 = vmatprep.subr.msk.bf16.mxu1 %vm694_vm0, %v7070_v19  ;;  %v7118_v19 = vld [vmem:[%s7763_s18 + $0x1e8] sm:$0xff]  }
  0x92   : > { %6514 = vmatmul.mubr.msk.bf16.vlgmr.msra.gmra.mxu0 %vm694_vm0, %v7067_v20  ;;  %v7106_v20 = vld [vmem:[%s7785_s21 + $0x128] sm:$0xff]  }
  0x93   : > { %6546 = vmatmul.mubr.msk.bf16.vlgmr.msra.gmra.mxu1 %vm694_vm0, %v7068_v21  ;;  %6562 = vmatpush3.bf16.xpose.msra.mxu0 %v1641_v22  ;;  %v7108_v21 = vld [vmem:[%s7785_s21 + $0x168] sm:$0xff]   ;;  %v7109_v22 = vld [vmem:[%s7785_s21 + $0x130] sm:$0xff]  }
  0x94   : > { %6594 = vmatpush3.bf16.xpose.msra.mxu1 %v1866_v24  ;;  %6978 = vmatprep.subr.msk.bf16.mxu0 %vm694_vm0, %v7071_v23  ;;  %v7111_v23 = vld [vmem:[%s7785_s21 + $0x170] sm:$0xff]   ;;  %v2085_v24 = vsel %vm694_vm0, %v7117_v17, 0 }
  0x95   : > { %6986 = vmatprep.subr.msk.bf16.mxu1 %vm694_vm0, %v7072_v25  ;;  %6517 = vmatprep.mubr.msk.bf16.mxu0 %vm694_vm0, %v7073_v26  ;;  %v7119_v25 = vld [vmem:[%s7763_s18 + $0x1a0] sm:$0xff]   ;;  %v2310_v26 = vsel %vm694_vm0, %v7118_v19, 0 }
  0x96   : > { %6549 = vmatprep.mubr.msk.bf16.mxu1 %vm694_vm0, %v7075_v27  ;;  %v7120_v27 = vld [vmem:[%s7763_s18 + $0x1e0] sm:$0xff]  }
  0x9a   : > { %6518 = vmatmul.mubr.msk.bf16.gmra.mxu0 %vm694_vm0, %v7074_v28  ;;  %v7110_v28 = vld [vmem:[%s7785_s21 + $0x138] sm:$0xff]  }
  0x9b   : > { %6564 = vmatpush3.bf16.xpose.msra.mxu0 %v1638_v30  ;;  %6550 = vmatmul.mubr.msk.bf16.gmra.mxu1 %vm694_vm0, %v7076_v29  ;;  %v7112_v29 = vld [vmem:[%s7785_s21 + $0x178] sm:$0xff]   ;;  %v7129_v30 = vld [vmem:[%s7785_s21 + $0x180] sm:$0xff]  }
  0x9c   : > { %6596 = vmatpush3.bf16.xpose.msra.mxu1 %v1863_v32  ;;  %6979 = vmatprep.subr.msk.bf16.mxu0 %vm694_vm0, %v7077_v31  ;;  %v7131_v31 = vld [vmem:[%s7785_s21 + $0x1c0] sm:$0xff]   ;;  %v2082_v32 = vsel %vm694_vm0, %v7119_v25, 0 }
  0x9d   : > { %6987 = vmatprep.subr.msk.bf16.mxu1 %vm694_vm0, %v7078_v33  ;;  %6521 = vmatprep.mubr.msk.bf16.mxu0 %vm694_vm0, %v7081_v34  ;;  %v7121_v33 = vld [vmem:[%s7763_s18 + $0x198] sm:$0xff]   ;;  %v2307_v34 = vsel %vm694_vm0, %v7120_v27, 0 }
  0x9e   : > { %6553 = vmatprep.mubr.msk.bf16.mxu1 %vm694_vm0, %v7083_v35  ;;  %v7122_v35 = vld [vmem:[%s7763_s18 + $0x1d8] sm:$0xff]  }
  0xa2   : > { %6522 = vmatmul.mubr.msk.bf16.gmra.mxu0 %vm694_vm0, %v7082_v36  ;;  %v2079_v36 = vsel %vm694_vm0, %v7121_v33, 0 }
  0xa3   : > { %6566 = vmatpush3.bf16.xpose.msra.mxu0 %v1635_v38  ;;  %6554 = vmatmul.mubr.msk.bf16.gmra.mxu1 %vm694_vm0, %v7084_v37  ;;  %v7123_v37 = vld [vmem:[%s7763_s18 + $0x190] sm:$0xff]   ;;  %v2304_v38 = vsel %vm694_vm0, %v7122_v35, 0 }
  0xa4   : > { %6598 = vmatpush3.bf16.xpose.msra.mxu1 %v1860_v40  ;;  %6980 = vmatprep.subr.msk.bf16.mxu0 %vm694_vm0, %v7079_v39  ;;  %v7124_v39 = vld [vmem:[%s7763_s18 + $0x1d0] sm:$0xff]   ;;  %v2076_v40 = vsel %vm694_vm0, %v7123_v37, 0 }
  0xa5   : > { %6988 = vmatprep.subr.msk.bf16.mxu1 %vm694_vm0, %v7080_v41  ;;  %6525 = vmatprep.mubr.msk.bf16.mxu0 %vm694_vm0, %v7089_v42  ;;  %v7125_v41 = vld [vmem:[%s7763_s18 + $0x188] sm:$0xff]   ;;  %v2301_v42 = vsel %vm694_vm0, %v7124_v39, 0 }
  0xa6   : > { %6557 = vmatprep.mubr.msk.bf16.mxu1 %vm694_vm0, %v7091_v43  ;;  %v7126_v43 = vld [vmem:[%s7763_s18 + $0x1c8] sm:$0xff]  }
  0xaa   : > { %6526 = vmatmul.mubr.msk.bf16.gmra.mxu0 %vm694_vm0, %v7090_v44  ;;  %v2073_v44 = vsel %vm694_vm0, %v7125_v41, 0 }
  0xab   : > { %6568 = vmatpush3.bf16.xpose.msra.mxu0 %v1632_v46  ;;  %6558 = vmatmul.mubr.msk.bf16.gmra.mxu1 %vm694_vm0, %v7092_v45  ;;  %v7127_v45 = vld [vmem:[%s7763_s18 + $0x180] sm:$0xff]   ;;  %v2298_v46 = vsel %vm694_vm0, %v7126_v43, 0 }
  0xac   : > { %6600 = vmatpush3.bf16.xpose.msra.mxu1 %v1857_v48  ;;  %6981 = vmatprep.subr.msk.bf16.mxu0 %vm694_vm0, %v7085_v47  ;;  %v7128_v47 = vld [vmem:[%s7763_s18 + $0x1c0] sm:$0xff]   ;;  %v2070_v48 = vsel %vm694_vm0, %v7127_v45, 0 }
  0xad   : > { %6989 = vmatprep.subr.msk.bf16.mxu1 %vm694_vm0, %v7086_v49  ;;  %6577 = vmatprep.mubr.msk.bf16.mxu0 %vm694_vm0, %v7097_v50  ;;  %v2295_v49 = vsel %vm694_vm0, %v7128_v47, 0  ;;  %v7130_v50 = vld [vmem:[%s7785_s21 + $0x188] sm:$0xff]  }
  0xae   : > { %6609 = vmatprep.mubr.msk.bf16.mxu1 %vm694_vm0, %v7098_v51  ;;  %v7132_v51 = vld [vmem:[%s7785_s21 + $0x1c8] sm:$0xff]  }
  0xb3   : > { %6570 = vmatpush3.bf16.xpose.msra.mxu0 %v1629_v52  ;;  %v7133_v52 = vld [vmem:[%s7785_s21 + $0x190] sm:$0xff]  }
  0xb4   : > { %6602 = vmatpush3.bf16.xpose.msra.mxu1 %v1854_v54  ;;  %6982 = vmatprep.subr.msk.bf16.mxu0 %vm694_vm0, %v7087_v53  ;;  %v7135_v53 = vld [vmem:[%s7785_s21 + $0x1d0] sm:$0xff]  }
  0xb5   : > { %6990 = vmatprep.subr.msk.bf16.mxu1 %vm694_vm0, %v7088_v55 }
  0xbb   : > { %6572 = vmatpush3.bf16.xpose.msra.mxu0 %v1626_v56 }
  0xbc   : > { %6604 = vmatpush3.bf16.xpose.msra.mxu1 %v1851_v58  ;;  %6983 = vmatprep.subr.msk.bf16.mxu0 %vm694_vm0, %v7093_v57 }
  0xbd   : > { %6991 = vmatprep.subr.msk.bf16.mxu1 %vm694_vm0, %v7094_v59 }
  0xc3   : > { %6574 = vmatpush3.bf16.xpose.msra.mxu0 %v1623_v60 }
  0xc4   : > { %6606 = vmatpush3.bf16.xpose.msra.mxu1 %v1848_v62  ;;  %6984 = vmatprep.subr.msk.bf16.mxu0 %vm694_vm0, %v7095_v61 }
  0xc5   : > { %6992 = vmatprep.subr.msk.bf16.mxu1 %vm694_vm0, %v7096_v63  ;;  %v7134_v63 = vld [vmem:[%s7785_s21 + $0x198] sm:$0xff]  }
  0xcb   : > { %6576 = vmatpush3.bf16.xpose.msra.mxu0 %v1620_v0 }
  0xcc   : > { %6608 = vmatpush3.bf16.xpose.msra.mxu1 %v1845_v2  ;;  %6993 = vmatprep.subr.msk.bf16.mxu0 %vm694_vm0, %v7113_v1  ;;  %v7136_v1 = vld [vmem:[%s7785_s21 + $0x1d8] sm:$0xff]   ;;  %v7137_v2 = vld [vmem:[%s7785_s21 + $0x1a0] sm:$0xff]  }
  0xcd   : > { %7001 = vmatprep.subr.msk.bf16.mxu1 %vm694_vm0, %v7114_v3 }
  0xd2   : > { %6578 = vmatmul.mubr.msk.bf16.vlgmr.msra.gmra.mxu0 %vm694_vm0, %v7099_v4  ;;  %v7139_v4 = vld [vmem:[%s7785_s21 + $0x1e0] sm:$0xff]  }
  0xd3   : > { %6610 = vmatmul.mubr.msk.bf16.vlgmr.msra.gmra.mxu1 %vm694_vm0, %v7100_v5  ;;  %6581 = vmatprep.mubr.msk.bf16.mxu0 %vm694_vm0, %v7101_v6 }
  0xd4   : > { %6613 = vmatprep.mubr.msk.bf16.mxu1 %vm694_vm0, %v7103_v7  ;;  %6626 = vmatpush3.bf16.xpose.msra.mxu0 %v2091_v8 }
  0xd5   : > { %6658 = vmatpush3.bf16.xpose.msra.mxu1 %v2316_v10  ;;  %6994 = vmatprep.subr.msk.bf16.mxu0 %vm694_vm0, %v7115_v9 }
  0xd6   : > { %7002 = vmatprep.subr.msk.bf16.mxu1 %vm694_vm0, %v7116_v11 }
  0xda   : > { %6582 = vmatmul.mubr.msk.bf16.gmra.mxu0 %vm694_vm0, %v7102_v12  ;;  %v7138_v12 = vld [vmem:[%s7785_s21 + $0x1a8] sm:$0xff]  }
  0xdb   : > { %6614 = vmatmul.mubr.msk.bf16.gmra.mxu1 %vm694_vm0, %v7104_v13  ;;  %6585 = vmatprep.mubr.msk.bf16.mxu0 %vm694_vm0, %v7105_v14  ;;  %v7140_v14 = vld [vmem:[%s7785_s21 + $0x1e8] sm:$0xff]  }
  0xdc   : > { %6617 = vmatprep.mubr.msk.bf16.mxu1 %vm694_vm0, %v7107_v15  ;;  %6628 = vmatpush3.bf16.xpose.msra.mxu0 %v2088_v16  ;;  %v7141_v15 = vld [vmem:[%s7785_s21 + $0x1b0] sm:$0xff]  }
  0xdd   : > { %6660 = vmatpush3.bf16.xpose.msra.mxu1 %v2313_v18  ;;  %6995 = vmatprep.subr.msk.bf16.mxu0 %vm694_vm0, %v7117_v17  ;;  %v7143_v18 = vld [vmem:[%s7785_s21 + $0x1f0] sm:$0xff]  }
  0xde   : > { %7003 = vmatprep.subr.msk.bf16.mxu1 %vm694_vm0, %v7118_v19 }
  0xe2   : > { %6586 = vmatmul.mubr.msk.bf16.gmra.mxu0 %vm694_vm0, %v7106_v20 }
  0xe3   : > { %6618 = vmatmul.mubr.msk.bf16.gmra.mxu1 %vm694_vm0, %v7108_v21  ;;  %6589 = vmatprep.mubr.msk.bf16.mxu0 %vm694_vm0, %v7109_v22 }
  0xe4   : > { %6621 = vmatprep.mubr.msk.bf16.mxu1 %vm694_vm0, %v7111_v23  ;;  %6630 = vmatpush3.bf16.xpose.msra.mxu0 %v2085_v24  ;;  %v7142_v24 = vld [vmem:[%s7785_s21 + $0x1b8] sm:$0xff]  }
  0xe5   : > { %6662 = vmatpush3.bf16.xpose.msra.mxu1 %v2310_v26  ;;  %6996 = vmatprep.subr.msk.bf16.mxu0 %vm694_vm0, %v7119_v25  ;;  %v7144_v26 = vld [vmem:[%s7785_s21 + $0x1f8] sm:$0xff]  }
  0xe6   : > { %7004 = vmatprep.subr.msk.bf16.mxu1 %vm694_vm0, %v7120_v27 }
  0xea   : > { %6590 = vmatmul.mubr.msk.bf16.gmra.mxu0 %vm694_vm0, %v7110_v28 }
  0xeb   : > { %6622 = vmatmul.mubr.msk.bf16.gmra.mxu1 %vm694_vm0, %v7112_v29  ;;  %6641 = vmatprep.mubr.msk.bf16.mxu0 %vm694_vm0, %v7129_v30 }
  0xec   : > { %6632 = vmatpush3.bf16.xpose.msra.mxu0 %v2082_v32  ;;  %6673 = vmatprep.mubr.msk.bf16.mxu1 %vm694_vm0, %v7131_v31 }
  0xed   : > { %6664 = vmatpush3.bf16.xpose.msra.mxu1 %v2307_v34  ;;  %6997 = vmatprep.subr.msk.bf16.mxu0 %vm694_vm0, %v7121_v33 }
  0xee   : > { %7005 = vmatprep.subr.msk.bf16.mxu1 %vm694_vm0, %v7122_v35 }
  0xf4   : > { %6634 = vmatpush3.bf16.xpose.msra.mxu0 %v2079_v36 }
  0xf5   : > { %6666 = vmatpush3.bf16.xpose.msra.mxu1 %v2304_v38  ;;  %6998 = vmatprep.subr.msk.bf16.mxu0 %vm694_vm0, %v7123_v37 }
  0xf6   : > { %7006 = vmatprep.subr.msk.bf16.mxu1 %vm694_vm0, %v7124_v39 }
  0xfc   : > { %6636 = vmatpush3.bf16.xpose.msra.mxu0 %v2076_v40 }
  0xfd   : > { %6668 = vmatpush3.bf16.xpose.msra.mxu1 %v2301_v42  ;;  %6999 = vmatprep.subr.msk.bf16.mxu0 %vm694_vm0, %v7125_v41 }
  0xfe   : > { %7007 = vmatprep.subr.msk.bf16.mxu1 %vm694_vm0, %v7126_v43 }
 0x104   : > { %6638 = vmatpush3.bf16.xpose.msra.mxu0 %v2073_v44 }
 0x105   : > { %6670 = vmatpush3.bf16.xpose.msra.mxu1 %v2298_v46  ;;  %7000 = vmatprep.subr.msk.bf16.mxu0 %vm694_vm0, %v7127_v45 }
 0x106   : > { %7008 = vmatprep.subr.msk.bf16.mxu1 %vm694_vm0, %v7128_v47 }
 0x10c   : > { %6640 = vmatpush3.bf16.xpose.msra.mxu0 %v2070_v48 }
 0x10d   : > { %6672 = vmatpush3.bf16.xpose.msra.mxu1 %v2295_v49 }
 0x112   : > { %v6451_v54 = vpop.f32.mrf.mxu0 }
 0x113   : > { %v8067_v55 = vmul.f32 0.35355338, %v6451_v54  ;;  %v6483_v56 = vpop.f32.mrf.mxu1  ;;  %6642 = vmatmul.mubr.msk.bf16.vlgmr.msra.gmra.mxu0 %vm694_vm0, %v7130_v50 }
 0x114   : > { %v777_v57 = vpop.f32.mrf.mxu0  ;;  %6674 = vmatmul.mubr.msk.bf16.vlgmr.msra.gmra.mxu1 %vm694_vm0, %v7132_v51  ;;  %6645 = vmatprep.mubr.msk.bf16.mxu0 %vm694_vm0, %v7133_v52  ;;  %v8072_v58 = vmul.f32 0.35355338, %v6483_v56 }
 0x115   : > { %v8074_v59 = vmul.f32 0.35355338, %v777_v57  ;;  %v1002_v60 = vpop.f32.mrf.mxu1  ;;  %2547 = vmax.xlane.f32.xlu1 %v8067_v55  ;;  %6677 = vmatprep.mubr.msk.bf16.mxu1 %vm694_vm0, %v7135_v53 }
 0x116   : > { %v6452_v61 = vpop.f32.mrf.mxu0  ;;  %v8086_v7 = vmul.f32 0.35355338, %v1002_v60 }
 0x117   : > { %v6484_v62 = vpop.f32.mrf.mxu1  ;;  %2543 = vmax.xlane.f32.xlu0 %v8074_v59  ;;  %v8096_v11 = vmul.f32 0.35355338, %v6452_v61 }
 0x118   : > { %v780_v0 = vpop.f32.mrf.mxu0  ;;  %v8082_v3 = vmul.f32 0.35355338, %v6484_v62 }
 0x119   : > { %2579 = vmax.xlane.f32.xlu1 %v8072_v58  ;;  %v1005_v5 = vpop.f32.mrf.mxu1  ;;  %v8093_v9 = vmul.f32 0.35355338, %v780_v0 }
 0x11a   : > { %v6455_v6 = vpop.f32.mrf.mxu0  ;;  %v8105_v17 = vmul.f32 0.35355338, %v1005_v5 }
 0x11b   : > { %2581 = vmax.xlane.f32.xlu0 %v8082_v3  ;;  %6646 = vmatmul.mubr.msk.bf16.gmra.mxu0 %vm694_vm0, %v7134_v63  ;;  %v6487_v8 = vpop.f32.mrf.mxu1  ;;  %v8108_v20 = vmul.f32 0.35355338, %v6455_v6 }
 0x11c   : > { %6678 = vmatmul.mubr.msk.bf16.gmra.mxu1 %vm694_vm0, %v7136_v1  ;;  %6649 = vmatprep.mubr.msk.bf16.mxu0 %vm694_vm0, %v7137_v2  ;;  %v793_v10 = vpop.f32.mrf.mxu0  ;;  %v8121_v27 = vmul.f32 0.35355338, %v6487_v8 }
 0x11d   : > { %2575 = vmax.xlane.f32.xlu1 %v8086_v7  ;;  %6681 = vmatprep.mubr.msk.bf16.mxu1 %vm694_vm0, %v7139_v4  ;;  %v1018_v13 = vpop.f32.mrf.mxu1  ;;  %v8129_v32 = vmul.f32 0.35355338, %v793_v10 }
 0x11e   : > { %v8102_v16 = vmul.f32 0.35355338, %v1018_v13  ;;  %v6456_v19 = vpop.f32.mrf.mxu0 }
 0x11f   : > { %2545 = vmax.xlane.f32.xlu0 %v8093_v9  ;;  %v8114_v21 = vmul.f32 0.35355338, %v6456_v19  ;;  %v6488_v22 = vpop.f32.mrf.mxu1 }
 0x120   : > { %v796_v23 = vpop.f32.mrf.mxu0  ;;  %v8124_v29 = vmul.f32 0.35355338, %v6488_v22 }
 0x121   : > { %2549 = vmax.xlane.f32.xlu1 %v8096_v11  ;;  %v1021_v28 = vpop.f32.mrf.mxu1  ;;  %v8133_v33 = vmul.f32 0.35355338, %v796_v23 }
 0x122   : > { %v6459_v25 = vpop.f32.mrf.mxu0  ;;  %v8138_v37 = vmul.f32 0.35355338, %v1021_v28 }
 0x123   : > { %2577 = vmax.xlane.f32.xlu0 %v8105_v17  ;;  %6650 = vmatmul.mubr.msk.bf16.gmra.mxu0 %vm694_vm0, %v7138_v12  ;;  %v6491_v31 = vpop.f32.mrf.mxu1  ;;  %v8141_v39 = vmul.f32 0.35355338, %v6459_v25 }
 0x124   : > { %6682 = vmatmul.mubr.msk.bf16.gmra.mxu1 %vm694_vm0, %v7140_v14  ;;  %6653 = vmatprep.mubr.msk.bf16.mxu0 %vm694_vm0, %v7141_v15  ;;  %v809_v30 = vpop.f32.mrf.mxu0  ;;  %v8147_v43 = vmul.f32 0.35355338, %v6491_v31 }
 0x125   : > { %2583 = vmax.xlane.f32.xlu1 %v8102_v16  ;;  %6685 = vmatprep.mubr.msk.bf16.mxu1 %vm694_vm0, %v7143_v18  ;;  %v1034_v35 = vpop.f32.mrf.mxu1  ;;  %v8153_v48 = vmul.f32 0.35355338, %v809_v30 }
 0x126   : > { %v6460_v34 = vpop.f32.mrf.mxu0  ;;  %v8159_v52 = vmul.f32 0.35355338, %v1034_v35 }
 0x127   : > { %2555 = vmax.xlane.f32.xlu0 %v8108_v20  ;;  %v8135_v36 = vmul.f32 0.35355338, %v6460_v34  ;;  %v6492_v38 = vpop.f32.mrf.mxu1 }
 0x128   : > { %v8143_v40 = vmul.f32 0.35355338, %v6492_v38  ;;  %v812_v41 = vpop.f32.mrf.mxu0 }
 0x129   : > { %2557 = vmax.xlane.f32.xlu1 %v8114_v21  ;;  %v1037_v44 = vpop.f32.mrf.mxu1  ;;  %v8151_v45 = vmul.f32 0.35355338, %v812_v41 }
 0x12a   : > { %v6463_v42 = vpop.f32.mrf.mxu0  ;;  %v8157_v49 = vmul.f32 0.35355338, %v1037_v44 }
 0x12b   : > { %2587 = vmax.xlane.f32.xlu0 %v8121_v27  ;;  %6654 = vmatmul.mubr.msk.bf16.gmra.mxu0 %vm694_vm0, %v7142_v24  ;;  %v6495_v47 = vpop.f32.mrf.mxu1  ;;  %v8165_v56 = vmul.f32 0.35355338, %v6463_v42 }
 0x12c   : > { %6686 = vmatmul.mubr.msk.bf16.gmra.mxu1 %vm694_vm0, %v7144_v26  ;;  %v825_v46 = vpop.f32.mrf.mxu0  ;;  %v8171_v61 = vmul.f32 0.35355338, %v6495_v47 }
 0x12d   : > { %2589 = vmax.xlane.f32.xlu1 %v8124_v29  ;;  %v1050_v51 = vpop.f32.mrf.mxu1  ;;  %v8177_v0 = vmul.f32 0.35355338, %v825_v46 }
 0x12e   : > { %v6464_v50 = vpop.f32.mrf.mxu0  ;;  %v8183_v2 = vmul.f32 0.35355338, %v1050_v51 }
 0x12f   : > { %2551 = vmax.xlane.f32.xlu0 %v8129_v32  ;;  %v8161_v53 = vmul.f32 0.35355338, %v6464_v50  ;;  %v6496_v54 = vpop.f32.mrf.mxu1 }
 0x130   : > { %v8167_v57 = vmul.f32 0.35355338, %v6496_v54  ;;  %v828_v60 = vpop.f32.mrf.mxu0 }
 0x131   : > { %2553 = vmax.xlane.f32.xlu1 %v8133_v33  ;;  %v8175_v62 = vmul.f32 0.35355338, %v828_v60  ;;  %v1053_v63 = vpop.f32.mrf.mxu1 }
 0x132   : > { %v8181_v1 = vmul.f32 0.35355338, %v1053_v63 }
 0x133   : > { %2585 = vmax.xlane.f32.xlu0 %v8138_v37 }
 0x135   : > { %2565 = vmax.xlane.f32.xlu1 %v8135_v36 }
 0x137   : > { %2563 = vmax.xlane.f32.xlu0 %v8141_v39 }
 0x139   : > { %2597 = vmax.xlane.f32.xlu1 %v8143_v40 }
 0x13b   : > { %2595 = vmax.xlane.f32.xlu0 %v8147_v43 }
 0x13d   : > { %2561 = vmax.xlane.f32.xlu1 %v8151_v45 }
 0x13f   : > { %2559 = vmax.xlane.f32.xlu0 %v8153_v48 }
 0x141   : > { %2593 = vmax.xlane.f32.xlu1 %v8157_v49 }
 0x143   : > { %2591 = vmax.xlane.f32.xlu0 %v8159_v52 }
 0x145   : > { %2573 = vmax.xlane.f32.xlu1 %v8161_v53 }
 0x147   : > { %2571 = vmax.xlane.f32.xlu0 %v8165_v56 }
 0x149   : > { %2605 = vmax.xlane.f32.xlu1 %v8167_v57 }
 0x14b   : > { %2603 = vmax.xlane.f32.xlu0 %v8171_v61 }
 0x14d   : > { %2569 = vmax.xlane.f32.xlu1 %v8175_v62 }
 0x14f   : > { %2567 = vmax.xlane.f32.xlu0 %v8177_v0 }
 0x151   : > { %2601 = vmax.xlane.f32.xlu1 %v8181_v1 }
 0x152   : > { %v6515_v4 = vpop.f32.mrf.mxu0 }
 0x153   : > { %v6547_v5 = vpop.f32.mrf.mxu1  ;;  %2599 = vmax.xlane.f32.xlu0 %v8183_v2  ;;  %v8187_v8 = vmul.f32 0.35355338, %v6515_v4 }
 0x154   : > { %v1227_v6 = vpop.f32.mrf.mxu0  ;;  %v8192_v15 = vmul.f32 0.35355338, %v6547_v5 }
 0x155   : > { %10031 = vst [vmem:[#allocation2_spill] sm:$0xff] %v8187_v8  ;;  %v1452_v10 = vpop.f32.mrf.mxu1  ;;  %v8198_v22 = vmul.f32 0.35355338, %v1227_v6 }
 0x156   : > { %v6516_v12 = vpop.f32.mrf.mxu0  ;;  %10033 = vst [vmem:[#allocation4_spill] sm:$0xff] %v8192_v15  ;;  %v8204_v26 = vmul.f32 0.35355338, %v1452_v10 }
 0x157   : > { %v8189_v13 = vmul.f32 0.35355338, %v6516_v12  ;;  %2611 = vmax.xlane.f32.xlu0 %v8187_v8  ;;  %v6548_v14 = vpop.f32.mrf.mxu1  ;;  %10035 = vst [vmem:[#allocation6_spill] sm:$0xff] %v8198_v22 }
 0x158   : > { %v8195_v18 = vmul.f32 0.35355338, %v6548_v14  ;;  %v1230_v19 = vpop.f32.mrf.mxu0  ;;  %10037 = vst [vmem:[#allocation8_spill] sm:$0xff] %v8204_v26 }
 0x159   : > { %10032 = vst [vmem:[#allocation3_spill] sm:$0xff] %v8189_v13  ;;  %2613 = vmax.xlane.f32.xlu1 %v8189_v13  ;;  %v8201_v24 = vmul.f32 0.35355338, %v1230_v19  ;;  %v1455_v25 = vpop.f32.mrf.mxu1 }
 0x15a   : > { %10034 = vst [vmem:[#allocation5_spill] sm:$0xff] %v8195_v18  ;;  %v6519_v23 = vpop.f32.mrf.mxu0  ;;  %v8207_v31 = vmul.f32 0.35355338, %v1455_v25 }
 0x15b   : > { %2643 = vmax.xlane.f32.xlu0 %v8192_v15  ;;  %10036 = vst [vmem:[#allocation7_spill] sm:$0xff] %v8201_v24  ;;  %v6551_v30 = vpop.f32.mrf.mxu1  ;;  %v8210_v34 = vmul.f32 0.35355338, %v6519_v23 }
 0x15c   : > { %v1243_v28 = vpop.f32.mrf.mxu0  ;;  %10038 = vst [vmem:[#allocation9_spill] sm:$0xff] %v8207_v31  ;;  %v8216_v42 = vmul.f32 0.35355338, %v6551_v30 }
 0x15d   : > { %2645 = vmax.xlane.f32.xlu1 %v8195_v18  ;;  %10039 = vst [vmem:[#allocation10_spill] sm:$0xff] %v8210_v34  ;;  %v1468_v38 = vpop.f32.mrf.mxu1  ;;  %v8222_v50 = vmul.f32 0.35355338, %v1243_v28 }
 0x15e   : > { %v6520_v35 = vpop.f32.mrf.mxu0  ;;  %10041 = vst [vmem:[#allocation12_spill] sm:$0xff] %v8216_v42  ;;  %v8228_v63 = vmul.f32 0.35355338, %v1468_v38 }
 0x15f   : > { %2607 = vmax.xlane.f32.xlu0 %v8198_v22  ;;  %v8213_v41 = vmul.f32 0.35355338, %v6520_v35  ;;  %v6552_v44 = vpop.f32.mrf.mxu1  ;;  %10043 = vst [vmem:[#allocation14_spill] sm:$0xff] %v8222_v50 }
 0x160   : > { %v8219_v46 = vmul.f32 0.35355338, %v6552_v44  ;;  %v1246_v47 = vpop.f32.mrf.mxu0  ;;  %10045 = vst [vmem:[#allocation16_spill] sm:$0xff] %v8228_v63 }
 0x161   : > { %2609 = vmax.xlane.f32.xlu1 %v8201_v24  ;;  %10040 = vst [vmem:[#allocation11_spill] sm:$0xff] %v8213_v41  ;;  %v8225_v54 = vmul.f32 0.35355338, %v1246_v47  ;;  %v1471_v60 = vpop.f32.mrf.mxu1 }
 0x162   : > { %10042 = vst [vmem:[#allocation13_spill] sm:$0xff] %v8219_v46  ;;  %v6523_v51 = vpop.f32.mrf.mxu0  ;;  %v8231_v6 = vmul.f32 0.35355338, %v1471_v60 }
 0x163   : > { %2639 = vmax.xlane.f32.xlu0 %v8204_v26  ;;  %10044 = vst [vmem:[#allocation15_spill] sm:$0xff] %v8225_v54  ;;  %v6555_v5 = vpop.f32.mrf.mxu1  ;;  %v8234_v10 = vmul.f32 0.35355338, %v6523_v51 }
 0x164   : > { %v1259_v4 = vpop.f32.mrf.mxu0  ;;  %10046 = vst [vmem:[#allocation17_spill] sm:$0xff] %v8231_v6  ;;  %v8240_v23 = vmul.f32 0.35355338, %v6555_v5 }
 0x165   : > { %2641 = vmax.xlane.f32.xlu1 %v8207_v31  ;;  %10047 = vst [vmem:[#allocation18_spill] sm:$0xff] %v8234_v10  ;;  %v1484_v14 = vpop.f32.mrf.mxu1  ;;  %v8246_v35 = vmul.f32 0.35355338, %v1259_v4 }
 0x166   : > { %v6524_v12 = vpop.f32.mrf.mxu0  ;;  %10049 = vst [vmem:[#allocation20_spill] sm:$0xff] %v8240_v23  ;;  %v8252_v51 = vmul.f32 0.35355338, %v1484_v14 }
 0x167   : > { %2619 = vmax.xlane.f32.xlu0 %v8210_v34  ;;  %v8237_v19 = vmul.f32 0.35355338, %v6524_v12  ;;  %v6556_v25 = vpop.f32.mrf.mxu1  ;;  %10051 = vst [vmem:[#allocation22_spill] sm:$0xff] %v8246_v35 }
 0x168   : > { %v8243_v28 = vmul.f32 0.35355338, %v6556_v25  ;;  %v1262_v30 = vpop.f32.mrf.mxu0  ;;  %10053 = vst [vmem:[#allocation24_spill] sm:$0xff] %v8252_v51 }
 0x169   : > { %2621 = vmax.xlane.f32.xlu1 %v8213_v41  ;;  %10048 = vst [vmem:[#allocation19_spill] sm:$0xff] %v8237_v19  ;;  %v8249_v44 = vmul.f32 0.35355338, %v1262_v30  ;;  %v1487_v47 = vpop.f32.mrf.mxu1 }
 0x16a   : > { %10050 = vst [vmem:[#allocation21_spill] sm:$0xff] %v8243_v28  ;;  %v6527_v38 = vpop.f32.mrf.mxu0  ;;  %v8255_v12 = vmul.f32 0.35355338, %v1487_v47 }
 0x16b   : > { %2651 = vmax.xlane.f32.xlu0 %v8216_v42  ;;  %10052 = vst [vmem:[#allocation23_spill] sm:$0xff] %v8249_v44  ;;  %v6559_v5 = vpop.f32.mrf.mxu1  ;;  %v8258_v4 = vmul.f32 0.35355338, %v6527_v38 }
 0x16c   : > { %v1275_v60 = vpop.f32.mrf.mxu0  ;;  %10054 = vst [vmem:[#allocation25_spill] sm:$0xff] %v8255_v12  ;;  %v8264_v14 = vmul.f32 0.35355338, %v6559_v5 }
 0x16d   : > { %2653 = vmax.xlane.f32.xlu1 %v8219_v46  ;;  %10055 = vst [vmem:[#allocation26_spill] sm:$0xff] %v8258_v4  ;;  %v1500_v30 = vpop.f32.mrf.mxu1  ;;  %v8270_v38 = vmul.f32 0.35355338, %v1275_v60 }
 0x16e   : > { %v6528_v25 = vpop.f32.mrf.mxu0  ;;  %10057 = vst [vmem:[#allocation28_spill] sm:$0xff] %v8264_v14 }
 0x16f   : > { %2615 = vmax.xlane.f32.xlu0 %v8222_v50  ;;  %10059 = vst [vmem:[#allocation30_spill] sm:$0xff] %v8270_v38 }
 0x170   : > { %v1278_v47 = vpop.f32.mrf.mxu0 }
 0x171   : > { %2617 = vmax.xlane.f32.xlu1 %v8225_v54 }
 0x173   : > { %2647 = vmax.xlane.f32.xlu0 %v8228_v63 }
 0x175   : > { %2649 = vmax.xlane.f32.xlu1 %v8231_v6 }
 0x177   : > { %2627 = vmax.xlane.f32.xlu0 %v8234_v10 }
 0x179   : > { %2629 = vmax.xlane.f32.xlu1 %v8237_v19 }
 0x17b   : > { %2659 = vmax.xlane.f32.xlu0 %v8240_v23 }
 0x17d   : > { %2661 = vmax.xlane.f32.xlu1 %v8243_v28  ;;  %v8261_v28 = vmul.f32 0.35355338, %v6528_v25 }
 0x17f   : > { %2623 = vmax.xlane.f32.xlu0 %v8246_v35  ;;  %10056 = vst [vmem:[#allocation27_spill] sm:$0xff] %v8261_v28 }
 0x181   : > { %2625 = vmax.xlane.f32.xlu1 %v8249_v44  ;;  %v6560_v44 = vpop.f32.mrf.mxu1 }
 0x182   : > { %v8267_v35 = vmul.f32 0.35355338, %v6560_v44 }
 0x183   : > { %2655 = vmax.xlane.f32.xlu0 %v8252_v51  ;;  %v1503_v25 = vpop.f32.mrf.mxu1 }
 0x184   : > { %10058 = vst [vmem:[#allocation29_spill] sm:$0xff] %v8267_v35 }
 0x185   : > { %2657 = vmax.xlane.f32.xlu1 %v8255_v12  ;;  %v8273_v12 = vmul.f32 0.35355338, %v1278_v47 }
 0x187   : > { %2635 = vmax.xlane.f32.xlu0 %v8258_v4  ;;  %10060 = vst [vmem:[#allocation31_spill] sm:$0xff] %v8273_v12  ;;  %v8276_v4 = vmul.f32 0.35355338, %v1500_v30 }
 0x189   : > { %2637 = vmax.xlane.f32.xlu1 %v8261_v28  ;;  %10061 = vst [vmem:[#allocation32_spill] sm:$0xff] %v8276_v4  ;;  %v8279_v28 = vmul.f32 0.35355338, %v1503_v25 }
 0x18b   : > { %2667 = vmax.xlane.f32.xlu0 %v8264_v14  ;;  %10062 = vst [vmem:[#allocation33_spill] sm:$0xff] %v8279_v28 }
 0x18d   : > { %2669 = vmax.xlane.f32.xlu1 %v8267_v35 }
 0x18f   : > { %2631 = vmax.xlane.f32.xlu0 %v8270_v38 }
 0x191   : > { %2633 = vmax.xlane.f32.xlu1 %v8273_v12 }
 0x192   : > { %v6579_v5 = vpop.f32.mrf.mxu0 }
 0x193   : > { %v6611_v44 = vpop.f32.mrf.mxu1  ;;  %2663 = vmax.xlane.f32.xlu0 %v8276_v4  ;;  %v8282_v60 = vmul.f32 0.35355338, %v6579_v5 }
 0x194   : > { %v1677_v14 = vpop.f32.mrf.mxu0  ;;  %v8288_v38 = vmul.f32 0.35355338, %v6611_v44 }
 0x195   : > { %10063 = vst [vmem:[#allocation34_spill] sm:$0xff] %v8282_v60  ;;  %v1902_v51 = vpop.f32.mrf.mxu1  ;;  %2665 = vmax.xlane.f32.xlu1 %v8279_v28  ;;  %v8294_v5 = vmul.f32 0.35355338, %v1677_v14 }
 0x196   : > { %v6580_v47 = vpop.f32.mrf.mxu0  ;;  %10065 = vst [vmem:[#allocation36_spill] sm:$0xff] %v8288_v38 }
 0x197   : > { %v8285_v35 = vmul.f32 0.35355338, %v6580_v47  ;;  %2675 = vmax.xlane.f32.xlu0 %v8282_v60  ;;  %v6612_v30 = vpop.f32.mrf.mxu1  ;;  %10067 = vst [vmem:[#allocation38_spill] sm:$0xff] %v8294_v5 }
 0x198   : > { %v8291_v25 = vmul.f32 0.35355338, %v6612_v30  ;;  %v1680_v4 = vpop.f32.mrf.mxu0 }
 0x199   : > { %10064 = vst [vmem:[#allocation35_spill] sm:$0xff] %v8285_v35  ;;  %2677 = vmax.xlane.f32.xlu1 %v8285_v35  ;;  %v8299_v47 = vmul.f32 0.35355338, %v1680_v4  ;;  %v1905_v60 = vpop.f32.mrf.mxu1  ;;  %v8304_v35 = vmul.f32 0.35355338, %v1902_v51 }
 0x19a   : > { %10066 = vst [vmem:[#allocation37_spill] sm:$0xff] %v8291_v25  ;;  %v6583_v28 = vpop.f32.mrf.mxu0  ;;  %v8309_v23 = vmul.f32 0.35355338, %v1905_v60 }
 0x19b   : > { %2707 = vmax.xlane.f32.xlu0 %v8288_v38  ;;  %10068 = vst [vmem:[#allocation39_spill] sm:$0xff] %v8299_v47  ;;  %10069 = vst [vmem:[#allocation40_spill] sm:$0xff] %v8304_v35  ;;  %v6615_v30 = vpop.f32.mrf.mxu1  ;;  %v8314_v4 = vmul.f32 0.35355338, %v6583_v28 }
 0x19c   : > { %v1693_v38 = vpop.f32.mrf.mxu0  ;;  %10070 = vst [vmem:[#allocation41_spill] sm:$0xff] %v8309_v23  ;;  %v8324_v60 = vmul.f32 0.35355338, %v6615_v30 }
 0x19d   : > { %2709 = vmax.xlane.f32.xlu1 %v8291_v25  ;;  %10071 = vst [vmem:[#allocation42_spill] sm:$0xff] %v8314_v4  ;;  %v1918_v19 = vpop.f32.mrf.mxu1 }
 0x19e   : > { %v8297_v12 = vpop.xlane.xlu1 %2547  ;;  %10073 = vst [vmem:[#allocation44_spill] sm:$0xff] %v8324_v60 }
 0x19f   : > { %2671 = vmax.xlane.f32.xlu0 %v8294_v5  ;;  %v6584_v5 = vpop.f32.mrf.mxu0 }
 0x1a0   : > { %v8302_v44 = vpop.xlane.xlu0 %2543  ;;  %v8319_v10 = vmul.f32 0.35355338, %v6584_v5  ;;  %v8334_v5 = vmul.f32 0.35355338, %v1693_v38 }
 0x1a1   : > { %2673 = vmax.xlane.f32.xlu1 %v8299_v47 }
 0x1a2   : > { %v8307_v14 = vpop.xlane.xlu1 %2579  ;;  %10072 = vst [vmem:[#allocation43_spill] sm:$0xff] %v8319_v10  ;;  %10075 = vst [vmem:[#allocation46_spill] sm:$0xff] %v8334_v5 }
 0x1a3   : > { %2703 = vmax.xlane.f32.xlu0 %v8304_v35  ;;  %v6616_v35 = vpop.f32.mrf.mxu1 }
 0x1a4   : > { %v8312_v25 = vpop.xlane.xlu0 %2581  ;;  %v8329_v28 = vmul.f32 0.35355338, %v6616_v35  ;;  %v8344_v35 = vmul.f32 0.35355338, %v1918_v19 }
 0x1a5   : > { %2705 = vmax.xlane.f32.xlu1 %v8309_v23  ;;  %v1696_v23 = vpop.f32.mrf.mxu0 }
 0x1a6   : > { %v8317_v51 = vpop.xlane.xlu1 %2575  ;;  %10074 = vst [vmem:[#allocation45_spill] sm:$0xff] %v8329_v28  ;;  %v8339_v30 = vmul.f32 0.35355338, %v1696_v23  ;;  %10077 = vst [vmem:[#allocation48_spill] sm:$0xff] %v8344_v35 }
 0x1a7   : > { %2683 = vmax.xlane.f32.xlu0 %v8314_v4  ;;  %v6587_v4 = vpop.f32.mrf.mxu0 }
 0x1a8   : > { %v8322_v47 = vpop.xlane.xlu0 %2545  ;;  %10076 = vst [vmem:[#allocation47_spill] sm:$0xff] %v8339_v30  ;;  %v8354_v23 = vmul.f32 0.35355338, %v6587_v4 }
 0x1a9   : > { %2685 = vmax.xlane.f32.xlu1 %v8319_v10  ;;  %v1921_v10 = vpop.f32.mrf.mxu1  ;;  %v1709_v46 = vpop.f32.mrf.mxu0 }
 0x1aa   : > { %v8327_v6 = vpop.xlane.xlu1 %2549  ;;  %v8349_v42 = vmul.f32 0.35355338, %v1921_v10  ;;  %10079 = vst [vmem:[#allocation50_spill] sm:$0xff] %v8354_v23 }
 0x1ab   : > { %2715 = vmax.xlane.f32.xlu0 %v8324_v60  ;;  %v6619_v60 = vpop.f32.mrf.mxu1 }
 0x1ac   : > { %v8332_v63 = vpop.xlane.xlu0 %2577  ;;  %10078 = vst [vmem:[#allocation49_spill] sm:$0xff] %v8349_v42  ;;  %v8364_v10 = vmul.f32 0.35355338, %v6619_v60 }
 0x1ad   : > { %2717 = vmax.xlane.f32.xlu1 %v8329_v28  ;;  %v1934_v41 = vpop.f32.mrf.mxu1 }
 0x1ae   : > { %v8337_v54 = vpop.xlane.xlu1 %2583  ;;  %10081 = vst [vmem:[#allocation52_spill] sm:$0xff] %v8364_v10 }
 0x1af   : > { %2679 = vmax.xlane.f32.xlu0 %v8334_v5  ;;  %v6588_v5 = vpop.f32.mrf.mxu0 }
 0x1b0   : > { %v8342_v50 = vpop.xlane.xlu0 %2555  ;;  %v8359_v34 = vmul.f32 0.35355338, %v6588_v5  ;;  %v8374_v5 = vmul.f32 0.35355338, %v1709_v46 }
 0x1b1   : > { %2681 = vmax.xlane.f32.xlu1 %v8339_v30 }
 0x1b2   : > { %v8347_v38 = vpop.xlane.xlu1 %2557  ;;  %10080 = vst [vmem:[#allocation51_spill] sm:$0xff] %v8359_v34  ;;  %10083 = vst [vmem:[#allocation54_spill] sm:$0xff] %v8374_v5 }
 0x1b3   : > { %2711 = vmax.xlane.f32.xlu0 %v8344_v35  ;;  %v6620_v35 = vpop.f32.mrf.mxu1 }
 0x1b4   : > { %v8352_v28 = vpop.xlane.xlu0 %2587  ;;  %v8369_v4 = vmul.f32 0.35355338, %v6620_v35  ;;  %v2801_v35 = vsub.f32 %v8067_v55, %v8297_v12  ;;  %v2817_v55 = vsub.f32 %v8072_v58, %v8307_v14  ;;  %v2799_v58 = vsub.f32 %v8074_v59, %v8302_v44 }
 0x1b5   : > { %2713 = vmax.xlane.f32.xlu1 %v8349_v42  ;;  %v1712_v42 = vpop.f32.mrf.mxu0 }
 0x1b6   : > { %v8357_v19 = vpop.xlane.xlu1 %2589  ;;  %10082 = vst [vmem:[#allocation53_spill] sm:$0xff] %v8369_v4  ;;  %v8379_v60 = vmul.f32 0.35355338, %v1712_v42  ;;  %v2802_v42 = vsub.f32 %v8096_v11, %v8327_v6  ;;  %v2931_v13 = vmul.f32 1.442695, %v2801_v35  ;;  %v2818_v11 = vsub.f32 %v8082_v3, %v8312_v25 }
 0x1b7   : > { %2691 = vmax.xlane.f32.xlu0 %v8354_v23  ;;  %v6591_v23 = vpop.f32.mrf.mxu0  ;;  %v2963_v14 = vmul.f32 1.442695, %v2817_v55  ;;  %v2800_v25 = vsub.f32 %v8093_v9, %v8322_v47  ;;  %v2927_v59 = vmul.f32 1.442695, %v2799_v58 }
 0x1b8   : > { %v8362_v30 = vpop.xlane.xlu0 %2551  ;;  %10084 = vst [vmem:[#allocation55_spill] sm:$0xff] %v8379_v60  ;;  %7209 = vpow2.f32 %v2931_v13  ;;  %v2965_v3 = vmul.f32 1.442695, %v2818_v11 }
 0x1b9   : > { %2693 = vmax.xlane.f32.xlu1 %v8359_v34  ;;  %v1937_v34 = vpop.f32.mrf.mxu1  ;;  %v1725_v46 = vpop.f32.mrf.mxu0  ;;  %v2929_v9 = vmul.f32 1.442695, %v2800_v25 }
 0x1ba   : > { %v8367_v31 = vpop.xlane.xlu1 %2553  ;;  %v8393_v15 = vmul.f32 0.35355338, %v1937_v34  ;;  %v2933_v34 = vmul.f32 1.442695, %v2802_v42  ;;  %v8428_v44 = vmul.f32 0.35355338, %v1725_v46 }
 0x1bb   : > { %2723 = vmax.xlane.f32.xlu0 %v8364_v10  ;;  %v8386_v10 = vmul.f32 0.35355338, %v1934_v41  ;;  %v6623_v18 = vpop.f32.mrf.mxu1  ;;  %v8400_v41 = vmul.f32 0.35355338, %v6591_v23 }
 0x1bc   : > { %v8372_v26 = vpop.xlane.xlu0 %2585  ;;  %10086 = vst [vmem:[#allocation57_spill] sm:$0xff] %v8393_v15  ;;  %v8414_v23 = vmul.f32 0.35355338, %v6623_v18  ;;  %7211 = vpow2.f32 %v2933_v34  ;;  %v2815_v18 = vsub.f32 %v8086_v7, %v8317_v51  ;;  %10091 = vst [vmem:[#allocation62_spill] sm:$0xff] %v8428_v44  ;;  %v2805_v51 = vsub.f32 %v8108_v20, %v8342_v50 }
 0x1bd   : > { %2725 = vmax.xlane.f32.xlu1 %v8369_v4  ;;  %10085 = vst [vmem:[#allocation56_spill] sm:$0xff] %v8386_v10  ;;  %10087 = vst [vmem:[#allocation58_spill] sm:$0xff] %v8400_v41  ;;  %v1950_v12 = vpop.f32.mrf.mxu1  ;;  %7213 = vpow2.f32 %v2963_v14  ;;  %v2821_v20 = vsub.f32 %v8121_v27, %v8352_v28  ;;  %v2803_v28 = vsub.f32 %v8129_v32, %v8362_v30 }
 0x1be   : > { %v8377_v24 = vpop.xlane.xlu1 %2565  ;;  %10089 = vst [vmem:[#allocation60_spill] sm:$0xff] %v8414_v23  ;;  %7215 = vpow2.f32 %v2965_v3  ;;  %v2959_v7 = vmul.f32 1.442695, %v2815_v18  ;;  %v8442_v46 = vmul.f32 0.35355338, %v1950_v12  ;;  %v2819_v32 = vsub.f32 %v8102_v16, %v8337_v54 }
 0x1bf   : > { %2687 = vmax.xlane.f32.xlu0 %v8374_v5  ;;  %7217 = vpow2.f32 %v2927_v59  ;;  %v2939_v25 = vmul.f32 1.442695, %v2805_v51  ;;  %v2971_v27 = vmul.f32 1.442695, %v2821_v20  ;;  %v2935_v30 = vmul.f32 1.442695, %v2803_v28 }
 0x1c0   : > { %v8382_v22 = vpop.xlane.xlu0 %2563  ;;  %10093 = vst [vmem:[#allocation64_spill] sm:$0xff] %v8442_v46  ;;  %7219 = vpow2.f32 %v2929_v9  ;;  %v2820_v51 = vsub.f32 %v8138_v37, %v8372_v26  ;;  %v2967_v54 = vmul.f32 1.442695, %v2819_v32  ;;  %v7147_v20 = vld [vmem:[%s8484_s24 + $0x78] sm:$0xff]  }
 0x1c1   : > { %2689 = vmax.xlane.f32.xlu1 %v8379_v60  ;;  %v6592_v60 = vpop.f32.mrf.mxu0  ;;  %7221 = vpow2.f32 %v2959_v7  ;;  %6721 = vmatprep.subr.bf16.mxu1 %v7147_v20 }
 0x1c2   : > { %v8389_v4 = vpop.xlane.xlu1 %2597  ;;  %v8407_v6 = vmul.f32 0.35355338, %v6592_v60  ;;  %v2969_v26 = vmul.f32 1.442695, %v2820_v51  ;;  %6722 = vmatpush3.bf16.msra.mxu1 %v7147_v20  ;;  %v7150_v51 = vld [vmem:[%s8484_s24 + $0x20] sm:$0xff]  }
 0x1c3   : > { %2719 = vmax.xlane.f32.xlu0 %v8386_v10  ;;  %v1728_v13 = vpop.f32.mrf.mxu0 }
 0x1c4   : > { %v8396_v5 = vpop.xlane.xlu0 %2595  ;;  %10088 = vst [vmem:[#allocation59_spill] sm:$0xff] %v8407_v6  ;;  %v8435_v47 = vmul.f32 0.35355338, %v1728_v13 }
 0x1c5   : > { %2721 = vmax.xlane.f32.xlu1 %v8393_v15  ;;  %v6624_v15 = vpop.f32.mrf.mxu1  ;;  %v8457_v50 = vpop.eup %7209  ;;  %v2825_v28 = vsub.f32 %v8147_v43, %v8396_v5 }
 0x1c6   : > { %v8403_v8 = vpop.xlane.xlu1 %2561  ;;  %v8421_v60 = vmul.f32 0.35355338, %v6624_v15  ;;  %v2816_v15 = vsub.f32 %v8105_v17, %v8332_v63  ;;  %10092 = vst [vmem:[#allocation63_spill] sm:$0xff] %v8435_v47  ;;  %v2806_v63 = vsub.f32 %v8114_v21, %v8347_v38  ;;  %v2822_v21 = vsub.f32 %v8124_v29, %v8357_v19 }
 0x1c7   : > { %2699 = vmax.xlane.f32.xlu0 %v8400_v41  ;;  %v1953_v11 = vpop.f32.mrf.mxu1  ;;  %v2804_v19 = vsub.f32 %v8133_v33, %v8367_v31 }
 0x1c8   : > { %v8410_v35 = vpop.xlane.xlu0 %2559  ;;  %10090 = vst [vmem:[#allocation61_spill] sm:$0xff] %v8421_v60  ;;  %v2961_v17 = vmul.f32 1.442695, %v2816_v15  ;;  %v8449_v14 = vmul.f32 0.35355338, %v1953_v11  ;;  %v7145_v11 = vld [vmem:[%s8484_s24 + $0x38] sm:$0xff]  }
 0x1c9   : > { %2701 = vmax.xlane.f32.xlu1 %v8407_v6  ;;  %v2941_v12 = vmul.f32 1.442695, %v2806_v63  ;;  %v8462_v38 = vpop.eup %7211  ;;  %v2973_v29 = vmul.f32 1.442695, %v2822_v21  ;;  %v2937_v7 = vmul.f32 1.442695, %v2804_v19  ;;  %6689 = vmatprep.subr.bf16.mxu0 %v7145_v11  ;;  %v2809_v63 = vsub.f32 %v8141_v39, %v8382_v22 }
 0x1ca   : > { %v8417_v10 = vpop.xlane.xlu1 %2593  ;;  %10094 = vst [vmem:[#allocation65_spill] sm:$0xff] %v8449_v14  ;;  %7223 = vpow2.f32 %v2961_v17  ;;  %v8471_v18 = vpop.eup %7213  ;;  %6690 = vmatpush3.bf16.msra.mxu0 %v7145_v11  ;;  %v2810_v21 = vsub.f32 %v8135_v36, %v8377_v24  ;;  %v7149_v19 = vld [vmem:[%s8484_s24 + $0x70] sm:$0xff]   ;;  %v2979_v11 = vmul.f32 1.442695, %v2825_v28 }
 0x1cb   : > { %2731 = vmax.xlane.f32.xlu0 %v8414_v23  ;;  %7225 = vpow2.f32 %v2939_v25  ;;  %v8476_v9 = vpop.eup %7215  ;;  %v7146_v25 = vld [vmem:[%s8484_s24 + $0x30] sm:$0xff]   ;;  %6723 = vmatprep.subr.bf16.mxu1 %v7149_v19 }
 0x1cc   : > { %v8424_v42 = vpop.xlane.xlu0 %2591  ;;  %7227 = vpow2.f32 %v2941_v12  ;;  %v8489_v33 = vpop.eup %7217  ;;  %6691 = vmatprep.subr.bf16.mxu0 %v7146_v25  ;;  %v2949_v24 = vmul.f32 1.442695, %v2810_v21  ;;  %6724 = vmatpush3.bf16.msra.mxu1 %v7149_v19  ;;  %v7152_v21 = vld [vmem:[%s8484_s24 + $0x18] sm:$0xff]  }
 0x1cd   : > { %2733 = vmax.xlane.f32.xlu1 %v8421_v60  ;;  %7229 = vpow2.f32 %v2971_v27  ;;  %v8497_v17 = vpop.eup %7219  ;;  %v2947_v27 = vmul.f32 1.442695, %v2809_v63 }
 0x1ce   : > { %v8431_v55 = vpop.xlane.xlu1 %2573  ;;  %7231 = vpow2.f32 %v2973_v29  ;;  %v8506_v12 = vpop.eup %7221  ;;  %6692 = vmatpush3.bf16.msra.mxu0 %v7146_v25  ;;  %v7148_v29 = vld [vmem:[%s8484_s24 + $0x28] sm:$0xff]   ;;  %v2808_v25 = vsub.f32 %v8151_v45, %v8403_v8 }
 0x1cf   : > { %2695 = vmax.xlane.f32.xlu0 %v8428_v44  ;;  %7233 = vpow2.f32 %v2935_v30  ;;  %v2826_v30 = vsub.f32 %v8143_v40, %v8389_v4  ;;  %6693 = vmatprep.subr.bf16.mxu0 %v7148_v29 }
 0x1d0   : > { %v8438_v34 = vpop.xlane.xlu0 %2571  ;;  %7235 = vpow2.f32 %v2937_v7  ;;  %v2807_v7 = vsub.f32 %v8153_v48, %v8410_v35  ;;  %v2945_v8 = vmul.f32 1.442695, %v2808_v25  ;;  %v7156_v25 = vld [vmem:[%s8484_s24 + $0x8] sm:$0xff]  }
 0x1d1   : > { %2697 = vmax.xlane.f32.xlu1 %v8435_v47  ;;  %7237 = vpow2.f32 %v2967_v54  ;;  %v7151_v54 = vld [vmem:[%s8484_s24 + $0x68] sm:$0xff]   ;;  %v2981_v4 = vmul.f32 1.442695, %v2826_v30  ;;  %v7154_v30 = vld [vmem:[%s8484_s24 + $0x10] sm:$0xff]  }
 0x1d2   : > { %v8445_v58 = vpop.xlane.xlu1 %2605  ;;  %7239 = vpow2.f32 %v2969_v26  ;;  %6694 = vmatpush3.bf16.msra.mxu0 %v7148_v29  ;;  %6725 = vmatprep.subr.bf16.mxu1 %v7151_v54  ;;  %v2943_v20 = vmul.f32 1.442695, %v2807_v7  ;;  %v2823_v26 = vsub.f32 %v8159_v52, %v8424_v42  ;;  %v2824_v29 = vsub.f32 %v8157_v49, %v8417_v10 }
 0x1d3   : > { %2727 = vmax.xlane.f32.xlu0 %v8442_v46  ;;  %7241 = vpow2.f32 %v2947_v27  ;;  %6695 = vmatprep.subr.bf16.mxu0 %v7150_v51  ;;  %v7153_v27 = vld [vmem:[%s8484_s24 + $0x60] sm:$0xff]  }
 0x1d4   : > { %v8452_v3 = vpop.xlane.xlu0 %2603  ;;  %7243 = vpow2.f32 %v2949_v24  ;;  %6726 = vmatpush3.bf16.msra.mxu1 %v7151_v54  ;;  %v2975_v19 = vmul.f32 1.442695, %v2823_v26  ;;  %v2813_v24 = vsub.f32 %v8165_v56, %v8438_v34  ;;  %v2977_v10 = vmul.f32 1.442695, %v2824_v29  ;;  %v7158_v29 = vld [vmem:[%s8484_s24] sm:$0xff]  }
 0x1d5   : > { %2729 = vmax.xlane.f32.xlu1 %v8449_v14  ;;  %7245 = vpow2.f32 %v2979_v11  ;;  %6727 = vmatprep.subr.bf16.mxu1 %v7153_v27  ;;  %v7155_v11 = vld [vmem:[%s8484_s24 + $0x58] sm:$0xff]   ;;  %v6675_v14 = vpop.f32.mrf.mxu1 }
 0x1d6   : > { %v8464_v13 = vpop.xlane.xlu1 %2569  ;;  %6696 = vmatpush3.bf16.msra.mxu0 %v7150_v51  ;;  %7247 = vpow2.f32 %v2981_v4  ;;  %v2814_v51 = vsub.f32 %v8161_v53, %v8431_v55  ;;  %v2955_v54 = vmul.f32 1.442695, %v2813_v24  ;;  %v2829_v4 = vsub.f32 %v8171_v61, %v8452_v3 }
 0x1d7   : > { %3187 = vadd.xlane.f32.xlu0 %v8457_v50  ;;  %v8513_v39 = vpop.eup %7223  ;;  %6697 = vmatprep.subr.bf16.mxu0 %v7152_v21  ;;  %7249 = vpow2.f32 %v2943_v20  ;;  %v7157_v20 = vld [vmem:[%s8484_s24 + $0x50] sm:$0xff]   ;;  %v2352_v41 = vpop.f32.mrf.mxu1 }
 0x1d8   : > { %v8466_v59 = vpop.xlane.xlu0 %2567  ;;  %v8522_v32 = vpop.eup %7225  ;;  %6728 = vmatpush3.bf16.msra.mxu1 %v7153_v27  ;;  %7251 = vpow2.f32 %v2945_v8  ;;  %v2957_v55 = vmul.f32 1.442695, %v2814_v51  ;;  %v2987_v27 = vmul.f32 1.442695, %v2829_v4  ;;  %v7160_v51 = vld [vmem:[%s8484_s24 + $0x40] sm:$0xff]  }
 0x1d9   : > { %3189 = vadd.xlane.f32.xlu1 %v8462_v38  ;;  %10095 = vst [vmem:[#allocation66_spill] sm:$0xff] %v8522_v32  ;;  %v8529_v43 = vpop.eup %7227  ;;  %6729 = vmatprep.subr.bf16.mxu1 %v7155_v11  ;;  %7253 = vpow2.f32 %v2975_v19  ;;  %v2811_v8 = vsub.f32 %v8177_v0, %v8466_v59  ;;  %v7159_v19 = vld [vmem:[%s8484_s24 + $0x48] sm:$0xff]  }
 0x1da   : > { %v8491_v31 = vpop.xlane.xlu1 %2601  ;;  %v8538_v63 = vpop.eup %7229  ;;  %6698 = vmatpush3.bf16.msra.mxu0 %v7152_v21  ;;  %7255 = vpow2.f32 %v2977_v10  ;;  %v2830_v21 = vsub.f32 %v8167_v57, %v8445_v58 }
 0x1db   : > { %3219 = vadd.xlane.f32.xlu0 %v8471_v18  ;;  %10096 = vst [vmem:[#allocation67_spill] sm:$0xff] %v8538_v63  ;;  %v8545_v48 = vpop.eup %7231  ;;  %6699 = vmatprep.subr.bf16.mxu0 %v7154_v30  ;;  %7257 = vpow2.f32 %v2955_v54  ;;  %v2828_v4 = vsub.f32 %v8181_v1, %v8491_v31 }
 0x1dc   : > { %v8478_v15 = vpop.xlane.xlu0 %2599  ;;  %10097 = vst [vmem:[#allocation68_spill] sm:$0xff] %v8545_v48  ;;  %v8554_v28 = vpop.eup %7233  ;;  %6730 = vmatpush3.bf16.msra.mxu1 %v7155_v11  ;;  %7259 = vpow2.f32 %v2957_v55  ;;  %v2989_v58 = vmul.f32 1.442695, %v2830_v21  ;;  %v2951_v11 = vmul.f32 1.442695, %v2811_v8 }
 0x1dd   : > { %3221 = vadd.xlane.f32.xlu1 %v8476_v9  ;;  %10098 = vst [vmem:[#allocation69_spill] sm:$0xff] %v8554_v28  ;;  %v8561_v52 = vpop.eup %7235  ;;  %6731 = vmatprep.subr.bf16.mxu1 %v7157_v20  ;;  %7261 = vpow2.f32 %v2987_v27  ;;  %v2827_v10 = vsub.f32 %v8183_v2, %v8478_v15  ;;  %v2985_v21 = vmul.f32 1.442695, %v2828_v4 }
 0x1de   : > { %10099 = vst [vmem:[#allocation70_spill] sm:$0xff] %v8561_v52  ;;  %v8570_v7 = vpop.eup %7237  ;;  %6700 = vmatpush3.bf16.msra.mxu0 %v7154_v30  ;;  %v2812_v30 = vsub.f32 %v8175_v62, %v8464_v13  ;;  %7263 = vpow2.f32 %v2989_v58 }
 0x1df   : > { %3183 = vadd.xlane.f32.xlu0 %v8489_v33  ;;  %10100 = vst [vmem:[#allocation71_spill] sm:$0xff] %v8570_v7  ;;  %v8577_v56 = vpop.eup %7239  ;;  %6701 = vmatprep.subr.bf16.mxu0 %v7156_v25  ;;  %7265 = vpow2.f32 %v2951_v11  ;;  %v2983_v15 = vmul.f32 1.442695, %v2827_v10 }
 0x1e0   : > { %v8499_v16 = vpop.xlane.xlu0 %2611  ;;  %10101 = vst [vmem:[#allocation72_spill] sm:$0xff] %v8577_v56  ;;  %v8586_v26 = vpop.eup %7241  ;;  %6732 = vmatpush3.bf16.msra.mxu1 %v7157_v20  ;;  %v2953_v13 = vmul.f32 1.442695, %v2812_v30 }
 0x1e1   : > { %3185 = vadd.xlane.f32.xlu1 %v8497_v17  ;;  %10102 = vst [vmem:[#allocation73_spill] sm:$0xff] %v8586_v26  ;;  %v8593_v61 = vpop.eup %7243  ;;  %6733 = vmatprep.subr.bf16.mxu1 %v7159_v19 }
 0x1e2   : > { %v8508_v37 = vpop.xlane.xlu1 %2613  ;;  %10103 = vst [vmem:[#allocation74_spill] sm:$0xff] %v8593_v61  ;;  %6702 = vmatpush3.bf16.msra.mxu0 %v7156_v25  ;;  %v8602_v24 = vpop.eup %7245  ;;  %7267 = vpow2.f32 %v2953_v13 }
 0x1e3   : > { %3215 = vadd.xlane.f32.xlu0 %v8506_v12  ;;  %10104 = vst [vmem:[#allocation75_spill] sm:$0xff] %v8602_v24  ;;  %6703 = vmatprep.subr.bf16.mxu0 %v7158_v29  ;;  %v8609_v0 = vpop.eup %7247  ;;  %7269 = vpow2.f32 %v2983_v15  ;;  %v6643_v13 = vpop.f32.mrf.mxu0 }
 0x1e4   : > { %v8515_v22 = vpop.xlane.xlu0 %2643  ;;  %10105 = vst [vmem:[#allocation76_spill] sm:$0xff] %v8609_v0  ;;  %v8617_v54 = vpop.eup %7249  ;;  %6734 = vmatpush3.bf16.msra.mxu1 %v7159_v19  ;;  %7271 = vpow2.f32 %v2985_v21  ;;  %v8678_v6 = vmul.f32 0.35355338, %v6643_v13 }
 0x1e5   : > { %3217 = vadd.xlane.f32.xlu1 %v8513_v39  ;;  %10106 = vst [vmem:[#allocation77_spill] sm:$0xff] %v8617_v54  ;;  %6735 = vmatprep.subr.bf16.mxu1 %v7160_v51  ;;  %v8624_v25 = vpop.eup %7251  ;;  %v2127_v47 = vpop.f32.mrf.mxu0 }
 0x1e6   : > { %v8524_v36 = vpop.xlane.xlu1 %2645  ;;  %6704 = vmatpush3.bf16.msra.mxu0 %v7158_v29  ;;  %10107 = vst [vmem:[#allocation78_spill] sm:$0xff] %v8624_v25  ;;  %v8629_v20 = vpop.eup %7253  ;;  %10118 = vst [vmem:[#allocation89_spill] sm:$0xff] %v8678_v6 }
 0x1e7   : > { %3195 = vadd.xlane.f32.xlu0 %v8522_v32  ;;  %10108 = vst [vmem:[#allocation79_spill] sm:$0xff] %v8629_v20  ;;  %v8634_v1 = vpop.eup %7255 }
 0x1e8   : > { %v8531_v5 = vpop.xlane.xlu0 %2607  ;;  %6736 = vmatpush3.bf16.msra.mxu1 %v7160_v51  ;;  %10109 = vst [vmem:[#allocation80_spill] sm:$0xff] %v8634_v1  ;;  %v8639_v27 = vpop.eup %7257 }
 0x1e9   : > { %3197 = vadd.xlane.f32.xlu1 %v8529_v43  ;;  %10110 = vst [vmem:[#allocation81_spill] sm:$0xff] %v8639_v27  ;;  %v8644_v29 = vpop.eup %7259 }
 0x1ea   : > { %v8540_v40 = vpop.xlane.xlu1 %2609  ;;  %10111 = vst [vmem:[#allocation82_spill] sm:$0xff] %v8644_v29  ;;  %v8649_v58 = vpop.eup %7261 }
 0x1eb   : > { %3227 = vadd.xlane.f32.xlu0 %v8538_v63  ;;  %10112 = vst [vmem:[#allocation83_spill] sm:$0xff] %v8649_v58  ;;  %v8654_v11 = vpop.eup %7263 }
 0x1ec   : > { %v8547_v35 = vpop.xlane.xlu0 %2639  ;;  %10113 = vst [vmem:[#allocation84_spill] sm:$0xff] %v8654_v11  ;;  %v8659_v51 = vpop.eup %7265 }
 0x1ed   : > { %3229 = vadd.xlane.f32.xlu1 %v8545_v48  ;;  %10114 = vst [vmem:[#allocation85_spill] sm:$0xff] %v8659_v51 }
 0x1ee   : > { %v8556_v45 = vpop.xlane.xlu1 %2641 }
 0x1ef   : > { %3191 = vadd.xlane.f32.xlu0 %v8554_v28  ;;  %v8664_v15 = vpop.eup %7267 }
 0x1f0   : > { %v8563_v42 = vpop.xlane.xlu0 %2619  ;;  %10115 = vst [vmem:[#allocation86_spill] sm:$0xff] %v8664_v15  ;;  %v8669_v46 = vpop.eup %7269 }
 0x1f1   : > { %3193 = vadd.xlane.f32.xlu1 %v8561_v52  ;;  %10116 = vst [vmem:[#allocation87_spill] sm:$0xff] %v8669_v46  ;;  %v8674_v60 = vpop.eup %7271 }
 0x1f2   : > { %v8572_v49 = vpop.xlane.xlu1 %2621  ;;  %10117 = vst [vmem:[#allocation88_spill] sm:$0xff] %v8674_v60 }
 0x1f3   : > { %3223 = vadd.xlane.f32.xlu0 %v8570_v7 }
 0x1f4   : > { %v8579_v34 = vpop.xlane.xlu0 %2651 }
 0x1f5   : > { %3225 = vadd.xlane.f32.xlu1 %v8577_v56 }
 0x1f6   : > { %v8588_v53 = vpop.xlane.xlu1 %2653 }
 0x1f7   : > { %3203 = vadd.xlane.f32.xlu0 %v8586_v26 }
 0x1f8   : > { %v8595_v3 = vpop.xlane.xlu0 %2615 }
 0x1f9   : > { %3205 = vadd.xlane.f32.xlu1 %v8593_v61 }
 0x1fa   : > { %v8604_v57 = vpop.xlane.xlu1 %2617 }
 0x1fb   : > { %3235 = vadd.xlane.f32.xlu0 %v8602_v24 }
 0x1fc   : > { %v8611_v59 = vpop.xlane.xlu0 %2647 }
 0x1fd   : > { %3237 = vadd.xlane.f32.xlu1 %v8609_v0 }
 0x1fe   : > { %v8619_v62 = vpop.xlane.xlu1 %2649 }
 0x1ff   : > { %3199 = vadd.xlane.f32.xlu0 %v8617_v54 }
 0x200   : > { %v8626_v2 = vpop.xlane.xlu0 %2627 }
 0x201   : > { %3201 = vadd.xlane.f32.xlu1 %v8624_v25 }
 0x202   : > { %v8631_v55 = vpop.xlane.xlu1 %2629 }
 0x203   : > { %3231 = vadd.xlane.f32.xlu0 %v8629_v20 }
 0x204   : > { %v8636_v31 = vpop.xlane.xlu0 %2659 }
 0x205   : > { %3233 = vadd.xlane.f32.xlu1 %v8634_v1 }
 0x206   : > { %v8641_v8 = vpop.xlane.xlu1 %2661 }
 0x207   : > { %3211 = vadd.xlane.f32.xlu0 %v8639_v27 }
 0x208   : > { %v8646_v19 = vpop.xlane.xlu0 %2623 }
 0x209   : > { %3213 = vadd.xlane.f32.xlu1 %v8644_v29 }
 0x20a   : > { %v8651_v30 = vpop.xlane.xlu1 %2625 }
 0x20b   : > { %3243 = vadd.xlane.f32.xlu0 %v8649_v58  ;;  %v6644_v58 = vpop.f32.mrf.mxu0 }
 0x20c   : > { %v8656_v10 = vpop.xlane.xlu0 %2655  ;;  %v8683_v27 = vmul.f32 0.35355338, %v6644_v58  ;;  %v8698_v58 = vmul.f32 0.35355338, %v2127_v47 }
 0x20d   : > { %3245 = vadd.xlane.f32.xlu1 %v8654_v11 }
 0x20e   : > { %v8661_v4 = vpop.xlane.xlu1 %2657  ;;  %10119 = vst [vmem:[#allocation90_spill] sm:$0xff] %v8683_v27  ;;  %10122 = vst [vmem:[#allocation93_spill] sm:$0xff] %v8698_v58 }
 0x20f   : > { %3207 = vadd.xlane.f32.xlu0 %v8659_v51  ;;  %v8688_v51 = vmul.f32 0.35355338, %v6675_v14 }
 0x210   : > { %v8666_v21 = vpop.xlane.xlu0 %2635 }
 0x211   : > { %3209 = vadd.xlane.f32.xlu1 %v8664_v15  ;;  %10120 = vst [vmem:[#allocation91_spill] sm:$0xff] %v8688_v51 }
 0x212   : > { %v8671_v44 = vpop.xlane.xlu1 %2637 }
 0x213   : > { %3239 = vadd.xlane.f32.xlu0 %v8669_v46  ;;  %v6676_v46 = vpop.f32.mrf.mxu1 }
 0x214   : > { %v8676_v23 = vpop.xlane.xlu0 %2667  ;;  %v8693_v13 = vmul.f32 0.35355338, %v6676_v46  ;;  %v8708_v46 = vmul.f32 0.35355338, %v2352_v41 }
 0x215   : > { %3241 = vadd.xlane.f32.xlu1 %v8674_v60  ;;  %v2130_v60 = vpop.f32.mrf.mxu0 }
 0x216   : > { %v8681_v11 = vpop.xlane.xlu1 %2669  ;;  %10121 = vst [vmem:[#allocation92_spill] sm:$0xff] %v8693_v13  ;;  %v8703_v14 = vmul.f32 0.35355338, %v2130_v60  ;;  %10124 = vst [vmem:[#allocation95_spill] sm:$0xff] %v8708_v46 }
 0x217   : > { %2739 = vmax.xlane.f32.xlu0 %v8678_v6  ;;  %v6647_v6 = vpop.f32.mrf.mxu0 }
 0x218   : > { %v8686_v15 = vpop.xlane.xlu0 %2631  ;;  %10123 = vst [vmem:[#allocation94_spill] sm:$0xff] %v8703_v14  ;;  %v8718_v60 = vmul.f32 0.35355338, %v6647_v6 }
 0x219   : > { %2741 = vmax.xlane.f32.xlu1 %v8683_v27  ;;  %v2355_v27 = vpop.f32.mrf.mxu1  ;;  %v2143_v0 = vpop.f32.mrf.mxu0 }
 0x21a   : > { %v8691_v29 = vpop.xlane.xlu1 %2633  ;;  %v8713_v26 = vmul.f32 0.35355338, %v2355_v27  ;;  %10126 = vst [vmem:[#allocation97_spill] sm:$0xff] %v8718_v60 }
 0x21b   : > { %2771 = vmax.xlane.f32.xlu0 %v8688_v51  ;;  %v6679_v51 = vpop.f32.mrf.mxu1 }
 0x21c   : > { %v8696_v24 = vpop.xlane.xlu0 %2663  ;;  %10125 = vst [vmem:[#allocation96_spill] sm:$0xff] %v8713_v26  ;;  %v8728_v27 = vmul.f32 0.35355338, %v6679_v51 }
 0x21d   : > { %2773 = vmax.xlane.f32.xlu1 %v8693_v13  ;;  %v2368_v25 = vpop.f32.mrf.mxu1 }
 0x21e   : > { %v8701_v1 = vpop.xlane.xlu1 %2665  ;;  %10128 = vst [vmem:[#allocation99_spill] sm:$0xff] %v8728_v27 }
 0x21f   : > { %2735 = vmax.xlane.f32.xlu0 %v8698_v58  ;;  %v6648_v58 = vpop.f32.mrf.mxu0 }
 0x220   : > { %v8706_v20 = vpop.xlane.xlu0 %2675  ;;  %v8723_v54 = vmul.f32 0.35355338, %v6648_v58  ;;  %v8738_v58 = vmul.f32 0.35355338, %v2143_v0 }
 0x221   : > { %2737 = vmax.xlane.f32.xlu1 %v8703_v14 }
 0x222   : > { %v8711_v47 = vpop.xlane.xlu1 %2677  ;;  %10127 = vst [vmem:[#allocation98_spill] sm:$0xff] %v8723_v54  ;;  %10131 = vst [vmem:[#allocation102_spill] sm:$0xff] %v8738_v58 }
 0x223   : > { %2767 = vmax.xlane.f32.xlu0 %v8708_v46  ;;  %v6680_v46 = vpop.f32.mrf.mxu1 }
 0x224   : > { %v8716_v13 = vpop.xlane.xlu0 %2707  ;;  %v8733_v6 = vmul.f32 0.35355338, %v6680_v46  ;;  %v8748_v46 = vmul.f32 0.35355338, %v2368_v25 }
 0x225   : > { %2769 = vmax.xlane.f32.xlu1 %v8713_v26  ;;  %v2146_v26 = vpop.f32.mrf.mxu0 }
 0x226   : > { %v8721_v41 = vpop.xlane.xlu1 %2709  ;;  %10129 = vst [vmem:[#allocation100_spill] sm:$0xff] %v8733_v6  ;;  %v8743_v51 = vmul.f32 0.35355338, %v2146_v26  ;;  %10135 = vst [vmem:[#allocation106_spill] sm:$0xff] %v8748_v46 }
 0x227   : > { %2747 = vmax.xlane.f32.xlu0 %v8718_v60  ;;  %v6651_v60 = vpop.f32.mrf.mxu0 }
 0x228   : > { %v8726_v14 = vpop.xlane.xlu0 %2671  ;;  %10133 = vst [vmem:[#allocation104_spill] sm:$0xff] %v8743_v51  ;;  %v8758_v26 = vmul.f32 0.35355338, %v6651_v60 }
 0x229   : > { %2749 = vmax.xlane.f32.xlu1 %v8723_v54  ;;  %v2371_v54 = vpop.f32.mrf.mxu1  ;;  %v2159_v48 = vpop.f32.mrf.mxu0 }
 0x22a   : > { %v8731_v61 = vpop.xlane.xlu1 %2673  ;;  %v8753_v32 = vmul.f32 0.35355338, %v2371_v54  ;;  %10139 = vst [vmem:[#allocation110_spill] sm:$0xff] %v8758_v26 }
 0x22b   : > { %2779 = vmax.xlane.f32.xlu0 %v8728_v27  ;;  %v6683_v27 = vpop.f32.mrf.mxu1 }
 0x22c   : > { %v8736_v63 = vpop.xlane.xlu0 %2703  ;;  %10137 = vst [vmem:[#allocation108_spill] sm:$0xff] %v8753_v32  ;;  %v8768_v54 = vmul.f32 0.35355338, %v6683_v27 }
 0x22d   : > { %10130 = vst [vmem:[#allocation101_spill] sm:$0xff] %v8736_v63  ;;  %2781 = vmax.xlane.f32.xlu1 %v8733_v6 }
 0x22e   : > { %v8741_v56 = vpop.xlane.xlu1 %2705  ;;  %10143 = vst [vmem:[#allocation114_spill] sm:$0xff] %v8768_v54 }
 0x22f   : > { %10132 = vst [vmem:[#allocation103_spill] sm:$0xff] %v8741_v56  ;;  %2743 = vmax.xlane.f32.xlu0 %v8738_v58  ;;  %v2384_v56 = vpop.f32.mrf.mxu1  ;;  %v6652_v58 = vpop.f32.mrf.mxu0 }
 0x230   : > { %v8746_v7 = vpop.xlane.xlu0 %2683 }
 0x231   : > { %10134 = vst [vmem:[#allocation105_spill] sm:$0xff] %v8746_v7  ;;  %2745 = vmax.xlane.f32.xlu1 %v8743_v51  ;;  %v8763_v7 = vmul.f32 0.35355338, %v6652_v58  ;;  %v8778_v58 = vmul.f32 0.35355338, %v2159_v48 }
 0x232   : > { %v8751_v0 = vpop.xlane.xlu1 %2685 }
 0x233   : > { %10136 = vst [vmem:[#allocation107_spill] sm:$0xff] %v8751_v0  ;;  %2775 = vmax.xlane.f32.xlu0 %v8748_v46  ;;  %10141 = vst [vmem:[#allocation112_spill] sm:$0xff] %v8763_v7  ;;  %v6684_v46 = vpop.f32.mrf.mxu1 }
 0x234   : > { %v8756_v6 = vpop.xlane.xlu0 %2715  ;;  %v8773_v60 = vmul.f32 0.35355338, %v6684_v46  ;;  %10147 = vst [vmem:[#allocation118_spill] sm:$0xff] %v8778_v58  ;;  %v10151_v46 = vld [vmem:[#allocation2_spill] sm:$0xff] }
 0x235   : > { %10138 = vst [vmem:[#allocation109_spill] sm:$0xff] %v8756_v6  ;;  %2777 = vmax.xlane.f32.xlu1 %v8753_v32  ;;  %v2162_v32 = vpop.f32.mrf.mxu0 }
 0x236   : > { %v8761_v25 = vpop.xlane.xlu1 %2717  ;;  %10145 = vst [vmem:[#allocation116_spill] sm:$0xff] %v8773_v60  ;;  %v8783_v27 = vmul.f32 0.35355338, %v2162_v32 }
 0x237   : > { %10140 = vst [vmem:[#allocation111_spill] sm:$0xff] %v8761_v25  ;;  %2755 = vmax.xlane.f32.xlu0 %v8758_v26  ;;  %v6655_v26 = vpop.f32.mrf.mxu0  ;;  %v8790_v25 = vmul.f32 0.35355338, %v2384_v56 }
 0x238   : > { %v8766_v51 = vpop.xlane.xlu0 %2679  ;;  %10149 = vst [vmem:[#allocation120_spill] sm:$0xff] %v8783_v27 }
 0x239   : > { %10142 = vst [vmem:[#allocation113_spill] sm:$0xff] %v8766_v51  ;;  %2757 = vmax.xlane.f32.xlu1 %v8763_v7  ;;  %v2387_v7 = vpop.f32.mrf.mxu1  ;;  %10152 = vst [vmem:[#allocation2_spill] sm:$0xff] %v8790_v25  ;;  %v2175_v48 = vpop.f32.mrf.mxu0 }
 0x23a   : > { %v8771_v6 = vpop.xlane.xlu1 %2681  ;;  %v8797_v63 = vmul.f32 0.35355338, %v2387_v7 }
 0x23b   : > { %10144 = vst [vmem:[#allocation115_spill] sm:$0xff] %v8771_v6  ;;  %2787 = vmax.xlane.f32.xlu0 %v8768_v54  ;;  %v2833_v54 = vsub.f32 %v10151_v46, %v8499_v16  ;;  %v10156_v16 = vld [vmem:[#allocation4_spill] sm:$0xff]  ;;  %v8804_v46 = vmul.f32 0.35355338, %v6655_v26  ;;  %v10160_v26 = vld [vmem:[#allocation6_spill] sm:$0xff] }
 0x23c   : > { %v8776_v0 = vpop.xlane.xlu0 %2711  ;;  %v2849_v56 = vsub.f32 %v10156_v16, %v8515_v22  ;;  %v2831_v16 = vsub.f32 %v10160_v26, %v8531_v5 }
 0x23d   : > { %10146 = vst [vmem:[#allocation117_spill] sm:$0xff] %v8776_v0  ;;  %2789 = vmax.xlane.f32.xlu1 %v8773_v60  ;;  %v6687_v0 = vpop.f32.mrf.mxu1  ;;  %10157 = vst [vmem:[#allocation4_spill] sm:$0xff] %v8804_v46 }
 0x23e   : > { %v8781_v51 = vpop.xlane.xlu1 %2713  ;;  %v3027_v22 = vmul.f32 1.442695, %v2849_v56  ;;  %v2991_v5 = vmul.f32 1.442695, %v2831_v16 }
 0x23f   : > { %10148 = vst [vmem:[#allocation119_spill] sm:$0xff] %v8781_v51  ;;  %2751 = vmax.xlane.f32.xlu0 %v8778_v58  ;;  %v10154_v51 = vld [vmem:[#allocation3_spill] sm:$0xff]  ;;  %v2400_v52 = vpop.f32.mrf.mxu1 }
 0x240   : > { %v8786_v6 = vpop.xlane.xlu0 %2691  ;;  %v2834_v32 = vsub.f32 %v10154_v51, %v8508_v37  ;;  %10155 = vst [vmem:[#allocation3_spill] sm:$0xff] %v8797_v63  ;;  %v10158_v37 = vld [vmem:[#allocation5_spill] sm:$0xff] }
 0x241   : > { %10150 = vst [vmem:[#allocation121_spill] sm:$0xff] %v8786_v6  ;;  %2753 = vmax.xlane.f32.xlu1 %v8783_v27  ;;  %v2995_v6 = vmul.f32 1.442695, %v2833_v54  ;;  %v6656_v27 = vpop.f32.mrf.mxu0  ;;  %v2850_v7 = vsub.f32 %v10158_v37, %v8524_v36 }
 0x242   : > { %v8793_v60 = vpop.xlane.xlu1 %2693  ;;  %v2997_v28 = vmul.f32 1.442695, %v2834_v32  ;;  %v8811_v51 = vmul.f32 0.35355338, %v6656_v27  ;;  %v10162_v27 = vld [vmem:[#allocation7_spill] sm:$0xff] }
 0x243   : > { %10153 = vst [vmem:[#allocation122_spill] sm:$0xff] %v8793_v60  ;;  %2783 = vmax.xlane.f32.xlu0 %v8790_v25  ;;  %7273 = vpow2.f32 %v2995_v6  ;;  %v8818_v25 = vmul.f32 0.35355338, %v6687_v0  ;;  %v3029_v36 = vmul.f32 1.442695, %v2850_v7  ;;  %v2832_v37 = vsub.f32 %v10162_v27, %v8540_v40  ;;  %v2178_v6 = vpop.f32.mrf.mxu0  ;;  %v10164_v0 = vld [vmem:[#allocation8_spill] sm:$0xff] }
 0x244   : > { %v8800_v58 = vpop.xlane.xlu0 %2723  ;;  %10159 = vst [vmem:[#allocation5_spill] sm:$0xff] %v8811_v51  ;;  %7275 = vpow2.f32 %v2997_v28  ;;  %v2847_v26 = vsub.f32 %v10164_v0, %v8547_v35  ;;  %v8839_v27 = vmul.f32 0.35355338, %v2178_v6 }
 0x245   : > { %2785 = vmax.xlane.f32.xlu1 %v8797_v63  ;;  %10161 = vst [vmem:[#allocation6_spill] sm:$0xff] %v8818_v25  ;;  %v6688_v63 = vpop.f32.mrf.mxu1  ;;  %7277 = vpow2.f32 %v3027_v22  ;;  %v2993_v40 = vmul.f32 1.442695, %v2832_v37  ;;  %v10168_v37 = vld [vmem:[#allocation11_spill] sm:$0xff] }
 0x246   : > { %v8807_v60 = vpop.xlane.xlu1 %2725  ;;  %7279 = vpow2.f32 %v3029_v36  ;;  %v3023_v35 = vmul.f32 1.442695, %v2847_v26  ;;  %v2838_v6 = vsub.f32 %v10168_v37, %v8572_v49  ;;  %v10172_v49 = vld [vmem:[#allocation13_spill] sm:$0xff] }
 0x247   : > { %2763 = vmax.xlane.f32.xlu0 %v8804_v46  ;;  %v8825_v46 = vmul.f32 0.35355338, %v6688_v63  ;;  %v10165_v63 = vld [vmem:[#allocation9_spill] sm:$0xff]  ;;  %v2403_v22 = vpop.f32.mrf.mxu1  ;;  %7281 = vpow2.f32 %v2991_v5 }
 0x248   : > { %v8814_v54 = vpop.xlane.xlu0 %2687  ;;  %v2848_v7 = vsub.f32 %v10165_v63, %v8556_v45  ;;  %7283 = vpow2.f32 %v2993_v40  ;;  %v8853_v63 = vmul.f32 0.35355338, %v2403_v22  ;;  %v2854_v22 = vsub.f32 %v10172_v49, %v8588_v53  ;;  %v10177_v53 = vld [vmem:[#allocation16_spill] sm:$0xff] }
 0x249   : > { %2765 = vmax.xlane.f32.xlu1 %v8811_v51  ;;  %10163 = vst [vmem:[#allocation7_spill] sm:$0xff] %v8825_v46  ;;  %v8832_v51 = vmul.f32 0.35355338, %v2175_v48  ;;  %v10166_v48 = vld [vmem:[#allocation10_spill] sm:$0xff]  ;;  %7285 = vpow2.f32 %v3023_v35 }
 0x24a   : > { %v8821_v32 = vpop.xlane.xlu1 %2689  ;;  %v2837_v0 = vsub.f32 %v10166_v48, %v8563_v42  ;;  %v3025_v45 = vmul.f32 1.442695, %v2848_v7  ;;  %10169 = vst [vmem:[#allocation9_spill] sm:$0xff] %v8853_v63  ;;  %v3005_v7 = vmul.f32 1.442695, %v2838_v6  ;;  %v10174_v35 = vld [vmem:[#allocation14_spill] sm:$0xff]  ;;  %v2851_v6 = vsub.f32 %v10177_v53, %v8611_v59 }
 0x24b   : > { %2795 = vmax.xlane.f32.xlu0 %v8818_v25  ;;  %v10180_v59 = vld [vmem:[#allocation19_spill] sm:$0xff] }
 0x24c   : > { %v8828_v56 = vpop.xlane.xlu0 %2719  ;;  %v3003_v26 = vmul.f32 1.442695, %v2837_v0  ;;  %7287 = vpow2.f32 %v3025_v45  ;;  %v2835_v0 = vsub.f32 %v10174_v35, %v8595_v3  ;;  %v10178_v3 = vld [vmem:[#allocation17_spill] sm:$0xff]  ;;  %v2842_v53 = vsub.f32 %v10180_v59, %v8631_v55 }
 0x24d   : > { %2797 = vmax.xlane.f32.xlu1 %v8825_v46  ;;  %v8846_v46 = vmul.f32 0.35355338, %v2400_v52  ;;  %v10170_v52 = vld [vmem:[#allocation12_spill] sm:$0xff]  ;;  %v2852_v35 = vsub.f32 %v10178_v3, %v8619_v62 }
 0x24e   : > { %v8835_v28 = vpop.xlane.xlu1 %2721  ;;  %v2853_v42 = vsub.f32 %v10170_v52, %v8579_v34  ;;  %7289 = vpow2.f32 %v3003_v26  ;;  %v10175_v52 = vld [vmem:[#allocation15_spill] sm:$0xff] }
 0x24f   : > { %2759 = vmax.xlane.f32.xlu0 %v8832_v51  ;;  %10167 = vst [vmem:[#allocation8_spill] sm:$0xff] %v8846_v46  ;;  %7291 = vpow2.f32 %v3005_v7  ;;  %v8896_v7 = vld [vmem:[%s8484_s24 + $0xb8] sm:$0xff]  }
 0x250   : > { %v8842_v16 = vpop.xlane.xlu0 %2699  ;;  %v8861_v48 = vpop.eup %7273  ;;  %v3035_v34 = vmul.f32 1.442695, %v2853_v42  ;;  %v10179_v42 = vld [vmem:[#allocation18_spill] sm:$0xff]  ;;  %6753 = vmatprep.subr.bf16.mxu0 %v8896_v7 }
 0x251   : > { %2761 = vmax.xlane.f32.xlu1 %v8839_v27  ;;  %10171 = vst [vmem:[#allocation10_spill] sm:$0xff] %v8861_v48  ;;  %v8868_v37 = vpop.eup %7275 }
 0x252   : > { %v8849_v36 = vpop.xlane.xlu1 %2701  ;;  %10173 = vst [vmem:[#allocation11_spill] sm:$0xff] %v8868_v37  ;;  %v8877_v45 = vpop.eup %7277  ;;  %7293 = vpow2.f32 %v3035_v34 }
 0x253   : > { %2791 = vmax.xlane.f32.xlu0 %v8846_v46  ;;  %10176 = vst [vmem:[#allocation12_spill] sm:$0xff] %v8877_v45  ;;  %v8886_v26 = vpop.eup %7279 }
 0x254   : > { %v8856_v5 = vpop.xlane.xlu0 %2731  ;;  %v8898_v62 = vpop.eup %7281 }
 0x255   : > { %2793 = vmax.xlane.f32.xlu1 %v8853_v63  ;;  %v2836_v63 = vsub.f32 %v10175_v52, %v8604_v57  ;;  %v2999_v57 = vmul.f32 1.442695, %v2835_v0  ;;  %v2841_v52 = vsub.f32 %v10179_v42, %v8626_v2  ;;  %v10181_v0 = vld [vmem:[#allocation20_spill] sm:$0xff]  ;;  %v3033_v2 = vmul.f32 1.442695, %v2852_v35  ;;  %v8908_v55 = vpop.eup %7283 }
 0x256   : > { %v8863_v40 = vpop.xlane.xlu1 %2733  ;;  %v2857_v3 = vsub.f32 %v10181_v0, %v8636_v31  ;;  %v8912_v31 = vld [vmem:[%s8484_s24 + $0xf8] sm:$0xff]  }
 0x257   : > { %3251 = vadd.xlane.f32.xlu0 %v8861_v48  ;;  %v3037_v48 = vmul.f32 1.442695, %v2854_v22  ;;  %v3031_v22 = vmul.f32 1.442695, %v2851_v6  ;;  %v3011_v42 = vmul.f32 1.442695, %v2841_v52  ;;  %6785 = vmatprep.subr.bf16.mxu1 %v8912_v31 }
 0x258   : > { %v8872_v25 = vpop.xlane.xlu0 %2695  ;;  %v3013_v6 = vmul.f32 1.442695, %v2842_v53  ;;  %v3043_v35 = vmul.f32 1.442695, %v2857_v3  ;;  %v10187_v3 = vld [vmem:[#allocation22_spill] sm:$0xff] }
 0x259   : > { %3253 = vadd.xlane.f32.xlu1 %v8868_v37  ;;  %v3001_v37 = vmul.f32 1.442695, %v2836_v63  ;;  %7295 = vpow2.f32 %v3037_v48  ;;  %v10182_v63 = vld [vmem:[#allocation21_spill] sm:$0xff]  ;;  %v8914_v48 = vpop.eup %7285 }
 0x25a   : > { %v8881_v49 = vpop.xlane.xlu1 %2697  ;;  %v2858_v34 = vsub.f32 %v10182_v63, %v8641_v8  ;;  %7297 = vpow2.f32 %v2999_v57  ;;  %10183 = vst [vmem:[#allocation13_spill] sm:$0xff] %v8914_v48  ;;  %v8918_v57 = vpop.eup %7287 }
 0x25b   : > { %3283 = vadd.xlane.f32.xlu0 %v8877_v45  ;;  %7299 = vpow2.f32 %v3001_v37  ;;  %10184 = vst [vmem:[#allocation14_spill] sm:$0xff] %v8918_v57  ;;  %v8921_v52 = vpop.eup %7289 }
 0x25c   : > { %v8890_v46 = vpop.xlane.xlu0 %2727  ;;  %7301 = vpow2.f32 %v3031_v22  ;;  %v3045_v0 = vmul.f32 1.442695, %v2858_v34  ;;  %10185 = vst [vmem:[#allocation15_spill] sm:$0xff] %v8921_v52  ;;  %v8924_v22 = vpop.eup %7291  ;;  %v10188_v34 = vld [vmem:[#allocation23_spill] sm:$0xff] }
 0x25d   : > { %3285 = vadd.xlane.f32.xlu1 %v8886_v26  ;;  %7303 = vpow2.f32 %v3033_v2  ;;  %10186 = vst [vmem:[#allocation16_spill] sm:$0xff] %v8924_v22  ;;  %v2839_v2 = vsub.f32 %v10187_v3, %v8646_v19 }
 0x25e   : > { %v8902_v45 = vpop.xlane.xlu1 %2729  ;;  %7305 = vpow2.f32 %v3011_v42  ;;  %v2840_v42 = vsub.f32 %v10188_v34, %v8651_v30  ;;  %v10193_v30 = vld [vmem:[#allocation26_spill] sm:$0xff] }
 0x25f   : > { %3247 = vadd.xlane.f32.xlu0 %v8898_v62  ;;  %7307 = vpow2.f32 %v3013_v6  ;;  %v8931_v6 = vpop.eup %7293  ;;  %v2845_v3 = vsub.f32 %v10193_v30, %v8666_v21  ;;  %v10197_v30 = vld [vmem:[#allocation29_spill] sm:$0xff] }
 0x260   : > { %v3188_v59 = vpop.xlane.xlu0 %3187  ;;  %7309 = vpow2.f32 %v3043_v35  ;;  %10189 = vst [vmem:[#allocation17_spill] sm:$0xff] %v8931_v6  ;;  %v10190_v35 = vld [vmem:[#allocation24_spill] sm:$0xff] }
 0x261   : > { %3249 = vadd.xlane.f32.xlu1 %v8908_v55  ;;  %7311 = vpow2.f32 %v3045_v0  ;;  %v2855_v0 = vsub.f32 %v10190_v35, %v8656_v10  ;;  %v10194_v10 = vld [vmem:[#allocation27_spill] sm:$0xff] }
 0x262   : > { %v3190_v8 = vpop.xlane.xlu1 %3189 }
 0x263   : > { %3279 = vadd.xlane.f32.xlu0 %v8914_v48  ;;  %7313 = vrcp.f32 %v3190_v8  ;;  %v3007_v8 = vmul.f32 1.442695, %v2839_v2 }
 0x264   : > { %v3220_v37 = vpop.xlane.xlu0 %3219 }
 0x265   : > { %3281 = vadd.xlane.f32.xlu1 %v8918_v57  ;;  %v10191_v57 = vld [vmem:[#allocation25_spill] sm:$0xff] }
 0x266   : > { %v3222_v53 = vpop.xlane.xlu1 %3221  ;;  %v2856_v48 = vsub.f32 %v10191_v57, %v8661_v4  ;;  %v8938_v19 = vpop.eup %7295  ;;  %v3039_v57 = vmul.f32 1.442695, %v2855_v0 }
 0x267   : > { %3259 = vadd.xlane.f32.xlu0 %v8921_v52  ;;  %10192 = vst [vmem:[#allocation18_spill] sm:$0xff] %v8938_v19  ;;  %v8942_v34 = vpop.eup %7297 }
 0x268   : > { %v3184_v63 = vpop.xlane.xlu0 %3183  ;;  %v8947_v4 = vpop.eup %7299 }
 0x269   : > { %7315 = vrcp.f32 %v3184_v63  ;;  %3261 = vadd.xlane.f32.xlu1 %v8924_v22  ;;  %v3009_v22 = vmul.f32 1.442695, %v2840_v42  ;;  %v8951_v21 = vpop.eup %7301  ;;  %v2862_v42 = vsub.f32 %v10197_v30, %v8681_v11 }
 0x26a   : > { %7317 = vrcp.f32 %v3188_v59  ;;  %v3186_v52 = vpop.xlane.xlu1 %3185  ;;  %v2846_v59 = vsub.f32 %v10194_v10, %v8671_v44  ;;  %10196 = vst [vmem:[#allocation19_spill] sm:$0xff] %v8951_v21  ;;  %v8956_v44 = vpop.eup %7303 }
 0x26b   : > { %7319 = vrcp.f32 %v3186_v52  ;;  %3291 = vadd.xlane.f32.xlu0 %v8931_v6  ;;  %v10195_v52 = vld [vmem:[#allocation28_spill] sm:$0xff]  ;;  %10198 = vst [vmem:[#allocation20_spill] sm:$0xff] %v8956_v44  ;;  %v8958_v0 = vpop.eup %7305 }
 0x26c   : > { %7321 = vrcp.f32 %v3222_v53  ;;  %v3216_v63 = vpop.xlane.xlu0 %3215  ;;  %v2861_v2 = vsub.f32 %v10195_v52, %v8676_v23  ;;  %v3041_v53 = vmul.f32 1.442695, %v2856_v48  ;;  %10199 = vst [vmem:[#allocation21_spill] sm:$0xff] %v8958_v0  ;;  %v3021_v23 = vmul.f32 1.442695, %v2846_v59  ;;  %v10200_v59 = vld [vmem:[#allocation30_spill] sm:$0xff] }
 0x26d   : > { %7323 = vrcp.f32 %v3216_v63  ;;  %3293 = vadd.xlane.f32.xlu1 %v8938_v19  ;;  %v3019_v63 = vmul.f32 1.442695, %v2845_v3 }
 0x26e   : > { %7325 = vrcp.f32 %v3220_v37  ;;  %v3218_v35 = vpop.xlane.xlu1 %3217  ;;  %v8961_v37 = vpop.eup %7307  ;;  %v3051_v48 = vmul.f32 1.442695, %v2861_v2 }
 0x26f   : > { %7327 = vrcp.f32 %v3218_v35  ;;  %3255 = vadd.xlane.f32.xlu0 %v8942_v34  ;;  %v8963_v11 = vpop.eup %7309  ;;  %v3053_v35 = vmul.f32 1.442695, %v2862_v42 }
 0x270   : > { %7329 = vpow2.f32 %v3007_v8  ;;  %v3196_v10 = vpop.xlane.xlu0 %3195  ;;  %v8966_v8 = vpop.eup %7311 }
 0x271   : > { %7331 = vpow2.f32 %v3009_v22  ;;  %3257 = vadd.xlane.f32.xlu1 %v8947_v4  ;;  %v7314_v30 = vpop.eup %7313 }
 0x272   : > { %7333 = vpow2.f32 %v3039_v57  ;;  %v3198_v52 = vpop.xlane.xlu1 %3197  ;;  %v2843_v57 = vsub.f32 %v10200_v59, %v8686_v15 }
 0x273   : > { %7335 = vpow2.f32 %v3041_v53  ;;  %3287 = vadd.xlane.f32.xlu0 %v8951_v21  ;;  %v10201_v53 = vld [vmem:[#allocation31_spill] sm:$0xff] }
 0x274   : > { %7337 = vpow2.f32 %v3019_v63  ;;  %v3228_v3 = vpop.xlane.xlu0 %3227  ;;  %v2844_v42 = vsub.f32 %v10201_v53, %v8691_v29 }
 0x275   : > { %7339 = vpow2.f32 %v3021_v23  ;;  %3289 = vadd.xlane.f32.xlu1 %v8956_v44  ;;  %v3570_v23 = vmul.f32 %v7314_v30, %v8462_v38  ;;  %v10202_v44 = vld [vmem:[#allocation32_spill] sm:$0xff]  ;;  %v10203_v30 = vld [vmem:[#allocation33_spill] sm:$0xff] }
 0x276   : > { %v7316_v22 = vpop.eup %7315  ;;  %7341 = vpow2.f32 %v3051_v48  ;;  %v3230_v2 = vpop.xlane.xlu1 %3229  ;;  %v2859_v29 = vsub.f32 %v10202_v44, %v8696_v24  ;;  %v3017_v38 = vmul.f32 1.442695, %v2844_v42 }
 0x277   : > { %v7318_v6 = vpop.eup %7317  ;;  %7343 = vpow2.f32 %v3053_v35  ;;  %3267 = vadd.xlane.f32.xlu0 %v8958_v0  ;;  %v3567_v48 = vmul.f32 %v7316_v22, %v8489_v33  ;;  %v3015_v35 = vmul.f32 1.442695, %v2843_v57  ;;  %v7162_v57 = vld [vmem:[%s8484_s24 + $0xb0] sm:$0xff]  }
 0x278   : > { %v7320_v21 = vpop.eup %7319  ;;  %7345 = vrcp.f32 %v3198_v52  ;;  %v3192_v63 = vpop.xlane.xlu0 %3191  ;;  %v3569_v52 = vmul.f32 %v7318_v6, %v8457_v50  ;;  %v10205_v6 = vld [vmem:[#allocation35_spill] sm:$0xff] }
 0x279   : > { %v7322_v19 = vpop.eup %7321  ;;  %7347 = vrcp.f32 %v3192_v63  ;;  %3269 = vadd.xlane.f32.xlu1 %v8961_v37  ;;  %v3568_v15 = vmul.f32 %v7320_v21, %v8497_v17  ;;  %v2860_v63 = vsub.f32 %v10203_v30, %v8701_v1  ;;  %v10204_v21 = vld [vmem:[#allocation34_spill] sm:$0xff]  ;;  %v2866_v42 = vsub.f32 %v10205_v6, %v8711_v47 }
 0x27a   : > { %v7324_v59 = vpop.eup %7323  ;;  %7349 = vrcp.f32 %v3196_v10  ;;  %v3194_v53 = vpop.xlane.xlu1 %3193  ;;  %v2865_v22 = vsub.f32 %v10204_v21, %v8706_v20  ;;  %v3696_v44 = vpack.c.bf16 %v3570_v23, %v3569_v52  ;;  %v3586_v10 = vmul.f32 %v7322_v19, %v8476_v9  ;;  %v10206_v23 = vld [vmem:[#allocation36_spill] sm:$0xff]  ;;  %v10207_v52 = vld [vmem:[#allocation37_spill] sm:$0xff] }
 0x27b   : > { %v7326_v0 = vpop.eup %7325  ;;  %7351 = vrcp.f32 %v3194_v53  ;;  %3299 = vadd.xlane.f32.xlu0 %v8963_v11  ;;  %v3695_v33 = vpack.c.bf16 %v3568_v15, %v3567_v48  ;;  %v3583_v1 = vmul.f32 %v7324_v59, %v8506_v12  ;;  %v2881_v9 = vsub.f32 %v10206_v23, %v8716_v13 }
 0x27c   : > { %v7328_v17 = vpop.eup %7327  ;;  %7353 = vrcp.f32 %v3230_v2  ;;  %v3224_v24 = vpop.xlane.xlu0 %3223  ;;  %v3047_v2 = vmul.f32 1.442695, %v2859_v29  ;;  %v3585_v47 = vmul.f32 %v7326_v0, %v8471_v18  ;;  %v3049_v53 = vmul.f32 1.442695, %v2860_v63  ;;  %v7164_v18 = vld [vmem:[%s8484_s24 + $0xa8] sm:$0xff]  }
 0x27d   : > { %v8988_v50 = vpop.eup %7329  ;;  %7355 = vrcp.f32 %v3224_v24  ;;  %6705 = vmatprep.mubr.bf16.mxu0 %v3695_v33  ;;  %3301 = vadd.xlane.f32.xlu1 %v8966_v8  ;;  %v3584_v48 = vmul.f32 %v7328_v17, %v8513_v39  ;;  %v2882_v12 = vsub.f32 %v10207_v52, %v8721_v41  ;;  %v3061_v30 = vmul.f32 1.442695, %v2866_v42  ;;  %v7165_v41 = vld [vmem:[%s8484_s24 + $0xf0] sm:$0xff]   ;;  %v10212_v52 = vld [vmem:[#allocation70_spill] sm:$0xff] }
 0x27e   : > { %v8995_v20 = vpop.eup %7331  ;;  %7357 = vrcp.f32 %v3228_v3  ;;  %6706 = vmatmul.mubr.bf16.vlgmr.msra.gmra.mxu0 %v3696_v44  ;;  %v3226_v19 = vpop.xlane.xlu1 %3225  ;;  %v3059_v3 = vmul.f32 1.442695, %v2865_v22  ;;  %v3704_v29 = vpack.c.bf16 %v3586_v10, %v3585_v47  ;;  %v7166_v22 = vld [vmem:[%s8484_s24 + $0xa0] sm:$0xff]   ;;  %v7167_v44 = vld [vmem:[%s8484_s24 + $0xe8] sm:$0xff]  }
 0x27f   : > { %v9000_v15 = vpop.eup %7333  ;;  %7359 = vrcp.f32 %v3226_v19  ;;  %3263 = vadd.xlane.f32.xlu0 %v8988_v50  ;;  %v3703_v39 = vpack.c.bf16 %v3584_v48, %v3583_v1  ;;  %6754 = vmatpush3.bf16.msra.mxu0 %v8896_v7  ;;  %v3091_v7 = vmul.f32 1.442695, %v2881_v9  ;;  %v3093_v17 = vmul.f32 1.442695, %v2882_v12  ;;  %v10210_v48 = vld [vmem:[#allocation39_spill] sm:$0xff]  ;;  %v7168_v19 = vld [vmem:[%s8484_s24 + $0x98] sm:$0xff]  }
 0x280   : > { %v9006_v13 = vpop.eup %7335  ;;  %7361 = vpow2.f32 %v3015_v35  ;;  %v3204_v59 = vpop.xlane.xlu0 %3203  ;;  %6755 = vmatprep.subr.bf16.mxu0 %v7162_v57 }
 0x281   : > { %v9009_v0 = vpop.eup %7337  ;;  %7363 = vpow2.f32 %v3017_v38  ;;  %6737 = vmatprep.mubr.bf16.mxu1 %v3703_v39  ;;  %3265 = vadd.xlane.f32.xlu1 %v8995_v20 }
 0x282   : > { %v9013_v63 = vpop.eup %7339  ;;  %7365 = vpow2.f32 %v3047_v2  ;;  %6738 = vmatmul.mubr.bf16.vlgmr.msra.gmra.mxu1 %v3704_v29  ;;  %v3206_v35 = vpop.xlane.xlu1 %3205  ;;  %v10214_v29 = vld [vmem:[#allocation40_spill] sm:$0xff] }
 0x283   : > { %v9015_v33 = vpop.eup %7341  ;;  %7367 = vpow2.f32 %v3049_v53  ;;  %3295 = vadd.xlane.f32.xlu0 %v9000_v15  ;;  %6756 = vmatpush3.bf16.msra.mxu0 %v7162_v57  ;;  %v10209_v57 = vld [vmem:[#allocation38_spill] sm:$0xff] }
 0x284   : > { %10208 = vst [vmem:[#allocation22_spill] sm:$0xff] %v9015_v33  ;;  %v9018_v38 = vpop.eup %7343  ;;  %7369 = vpow2.f32 %v3059_v3  ;;  %v9020_v21 = vpop.xlane.xlu0 %3235  ;;  %6786 = vmatpush3.bf16.msra.mxu1 %v8912_v31  ;;  %6757 = vmatprep.subr.bf16.mxu0 %v7164_v18  ;;  %v2863_v6 = vsub.f32 %v10209_v57, %v8726_v14  ;;  %v2864_v31 = vsub.f32 %v10210_v48, %v8731_v61  ;;  %v10211_v14 = vld [vmem:[#allocation69_spill] sm:$0xff] }
 0x285   : > { %v7346_v24 = vpop.eup %7345  ;;  %7371 = vpow2.f32 %v3061_v30  ;;  %3297 = vadd.xlane.f32.xlu1 %v9006_v13  ;;  %6787 = vmatprep.subr.bf16.mxu1 %v7165_v41  ;;  %v10213_v3 = vld [vmem:[#allocation101_spill] sm:$0xff]  ;;  %v10215_v30 = vld [vmem:[#allocation66_spill] sm:$0xff] }
 0x286   : > { %v7348_v10 = vpop.eup %7347  ;;  %7373 = vpow2.f32 %v3091_v7  ;;  %v3238_v42 = vpop.xlane.xlu1 %3237  ;;  %v3574_v9 = vmul.f32 %v7346_v24, %v8529_v43  ;;  %v3055_v39 = vmul.f32 1.442695, %v2863_v6  ;;  %v7169_v7 = vld [vmem:[%s8484_s24 + $0xe0] sm:$0xff]   ;;  %v10216_v24 = vld [vmem:[#allocation103_spill] sm:$0xff]  ;;  %v10217_v57 = vld [vmem:[#allocation41_spill] sm:$0xff] }
 0x287   : > { %v7350_v1 = vpop.eup %7349  ;;  %7375 = vpow2.f32 %v3093_v17  ;;  %3275 = vadd.xlane.f32.xlu0 %v9009_v0  ;;  %6758 = vmatpush3.bf16.msra.mxu0 %v7164_v18  ;;  %v3571_v53 = vmul.f32 %v7348_v10, %v10211_v14  ;;  %v2879_v18 = vsub.f32 %v10214_v29, %v10213_v3  ;;  %v3057_v17 = vmul.f32 1.442695, %v2864_v31  ;;  %v7170_v31 = vld [vmem:[%s8484_s24 + $0x90] sm:$0xff]  }
 0x288   : > { %v7352_v2 = vpop.eup %7351  ;;  %7377 = vrcp.f32 %v3206_v35  ;;  %v3200_v23 = vpop.xlane.xlu0 %3199  ;;  %6788 = vmatpush3.bf16.msra.mxu1 %v7165_v41  ;;  %6759 = vmatprep.subr.bf16.mxu0 %v7166_v22  ;;  %v3573_v41 = vmul.f32 %v7350_v1, %v10215_v30  ;;  %v2880_v48 = vsub.f32 %v10217_v57, %v10216_v24  ;;  %v10220_v1 = vld [vmem:[#allocation68_spill] sm:$0xff]  ;;  %v10222_v30 = vld [vmem:[#allocation43_spill] sm:$0xff] }
 0x289   : > { %v7354_v47 = vpop.eup %7353  ;;  %7379 = vrcp.f32 %v3200_v23  ;;  %3277 = vadd.xlane.f32.xlu1 %v9013_v63  ;;  %v3572_v61 = vmul.f32 %v7352_v2, %v10212_v52  ;;  %6789 = vmatprep.subr.bf16.mxu1 %v7167_v44  ;;  %v10218_v2 = vld [vmem:[#allocation105_spill] sm:$0xff]  ;;  %v10219_v23 = vld [vmem:[#allocation42_spill] sm:$0xff] }
 0x28a   : > { %v7356_v12 = vpop.eup %7355  ;;  %7381 = vrcp.f32 %v3204_v59  ;;  %v3202_v43 = vpop.xlane.xlu1 %3201  ;;  %v2869_v14 = vsub.f32 %v10219_v23, %v10218_v2  ;;  %v3698_v52 = vpack.c.bf16 %v3574_v9, %v3573_v41  ;;  %v3590_v3 = vmul.f32 %v7354_v47, %v10220_v1  ;;  %v10226_v41 = vld [vmem:[#allocation44_spill] sm:$0xff]  ;;  %v10227_v23 = vld [vmem:[#allocation67_spill] sm:$0xff] }
 0x28b   : > { %v7358_v35 = vpop.eup %7357  ;;  %7383 = vrcp.f32 %v3202_v43  ;;  %3307 = vadd.xlane.f32.xlu0 %v9015_v33  ;;  %v3697_v10 = vpack.c.bf16 %v3572_v61, %v3571_v53  ;;  %6760 = vmatpush3.bf16.msra.mxu0 %v7166_v22  ;;  %v10221_v43 = vld [vmem:[#allocation107_spill] sm:$0xff]  ;;  %v3087_v47 = vmul.f32 1.442695, %v2879_v18 }
 0x28c   : > { %v7360_v6 = vpop.eup %7359  ;;  %7385 = vrcp.f32 %v3238_v42  ;;  %v3232_v59 = vpop.xlane.xlu0 %3231  ;;  %6790 = vmatpush3.bf16.msra.mxu1 %v7167_v44  ;;  %6761 = vmatprep.subr.bf16.mxu0 %v7168_v19  ;;  %v2870_v24 = vsub.f32 %v10222_v30, %v10221_v43  ;;  %v10223_v22 = vld [vmem:[#allocation71_spill] sm:$0xff]  ;;  %v10224_v42 = vld [vmem:[#allocation72_spill] sm:$0xff]  ;;  %v10225_v44 = vld [vmem:[#allocation109_spill] sm:$0xff]  ;;  %v3589_v1 = vmul.f32 %v7358_v35, %v10227_v23 }
 0x28d   : > { %v9047_v29 = vpop.eup %7361  ;;  %7387 = vrcp.f32 %v3232_v59  ;;  %6709 = vmatprep.mubr.bf16.mxu0 %v3697_v10  ;;  %3309 = vadd.xlane.f32.xlu1 %v9018_v38  ;;  %v3587_v53 = vmul.f32 %v7356_v12, %v10223_v22  ;;  %v3588_v61 = vmul.f32 %v7360_v6, %v10224_v42  ;;  %v2885_v57 = vsub.f32 %v10226_v41, %v10225_v44  ;;  %v7171_v10 = vld [vmem:[%s8484_s24 + $0xd8] sm:$0xff]   ;;  %v10229_v43 = vld [vmem:[#allocation111_spill] sm:$0xff]  ;;  %v7173_v41 = vld [vmem:[%s8484_s24 + $0xd0] sm:$0xff]  }
 0x28e   : > { %v9054_v9 = vpop.eup %7363  ;;  %7389 = vrcp.f32 %v9020_v21  ;;  %6710 = vmatmul.mubr.bf16.gmra.mxu0 %v3698_v52  ;;  %v3234_v2 = vpop.xlane.xlu1 %3233  ;;  %6791 = vmatprep.subr.bf16.mxu1 %v7169_v7  ;;  %v3089_v12 = vmul.f32 1.442695, %v2880_v48  ;;  %v10230_v6 = vld [vmem:[#allocation45_spill] sm:$0xff]  ;;  %v3067_v52 = vmul.f32 1.442695, %v2869_v14  ;;  %v3706_v22 = vpack.c.bf16 %v3590_v3, %v3589_v1  ;;  %v7172_v42 = vld [vmem:[%s8484_s24 + $0x88] sm:$0xff]  }
 0x28f   : > { %v9061_v59 = vpop.eup %7365  ;;  %v2886_v30 = vsub.f32 %v10230_v6, %v10229_v43  ;;  %7391 = vrcp.f32 %v3234_v2  ;;  %3271 = vadd.xlane.f32.xlu0 %v9047_v29  ;;  %v3705_v18 = vpack.c.bf16 %v3588_v61, %v3587_v53  ;;  %6762 = vmatpush3.bf16.msra.mxu0 %v7168_v19  ;;  %v3069_v48 = vmul.f32 1.442695, %v2870_v24  ;;  %v7174_v24 = vld [vmem:[%s8484_s24 + $0x80] sm:$0xff]   ;;  %v7175_v61 = vld [vmem:[%s8484_s24 + $0xc8] sm:$0xff]   ;;  %v10236_v1 = vld [vmem:[#allocation113_spill] sm:$0xff] }
 0x290   : > { %10228 = vst [vmem:[#allocation23_spill] sm:$0xff] %v9061_v59  ;;  %v9066_v21 = vpop.eup %7367  ;;  %7393 = vpow2.f32 %v3055_v39  ;;  %v3212_v35 = vpop.xlane.xlu0 %3211  ;;  %6792 = vmatpush3.bf16.msra.mxu1 %v7169_v7  ;;  %6763 = vmatprep.subr.bf16.mxu0 %v7170_v31  ;;  %v3099_v19 = vmul.f32 1.442695, %v2885_v57  ;;  %v10238_v6 = vld [vmem:[#allocation74_spill] sm:$0xff]  ;;  %v10242_v33 = vld [vmem:[#allocation115_spill] sm:$0xff] }
 0x291   : > { %10231 = vst [vmem:[#allocation24_spill] sm:$0xff] %v9066_v21  ;;  %v9069_v44 = vpop.eup %7369  ;;  %7395 = vpow2.f32 %v3057_v17  ;;  %6741 = vmatprep.mubr.bf16.mxu1 %v3705_v18  ;;  %3273 = vadd.xlane.f32.xlu1 %v9054_v9  ;;  %v3101_v14 = vmul.f32 1.442695, %v2886_v30 }
 0x292   : > { %10232 = vst [vmem:[#allocation25_spill] sm:$0xff] %v9069_v44  ;;  %v9073_v2 = vpop.eup %7371  ;;  %7397 = vpow2.f32 %v3087_v47  ;;  %6742 = vmatmul.mubr.bf16.gmra.mxu1 %v3706_v22  ;;  %v3214_v39 = vpop.xlane.xlu1 %3213  ;;  %6793 = vmatprep.subr.bf16.mxu1 %v7171_v10 }
 0x293   : > { %10233 = vst [vmem:[#allocation26_spill] sm:$0xff] %v9073_v2  ;;  %v9075_v7 = vpop.eup %7373  ;;  %7399 = vpow2.f32 %v3089_v12  ;;  %3303 = vadd.xlane.f32.xlu0 %v9061_v59  ;;  %6764 = vmatpush3.bf16.msra.mxu0 %v7170_v31  ;;  %v10237_v12 = vld [vmem:[#allocation46_spill] sm:$0xff] }
 0x294   : > { %10234 = vst [vmem:[#allocation27_spill] sm:$0xff] %v9075_v7  ;;  %v9078_v17 = vpop.eup %7375  ;;  %7401 = vpow2.f32 %v3067_v52  ;;  %v3244_v3 = vpop.xlane.xlu0 %3243  ;;  %6794 = vmatpush3.bf16.msra.mxu1 %v7171_v10  ;;  %6765 = vmatprep.subr.bf16.mxu0 %v7172_v42  ;;  %v2867_v10 = vsub.f32 %v10237_v12, %v10236_v1  ;;  %v10239_v52 = vld [vmem:[#allocation77_spill] sm:$0xff] }
 0x295   : > { %10235 = vst [vmem:[#allocation28_spill] sm:$0xff] %v9078_v17  ;;  %v7378_v53 = vpop.eup %7377  ;;  %7403 = vpow2.f32 %v3069_v48  ;;  %3305 = vadd.xlane.f32.xlu1 %v9066_v21  ;;  %6795 = vmatprep.subr.bf16.mxu1 %v7173_v41  ;;  %v10240_v48 = vld [vmem:[#allocation78_spill] sm:$0xff]  ;;  %v10241_v1 = vld [vmem:[#allocation73_spill] sm:$0xff] }
 0x296   : > { %v7380_v47 = vpop.eup %7379  ;;  %7405 = vpow2.f32 %v3099_v19  ;;  %v3246_v57 = vpop.xlane.xlu1 %3245  ;;  %v3578_v30 = vmul.f32 %v7378_v53, %v10238_v6  ;;  %v10243_v53 = vld [vmem:[#allocation47_spill] sm:$0xff]  ;;  %v3063_v6 = vmul.f32 1.442695, %v2867_v10  ;;  %v9104_v10 = vld [vmem:[%s8484_s24 + $0x138] sm:$0xff]  }
 0x297   : > { %v7382_v23 = vpop.eup %7381  ;;  %7407 = vpow2.f32 %v3101_v14  ;;  %3315 = vadd.xlane.f32.xlu0 %v9069_v44  ;;  %6766 = vmatpush3.bf16.msra.mxu0 %v7172_v42  ;;  %v3575_v22 = vmul.f32 %v7380_v47, %v10239_v52 }
 0x298   : > { %v7384_v31 = vpop.eup %7383  ;;  %7409 = vrcp.f32 %v3214_v39  ;;  %v3208_v43 = vpop.xlane.xlu0 %3207  ;;  %6796 = vmatpush3.bf16.msra.mxu1 %v7173_v41  ;;  %6767 = vmatprep.subr.bf16.mxu0 %v7174_v24  ;;  %v3577_v12 = vmul.f32 %v7382_v23, %v10241_v1  ;;  %v7176_v39 = vld [vmem:[%s8484_s24 + $0xc0] sm:$0xff]   ;;  %v2868_v41 = vsub.f32 %v10243_v53, %v10242_v33  ;;  %v10246_v1 = vld [vmem:[#allocation117_spill] sm:$0xff]  ;;  %v10248_v33 = vld [vmem:[#allocation79_spill] sm:$0xff] }
 0x299   : > { %v7386_v18 = vpop.eup %7385  ;;  %7411 = vrcp.f32 %v3208_v43  ;;  %3317 = vadd.xlane.f32.xlu1 %v9073_v2  ;;  %v3576_v19 = vmul.f32 %v7384_v31, %v10240_v48  ;;  %6797 = vmatprep.subr.bf16.mxu1 %v7175_v61  ;;  %v10247_v2 = vld [vmem:[#allocation48_spill] sm:$0xff]  ;;  %v10254_v53 = vld [vmem:[#allocation49_spill] sm:$0xff] }
 0x29a   : > { %v7388_v42 = vpop.eup %7387  ;;  %7413 = vrcp.f32 %v3212_v35  ;;  %v3210_v14 = vpop.xlane.xlu1 %3209  ;;  %v3700_v52 = vpack.c.bf16 %v3578_v30, %v3577_v12  ;;  %v10244_v35 = vld [vmem:[#allocation76_spill] sm:$0xff]  ;;  %v2883_v21 = vsub.f32 %v10247_v2, %v10246_v1  ;;  %v10251_v30 = vld [vmem:[#allocation75_spill] sm:$0xff]  ;;  %v3065_v2 = vmul.f32 1.442695, %v2868_v41 }
 0x29b   : > { %v7390_v44 = vpop.eup %7389  ;;  %7415 = vrcp.f32 %v3210_v14  ;;  %3347 = vadd.xlane.f32.xlu0 %v9075_v7  ;;  %v3699_v43 = vpack.c.bf16 %v3576_v19, %v3575_v22  ;;  %6768 = vmatpush3.bf16.msra.mxu0 %v7174_v24  ;;  %v3594_v48 = vmul.f32 %v7386_v18, %v10244_v35  ;;  %v3591_v22 = vmul.f32 %v7388_v42, %v10248_v33  ;;  %v10249_v24 = vld [vmem:[#allocation80_spill] sm:$0xff]  ;;  %v10253_v12 = vld [vmem:[#allocation119_spill] sm:$0xff]  ;;  %v10258_v35 = vld [vmem:[#allocation50_spill] sm:$0xff] }
 0x29c   : > { %v7392_v47 = vpop.eup %7391  ;;  %7417 = vrcp.f32 %v3246_v57  ;;  %v3240_v31 = vpop.xlane.xlu0 %3239  ;;  %6798 = vmatpush3.bf16.msra.mxu1 %v7175_v61  ;;  %v3593_v18 = vmul.f32 %v7390_v44, %v10251_v30  ;;  %6817 = vmatprep.subr.bf16.mxu0 %v9104_v10  ;;  %v3095_v41 = vmul.f32 1.442695, %v2883_v21  ;;  %v9125_v33 = vld [vmem:[%s8484_s24 + $0x178] sm:$0xff]   ;;  %v10262_v30 = vld [vmem:[#allocation52_spill] sm:$0xff]  ;;  %v10264_v7 = vld [vmem:[#allocation82_spill] sm:$0xff] }
 0x29d   : > { %v9096_v23 = vpop.eup %7393  ;;  %7419 = vrcp.f32 %v3240_v31  ;;  %6713 = vmatprep.mubr.bf16.mxu0 %v3699_v43  ;;  %3349 = vadd.xlane.f32.xlu1 %v9078_v17  ;;  %v3592_v19 = vmul.f32 %v7392_v47, %v10249_v24  ;;  %v2884_v43 = vsub.f32 %v10254_v53, %v10253_v12  ;;  %v10267_v17 = vld [vmem:[#allocation86_spill] sm:$0xff] }
 0x29e   : > { %10245 = vst [vmem:[#allocation29_spill] sm:$0xff] %v9096_v23  ;;  %v9106_v57 = vpop.eup %7395  ;;  %7421 = vrcp.f32 %v3244_v3  ;;  %6714 = vmatmul.mubr.bf16.gmra.mxu0 %v3700_v52  ;;  %v3242_v61 = vpop.xlane.xlu1 %3241  ;;  %6799 = vmatprep.subr.bf16.mxu1 %v7176_v39  ;;  %v3708_v31 = vpack.c.bf16 %v3594_v48, %v3593_v18  ;;  %v10257_v52 = vld [vmem:[#allocation121_spill] sm:$0xff]  ;;  %v10260_v48 = vld [vmem:[#allocation122_spill] sm:$0xff]  ;;  %v2889_v18 = vsub.f32 %v10262_v30, %v8800_v58 }
 0x29f   : > { %10250 = vst [vmem:[#allocation30_spill] sm:$0xff] %v9106_v57  ;;  %v9109_v14 = vpop.eup %7397  ;;  %7423 = vrcp.f32 %v3242_v61  ;;  %3311 = vadd.xlane.f32.xlu0 %v9096_v23  ;;  %v3707_v42 = vpack.c.bf16 %v3592_v19, %v3591_v22  ;;  %v2873_v1 = vsub.f32 %v10258_v35, %v10257_v52  ;;  %v10263_v35 = vld [vmem:[#allocation53_spill] sm:$0xff] }
 0x2a0   : > { %10252 = vst [vmem:[#allocation31_spill] sm:$0xff] %v9109_v14  ;;  %v9115_v47 = vpop.eup %7399  ;;  %v9117_v3 = vpop.xlane.xlu0 %2739  ;;  %6800 = vmatpush3.bf16.msra.mxu1 %v7176_v39  ;;  %7425 = vpow2.f32 %v3063_v6  ;;  %v3097_v39 = vmul.f32 1.442695, %v2884_v43  ;;  %v10261_v6 = vld [vmem:[#allocation51_spill] sm:$0xff]  ;;  %v3107_v58 = vmul.f32 1.442695, %v2889_v18 }
 0x2a1   : > { %10255 = vst [vmem:[#allocation32_spill] sm:$0xff] %v9115_v47  ;;  %v9119_v44 = vpop.eup %7401  ;;  %6745 = vmatprep.mubr.bf16.mxu1 %v3707_v42  ;;  %3313 = vadd.xlane.f32.xlu1 %v9106_v57  ;;  %7427 = vpow2.f32 %v3065_v2  ;;  %v2874_v21 = vsub.f32 %v10261_v6, %v10260_v48  ;;  %v3075_v42 = vmul.f32 1.442695, %v2873_v1  ;;  %v2890_v48 = vsub.f32 %v10263_v35, %v8807_v60 }
 0x2a2   : > { %10256 = vst [vmem:[#allocation33_spill] sm:$0xff] %v9119_v44  ;;  %v9127_v22 = vpop.eup %7403  ;;  %6746 = vmatmul.mubr.bf16.gmra.mxu1 %v3708_v31  ;;  %v9129_v24 = vpop.xlane.xlu1 %2741  ;;  %6849 = vmatprep.subr.bf16.mxu1 %v9125_v33  ;;  %7429 = vpow2.f32 %v3095_v41 }
 0x2a3   : > { %10259 = vst [vmem:[#allocation34_spill] sm:$0xff] %v9127_v22  ;;  %v9131_v19 = vpop.eup %7405  ;;  %3343 = vadd.xlane.f32.xlu0 %v9109_v14  ;;  %7431 = vpow2.f32 %v3097_v39  ;;  %v3077_v52 = vmul.f32 1.442695, %v2874_v21  ;;  %v10266_v39 = vld [vmem:[#allocation85_spill] sm:$0xff]  ;;  %v3109_v59 = vmul.f32 1.442695, %v2890_v48 }
 0x2a4   : > { %v9137_v61 = vpop.eup %7407  ;;  %v9141_v12 = vpop.xlane.xlu0 %2771  ;;  %7433 = vpow2.f32 %v3075_v42 }
 0x2a5   : > { %v7410_v53 = vpop.eup %7409  ;;  %3345 = vadd.xlane.f32.xlu1 %v9115_v47  ;;  %v10265_v47 = vld [vmem:[#allocation54_spill] sm:$0xff]  ;;  %7435 = vpow2.f32 %v3077_v52 }
 0x2a6   : > { %v7412_v2 = vpop.eup %7411  ;;  %v9144_v43 = vpop.xlane.xlu1 %2773  ;;  %v3582_v41 = vmul.f32 %v7410_v53, %v10264_v7  ;;  %v2871_v14 = vsub.f32 %v10265_v47, %v8814_v54  ;;  %v10269_v7 = vld [vmem:[#allocation55_spill] sm:$0xff]  ;;  %7437 = vpow2.f32 %v3107_v58 }
 0x2a7   : > { %v7414_v31 = vpop.eup %7413  ;;  %3323 = vadd.xlane.f32.xlu0 %v9119_v44  ;;  %v3579_v21 = vmul.f32 %v7412_v2, %v10266_v39  ;;  %v10268_v44 = vld [vmem:[#allocation81_spill] sm:$0xff]  ;;  %v2872_v53 = vsub.f32 %v10269_v7, %v8821_v32  ;;  %v10273_v32 = vld [vmem:[#allocation88_spill] sm:$0xff]  ;;  %v10274_v58 = vld [vmem:[#allocation83_spill] sm:$0xff]  ;;  %7439 = vpow2.f32 %v3109_v59 }
 0x2a8   : > { %v7416_v6 = vpop.eup %7415  ;;  %v9149_v30 = vpop.xlane.xlu0 %2735  ;;  %v3581_v18 = vmul.f32 %v7414_v31, %v10268_v44  ;;  %v3071_v39 = vmul.f32 1.442695, %v2871_v14  ;;  %v10272_v31 = vld [vmem:[#allocation87_spill] sm:$0xff]  ;;  %v10275_v14 = vld [vmem:[#allocation57_spill] sm:$0xff] }
 0x2a9   : > { %v7418_v1 = vpop.eup %7417  ;;  %3325 = vadd.xlane.f32.xlu1 %v9127_v22  ;;  %v3580_v57 = vmul.f32 %v7416_v6, %v10267_v17  ;;  %v10270_v17 = vld [vmem:[#allocation84_spill] sm:$0xff] }
 0x2aa   : > { %v7420_v60 = vpop.eup %7419  ;;  %v9157_v35 = vpop.xlane.xlu1 %2737  ;;  %v3702_v2 = vpack.c.bf16 %v3582_v41, %v3581_v18  ;;  %v3598_v6 = vmul.f32 %v7418_v1, %v10270_v17  ;;  %v10271_v22 = vld [vmem:[#allocation56_spill] sm:$0xff]  ;;  %v3073_v1 = vmul.f32 1.442695, %v2872_v53  ;;  %7441 = vpow2.f32 %v3071_v39  ;;  %v10277_v53 = vld [vmem:[#allocation59_spill] sm:$0xff] }
 0x2ab   : > { %v7422_v23 = vpop.eup %7421  ;;  %3355 = vadd.xlane.f32.xlu0 %v9131_v19  ;;  %v3701_v54 = vpack.c.bf16 %v3580_v57, %v3579_v21  ;;  %v2887_v44 = vsub.f32 %v10271_v22, %v8828_v56  ;;  %v3595_v52 = vmul.f32 %v7420_v60, %v10272_v31  ;;  %v2888_v21 = vsub.f32 %v10275_v14, %v8835_v28 }
 0x2ac   : > { %v7424_v47 = vpop.eup %7423  ;;  %v9163_v42 = vpop.xlane.xlu0 %2767  ;;  %v3597_v41 = vmul.f32 %v7422_v23, %v10274_v58  ;;  %7443 = vpow2.f32 %v3073_v1  ;;  %v2878_v17 = vsub.f32 %v10277_v53, %v8849_v36  ;;  %v10279_v36 = vld [vmem:[#allocation61_spill] sm:$0xff] }
 0x2ad   : > { %6717 = vmatprep.mubr.bf16.mxu0 %v3701_v54  ;;  %3357 = vadd.xlane.f32.xlu1 %v9137_v61  ;;  %v3596_v48 = vmul.f32 %v7424_v47, %v10273_v32  ;;  %v9171_v7 = vpop.eup %7425  ;;  %v3103_v54 = vmul.f32 1.442695, %v2887_v44  ;;  %v10276_v47 = vld [vmem:[#allocation58_spill] sm:$0xff]  ;;  %v3105_v23 = vmul.f32 1.442695, %v2888_v21  ;;  %v10278_v44 = vld [vmem:[#allocation60_spill] sm:$0xff]  ;;  %v2894_v58 = vsub.f32 %v10279_v36, %v8863_v40 }
 0x2ae   : > { %6718 = vmatmul.mubr.bf16.gmra.mxu0 %v3702_v2  ;;  %v9173_v57 = vpop.xlane.xlu1 %2769  ;;  %v9179_v22 = vpop.eup %7427  ;;  %v3710_v18 = vpack.c.bf16 %v3598_v6, %v3597_v41  ;;  %v2877_v2 = vsub.f32 %v10276_v47, %v8842_v16  ;;  %v2893_v31 = vsub.f32 %v10278_v44, %v8856_v5  ;;  %v10281_v21 = vld [vmem:[#allocation62_spill] sm:$0xff]  ;;  %v10282_v40 = vld [vmem:[#allocation63_spill] sm:$0xff] }
 0x2af   : > { %3319 = vadd.xlane.f32.xlu0 %v9171_v7  ;;  %v3709_v56 = vpack.c.bf16 %v3596_v48, %v3595_v52  ;;  %v9186_v59 = vpop.eup %7429  ;;  %7445 = vpow2.f32 %v3103_v54  ;;  %v3085_v48 = vmul.f32 1.442695, %v2878_v17  ;;  %v3117_v54 = vmul.f32 1.442695, %v2894_v58  ;;  %v10284_v17 = vld [vmem:[#allocation64_spill] sm:$0xff] }
 0x2b0   : > { %v9181_v60 = vpop.xlane.xlu0 %2747  ;;  %v9193_v6 = vpop.eup %7431  ;;  %v3083_v16 = vmul.f32 1.442695, %v2877_v2  ;;  %7447 = vpow2.f32 %v3105_v23  ;;  %v3115_v5 = vmul.f32 1.442695, %v2893_v31  ;;  %v2876_v47 = vsub.f32 %v10282_v40, %v8881_v49  ;;  %v10285_v49 = vld [vmem:[#allocation65_spill] sm:$0xff] }
 0x2b1   : > { %6749 = vmatprep.mubr.bf16.mxu1 %v3709_v56  ;;  %3321 = vadd.xlane.f32.xlu1 %v9179_v22  ;;  %v9200_v52 = vpop.eup %7433  ;;  %v2875_v56 = vsub.f32 %v10281_v21, %v8872_v25  ;;  %v2891_v25 = vsub.f32 %v10284_v17, %v8890_v46  ;;  %v10286_v46 = vld [vmem:[#allocation89_spill] sm:$0xff] }
 0x2b2   : > { %6750 = vmatmul.mubr.bf16.gmra.mxu1 %v3710_v18  ;;  %v9188_v28 = vpop.xlane.xlu1 %2749  ;;  %v9207_v41 = vpop.eup %7435  ;;  %7449 = vpow2.f32 %v3083_v16  ;;  %v3081_v31 = vmul.f32 1.442695, %v2876_v47  ;;  %v2897_v21 = vsub.f32 %v10286_v46, %v9117_v3  ;;  %v10290_v3 = vld [vmem:[#allocation91_spill] sm:$0xff] }
 0x2b3   : > { %3351 = vadd.xlane.f32.xlu0 %v9186_v59  ;;  %v9211_v14 = vpop.eup %7437  ;;  %7451 = vpow2.f32 %v3085_v48  ;;  %v3079_v53 = vmul.f32 1.442695, %v2875_v56  ;;  %v2892_v48 = vsub.f32 %v10285_v49, %v8902_v45  ;;  %v10288_v45 = vld [vmem:[#allocation90_spill] sm:$0xff]  ;;  %v2913_v49 = vsub.f32 %v10290_v3, %v9141_v12  ;;  %v10294_v12 = vld [vmem:[#allocation93_spill] sm:$0xff] }
 0x2b4   : > { %v9195_v39 = vpop.xlane.xlu0 %2779  ;;  %10280 = vst [vmem:[#allocation35_spill] sm:$0xff] %v9211_v14  ;;  %v9221_v2 = vpop.eup %7439  ;;  %7453 = vpow2.f32 %v3115_v5  ;;  %v3111_v5 = vmul.f32 1.442695, %v2891_v25  ;;  %v2898_v47 = vsub.f32 %v10288_v45, %v9129_v24  ;;  %v3123_v25 = vmul.f32 1.442695, %v2897_v21  ;;  %v10292_v24 = vld [vmem:[#allocation92_spill] sm:$0xff] }
 0x2b5   : > { %3353 = vadd.xlane.f32.xlu1 %v9193_v6  ;;  %10283 = vst [vmem:[#allocation36_spill] sm:$0xff] %v9221_v2  ;;  %7455 = vpow2.f32 %v3117_v54  ;;  %v3113_v40 = vmul.f32 1.442695, %v2892_v48  ;;  %v2914_v45 = vsub.f32 %v10292_v24, %v9144_v43  ;;  %v3155_v21 = vmul.f32 1.442695, %v2913_v49  ;;  %v10296_v43 = vld [vmem:[#allocation94_spill] sm:$0xff] }
 0x2b6   : > { %v9202_v32 = vpop.xlane.xlu1 %2781  ;;  %7457 = vpow2.f32 %v3079_v53  ;;  %v3125_v48 = vmul.f32 1.442695, %v2898_v47  ;;  %v2895_v3 = vsub.f32 %v10294_v12, %v9149_v30  ;;  %v2896_v24 = vsub.f32 %v10296_v43, %v9157_v35  ;;  %v10298_v30 = vld [vmem:[#allocation95_spill] sm:$0xff]  ;;  %v10300_v35 = vld [vmem:[#allocation96_spill] sm:$0xff] }
 0x2b7   : > { %3331 = vadd.xlane.f32.xlu0 %v9200_v52  ;;  %v9228_v16 = vpop.eup %7441  ;;  %7459 = vpow2.f32 %v3081_v31  ;;  %v3157_v47 = vmul.f32 1.442695, %v2914_v45  ;;  %v2911_v12 = vsub.f32 %v10298_v30, %v9163_v42  ;;  %v2912_v43 = vsub.f32 %v10300_v35, %v9173_v57  ;;  %v10302_v42 = vld [vmem:[#allocation97_spill] sm:$0xff]  ;;  %v10304_v57 = vld [vmem:[#allocation98_spill] sm:$0xff] }
 0x2b8   : > { %v9209_v1 = vpop.xlane.xlu0 %2743  ;;  %7461 = vpow2.f32 %v3111_v5  ;;  %v3119_v49 = vmul.f32 1.442695, %v2895_v3  ;;  %v3121_v45 = vmul.f32 1.442695, %v2896_v24  ;;  %v2901_v30 = vsub.f32 %v10302_v42, %v9181_v60  ;;  %v10306_v60 = vld [vmem:[#allocation99_spill] sm:$0xff] }
 0x2b9   : > { %3333 = vadd.xlane.f32.xlu1 %v9207_v41  ;;  %v9235_v36 = vpop.eup %7443  ;;  %7463 = vpow2.f32 %v3113_v40  ;;  %v3151_v3 = vmul.f32 1.442695, %v2911_v12  ;;  %v3153_v24 = vmul.f32 1.442695, %v2912_v43  ;;  %v2902_v35 = vsub.f32 %v10304_v57, %v9188_v28  ;;  %v10308_v28 = vld [vmem:[#allocation100_spill] sm:$0xff] }
 0x2ba   : > { %v9216_v18 = vpop.xlane.xlu1 %2745  ;;  %7465 = vpow2.f32 %v3123_v25  ;;  %v3131_v12 = vmul.f32 1.442695, %v2901_v30  ;;  %v2917_v42 = vsub.f32 %v10306_v60, %v9195_v39  ;;  %v2918_v57 = vsub.f32 %v10308_v28, %v9202_v32  ;;  %v10311_v60 = vld [vmem:[#allocation104_spill] sm:$0xff]  ;;  %v10313_v32 = vld [vmem:[#allocation106_spill] sm:$0xff] }
 0x2bb   : > { %3363 = vadd.xlane.f32.xlu0 %v9211_v14  ;;  %7467 = vpow2.f32 %v3125_v48  ;;  %v3133_v43 = vmul.f32 1.442695, %v2902_v35 }
 0x2bc   : > { %v9223_v23 = vpop.xlane.xlu0 %2775  ;;  %v9242_v56 = vpop.eup %7445  ;;  %7469 = vpow2.f32 %v3155_v21  ;;  %v3163_v39 = vmul.f32 1.442695, %v2917_v42 }
 0x2bd   : > { %3365 = vadd.xlane.f32.xlu1 %v9221_v2  ;;  %10287 = vst [vmem:[#allocation37_spill] sm:$0xff] %v9242_v56  ;;  %v9249_v17 = vpop.eup %7447  ;;  %7471 = vpow2.f32 %v3157_v47  ;;  %v2915_v35 = vsub.f32 %v10313_v32, %v9223_v23  ;;  %v10316_v23 = vld [vmem:[#allocation112_spill] sm:$0xff] }
 0x2be   : > { %v9230_v44 = vpop.xlane.xlu1 %2777  ;;  %10289 = vst [vmem:[#allocation38_spill] sm:$0xff] %v9249_v17  ;;  %7473 = vpow2.f32 %v3119_v49 }
 0x2bf   : > { %3327 = vadd.xlane.f32.xlu0 %v9228_v16  ;;  %v9256_v46 = vpop.eup %7449  ;;  %7475 = vpow2.f32 %v3121_v45 }
 0x2c0   : > { %v9237_v58 = vpop.xlane.xlu0 %2755  ;;  %10291 = vst [vmem:[#allocation39_spill] sm:$0xff] %v9256_v46  ;;  %v9263_v14 = vpop.eup %7451  ;;  %7477 = vpow2.f32 %v3151_v3  ;;  %v10310_v3 = vld [vmem:[#allocation102_spill] sm:$0xff] }
 0x2c1   : > { %3329 = vadd.xlane.f32.xlu1 %v9235_v36  ;;  %10293 = vst [vmem:[#allocation69_spill] sm:$0xff] %v9263_v14  ;;  %7479 = vpow2.f32 %v3153_v24  ;;  %v2899_v30 = vsub.f32 %v10310_v3, %v9209_v1  ;;  %v10314_v1 = vld [vmem:[#allocation108_spill] sm:$0xff] }
 0x2c2   : > { %v9244_v54 = vpop.xlane.xlu1 %2757  ;;  %7481 = vpow2.f32 %v3131_v12  ;;  %v2916_v3 = vsub.f32 %v10314_v1, %v9230_v44  ;;  %v3159_v44 = vmul.f32 1.442695, %v2915_v35 }
 0x2c3   : > { %3359 = vadd.xlane.f32.xlu0 %v9242_v56  ;;  %7483 = vpow2.f32 %v3133_v43  ;;  %v3127_v42 = vmul.f32 1.442695, %v2899_v30  ;;  %v2906_v32 = vsub.f32 %v10316_v23, %v9244_v54 }
 0x2c4   : > { %v9251_v53 = vpop.xlane.xlu0 %2787  ;;  %v3161_v30 = vmul.f32 1.442695, %v2916_v3 }
 0x2c5   : > { %3361 = vadd.xlane.f32.xlu1 %v9249_v17  ;;  %v9270_v17 = vpop.eup %7453  ;;  %7485 = vpow2.f32 %v3163_v39  ;;  %v3141_v23 = vmul.f32 1.442695, %v2906_v32  ;;  %v10321_v32 = vld [vmem:[#allocation118_spill] sm:$0xff] }
 0x2c6   : > { %v9258_v31 = vpop.xlane.xlu1 %2789  ;;  %10295 = vst [vmem:[#allocation70_spill] sm:$0xff] %v9270_v17 }
 0x2c7   : > { %3339 = vadd.xlane.f32.xlu0 %v9256_v46  ;;  %v9277_v46 = vpop.eup %7455 }
 0x2c8   : > { %v9265_v5 = vpop.xlane.xlu0 %2751  ;;  %10297 = vst [vmem:[#allocation101_spill] sm:$0xff] %v9277_v46 }
 0x2c9   : > { %3341 = vadd.xlane.f32.xlu1 %v9263_v14  ;;  %v9284_v14 = vpop.eup %7457 }
 0x2ca   : > { %v9272_v40 = vpop.xlane.xlu1 %2753  ;;  %10299 = vst [vmem:[#allocation40_spill] sm:$0xff] %v9284_v14 }
 0x2cb   : > { %3371 = vadd.xlane.f32.xlu0 %v9270_v17  ;;  %v9291_v17 = vpop.eup %7459 }
 0x2cc   : > { %v9279_v25 = vpop.xlane.xlu0 %2783  ;;  %10301 = vst [vmem:[#allocation66_spill] sm:$0xff] %v9291_v17 }
 0x2cd   : > { %3373 = vadd.xlane.f32.xlu1 %v9277_v46  ;;  %v9298_v46 = vpop.eup %7461 }
 0x2ce   : > { %v9286_v48 = vpop.xlane.xlu1 %2785  ;;  %10303 = vst [vmem:[#allocation103_spill] sm:$0xff] %v9298_v46 }
 0x2cf   : > { %3335 = vadd.xlane.f32.xlu0 %v9284_v14  ;;  %v9305_v14 = vpop.eup %7463 }
 0x2d0   : > { %v9293_v21 = vpop.xlane.xlu0 %2763  ;;  %10305 = vst [vmem:[#allocation41_spill] sm:$0xff] %v9305_v14 }
 0x2d1   : > { %3337 = vadd.xlane.f32.xlu1 %v9291_v17  ;;  %v9312_v17 = vpop.eup %7465 }
 0x2d2   : > { %v9300_v47 = vpop.xlane.xlu1 %2765  ;;  %10307 = vst [vmem:[#allocation105_spill] sm:$0xff] %v9312_v17 }
 0x2d3   : > { %3367 = vadd.xlane.f32.xlu0 %v9298_v46  ;;  %v9319_v46 = vpop.eup %7467 }
 0x2d4   : > { %v9307_v49 = vpop.xlane.xlu0 %2795  ;;  %10309 = vst [vmem:[#allocation42_spill] sm:$0xff] %v9319_v46  ;;  %v9328_v24 = vpop.eup %7469 }
 0x2d5   : > { %3369 = vadd.xlane.f32.xlu1 %v9305_v14  ;;  %v2900_v14 = vsub.f32 %v10311_v60, %v9216_v18  ;;  %10312 = vst [vmem:[#allocation68_spill] sm:$0xff] %v9328_v24  ;;  %v9337_v12 = vpop.eup %7471  ;;  %v10315_v18 = vld [vmem:[#allocation110_spill] sm:$0xff] }
 0x2d6   : > { %v9314_v45 = vpop.xlane.xlu1 %2797  ;;  %v2905_v60 = vsub.f32 %v10315_v18, %v9237_v58  ;;  %v9346_v43 = vpop.eup %7473  ;;  %v10318_v58 = vld [vmem:[#allocation116_spill] sm:$0xff] }
 0x2d7   : > { %3379 = vadd.xlane.f32.xlu0 %v9312_v17  ;;  %v3165_v17 = vmul.f32 1.442695, %v2918_v57  ;;  %v3129_v2 = vmul.f32 1.442695, %v2900_v14  ;;  %v10317_v57 = vld [vmem:[#allocation114_spill] sm:$0xff]  ;;  %v2922_v18 = vsub.f32 %v10318_v58, %v9258_v31  ;;  %v9355_v14 = vpop.eup %7475 }
 0x2d8   : > { %v9323_v56 = vpop.xlane.xlu0 %2759  ;;  %v2921_v1 = vsub.f32 %v10317_v57, %v9251_v53  ;;  %v3139_v54 = vmul.f32 1.442695, %v2905_v60  ;;  %v9358_v35 = vpop.eup %7477 }
 0x2d9   : > { %3381 = vadd.xlane.f32.xlu1 %v9319_v46  ;;  %7487 = vpow2.f32 %v3165_v17  ;;  %v3173_v3 = vmul.f32 1.442695, %v2922_v18  ;;  %v9361_v31 = vpop.eup %7479 }
 0x2da   : > { %v9332_v28 = vpop.xlane.xlu1 %2761  ;;  %7489 = vpow2.f32 %v3127_v42  ;;  %v3171_v53 = vmul.f32 1.442695, %v2921_v1 }
 0x2db   : > { %3411 = vadd.xlane.f32.xlu0 %v9328_v24  ;;  %7491 = vpow2.f32 %v3129_v2  ;;  %v9364_v2 = vpop.eup %7481 }
 0x2dc   : > { %v9341_v46 = vpop.xlane.xlu0 %2791  ;;  %7493 = vpow2.f32 %v3159_v44  ;;  %10319 = vst [vmem:[#allocation107_spill] sm:$0xff] %v9364_v2  ;;  %v9367_v60 = vpop.eup %7483  ;;  %v2903_v44 = vsub.f32 %v10321_v32, %v9265_v5 }
 0x2dd   : > { %3413 = vadd.xlane.f32.xlu1 %v9337_v12  ;;  %7495 = vpow2.f32 %v3161_v30  ;;  %10320 = vst [vmem:[#allocation43_spill] sm:$0xff] %v9367_v60  ;;  %v10322_v30 = vld [vmem:[#allocation120_spill] sm:$0xff]  ;;  %v9374_v18 = vpop.eup %7485 }
 0x2de   : > { %v9350_v24 = vpop.xlane.xlu1 %2793  ;;  %7497 = vpow2.f32 %v3139_v54  ;;  %v2904_v58 = vsub.f32 %v10322_v30, %v9272_v40  ;;  %10323 = vst [vmem:[#allocation71_spill] sm:$0xff] %v9374_v18  ;;  %v10324_v54 = vld [vmem:[#allocation2_spill] sm:$0xff]  ;;  %v10326_v40 = vld [vmem:[#allocation4_spill] sm:$0xff] }
 0x2df   : > { %3375 = vadd.xlane.f32.xlu0 %v9346_v43  ;;  %7499 = vpow2.f32 %v3141_v23  ;;  %v2919_v23 = vsub.f32 %v10324_v54, %v9279_v25  ;;  %v2909_v32 = vsub.f32 %v10326_v40, %v9293_v21  ;;  %v10327_v25 = vld [vmem:[#allocation5_spill] sm:$0xff] }
 0x2e0   : > { %v3252_v39 = vpop.xlane.xlu0 %3251  ;;  %7501 = vpow2.f32 %v3171_v53 }
 0x2e1   : > { %3377 = vadd.xlane.f32.xlu1 %v9355_v14  ;;  %7503 = vpow2.f32 %v3173_v3  ;;  %v10325_v3 = vld [vmem:[#allocation3_spill] sm:$0xff]  ;;  %v3167_v54 = vmul.f32 1.442695, %v2919_v23 }
 0x2e2   : > { %v3254_v17 = vpop.xlane.xlu1 %3253 }
 0x2e3   : > { %3407 = vadd.xlane.f32.xlu0 %v9358_v35  ;;  %7505 = vrcp.f32 %v3254_v17  ;;  %v3135_v17 = vmul.f32 1.442695, %v2903_v44  ;;  %v2907_v44 = vsub.f32 %v8832_v51, %v9323_v56 }
 0x2e4   : > { %v3284_v57 = vpop.xlane.xlu0 %3283 }
 0x2e5   : > { %3409 = vadd.xlane.f32.xlu1 %v9361_v31 }
 0x2e6   : > { %v3286_v42 = vpop.xlane.xlu1 %3285  ;;  %v9381_v5 = vpop.eup %7487 }
 0x2e7   : > { %3387 = vadd.xlane.f32.xlu0 %v9364_v2  ;;  %v2920_v2 = vsub.f32 %v10325_v3, %v9286_v48  ;;  %v9385_v30 = vpop.eup %7489  ;;  %v3147_v3 = vmul.f32 1.442695, %v2909_v32 }
 0x2e8   : > { %v3248_v1 = vpop.xlane.xlu0 %3247  ;;  %v9390_v48 = vpop.eup %7491 }
 0x2e9   : > { %7507 = vrcp.f32 %v3248_v1  ;;  %3389 = vadd.xlane.f32.xlu1 %v9367_v60  ;;  %v3137_v60 = vmul.f32 1.442695, %v2904_v58  ;;  %v9394_v21 = vpop.eup %7493  ;;  %v2908_v58 = vsub.f32 %v8839_v27, %v9332_v28 }
 0x2ea   : > { %7509 = vrcp.f32 %v3252_v39  ;;  %v3250_v53 = vpop.xlane.xlu1 %3249  ;;  %v2910_v39 = vsub.f32 %v10327_v25, %v9300_v47  ;;  %10328 = vst [vmem:[#allocation72_spill] sm:$0xff] %v9394_v21  ;;  %v9399_v47 = vpop.eup %7495 }
 0x2eb   : > { %7511 = vrcp.f32 %v3250_v53  ;;  %3419 = vadd.xlane.f32.xlu0 %v9374_v18  ;;  %10329 = vst [vmem:[#allocation109_spill] sm:$0xff] %v9399_v47  ;;  %v9401_v23 = vpop.eup %7497  ;;  %v3145_v28 = vmul.f32 1.442695, %v2908_v58 }
 0x2ec   : > { %7513 = vrcp.f32 %v3286_v42  ;;  %v3280_v1 = vpop.xlane.xlu0 %3279  ;;  %v3169_v42 = vmul.f32 1.442695, %v2920_v2  ;;  %10330 = vst [vmem:[#allocation44_spill] sm:$0xff] %v9401_v23  ;;  %v3149_v51 = vmul.f32 1.442695, %v2910_v39  ;;  %v9404_v56 = vpop.eup %7499 }
 0x2ed   : > { %7515 = vrcp.f32 %v3280_v1  ;;  %3421 = vadd.xlane.f32.xlu1 %v9381_v5  ;;  %10331 = vst [vmem:[#allocation67_spill] sm:$0xff] %v9404_v56  ;;  %v9406_v27 = vpop.eup %7501 }
 0x2ee   : > { %7517 = vrcp.f32 %v3284_v57  ;;  %v3282_v53 = vpop.xlane.xlu1 %3281  ;;  %v3143_v57 = vmul.f32 1.442695, %v2907_v44 }
 0x2ef   : > { %7519 = vrcp.f32 %v3282_v53  ;;  %3383 = vadd.xlane.f32.xlu0 %v9385_v30  ;;  %v10332_v53 = vld [vmem:[#allocation11_spill] sm:$0xff] }
 0x2f0   : > { %7521 = vpow2.f32 %v3135_v17  ;;  %v3260_v40 = vpop.xlane.xlu0 %3259  ;;  %v9409_v17 = vpop.eup %7503 }
 0x2f1   : > { %7523 = vpow2.f32 %v3137_v60  ;;  %3385 = vadd.xlane.f32.xlu1 %v9390_v48  ;;  %v7506_v1 = vpop.eup %7505 }
 0x2f2   : > { %7525 = vpow2.f32 %v3167_v54  ;;  %v3262_v2 = vpop.xlane.xlu1 %3261 }
 0x2f3   : > { %7527 = vpow2.f32 %v3169_v42  ;;  %3415 = vadd.xlane.f32.xlu0 %v9394_v21  ;;  %v3602_v42 = vmul.f32 %v7506_v1, %v10332_v53  ;;  %v10335_v1 = vld [vmem:[#allocation9_spill] sm:$0xff] }
 0x2f4   : > { %7529 = vpow2.f32 %v3147_v3  ;;  %v3292_v32 = vpop.xlane.xlu0 %3291  ;;  %v10333_v3 = vld [vmem:[#allocation8_spill] sm:$0xff]  ;;  %v2924_v53 = vsub.f32 %v10335_v1, %v9350_v24  ;;  %v10337_v24 = vld [vmem:[#allocation13_spill] sm:$0xff] }
 0x2f5   : > { %7531 = vpow2.f32 %v3149_v51  ;;  %3417 = vadd.xlane.f32.xlu1 %v9399_v47  ;;  %v2923_v18 = vsub.f32 %v10333_v3, %v9341_v46  ;;  %v10334_v47 = vld [vmem:[#allocation10_spill] sm:$0xff] }
 0x2f6   : > { %v7508_v60 = vpop.eup %7507  ;;  %7533 = vpow2.f32 %v3143_v57  ;;  %v3294_v25 = vpop.xlane.xlu1 %3293  ;;  %v10336_v3 = vld [vmem:[#allocation6_spill] sm:$0xff] }
 0x2f7   : > { %v7510_v39 = vpop.eup %7509  ;;  %7535 = vpow2.f32 %v3145_v28  ;;  %3395 = vadd.xlane.f32.xlu0 %v9401_v23  ;;  %v3599_v51 = vmul.f32 %v7508_v60, %v8898_v62  ;;  %v2925_v62 = vsub.f32 %v10336_v3, %v9307_v49 }
 0x2f8   : > { %v7512_v54 = vpop.eup %7511  ;;  %7537 = vrcp.f32 %v3262_v2  ;;  %v3256_v44 = vpop.xlane.xlu0 %3255  ;;  %v3601_v2 = vmul.f32 %v7510_v39, %v10334_v47  ;;  %v3175_v47 = vmul.f32 1.442695, %v2923_v18  ;;  %v10338_v39 = vld [vmem:[#allocation14_spill] sm:$0xff]  ;;  %v10340_v18 = vld [vmem:[#allocation7_spill] sm:$0xff] }
 0x2f9   : > { %v7514_v58 = vpop.eup %7513  ;;  %7539 = vrcp.f32 %v3256_v44  ;;  %3397 = vadd.xlane.f32.xlu1 %v9404_v56  ;;  %v3600_v57 = vmul.f32 %v7512_v54, %v8908_v55  ;;  %v7178_v54 = vld [vmem:[%s8484_s24 + $0x130] sm:$0xff]   ;;  %v3179_v3 = vmul.f32 1.442695, %v2925_v62 }
 0x2fa   : > { %v7516_v28 = vpop.eup %7515  ;;  %7541 = vrcp.f32 %v3260_v40  ;;  %v3258_v23 = vpop.xlane.xlu1 %3257  ;;  %v3712_v60 = vpack.c.bf16 %v3602_v42, %v3601_v2  ;;  %v3618_v40 = vmul.f32 %v7514_v58, %v8886_v26  ;;  %v2926_v58 = vsub.f32 %v10340_v18, %v9314_v45  ;;  %v7181_v45 = vld [vmem:[%s8484_s24 + $0x170] sm:$0xff]   ;;  %v7184_v18 = vld [vmem:[%s8484_s24 + $0x118] sm:$0xff]  }
 0x2fb   : > { %v7518_v21 = vpop.eup %7517  ;;  %7543 = vrcp.f32 %v3258_v23  ;;  %3427 = vadd.xlane.f32.xlu0 %v9406_v27  ;;  %v3711_v46 = vpack.c.bf16 %v3600_v57, %v3599_v51  ;;  %v3615_v23 = vmul.f32 %v7516_v28, %v10337_v24  ;;  %v3177_v2 = vmul.f32 1.442695, %v2924_v53 }
 0x2fc   : > { %v7520_v44 = vpop.eup %7519  ;;  %7545 = vrcp.f32 %v3294_v25  ;;  %v3288_v55 = vpop.xlane.xlu0 %3287  ;;  %v10339_v25 = vld [vmem:[#allocation12_spill] sm:$0xff] }
 0x2fd   : > { %v9427_v56 = vpop.eup %7521  ;;  %7547 = vrcp.f32 %v3288_v55  ;;  %3429 = vadd.xlane.f32.xlu1 %v9409_v17  ;;  %6769 = vmatprep.mubr.bf16.mxu0 %v3711_v46  ;;  %v3616_v51 = vmul.f32 %v7520_v44, %v10338_v39  ;;  %v3617_v26 = vmul.f32 %v7518_v21, %v10339_v25  ;;  %v7180_v44 = vld [vmem:[%s8484_s24 + $0x128] sm:$0xff]   ;;  %v10341_v25 = vld [vmem:[#allocation16_spill] sm:$0xff] }
 0x2fe   : > { %v9432_v57 = vpop.eup %7523  ;;  %7549 = vrcp.f32 %v3292_v32  ;;  %6770 = vmatmul.mubr.bf16.vlgmr.msra.gmra.mxu0 %v3712_v60  ;;  %v3290_v49 = vpop.xlane.xlu1 %3289  ;;  %v3181_v60 = vmul.f32 1.442695, %v2926_v58 }
 0x2ff   : > { %v9435_v42 = vpop.eup %7525  ;;  %7551 = vrcp.f32 %v3290_v49  ;;  %3391 = vadd.xlane.f32.xlu0 %v9427_v56  ;;  %v3719_v28 = vpack.c.bf16 %v3616_v51, %v3615_v23  ;;  %6818 = vmatpush3.bf16.msra.mxu0 %v9104_v10  ;;  %v3720_v46 = vpack.c.bf16 %v3618_v40, %v3617_v26  ;;  %v7183_v23 = vld [vmem:[%s8484_s24 + $0x168] sm:$0xff]  }
 0x300   : > { %v9441_v1 = vpop.eup %7527  ;;  %v3268_v32 = vpop.xlane.xlu0 %3267  ;;  %6819 = vmatprep.subr.bf16.mxu0 %v7178_v54  ;;  %7553 = vpow2.f32 %v3175_v47  ;;  %v7182_v47 = vld [vmem:[%s8484_s24 + $0x120] sm:$0xff]  }
 0x301   : > { %v9444_v21 = vpop.eup %7529  ;;  %3393 = vadd.xlane.f32.xlu1 %v9432_v57  ;;  %6801 = vmatprep.mubr.bf16.mxu1 %v3719_v28  ;;  %7555 = vpow2.f32 %v3177_v2 }
 0x302   : > { %v9448_v53 = vpop.eup %7531  ;;  %6802 = vmatmul.mubr.bf16.vlgmr.msra.gmra.mxu1 %v3720_v46  ;;  %v3270_v10 = vpop.xlane.xlu1 %3269  ;;  %7557 = vpow2.f32 %v3179_v3  ;;  %v10342_v3 = vld [vmem:[#allocation15_spill] sm:$0xff] }
 0x303   : > { %v9450_v55 = vpop.eup %7533  ;;  %3423 = vadd.xlane.f32.xlu0 %v9435_v42  ;;  %6820 = vmatpush3.bf16.msra.mxu0 %v7178_v54  ;;  %7559 = vpow2.f32 %v3181_v60  ;;  %v7185_v60 = vld [vmem:[%s8484_s24 + $0x160] sm:$0xff]  }
 0x304   : > { %v9453_v40 = vpop.eup %7535  ;;  %v3300_v62 = vpop.xlane.xlu0 %3299  ;;  %6850 = vmatpush3.bf16.msra.mxu1 %v9125_v33  ;;  %6821 = vmatprep.subr.bf16.mxu0 %v7180_v44  ;;  %7561 = vrcp.f32 %v3270_v10 }
 0x305   : > { %v7538_v24 = vpop.eup %7537  ;;  %3425 = vadd.xlane.f32.xlu1 %v9441_v1  ;;  %6851 = vmatprep.subr.bf16.mxu1 %v7181_v45 }
 0x306   : > { %v7540_v39 = vpop.eup %7539  ;;  %v3302_v51 = vpop.xlane.xlu1 %3301  ;;  %v3606_v26 = vmul.f32 %v7538_v24, %v10341_v25 }
 0x307   : > { %v7542_v49 = vpop.eup %7541  ;;  %3403 = vadd.xlane.f32.xlu0 %v9444_v21  ;;  %6822 = vmatpush3.bf16.msra.mxu0 %v7180_v44  ;;  %v3603_v2 = vmul.f32 %v7540_v39, %v8942_v34  ;;  %v10343_v39 = vld [vmem:[#allocation18_spill] sm:$0xff] }
 0x308   : > { %v7544_v54 = vpop.eup %7543  ;;  %v3264_v33 = vpop.xlane.xlu0 %3263  ;;  %6852 = vmatpush3.bf16.msra.mxu1 %v7181_v45  ;;  %6823 = vmatprep.subr.bf16.mxu0 %v7182_v47  ;;  %v3605_v10 = vmul.f32 %v7542_v49, %v10342_v3  ;;  %v10344_v49 = vld [vmem:[#allocation19_spill] sm:$0xff] }
 0x309   : > { %v7546_v58 = vpop.eup %7545  ;;  %7563 = vrcp.f32 %v3264_v33  ;;  %3405 = vadd.xlane.f32.xlu1 %v9448_v53  ;;  %v3604_v28 = vmul.f32 %v7544_v54, %v8947_v4  ;;  %6853 = vmatprep.subr.bf16.mxu1 %v7183_v23 }
 0x30a   : > { %v7548_v46 = vpop.eup %7547  ;;  %7565 = vrcp.f32 %v3268_v32  ;;  %v3266_v44 = vpop.xlane.xlu1 %3265  ;;  %v3714_v34 = vpack.c.bf16 %v3606_v26, %v3605_v10  ;;  %v3622_v4 = vmul.f32 %v7546_v58, %v10343_v39  ;;  %v7186_v32 = vld [vmem:[%s8484_s24 + $0x110] sm:$0xff]   ;;  %v7191_v39 = vld [vmem:[%s8484_s24 + $0x148] sm:$0xff]  }
 0x30b   : > { %v7550_v24 = vpop.eup %7549  ;;  %7567 = vrcp.f32 %v3266_v44  ;;  %3399 = vadd.xlane.f32.xlu0 %v9450_v55  ;;  %v3713_v45 = vpack.c.bf16 %v3604_v28, %v3603_v2  ;;  %6824 = vmatpush3.bf16.msra.mxu0 %v7182_v47  ;;  %v3619_v54 = vmul.f32 %v7548_v46, %v10344_v49  ;;  %v10345_v44 = vld [vmem:[#allocation20_spill] sm:$0xff] }
 0x30c   : > { %v7552_v33 = vpop.eup %7551  ;;  %7569 = vrcp.f32 %v3302_v51  ;;  %v3296_v25 = vpop.xlane.xlu0 %3295  ;;  %6854 = vmatpush3.bf16.msra.mxu1 %v7183_v23  ;;  %6825 = vmatprep.subr.bf16.mxu0 %v7184_v18  ;;  %v10346_v51 = vld [vmem:[#allocation17_spill] sm:$0xff] }
 0x30d   : > { %7571 = vrcp.f32 %v3296_v25  ;;  %3401 = vadd.xlane.f32.xlu1 %v9453_v40  ;;  %6773 = vmatprep.mubr.bf16.mxu0 %v3713_v45  ;;  %v3620_v3 = vmul.f32 %v7552_v33, %v10345_v44  ;;  %v9473_v2 = vpop.eup %7553  ;;  %v3621_v26 = vmul.f32 %v7550_v24, %v10346_v51  ;;  %v7187_v23 = vld [vmem:[%s8484_s24 + $0x158] sm:$0xff]   ;;  %v7189_v24 = vld [vmem:[%s8484_s24 + $0x150] sm:$0xff]  }
 0x30e   : > { %7573 = vrcp.f32 %v3300_v62  ;;  %6774 = vmatmul.mubr.bf16.gmra.mxu0 %v3714_v34  ;;  %v3298_v47 = vpop.xlane.xlu1 %3297  ;;  %6855 = vmatprep.subr.bf16.mxu1 %v7185_v60  ;;  %v9478_v28 = vpop.eup %7555  ;;  %v7188_v62 = vld [vmem:[%s8484_s24 + $0x108] sm:$0xff]  }
 0x30f   : > { %7575 = vrcp.f32 %v3298_v47  ;;  %3431 = vadd.xlane.f32.xlu0 %v9473_v2  ;;  %v3721_v58 = vpack.c.bf16 %v3620_v3, %v3619_v54  ;;  %6826 = vmatpush3.bf16.msra.mxu0 %v7184_v18  ;;  %v3722_v10 = vpack.c.bf16 %v3622_v4, %v3621_v26  ;;  %v9483_v45 = vpop.eup %7557  ;;  %v9493_v47 = vld [vmem:[%s8484_s24 + $0x1b8] sm:$0xff]  }
 0x310   : > { %v3276_v46 = vpop.xlane.xlu0 %3275  ;;  %6856 = vmatpush3.bf16.msra.mxu1 %v7185_v60  ;;  %6827 = vmatprep.subr.bf16.mxu0 %v7186_v32  ;;  %10347 = vst [vmem:[#allocation111_spill] sm:$0xff] %v9483_v45  ;;  %v9486_v18 = vpop.eup %7559  ;;  %v7190_v60 = vld [vmem:[%s8484_s24 + $0x100] sm:$0xff]  }
 0x311   : > { %3433 = vadd.xlane.f32.xlu1 %v9478_v28  ;;  %6805 = vmatprep.mubr.bf16.mxu1 %v3721_v58  ;;  %10348 = vst [vmem:[#allocation45_spill] sm:$0xff] %v9486_v18  ;;  %v7562_v34 = vpop.eup %7561  ;;  %v7192_v58 = vld [vmem:[%s8484_s24 + $0x140] sm:$0xff]  }
 0x312   : > { %6806 = vmatmul.mubr.bf16.gmra.mxu1 %v3722_v10  ;;  %v3278_v33 = vpop.xlane.xlu1 %3277  ;;  %6857 = vmatprep.subr.bf16.mxu1 %v7187_v23  ;;  %v3610_v3 = vmul.f32 %v7562_v34, %v8961_v37 }
 0x313   : > { %3435 = vadd.xlane.f32.xlu0 %v9483_v45  ;;  %6828 = vmatpush3.bf16.msra.mxu0 %v7186_v32  ;;  %7577 = vrcp.f32 %v3278_v33 }
 0x314   : > { %v3308_v25 = vpop.xlane.xlu0 %3307  ;;  %6858 = vmatpush3.bf16.msra.mxu1 %v7187_v23  ;;  %6829 = vmatprep.subr.bf16.mxu0 %v7188_v62 }
 0x315   : > { %3437 = vadd.xlane.f32.xlu1 %v9486_v18  ;;  %6859 = vmatprep.subr.bf16.mxu1 %v7189_v24  ;;  %v10349_v18 = vld [vmem:[#allocation21_spill] sm:$0xff] }
 0x316   : > { %v7564_v4 = vpop.eup %7563  ;;  %v3310_v49 = vpop.xlane.xlu1 %3309 }
 0x317   : > { %v7566_v54 = vpop.eup %7565  ;;  %6830 = vmatpush3.bf16.msra.mxu0 %v7188_v62  ;;  %v3607_v26 = vmul.f32 %v7564_v4, %v8988_v50 }
 0x318   : > { %v7568_v44 = vpop.eup %7567  ;;  %v3272_v32 = vpop.xlane.xlu0 %3271  ;;  %6860 = vmatpush3.bf16.msra.mxu1 %v7189_v24  ;;  %6831 = vmatprep.subr.bf16.mxu0 %v7190_v60  ;;  %v3609_v33 = vmul.f32 %v7566_v54, %v10349_v18  ;;  %v9504_v18 = vld [vmem:[%s8484_s24 + $0x1f8] sm:$0xff]  }
 0x319   : > { %v7570_v51 = vpop.eup %7569  ;;  %7579 = vrcp.f32 %v3272_v32  ;;  %v3608_v23 = vmul.f32 %v7568_v44, %v8995_v20  ;;  %6861 = vmatprep.subr.bf16.mxu1 %v7191_v39 }
 0x31a   : > { %v7572_v10 = vpop.eup %7571  ;;  %7581 = vrcp.f32 %v3276_v46  ;;  %v3274_v62 = vpop.xlane.xlu1 %3273  ;;  %v3716_v32 = vpack.c.bf16 %v3610_v3, %v3609_v33  ;;  %v3626_v50 = vmul.f32 %v7570_v51, %v8966_v8 }
 0x31b   : > { %v7574_v45 = vpop.eup %7573  ;;  %7583 = vrcp.f32 %v3274_v62  ;;  %v3715_v37 = vpack.c.bf16 %v3608_v23, %v3607_v26  ;;  %6832 = vmatpush3.bf16.msra.mxu0 %v7190_v60  ;;  %v3623_v20 = vmul.f32 %v7572_v10, %v9000_v15 }
 0x31c   : > { %v7576_v24 = vpop.eup %7575  ;;  %7585 = vrcp.f32 %v3310_v49  ;;  %v3304_v34 = vpop.xlane.xlu0 %3303  ;;  %6862 = vmatpush3.bf16.msra.mxu1 %v7191_v39  ;;  %6881 = vmatprep.subr.bf16.mxu0 %v9493_v47  ;;  %v3625_v4 = vmul.f32 %v7574_v45, %v8963_v11 }
 0x31d   : > { %7587 = vrcp.f32 %v3304_v34  ;;  %6777 = vmatprep.mubr.bf16.mxu0 %v3715_v37  ;;  %v3624_v46 = vmul.f32 %v7576_v24, %v9006_v13  ;;  %6863 = vmatprep.subr.bf16.mxu1 %v7192_v58 }
 0x31e   : > { %7589 = vrcp.f32 %v3308_v25  ;;  %6778 = vmatmul.mubr.bf16.gmra.mxu0 %v3716_v32  ;;  %v3306_v60 = vpop.xlane.xlu1 %3305  ;;  %v3724_v39 = vpack.c.bf16 %v3626_v50, %v3625_v4  ;;  %v10352_v4 = vld [vmem:[#allocation22_spill] sm:$0xff] }
 0x31f   : > { %7591 = vrcp.f32 %v3306_v60  ;;  %v3723_v49 = vpack.c.bf16 %v3624_v46, %v3623_v20  ;;  %v10350_v20 = vld [vmem:[#allocation23_spill] sm:$0xff]  ;;  %v10351_v46 = vld [vmem:[#allocation24_spill] sm:$0xff] }
 0x320   : > { %v3316_v8 = vpop.xlane.xlu0 %3315  ;;  %6864 = vmatpush3.bf16.msra.mxu1 %v7192_v58  ;;  %v7578_v13 = vpop.eup %7577 }
 0x321   : > { %6809 = vmatprep.mubr.bf16.mxu1 %v3723_v49  ;;  %6913 = vmatprep.subr.bf16.mxu1 %v9504_v18  ;;  %v3614_v11 = vmul.f32 %v7578_v13, %v9013_v63 }
 0x322   : > { %6810 = vmatmul.mubr.bf16.gmra.mxu1 %v3724_v39  ;;  %v3318_v15 = vpop.xlane.xlu1 %3317 }
 0x323   : > { %7593 = vrcp.f32 %v3318_v15 }
 0x324   : > { %v3348_v54 = vpop.xlane.xlu0 %3347 }
 0x326   : > { %v7580_v44 = vpop.eup %7579  ;;  %v3350_v3 = vpop.xlane.xlu1 %3349 }
 0x327   : > { %v7582_v51 = vpop.eup %7581  ;;  %v3611_v23 = vmul.f32 %v7580_v44, %v9047_v29 }
 0x328   : > { %v7584_v25 = vpop.eup %7583  ;;  %v3312_v26 = vpop.xlane.xlu0 %3311  ;;  %v3613_v33 = vmul.f32 %v7582_v51, %v9009_v0 }
 0x329   : > { %v7586_v45 = vpop.eup %7585  ;;  %7595 = vrcp.f32 %v3312_v26  ;;  %v3612_v58 = vmul.f32 %v7584_v25, %v9054_v9 }
 0x32a   : > { %v7588_v10 = vpop.eup %7587  ;;  %7597 = vrcp.f32 %v3316_v8  ;;  %v3314_v62 = vpop.xlane.xlu1 %3313  ;;  %v3718_v50 = vpack.c.bf16 %v3614_v11, %v3613_v33  ;;  %v3630_v63 = vmul.f32 %v7586_v45, %v9018_v38 }
 0x32b   : > { %v7590_v37 = vpop.eup %7589  ;;  %7599 = vrcp.f32 %v3314_v62  ;;  %v3717_v24 = vpack.c.bf16 %v3612_v58, %v3611_v23  ;;  %v3627_v29 = vmul.f32 %v7588_v10, %v10350_v20  ;;  %v10354_v23 = vld [vmem:[#allocation29_spill] sm:$0xff]  ;;  %v10355_v10 = vld [vmem:[#allocation30_spill] sm:$0xff] }
 0x32c   : > { %v7592_v34 = vpop.eup %7591  ;;  %7601 = vrcp.f32 %v3350_v3  ;;  %v3344_v32 = vpop.xlane.xlu0 %3343  ;;  %v3629_v0 = vmul.f32 %v7590_v37, %v10352_v4  ;;  %v10358_v4 = vld [vmem:[#allocation31_spill] sm:$0xff] }
 0x32d   : > { %7603 = vrcp.f32 %v3344_v32  ;;  %6781 = vmatprep.mubr.bf16.mxu0 %v3717_v24  ;;  %v3628_v9 = vmul.f32 %v7592_v34, %v10351_v46  ;;  %v10356_v24 = vld [vmem:[#allocation25_spill] sm:$0xff]  ;;  %v10357_v46 = vld [vmem:[#allocation28_spill] sm:$0xff] }
 0x32e   : > { %7605 = vrcp.f32 %v3348_v54  ;;  %6782 = vmatmul.mubr.bf16.gmra.mxu0 %v3718_v50  ;;  %v3346_v60 = vpop.xlane.xlu1 %3345  ;;  %v3726_v39 = vpack.c.bf16 %v3630_v63, %v3629_v0  ;;  %v10353_v54 = vld [vmem:[#allocation26_spill] sm:$0xff] }
 0x32f   : > { %7607 = vrcp.f32 %v3346_v60  ;;  %v3725_v49 = vpack.c.bf16 %v3628_v9, %v3627_v29  ;;  %v7194_v60 = vld [vmem:[%s8484_s24 + $0x1b0] sm:$0xff]  }
 0x330   : > { %v3324_v8 = vpop.xlane.xlu0 %3323  ;;  %v7594_v38 = vpop.eup %7593 }
 0x331   : > { %6813 = vmatprep.mubr.bf16.mxu1 %v3725_v49  ;;  %v3634_v11 = vmul.f32 %v7594_v38, %v10353_v54  ;;  %v10359_v49 = vld [vmem:[#allocation32_spill] sm:$0xff]  ;;  %v10360_v38 = vld [vmem:[#allocation27_spill] sm:$0xff] }
 0x332   : > { %6814 = vmatmul.mubr.bf16.gmra.mxu1 %v3726_v39  ;;  %v3326_v15 = vpop.xlane.xlu1 %3325  ;;  %v7196_v54 = vld [vmem:[%s8484_s24 + $0x1a8] sm:$0xff]  }
 0x333   : > { %7609 = vrcp.f32 %v3326_v15 }
 0x334   : > { %v3356_v13 = vpop.xlane.xlu0 %3355 }
 0x336   : > { %v7596_v44 = vpop.eup %7595  ;;  %v3358_v3 = vpop.xlane.xlu1 %3357 }
 0x337   : > { %v7598_v51 = vpop.eup %7597  ;;  %v3631_v58 = vmul.f32 %v7596_v44, %v10354_v23 }
 0x338   : > { %v7600_v25 = vpop.eup %7599  ;;  %v3320_v26 = vpop.xlane.xlu0 %3319  ;;  %v3633_v34 = vmul.f32 %v7598_v51, %v10356_v24  ;;  %v7198_v24 = vld [vmem:[%s8484_s24 + $0x1a0] sm:$0xff]  }
 0x339   : > { %v7602_v45 = vpop.eup %7601  ;;  %7611 = vrcp.f32 %v3320_v26  ;;  %v3632_v62 = vmul.f32 %v7600_v25, %v10355_v10 }
 0x33a   : > { %v7604_v33 = vpop.eup %7603  ;;  %7613 = vrcp.f32 %v3324_v8  ;;  %v3322_v37 = vpop.xlane.xlu1 %3321  ;;  %v3728_v29 = vpack.c.bf16 %v3634_v11, %v3633_v34  ;;  %v3650_v9 = vmul.f32 %v7602_v45, %v10357_v46  ;;  %v7197_v45 = vld [vmem:[%s8484_s24 + $0x1f0] sm:$0xff]  }
 0x33b   : > { %v7606_v32 = vpop.eup %7605  ;;  %7615 = vrcp.f32 %v3322_v37  ;;  %v3727_v50 = vpack.c.bf16 %v3632_v62, %v3631_v58  ;;  %v3647_v0 = vmul.f32 %v7604_v33, %v10358_v4 }
 0x33c   : > { %v7608_v63 = vpop.eup %7607  ;;  %7617 = vrcp.f32 %v3358_v3  ;;  %v3352_v20 = vpop.xlane.xlu0 %3351  ;;  %v3649_v44 = vmul.f32 %v7606_v32, %v10360_v38 }
 0x33d   : > { %7619 = vrcp.f32 %v3352_v20  ;;  %6833 = vmatprep.mubr.bf16.mxu0 %v3727_v50  ;;  %v3648_v8 = vmul.f32 %v7608_v63, %v10359_v49  ;;  %v7199_v63 = vld [vmem:[%s8484_s24 + $0x1e8] sm:$0xff]  }
 0x33e   : > { %7621 = vrcp.f32 %v3356_v13  ;;  %v6707_v39 = vpop.f32.mrf.mxu0  ;;  %6834 = vmatmul.mubr.bf16.vlgmr.msra.gmra.mxu0 %v3728_v29  ;;  %v3354_v15 = vpop.xlane.xlu1 %3353  ;;  %v3736_v26 = vpack.c.bf16 %v3650_v9, %v3649_v44 }
 0x33f   : > { %v6051_v3 = vpack.c.bf16 %v6707_v39, %v6707_v39  ;;  %7623 = vrcp.f32 %v3354_v15  ;;  %v3735_v51 = vpack.c.bf16 %v3648_v8, %v3647_v0  ;;  %6882 = vmatpush3.bf16.msra.mxu0 %v9493_v47  ;;  %v10361_v8 = vld [vmem:[#allocation34_spill] sm:$0xff]  ;;  %v7200_v15 = vld [vmem:[%s8484_s24 + $0x198] sm:$0xff]  }
 0x340   : > { %v3332_v13 = vpop.xlane.xlu0 %3331  ;;  %v3841_v25 = vpop.f32.mrf.mxu0  ;;  %6883 = vmatprep.subr.bf16.mxu0 %v7194_v60 }
 0x341   : > { %5434 = vst.msk [vmem:[%s9528_s27 + $0x8] sm:$0xf] %vm5431_vm1, %v6051_v3  ;;  %v6049_v11 = vpack.c.bf16 %v3841_v25, %v3841_v25  ;;  %6865 = vmatprep.mubr.bf16.mxu1 %v3735_v51  ;;  %v7610_v34 = vpop.eup %7609  ;;  %v7201_v25 = vld [vmem:[%s8484_s24 + $0x1e0] sm:$0xff]  }
 0x342   : > { %v6708_v23 = vpop.f32.mrf.mxu0  ;;  %v6739_v58 = vpop.f32.mrf.mxu1  ;;  %6866 = vmatmul.mubr.bf16.vlgmr.msra.gmra.mxu1 %v3736_v26  ;;  %v3638_v39 = vmul.f32 %v7610_v34, %v10361_v8  ;;  %v7203_v34 = vld [vmem:[%s8484_s24 + $0x1d8] sm:$0xff]   ;;  %v7206_v8 = vld [vmem:[%s8484_s24 + $0x180] sm:$0xff]  }
 0x343   : > { %5432 = vst.msk [vmem:[%s9528_s27] sm:$0xf] %vm5431_vm1, %v6049_v11  ;;  %v6052_v47 = vpack.c.bf16 %v6708_v23, %v6708_v23  ;;  %v6067_v10 = vpack.c.bf16 %v6739_v58, %v6739_v58  ;;  %v3334_v62 = vpop.xlane.xlu1 %3333  ;;  %6884 = vmatpush3.bf16.msra.mxu0 %v7194_v60  ;;  %6914 = vmatpush3.bf16.msra.mxu1 %v9504_v18 }
 0x344   : > { %v3986_v33 = vpop.f32.mrf.mxu1  ;;  %v3364_v37 = vpop.xlane.xlu0 %3363  ;;  %6885 = vmatprep.subr.bf16.mxu0 %v7196_v54  ;;  %6915 = vmatprep.subr.bf16.mxu1 %v7197_v45  ;;  %7625 = vrcp.f32 %v3334_v62  ;;  %v7202_v62 = vld [vmem:[%s8484_s24 + $0x190] sm:$0xff]  }
 0x345   : > { %5435 = vst.msk [vmem:[%s9528_s27 + $0xc] sm:$0xf] %vm5431_vm1, %v6052_v47  ;;  %5450 = vst.msk [vmem:[%s9528_s27 + $0x48] sm:$0xf] %vm5431_vm1, %v6067_v10  ;;  %v6065_v32 = vpack.c.bf16 %v3986_v33, %v3986_v33  ;;  %v3844_v50 = vpop.f32.mrf.mxu0 }
 0x346   : > { %v7612_v20 = vpop.eup %7611  ;;  %v6050_v29 = vpack.c.bf16 %v3844_v50, %v3844_v50  ;;  %v6740_v46 = vpop.f32.mrf.mxu1 }
 0x347   : > { %v7614_v9 = vpop.eup %7613  ;;  %5448 = vst.msk [vmem:[%s9528_s27 + $0x40] sm:$0xf] %vm5431_vm1, %v6065_v32  ;;  %v6068_v18 = vpack.c.bf16 %v6740_v46, %v6740_v46  ;;  %v3366_v60 = vpop.xlane.xlu1 %3365  ;;  %6886 = vmatpush3.bf16.msra.mxu0 %v7196_v54  ;;  %6916 = vmatpush3.bf16.msra.mxu1 %v7197_v45  ;;  %v3635_v3 = vmul.f32 %v7612_v20, %v9171_v7  ;;  %v10362_v54 = vld [vmem:[#allocation33_spill] sm:$0xff] }
 0x348   : > { %v7616_v4 = vpop.eup %7615  ;;  %5433 = vst.msk [vmem:[%s9528_s27 + $0x4] sm:$0xf] %vm5431_vm1, %v6050_v29  ;;  %v3989_v0 = vpop.f32.mrf.mxu1  ;;  %6887 = vmatprep.subr.bf16.mxu0 %v7198_v24  ;;  %6917 = vmatprep.subr.bf16.mxu1 %v7199_v63  ;;  %v3637_v11 = vmul.f32 %v7614_v9, %v10362_v54  ;;  %v7204_v29 = vld [vmem:[%s8484_s24 + $0x188] sm:$0xff]  }
 0x349   : > { %v3328_v49 = vpop.xlane.xlu0 %3327  ;;  %v7618_v38 = vpop.eup %7617  ;;  %5451 = vst.msk [vmem:[%s9528_s27 + $0x4c] sm:$0xf] %vm5431_vm1, %v6068_v18  ;;  %v6066_v44 = vpack.c.bf16 %v3989_v0, %v3989_v0  ;;  %v3636_v51 = vmul.f32 %v7616_v4, %v9179_v22 }
 0x34a   : > { %v7620_v26 = vpop.eup %7619  ;;  %7627 = vrcp.f32 %v3328_v49  ;;  %v3730_v10 = vpack.c.bf16 %v3638_v39, %v3637_v11  ;;  %v3654_v22 = vmul.f32 %v7618_v38, %v9137_v61  ;;  %v7207_v38 = vld [vmem:[%s8484_s24 + $0x1c8] sm:$0xff]  }
 0x34b   : > { %v7622_v45 = vpop.eup %7621  ;;  %7629 = vrcp.f32 %v3332_v13  ;;  %5449 = vst.msk [vmem:[%s9528_s27 + $0x44] sm:$0xf] %vm5431_vm1, %v6066_v44  ;;  %v3330_v23 = vpop.xlane.xlu1 %3329  ;;  %v3729_v58 = vpack.c.bf16 %v3636_v51, %v3635_v3  ;;  %6888 = vmatpush3.bf16.msra.mxu0 %v7198_v24  ;;  %6918 = vmatpush3.bf16.msra.mxu1 %v7199_v63  ;;  %v3651_v33 = vmul.f32 %v7620_v26, %v9186_v59 }
 0x34c   : > { %v7624_v47 = vpop.eup %7623  ;;  %7631 = vrcp.f32 %v3330_v23  ;;  %6889 = vmatprep.subr.bf16.mxu0 %v7200_v15  ;;  %6919 = vmatprep.subr.bf16.mxu1 %v7201_v25  ;;  %v3653_v32 = vmul.f32 %v7622_v45, %v9131_v19  ;;  %v7205_v19 = vld [vmem:[%s8484_s24 + $0x1d0] sm:$0xff]  }
 0x34d   : > { %v3360_v7 = vpop.xlane.xlu0 %3359  ;;  %7633 = vrcp.f32 %v3366_v60  ;;  %6837 = vmatprep.mubr.bf16.mxu0 %v3729_v58  ;;  %v3652_v13 = vmul.f32 %v7624_v47, %v9193_v6 }
 0x34e   : > { %7635 = vrcp.f32 %v3360_v7  ;;  %v6711_v24 = vpop.f32.mrf.mxu0  ;;  %6838 = vmatmul.mubr.bf16.gmra.mxu0 %v3730_v10  ;;  %v3738_v6 = vpack.c.bf16 %v3654_v22, %v3653_v32  ;;  %v7208_v10 = vld [vmem:[%s8484_s24 + $0x1c0] sm:$0xff]  }
 0x34f   : > { %7637 = vrcp.f32 %v3364_v37  ;;  %v6055_v61 = vpack.c.bf16 %v6711_v24, %v6711_v24  ;;  %v3362_v50 = vpop.xlane.xlu1 %3361  ;;  %v3737_v63 = vpack.c.bf16 %v3652_v13, %v3651_v33  ;;  %6890 = vmatpush3.bf16.msra.mxu0 %v7200_v15  ;;  %6920 = vmatpush3.bf16.msra.mxu1 %v7201_v25 }
 0x350   : > { %7639 = vrcp.f32 %v3362_v50  ;;  %v3857_v20 = vpop.f32.mrf.mxu0  ;;  %6891 = vmatprep.subr.bf16.mxu0 %v7202_v62  ;;  %6921 = vmatprep.subr.bf16.mxu1 %v7203_v34 }
 0x351   : > { %v3340_v59 = vpop.xlane.xlu0 %3339  ;;  %5438 = vst.msk [vmem:[%s9528_s27 + $0x18] sm:$0xf] %vm5431_vm1, %v6055_v61  ;;  %v6053_v46 = vpack.c.bf16 %v3857_v20, %v3857_v20  ;;  %6869 = vmatprep.mubr.bf16.mxu1 %v3737_v63  ;;  %v7626_v44 = vpop.eup %7625  ;;  %v10363_v20 = vld [vmem:[#allocation36_spill] sm:$0xff] }
 0x352   : > { %v6712_v37 = vpop.f32.mrf.mxu0  ;;  %v6743_v9 = vpop.f32.mrf.mxu1  ;;  %6870 = vmatmul.mubr.bf16.gmra.mxu1 %v3738_v6  ;;  %v3642_v7 = vmul.f32 %v7626_v44, %v9207_v41 }
 0x353   : > { %5436 = vst.msk [vmem:[%s9528_s27 + $0x10] sm:$0xf] %vm5431_vm1, %v6053_v46  ;;  %v6056_v18 = vpack.c.bf16 %v6712_v37, %v6712_v37  ;;  %v6071_v60 = vpack.c.bf16 %v6743_v9, %v6743_v9  ;;  %v3342_v4 = vpop.xlane.xlu1 %3341  ;;  %6892 = vmatpush3.bf16.msra.mxu0 %v7202_v62  ;;  %6922 = vmatpush3.bf16.msra.mxu1 %v7203_v34  ;;  %v10366_v37 = vld [vmem:[#allocation35_spill] sm:$0xff] }
 0x354   : > { %v4002_v0 = vpop.f32.mrf.mxu1  ;;  %6893 = vmatprep.subr.bf16.mxu0 %v7204_v29  ;;  %v3860_v15 = vpop.f32.mrf.mxu0  ;;  %6923 = vmatprep.subr.bf16.mxu1 %v7205_v19  ;;  %7641 = vrcp.f32 %v3342_v4 }
 0x355   : > { %v3372_v49 = vpop.xlane.xlu0 %3371  ;;  %5439 = vst.msk [vmem:[%s9528_s27 + $0x1c] sm:$0xf] %vm5431_vm1, %v6056_v18  ;;  %5454 = vst.msk [vmem:[%s9528_s27 + $0x58] sm:$0xf] %vm5431_vm1, %v6071_v60  ;;  %v6069_v39 = vpack.c.bf16 %v4002_v0, %v4002_v0  ;;  %v6054_v3 = vpack.c.bf16 %v3860_v15, %v3860_v15 }
 0x356   : > { %v6744_v51 = vpop.f32.mrf.mxu1 }
 0x357   : > { %v7628_v25 = vpop.eup %7627  ;;  %5452 = vst.msk [vmem:[%s9528_s27 + $0x50] sm:$0xf] %vm5431_vm1, %v6069_v39  ;;  %v6072_v26 = vpack.c.bf16 %v6744_v51, %v6744_v51  ;;  %v3374_v54 = vpop.xlane.xlu1 %3373  ;;  %6894 = vmatpush3.bf16.msra.mxu0 %v7204_v29  ;;  %5437 = vst.msk [vmem:[%s9528_s27 + $0x14] sm:$0xf] %vm5431_vm1, %v6054_v3  ;;  %6924 = vmatpush3.bf16.msra.mxu1 %v7205_v19  ;;  %v10365_v29 = vld [vmem:[#allocation38_spill] sm:$0xff] }
 0x358   : > { %v7630_v11 = vpop.eup %7629  ;;  %v4005_v45 = vpop.f32.mrf.mxu1  ;;  %6895 = vmatprep.subr.bf16.mxu0 %v7206_v8  ;;  %6925 = vmatprep.subr.bf16.mxu1 %v7207_v38  ;;  %v3639_v62 = vmul.f32 %v7628_v25, %v9228_v16 }
 0x359   : > { %v3336_v23 = vpop.xlane.xlu0 %3335  ;;  %v7632_v58 = vpop.eup %7631  ;;  %5455 = vst.msk [vmem:[%s9528_s27 + $0x5c] sm:$0xf] %vm5431_vm1, %v6072_v26  ;;  %v6070_v47 = vpack.c.bf16 %v4005_v45, %v4005_v45  ;;  %v3641_v24 = vmul.f32 %v7630_v11, %v9200_v52 }
 0x35a   : > { %v7634_v22 = vpop.eup %7633  ;;  %7643 = vrcp.f32 %v3336_v23  ;;  %v3640_v33 = vmul.f32 %v7632_v58, %v9235_v36 }
 0x35b   : > { %v7636_v13 = vpop.eup %7635  ;;  %7645 = vrcp.f32 %v3340_v59  ;;  %5453 = vst.msk [vmem:[%s9528_s27 + $0x54] sm:$0xf] %vm5431_vm1, %v6070_v47  ;;  %v3338_v34 = vpop.xlane.xlu1 %3337  ;;  %6896 = vmatpush3.bf16.msra.mxu0 %v7206_v8  ;;  %6926 = vmatpush3.bf16.msra.mxu1 %v7207_v38  ;;  %v3732_v63 = vpack.c.bf16 %v3642_v7, %v3641_v24  ;;  %v3658_v16 = vmul.f32 %v7634_v22, %v10363_v20  ;;  %v10364_v59 = vld [vmem:[#allocation37_spill] sm:$0xff] }
 0x35c   : > { %v7638_v32 = vpop.eup %7637  ;;  %7647 = vrcp.f32 %v3338_v34  ;;  %v3731_v41 = vpack.c.bf16 %v3640_v33, %v3639_v62  ;;  %6927 = vmatprep.subr.bf16.mxu1 %v7208_v10  ;;  %v3655_v6 = vmul.f32 %v7636_v13, %v10364_v59  ;;  %v10367_v13 = vld [vmem:[#allocation69_spill] sm:$0xff] }
 0x35d   : > { %v3368_v61 = vpop.xlane.xlu0 %3367  ;;  %v7640_v50 = vpop.eup %7639  ;;  %7649 = vrcp.f32 %v3374_v54  ;;  %v3657_v9 = vmul.f32 %v7638_v32, %v10366_v37  ;;  %v10368_v32 = vld [vmem:[#allocation40_spill] sm:$0xff] }
 0x35e   : > { %7651 = vrcp.f32 %v3368_v61  ;;  %6841 = vmatprep.mubr.bf16.mxu0 %v3731_v41  ;;  %v6715_v36 = vpop.f32.mrf.mxu0  ;;  %v3656_v52 = vmul.f32 %v7640_v50, %v10365_v29  ;;  %v10369_v41 = vld [vmem:[#allocation66_spill] sm:$0xff] }
 0x35f   : > { %7653 = vrcp.f32 %v3372_v49  ;;  %v6059_v46 = vpack.c.bf16 %v6715_v36, %v6715_v36  ;;  %6842 = vmatmul.mubr.bf16.gmra.mxu0 %v3732_v63  ;;  %v3370_v19 = vpop.xlane.xlu1 %3369  ;;  %6928 = vmatpush3.bf16.msra.mxu1 %v7208_v10  ;;  %v3740_v8 = vpack.c.bf16 %v3658_v16, %v3657_v9  ;;  %v10370_v16 = vld [vmem:[#allocation39_spill] sm:$0xff] }
 0x360   : > { %7655 = vrcp.f32 %v3370_v19  ;;  %v3873_v60 = vpop.f32.mrf.mxu0  ;;  %v3739_v4 = vpack.c.bf16 %v3656_v52, %v3655_v6  ;;  %v10371_v19 = vld [vmem:[#allocation101_spill] sm:$0xff] }
 0x361   : > { %v3380_v18 = vpop.xlane.xlu0 %3379  ;;  %5442 = vst.msk [vmem:[%s9528_s27 + $0x28] sm:$0xf] %vm5431_vm1, %v6059_v46  ;;  %v6057_v0 = vpack.c.bf16 %v3873_v60, %v3873_v60  ;;  %v7642_v54 = vpop.eup %7641  ;;  %v10372_v60 = vld [vmem:[#allocation103_spill] sm:$0xff] }
 0x362   : > { %6873 = vmatprep.mubr.bf16.mxu1 %v3739_v4  ;;  %v6716_v39 = vpop.f32.mrf.mxu0  ;;  %v6747_v49 = vpop.f32.mrf.mxu1  ;;  %v3646_v34 = vmul.f32 %v7642_v54, %v10367_v13  ;;  %v10373_v4 = vld [vmem:[#allocation41_spill] sm:$0xff] }
 0x363   : > { %5440 = vst.msk [vmem:[%s9528_s27 + $0x20] sm:$0xf] %vm5431_vm1, %v6057_v0  ;;  %v6060_v15 = vpack.c.bf16 %v6716_v39, %v6716_v39  ;;  %v6075_v38 = vpack.c.bf16 %v6747_v49, %v6747_v49  ;;  %6874 = vmatmul.mubr.bf16.gmra.mxu1 %v3740_v8  ;;  %v3382_v44 = vpop.xlane.xlu1 %3381  ;;  %v10374_v49 = vld [vmem:[#allocation70_spill] sm:$0xff] }
 0x364   : > { %v4018_v3 = vpop.f32.mrf.mxu1  ;;  %v3876_v26 = vpop.f32.mrf.mxu0  ;;  %7657 = vrcp.f32 %v3382_v44 }
 0x365   : > { %v3412_v51 = vpop.xlane.xlu0 %3411  ;;  %5443 = vst.msk [vmem:[%s9528_s27 + $0x2c] sm:$0xf] %vm5431_vm1, %v6060_v15  ;;  %5458 = vst.msk [vmem:[%s9528_s27 + $0x68] sm:$0xf] %vm5431_vm1, %v6075_v38  ;;  %v6073_v25 = vpack.c.bf16 %v4018_v3, %v4018_v3  ;;  %v6058_v11 = vpack.c.bf16 %v3876_v26, %v3876_v26 }
 0x366   : > { %v6748_v45 = vpop.f32.mrf.mxu1 }
 0x367   : > { %v7644_v23 = vpop.eup %7643  ;;  %5456 = vst.msk [vmem:[%s9528_s27 + $0x60] sm:$0xf] %vm5431_vm1, %v6073_v25  ;;  %v6076_v58 = vpack.c.bf16 %v6748_v45, %v6748_v45  ;;  %v3414_v47 = vpop.xlane.xlu1 %3413  ;;  %5441 = vst.msk [vmem:[%s9528_s27 + $0x24] sm:$0xf] %vm5431_vm1, %v6058_v11 }
 0x368   : > { %v7646_v7 = vpop.eup %7645  ;;  %v4021_v10 = vpop.f32.mrf.mxu1  ;;  %v3643_v61 = vmul.f32 %v7644_v23, %v10368_v32 }
 0x369   : > { %v3376_v22 = vpop.xlane.xlu0 %3375  ;;  %v7648_v62 = vpop.eup %7647  ;;  %5459 = vst.msk [vmem:[%s9528_s27 + $0x6c] sm:$0xf] %vm5431_vm1, %v6076_v58  ;;  %v6074_v33 = vpack.c.bf16 %v4021_v10, %v4021_v10  ;;  %v3645_v36 = vmul.f32 %v7646_v7, %v10370_v16 }
 0x36a   : > { %v7650_v24 = vpop.eup %7649  ;;  %7659 = vrcp.f32 %v3376_v22  ;;  %v3644_v50 = vmul.f32 %v7648_v62, %v10369_v41 }
 0x36b   : > { %v7652_v63 = vpop.eup %7651  ;;  %7661 = vrcp.f32 %v3380_v18  ;;  %5457 = vst.msk [vmem:[%s9528_s27 + $0x64] sm:$0xf] %vm5431_vm1, %v6074_v33  ;;  %v3378_v20 = vpop.xlane.xlu1 %3377  ;;  %v3734_v46 = vpack.c.bf16 %v3646_v34, %v3645_v36  ;;  %v3662_v37 = vmul.f32 %v7650_v24, %v10371_v19 }
 0x36c   : > { %v7654_v59 = vpop.eup %7653  ;;  %7663 = vrcp.f32 %v3378_v20  ;;  %v3733_v29 = vpack.c.bf16 %v3644_v50, %v3643_v61  ;;  %v3659_v18 = vmul.f32 %v7652_v63, %v10372_v60  ;;  %v10375_v63 = vld [vmem:[#allocation42_spill] sm:$0xff] }
 0x36d   : > { %v3408_v6 = vpop.xlane.xlu0 %3407  ;;  %v7656_v52 = vpop.eup %7655  ;;  %7665 = vrcp.f32 %v3414_v47  ;;  %v3661_v15 = vmul.f32 %v7654_v59, %v10374_v49 }
 0x36e   : > { %7667 = vrcp.f32 %v3408_v6  ;;  %6845 = vmatprep.mubr.bf16.mxu0 %v3733_v29  ;;  %v6719_v9 = vpop.f32.mrf.mxu0  ;;  %v3660_v0 = vmul.f32 %v7656_v52, %v10373_v4  ;;  %v10376_v52 = vld [vmem:[#allocation105_spill] sm:$0xff] }
 0x36f   : > { %7669 = vrcp.f32 %v3412_v51  ;;  %v6063_v8 = vpack.c.bf16 %v6719_v9, %v6719_v9  ;;  %6846 = vmatmul.mubr.bf16.gmra.mxu0 %v3734_v46  ;;  %v3410_v39 = vpop.xlane.xlu1 %3409  ;;  %v3742_v26 = vpack.c.bf16 %v3662_v37, %v3661_v15 }
 0x370   : > { %7671 = vrcp.f32 %v3410_v39  ;;  %v3889_v44 = vpop.f32.mrf.mxu0  ;;  %v3741_v3 = vpack.c.bf16 %v3660_v0, %v3659_v18 }
 0x371   : > { %v3388_v38 = vpop.xlane.xlu0 %3387  ;;  %5446 = vst.msk [vmem:[%s9528_s27 + $0x38] sm:$0xf] %vm5431_vm1, %v6063_v8  ;;  %v6061_v25 = vpack.c.bf16 %v3889_v44, %v3889_v44  ;;  %v7658_v22 = vpop.eup %7657  ;;  %v10377_v8 = vld [vmem:[#allocation68_spill] sm:$0xff] }
 0x372   : > { %6877 = vmatprep.mubr.bf16.mxu1 %v3741_v3  ;;  %v6720_v54 = vpop.f32.mrf.mxu0  ;;  %v6751_v11 = vpop.f32.mrf.mxu1  ;;  %v3666_v20 = vmul.f32 %v7658_v22, %v10375_v63  ;;  %v10379_v22 = vld [vmem:[#allocation107_spill] sm:$0xff] }
 0x373   : > { %5444 = vst.msk [vmem:[%s9528_s27 + $0x30] sm:$0xf] %vm5431_vm1, %v6061_v25  ;;  %v6064_v51 = vpack.c.bf16 %v6720_v54, %v6720_v54  ;;  %v6079_v45 = vpack.c.bf16 %v6751_v11, %v6751_v11  ;;  %6878 = vmatmul.mubr.bf16.gmra.mxu1 %v3742_v26  ;;  %v3390_v23 = vpop.xlane.xlu1 %3389 }
 0x374   : > { %v4034_v58 = vpop.f32.mrf.mxu1  ;;  %v3892_v10 = vpop.f32.mrf.mxu0  ;;  %7673 = vrcp.f32 %v3390_v23 }
 0x375   : > { %v3420_v47 = vpop.xlane.xlu0 %3419  ;;  %5447 = vst.msk [vmem:[%s9528_s27 + $0x3c] sm:$0xf] %vm5431_vm1, %v6064_v51  ;;  %5462 = vst.msk [vmem:[%s9528_s27 + $0x78] sm:$0xf] %vm5431_vm1, %v6079_v45  ;;  %v6077_v7 = vpack.c.bf16 %v4034_v58, %v4034_v58  ;;  %v6062_v62 = vpack.c.bf16 %v3892_v10, %v3892_v10 }
 0x376   : > { %v6752_v33 = vpop.f32.mrf.mxu1 }
 0x377   : > { %v7660_v13 = vpop.eup %7659  ;;  %5460 = vst.msk [vmem:[%s9528_s27 + $0x70] sm:$0xf] %vm5431_vm1, %v6077_v7  ;;  %v6080_v34 = vpack.c.bf16 %v6752_v33, %v6752_v33  ;;  %v3422_v24 = vpop.xlane.xlu1 %3421  ;;  %5445 = vst.msk [vmem:[%s9528_s27 + $0x34] sm:$0xf] %vm5431_vm1, %v6062_v62 }
 0x378   : > { %v7662_v32 = vpop.eup %7661  ;;  %v4037_v61 = vpop.f32.mrf.mxu1  ;;  %v3663_v59 = vmul.f32 %v7660_v13, %v9346_v43 }
 0x379   : > { %v3384_v41 = vpop.xlane.xlu0 %3383  ;;  %v7664_v50 = vpop.eup %7663  ;;  %5463 = vst.msk [vmem:[%s9528_s27 + $0x7c] sm:$0xf] %vm5431_vm1, %v6080_v34  ;;  %v6078_v16 = vpack.c.bf16 %v4037_v61, %v4037_v61  ;;  %v3665_v46 = vmul.f32 %v7662_v32, %v10376_v52 }
 0x37a   : > { %v7666_v36 = vpop.eup %7665  ;;  %7675 = vrcp.f32 %v3384_v41  ;;  %v3664_v6 = vmul.f32 %v7664_v50, %v9355_v14  ;;  %v10380_v41 = vld [vmem:[#allocation72_spill] sm:$0xff]  ;;  %v10381_v50 = vld [vmem:[#allocation109_spill] sm:$0xff] }
 0x37b   : > { %v7668_v29 = vpop.eup %7667  ;;  %7677 = vrcp.f32 %v3388_v38  ;;  %5461 = vst.msk [vmem:[%s9528_s27 + $0x74] sm:$0xf] %vm5431_vm1, %v6078_v16  ;;  %v3386_v19 = vpop.xlane.xlu1 %3385  ;;  %v3744_v4 = vpack.c.bf16 %v3666_v20, %v3665_v46  ;;  %v3682_v0 = vmul.f32 %v7666_v36, %v9337_v12  ;;  %v10382_v20 = vld [vmem:[#allocation71_spill] sm:$0xff] }
 0x37c   : > { %v7670_v37 = vpop.eup %7669  ;;  %7679 = vrcp.f32 %v3386_v19  ;;  %v3743_v60 = vpack.c.bf16 %v3664_v6, %v3663_v59  ;;  %v3679_v43 = vmul.f32 %v7668_v29, %v9358_v35 }
 0x37d   : > { %v3416_v9 = vpop.xlane.xlu0 %3415  ;;  %v7672_v18 = vpop.eup %7671  ;;  %7681 = vrcp.f32 %v3422_v24  ;;  %v3681_v39 = vmul.f32 %v7670_v37, %v10377_v8 }
 0x37e   : > { %7683 = vrcp.f32 %v3416_v9  ;;  %6897 = vmatprep.mubr.bf16.mxu0 %v3743_v60  ;;  %v3680_v14 = vmul.f32 %v7672_v18, %v9361_v31  ;;  %v10378_v31 = vld [vmem:[#allocation43_spill] sm:$0xff] }
 0x37f   : > { %7685 = vrcp.f32 %v3420_v47  ;;  %6898 = vmatmul.mubr.bf16.vlgmr.msra.gmra.mxu0 %v3744_v4  ;;  %v3418_v49 = vpop.xlane.xlu1 %3417  ;;  %v3752_v44 = vpack.c.bf16 %v3682_v0, %v3681_v39  ;;  %v10383_v18 = vld [vmem:[#allocation67_spill] sm:$0xff] }
 0x380   : > { %7687 = vrcp.f32 %v3418_v49  ;;  %v3751_v38 = vpack.c.bf16 %v3680_v14, %v3679_v43  ;;  %v10384_v49 = vld [vmem:[#allocation44_spill] sm:$0xff] }
 0x381   : > { %v3396_v15 = vpop.xlane.xlu0 %3395  ;;  %v7674_v25 = vpop.eup %7673 }
 0x382   : > { %6929 = vmatprep.mubr.bf16.mxu1 %v3751_v38  ;;  %v3670_v45 = vmul.f32 %v7674_v25, %v10378_v31 }
 0x383   : > { %6930 = vmatmul.mubr.bf16.vlgmr.msra.gmra.mxu1 %v3752_v44  ;;  %v3398_v3 = vpop.xlane.xlu1 %3397 }
 0x384   : > { %7689 = vrcp.f32 %v3398_v3 }
 0x385   : > { %v3428_v12 = vpop.xlane.xlu0 %3427 }
 0x387   : > { %v7676_v26 = vpop.eup %7675  ;;  %v3430_v54 = vpop.xlane.xlu1 %3429 }
 0x388   : > { %v7678_v11 = vpop.eup %7677  ;;  %v3667_v58 = vmul.f32 %v7676_v26, %v9385_v30 }
 0x389   : > { %v3392_v35 = vpop.xlane.xlu0 %3391  ;;  %v7680_v51 = vpop.eup %7679  ;;  %v3669_v62 = vmul.f32 %v7678_v11, %v10379_v22 }
 0x38a   : > { %v7682_v23 = vpop.eup %7681  ;;  %7691 = vrcp.f32 %v3392_v35  ;;  %v3668_v47 = vmul.f32 %v7680_v51, %v9390_v48 }
 0x38b   : > { %v7684_v7 = vpop.eup %7683  ;;  %7693 = vrcp.f32 %v3396_v15  ;;  %v3394_v10 = vpop.xlane.xlu1 %3393  ;;  %v3746_v32 = vpack.c.bf16 %v3670_v45, %v3669_v62  ;;  %v3686_v61 = vmul.f32 %v7682_v23, %v9381_v5 }
 0x38c   : > { %v7686_v33 = vpop.eup %7685  ;;  %7695 = vrcp.f32 %v3394_v10  ;;  %v3745_v34 = vpack.c.bf16 %v3668_v47, %v3667_v58  ;;  %v3683_v30 = vmul.f32 %v7684_v7, %v10380_v41 }
 0x38d   : > { %v3424_v13 = vpop.xlane.xlu0 %3423  ;;  %v7688_v24 = vpop.eup %7687  ;;  %7697 = vrcp.f32 %v3430_v54  ;;  %v3685_v16 = vmul.f32 %v7686_v33, %v10382_v20 }
 0x38e   : > { %7699 = vrcp.f32 %v3424_v13  ;;  %6901 = vmatprep.mubr.bf16.mxu0 %v3745_v34  ;;  %v3684_v48 = vmul.f32 %v7688_v24, %v10381_v50  ;;  %v10386_v24 = vld [vmem:[#allocation45_spill] sm:$0xff] }
 0x38f   : > { %7701 = vrcp.f32 %v3428_v12  ;;  %6902 = vmatmul.mubr.bf16.gmra.mxu0 %v3746_v32  ;;  %v3426_v63 = vpop.xlane.xlu1 %3425  ;;  %v3754_v6 = vpack.c.bf16 %v3686_v61, %v3685_v16 }
 0x390   : > { %7703 = vrcp.f32 %v3426_v63  ;;  %v3753_v59 = vpack.c.bf16 %v3684_v48, %v3683_v30 }
 0x391   : > { %v3404_v36 = vpop.xlane.xlu0 %3403  ;;  %v7690_v5 = vpop.eup %7689 }
 0x392   : > { %6933 = vmatprep.mubr.bf16.mxu1 %v3753_v59  ;;  %v3674_v4 = vmul.f32 %v7690_v5, %v10383_v18 }
 0x393   : > { %6934 = vmatmul.mubr.bf16.gmra.mxu1 %v3754_v6  ;;  %v3406_v29 = vpop.xlane.xlu1 %3405 }
 0x394   : > { %7705 = vrcp.f32 %v3406_v29 }
 0x395   : > { %v3400_v52 = vpop.xlane.xlu0 %3399 }
 0x396   : > { %7707 = vrcp.f32 %v3400_v52 }
 0x397   : > { %v7692_v46 = vpop.eup %7691  ;;  %7709 = vrcp.f32 %v3404_v36  ;;  %v3402_v19 = vpop.xlane.xlu1 %3401 }
 0x398   : > { %v7694_v37 = vpop.eup %7693  ;;  %7711 = vrcp.f32 %v3402_v19  ;;  %v3671_v43 = vmul.f32 %v7692_v46, %v9427_v56 }
 0x399   : > { %v3432_v9 = vpop.xlane.xlu0 %3431  ;;  %v7696_v60 = vpop.eup %7695  ;;  %v3673_v15 = vmul.f32 %v7694_v37, %v10384_v49 }
 0x39a   : > { %v7698_v0 = vpop.eup %7697  ;;  %7713 = vrcp.f32 %v3432_v9  ;;  %v3672_v14 = vmul.f32 %v7696_v60, %v9432_v57 }
 0x39b   : > { %v7700_v8 = vpop.eup %7699  ;;  %v3434_v39 = vpop.xlane.xlu1 %3433  ;;  %v3748_v25 = vpack.c.bf16 %v3674_v4, %v3673_v15  ;;  %v3690_v26 = vmul.f32 %v7698_v0, %v9409_v17 }
 0x39c   : > { %v7702_v38 = vpop.eup %7701  ;;  %7715 = vrcp.f32 %v3434_v39  ;;  %v3747_v3 = vpack.c.bf16 %v3672_v14, %v3671_v43  ;;  %v3687_v54 = vmul.f32 %v7700_v8, %v9435_v42 }
 0x39d   : > { %v3436_v44 = vpop.xlane.xlu0 %3435  ;;  %v7704_v12 = vpop.eup %7703  ;;  %v3689_v11 = vmul.f32 %v7702_v38, %v9406_v27 }
 0x39e   : > { %7717 = vrcp.f32 %v3436_v44  ;;  %6905 = vmatprep.mubr.bf16.mxu0 %v3747_v3  ;;  %v3688_v56 = vmul.f32 %v7704_v12, %v9441_v1 }
 0x39f   : > { %6906 = vmatmul.mubr.bf16.gmra.mxu0 %v3748_v25  ;;  %v3438_v57 = vpop.xlane.xlu1 %3437  ;;  %v3756_v51 = vpack.c.bf16 %v3690_v26, %v3689_v11 }
 0x3a0   : > { %7719 = vrcp.f32 %v3438_v57  ;;  %v3755_v35 = vpack.c.bf16 %v3688_v56, %v3687_v54 }
 0x3a1   : > { %v7706_v31 = vpop.eup %7705 }
 0x3a2   : > { %6937 = vmatprep.mubr.bf16.mxu1 %v3755_v35  ;;  %v3678_v17 = vmul.f32 %v7706_v31, %v9448_v53 }
 0x3a3   : > { %v7708_v45 = vpop.eup %7707  ;;  %6938 = vmatmul.mubr.bf16.gmra.mxu1 %v3756_v51 }
 0x3a4   : > { %v7710_v23 = vpop.eup %7709  ;;  %v3675_v47 = vmul.f32 %v7708_v45, %v9450_v55  ;;  %v10385_v55 = vld [vmem:[#allocation111_spill] sm:$0xff] }
 0x3a5   : > { %v7712_v58 = vpop.eup %7711  ;;  %v3677_v7 = vmul.f32 %v7710_v23, %v9444_v21 }
 0x3a6   : > { %v3676_v42 = vmul.f32 %v7712_v58, %v9453_v40 }
 0x3a7   : > { %v7714_v1 = vpop.eup %7713  ;;  %v3750_v22 = vpack.c.bf16 %v3678_v17, %v3677_v7 }
 0x3a8   : > { %v3749_v10 = vpack.c.bf16 %v3676_v42, %v3675_v47  ;;  %v3691_v62 = vmul.f32 %v7714_v1, %v9473_v2 }
 0x3a9   : > { %v7716_v27 = vpop.eup %7715 }
 0x3aa   : > { %6909 = vmatprep.mubr.bf16.mxu0 %v3749_v10  ;;  %v3692_v33 = vmul.f32 %v7716_v27, %v9478_v28 }
 0x3ab   : > { %v7718_v13 = vpop.eup %7717  ;;  %6910 = vmatmul.mubr.bf16.gmra.mxu0 %v3750_v22 }
 0x3ac   : > { %v3757_v53 = vpack.c.bf16 %v3692_v33, %v3691_v62  ;;  %v3693_v40 = vmul.f32 %v7718_v13, %v10385_v55 }
 0x3ad   : > { %v7720_v34 = vpop.eup %7719 }
 0x3ae   : > { %6941 = vmatprep.mubr.bf16.mxu1 %v3757_v53  ;;  %v3694_v21 = vmul.f32 %v7720_v34, %v10386_v24 }
 0x3b0   : > { %v3758_v32 = vpack.c.bf16 %v3694_v21, %v3693_v40 }
 0x3b2   : > { %6942 = vmatmul.mubr.bf16.gmra.mxu1 %v3758_v32 }
 0x3be   : > { %v6771_v61 = vpop.f32.mrf.mxu0 }
 0x3bf   : > { %v6083_v41 = vpack.c.bf16 %v6771_v61, %v6771_v61 }
 0x3c0   : > { %v4131_v2 = vpop.f32.mrf.mxu0 }
 0x3c1   : > { %5466 = vst.msk [vmem:[%s9528_s27 + $0x88] sm:$0xf] %vm5431_vm1, %v6083_v41  ;;  %v6081_v28 = vpack.c.bf16 %v4131_v2, %v4131_v2 }
 0x3c2   : > { %v6772_v30 = vpop.f32.mrf.mxu0  ;;  %v6803_v50 = vpop.f32.mrf.mxu1 }
 0x3c3   : > { %5464 = vst.msk [vmem:[%s9528_s27 + $0x80] sm:$0xf] %vm5431_vm1, %v6081_v28  ;;  %v6084_v48 = vpack.c.bf16 %v6772_v30, %v6772_v30  ;;  %v6099_v63 = vpack.c.bf16 %v6803_v50, %v6803_v50 }
 0x3c4   : > { %v4134_v20 = vpop.f32.mrf.mxu0  ;;  %v4276_v16 = vpop.f32.mrf.mxu1 }
 0x3c5   : > { %5467 = vst.msk [vmem:[%s9528_s27 + $0x8c] sm:$0xf] %vm5431_vm1, %v6084_v48  ;;  %5482 = vst.msk [vmem:[%s9528_s27 + $0xc8] sm:$0xf] %vm5431_vm1, %v6099_v63  ;;  %v6082_v36 = vpack.c.bf16 %v4134_v20, %v4134_v20  ;;  %v6097_v59 = vpack.c.bf16 %v4276_v16, %v4276_v16 }
 0x3c6   : > { %v6804_v6 = vpop.f32.mrf.mxu1 }
 0x3c7   : > { %5465 = vst.msk [vmem:[%s9528_s27 + $0x84] sm:$0xf] %vm5431_vm1, %v6082_v36  ;;  %5480 = vst.msk [vmem:[%s9528_s27 + $0xc0] sm:$0xf] %vm5431_vm1, %v6097_v59  ;;  %v6100_v29 = vpack.c.bf16 %v6804_v6, %v6804_v6 }
 0x3c8   : > { %v4279_v52 = vpop.f32.mrf.mxu1 }
 0x3c9   : > { %5483 = vst.msk [vmem:[%s9528_s27 + $0xcc] sm:$0xf] %vm5431_vm1, %v6100_v29  ;;  %v6098_v5 = vpack.c.bf16 %v4279_v52, %v4279_v52 }
 0x3cb   : > { %5481 = vst.msk [vmem:[%s9528_s27 + $0xc4] sm:$0xf] %vm5431_vm1, %v6098_v5 }
 0x3ce   : > { %v6775_v46 = vpop.f32.mrf.mxu0 }
 0x3cf   : > { %v6087_v19 = vpack.c.bf16 %v6775_v46, %v6775_v46 }
 0x3d0   : > { %v4147_v37 = vpop.f32.mrf.mxu0 }
 0x3d1   : > { %5470 = vst.msk [vmem:[%s9528_s27 + $0x98] sm:$0xf] %vm5431_vm1, %v6087_v19  ;;  %v6085_v9 = vpack.c.bf16 %v4147_v37, %v4147_v37 }
 0x3d2   : > { %v6776_v60 = vpop.f32.mrf.mxu0  ;;  %v6807_v18 = vpop.f32.mrf.mxu1 }
 0x3d3   : > { %5468 = vst.msk [vmem:[%s9528_s27 + $0x90] sm:$0xf] %vm5431_vm1, %v6085_v9  ;;  %v6088_v4 = vpack.c.bf16 %v6776_v60, %v6776_v60  ;;  %v6103_v0 = vpack.c.bf16 %v6807_v18, %v6807_v18 }
 0x3d4   : > { %v4150_v43 = vpop.f32.mrf.mxu0  ;;  %v4292_v14 = vpop.f32.mrf.mxu1 }
 0x3d5   : > { %5471 = vst.msk [vmem:[%s9528_s27 + $0x9c] sm:$0xf] %vm5431_vm1, %v6088_v4  ;;  %5486 = vst.msk [vmem:[%s9528_s27 + $0xd8] sm:$0xf] %vm5431_vm1, %v6103_v0  ;;  %v6086_v8 = vpack.c.bf16 %v4150_v43, %v4150_v43  ;;  %v6101_v39 = vpack.c.bf16 %v4292_v14, %v4292_v14 }
 0x3d6   : > { %v6808_v49 = vpop.f32.mrf.mxu1 }
 0x3d7   : > { %5469 = vst.msk [vmem:[%s9528_s27 + $0x94] sm:$0xf] %vm5431_vm1, %v6086_v8  ;;  %5484 = vst.msk [vmem:[%s9528_s27 + $0xd0] sm:$0xf] %vm5431_vm1, %v6101_v39  ;;  %v6104_v15 = vpack.c.bf16 %v6808_v49, %v6808_v49 }
 0x3d8   : > { %v4295_v38 = vpop.f32.mrf.mxu1 }
 0x3d9   : > { %5487 = vst.msk [vmem:[%s9528_s27 + $0xdc] sm:$0xf] %vm5431_vm1, %v6104_v15  ;;  %v6102_v44 = vpack.c.bf16 %v4295_v38, %v4295_v38 }
 0x3db   : > { %5485 = vst.msk [vmem:[%s9528_s27 + $0xd4] sm:$0xf] %vm5431_vm1, %v6102_v44 }
 0x3de   : > { %v6779_v3 = vpop.f32.mrf.mxu0 }
 0x3df   : > { %v6091_v12 = vpack.c.bf16 %v6779_v3, %v6779_v3 }
 0x3e0   : > { %v4163_v25 = vpop.f32.mrf.mxu0 }
 0x3e1   : > { %5474 = vst.msk [vmem:[%s9528_s27 + $0xa8] sm:$0xf] %vm5431_vm1, %v6091_v12  ;;  %v6089_v26 = vpack.c.bf16 %v4163_v25, %v4163_v25 }
 0x3e2   : > { %v6780_v54 = vpop.f32.mrf.mxu0  ;;  %v6811_v56 = vpop.f32.mrf.mxu1 }
 0x3e3   : > { %5472 = vst.msk [vmem:[%s9528_s27 + $0xa0] sm:$0xf] %vm5431_vm1, %v6089_v26  ;;  %v6092_v57 = vpack.c.bf16 %v6780_v54, %v6780_v54  ;;  %v6107_v11 = vpack.c.bf16 %v6811_v56, %v6811_v56 }
 0x3e4   : > { %v4166_v35 = vpop.f32.mrf.mxu0  ;;  %v4308_v51 = vpop.f32.mrf.mxu1 }
 0x3e5   : > { %5475 = vst.msk [vmem:[%s9528_s27 + $0xac] sm:$0xf] %vm5431_vm1, %v6092_v57  ;;  %5490 = vst.msk [vmem:[%s9528_s27 + $0xe8] sm:$0xf] %vm5431_vm1, %v6107_v11  ;;  %v6090_v31 = vpack.c.bf16 %v4166_v35, %v4166_v35  ;;  %v6105_v45 = vpack.c.bf16 %v4308_v51, %v4308_v51 }
 0x3e6   : > { %v6812_v23 = vpop.f32.mrf.mxu1 }
 0x3e7   : > { %5473 = vst.msk [vmem:[%s9528_s27 + $0xa4] sm:$0xf] %vm5431_vm1, %v6090_v31  ;;  %5488 = vst.msk [vmem:[%s9528_s27 + $0xe0] sm:$0xf] %vm5431_vm1, %v6105_v45  ;;  %v6108_v58 = vpack.c.bf16 %v6812_v23, %v6812_v23 }
 0x3e8   : > { %v4311_v17 = vpop.f32.mrf.mxu1 }
 0x3e9   : > { %5491 = vst.msk [vmem:[%s9528_s27 + $0xec] sm:$0xf] %vm5431_vm1, %v6108_v58  ;;  %v6106_v47 = vpack.c.bf16 %v4311_v17, %v4311_v17 }
 0x3eb   : > { %5489 = vst.msk [vmem:[%s9528_s27 + $0xe4] sm:$0xf] %vm5431_vm1, %v6106_v47 }
 0x3ee   : > { %v6783_v42 = vpop.f32.mrf.mxu0 }
 0x3ef   : > { %v6095_v1 = vpack.c.bf16 %v6783_v42, %v6783_v42 }
 0x3f0   : > { %v4179_v7 = vpop.f32.mrf.mxu0 }
 0x3f1   : > { %5478 = vst.msk [vmem:[%s9528_s27 + $0xb8] sm:$0xf] %vm5431_vm1, %v6095_v1  ;;  %v6093_v10 = vpack.c.bf16 %v4179_v7, %v4179_v7 }
 0x3f2   : > { %v6784_v27 = vpop.f32.mrf.mxu0  ;;  %v6815_v22 = vpop.f32.mrf.mxu1 }
 0x3f3   : > { %5476 = vst.msk [vmem:[%s9528_s27 + $0xb0] sm:$0xf] %vm5431_vm1, %v6093_v10  ;;  %v6096_v62 = vpack.c.bf16 %v6784_v27, %v6784_v27  ;;  %v6111_v33 = vpack.c.bf16 %v6815_v22, %v6815_v22 }
 0x3f4   : > { %v4182_v13 = vpop.f32.mrf.mxu0  ;;  %v4324_v53 = vpop.f32.mrf.mxu1 }
 0x3f5   : > { %5479 = vst.msk [vmem:[%s9528_s27 + $0xbc] sm:$0xf] %vm5431_vm1, %v6096_v62  ;;  %5494 = vst.msk [vmem:[%s9528_s27 + $0xf8] sm:$0xf] %vm5431_vm1, %v6111_v33  ;;  %v6094_v34 = vpack.c.bf16 %v4182_v13, %v4182_v13  ;;  %v6109_v55 = vpack.c.bf16 %v4324_v53, %v4324_v53 }
 0x3f6   : > { %v6816_v40 = vpop.f32.mrf.mxu1 }
 0x3f7   : > { %5477 = vst.msk [vmem:[%s9528_s27 + $0xb4] sm:$0xf] %vm5431_vm1, %v6094_v34  ;;  %5492 = vst.msk [vmem:[%s9528_s27 + $0xf0] sm:$0xf] %vm5431_vm1, %v6109_v55  ;;  %v6112_v24 = vpack.c.bf16 %v6816_v40, %v6816_v40 }
 0x3f8   : > { %v4327_v21 = vpop.f32.mrf.mxu1 }
 0x3f9   : > { %5495 = vst.msk [vmem:[%s9528_s27 + $0xfc] sm:$0xf] %vm5431_vm1, %v6112_v24  ;;  %v6110_v32 = vpack.c.bf16 %v4327_v21, %v4327_v21 }
 0x3fb   : > { %5493 = vst.msk [vmem:[%s9528_s27 + $0xf4] sm:$0xf] %vm5431_vm1, %v6110_v32 }
 0x3fe   : > { %v6835_v61 = vpop.f32.mrf.mxu0 }
 0x3ff   : > { %v6115_v41 = vpack.c.bf16 %v6835_v61, %v6835_v61 }
 0x400   : > { %v4421_v2 = vpop.f32.mrf.mxu0 }
 0x401   : > { %5498 = vst.msk [vmem:[%s9528_s27 + $0x108] sm:$0xf] %vm5431_vm1, %v6115_v41  ;;  %v6113_v28 = vpack.c.bf16 %v4421_v2, %v4421_v2 }
 0x402   : > { %v6836_v30 = vpop.f32.mrf.mxu0  ;;  %v6867_v50 = vpop.f32.mrf.mxu1 }
 0x403   : > { %5496 = vst.msk [vmem:[%s9528_s27 + $0x100] sm:$0xf] %vm5431_vm1, %v6113_v28  ;;  %v6116_v48 = vpack.c.bf16 %v6836_v30, %v6836_v30  ;;  %v6131_v63 = vpack.c.bf16 %v6867_v50, %v6867_v50 }
 0x404   : > { %v4424_v20 = vpop.f32.mrf.mxu0  ;;  %v4566_v16 = vpop.f32.mrf.mxu1 }
 0x405   : > { %5499 = vst.msk [vmem:[%s9528_s27 + $0x10c] sm:$0xf] %vm5431_vm1, %v6116_v48  ;;  %5514 = vst.msk [vmem:[%s9528_s27 + $0x148] sm:$0xf] %vm5431_vm1, %v6131_v63  ;;  %v6114_v36 = vpack.c.bf16 %v4424_v20, %v4424_v20  ;;  %v6129_v59 = vpack.c.bf16 %v4566_v16, %v4566_v16 }
 0x406   : > { %v6868_v6 = vpop.f32.mrf.mxu1 }
 0x407   : > { %5497 = vst.msk [vmem:[%s9528_s27 + $0x104] sm:$0xf] %vm5431_vm1, %v6114_v36  ;;  %5512 = vst.msk [vmem:[%s9528_s27 + $0x140] sm:$0xf] %vm5431_vm1, %v6129_v59  ;;  %v6132_v29 = vpack.c.bf16 %v6868_v6, %v6868_v6 }
 0x408   : > { %v4569_v52 = vpop.f32.mrf.mxu1 }
 0x409   : > { %5515 = vst.msk [vmem:[%s9528_s27 + $0x14c] sm:$0xf] %vm5431_vm1, %v6132_v29  ;;  %v6130_v5 = vpack.c.bf16 %v4569_v52, %v4569_v52 }
 0x40b   : > { %5513 = vst.msk [vmem:[%s9528_s27 + $0x144] sm:$0xf] %vm5431_vm1, %v6130_v5 }
 0x40e   : > { %v6839_v46 = vpop.f32.mrf.mxu0 }
 0x40f   : > { %v6119_v19 = vpack.c.bf16 %v6839_v46, %v6839_v46 }
 0x410   : > { %v4437_v37 = vpop.f32.mrf.mxu0 }
 0x411   : > { %5502 = vst.msk [vmem:[%s9528_s27 + $0x118] sm:$0xf] %vm5431_vm1, %v6119_v19  ;;  %v6117_v9 = vpack.c.bf16 %v4437_v37, %v4437_v37 }
 0x412   : > { %v6840_v60 = vpop.f32.mrf.mxu0  ;;  %v6871_v18 = vpop.f32.mrf.mxu1 }
 0x413   : > { %5500 = vst.msk [vmem:[%s9528_s27 + $0x110] sm:$0xf] %vm5431_vm1, %v6117_v9  ;;  %v6120_v4 = vpack.c.bf16 %v6840_v60, %v6840_v60  ;;  %v6135_v0 = vpack.c.bf16 %v6871_v18, %v6871_v18 }
 0x414   : > { %v4440_v43 = vpop.f32.mrf.mxu0  ;;  %v4582_v14 = vpop.f32.mrf.mxu1 }
 0x415   : > { %5503 = vst.msk [vmem:[%s9528_s27 + $0x11c] sm:$0xf] %vm5431_vm1, %v6120_v4  ;;  %5518 = vst.msk [vmem:[%s9528_s27 + $0x158] sm:$0xf] %vm5431_vm1, %v6135_v0  ;;  %v6118_v8 = vpack.c.bf16 %v4440_v43, %v4440_v43  ;;  %v6133_v39 = vpack.c.bf16 %v4582_v14, %v4582_v14 }
 0x416   : > { %v6872_v49 = vpop.f32.mrf.mxu1 }
 0x417   : > { %5501 = vst.msk [vmem:[%s9528_s27 + $0x114] sm:$0xf] %vm5431_vm1, %v6118_v8  ;;  %5516 = vst.msk [vmem:[%s9528_s27 + $0x150] sm:$0xf] %vm5431_vm1, %v6133_v39  ;;  %v6136_v15 = vpack.c.bf16 %v6872_v49, %v6872_v49 }
 0x418   : > { %v4585_v38 = vpop.f32.mrf.mxu1 }
 0x419   : > { %5519 = vst.msk [vmem:[%s9528_s27 + $0x15c] sm:$0xf] %vm5431_vm1, %v6136_v15  ;;  %v6134_v44 = vpack.c.bf16 %v4585_v38, %v4585_v38 }
 0x41b   : > { %5517 = vst.msk [vmem:[%s9528_s27 + $0x154] sm:$0xf] %vm5431_vm1, %v6134_v44 }
 0x41f   : > { %v6843_v3 = vpop.f32.mrf.mxu0 }
 0x420   : > { %v6123_v12 = vpack.c.bf16 %v6843_v3, %v6843_v3 }
 0x421   : > { %v4453_v25 = vpop.f32.mrf.mxu0 }
 0x422   : > { %5506 = vst.msk [vmem:[%s9528_s27 + $0x128] sm:$0xf] %vm5431_vm1, %v6123_v12  ;;  %v6121_v26 = vpack.c.bf16 %v4453_v25, %v4453_v25 }
 0x423   : > { %v6844_v54 = vpop.f32.mrf.mxu0  ;;  %v6875_v56 = vpop.f32.mrf.mxu1 }
 0x424   : > { %5504 = vst.msk [vmem:[%s9528_s27 + $0x120] sm:$0xf] %vm5431_vm1, %v6121_v26  ;;  %v6124_v57 = vpack.c.bf16 %v6844_v54, %v6844_v54  ;;  %v6139_v11 = vpack.c.bf16 %v6875_v56, %v6875_v56 }
 0x425   : > { %v4456_v35 = vpop.f32.mrf.mxu0  ;;  %v4598_v51 = vpop.f32.mrf.mxu1 }
 0x426   : > { %5507 = vst.msk [vmem:[%s9528_s27 + $0x12c] sm:$0xf] %vm5431_vm1, %v6124_v57  ;;  %5522 = vst.msk [vmem:[%s9528_s27 + $0x168] sm:$0xf] %vm5431_vm1, %v6139_v11  ;;  %v6122_v31 = vpack.c.bf16 %v4456_v35, %v4456_v35  ;;  %v6137_v45 = vpack.c.bf16 %v4598_v51, %v4598_v51 }
 0x427   : > { %v6876_v23 = vpop.f32.mrf.mxu1 }
 0x428   : > { %5505 = vst.msk [vmem:[%s9528_s27 + $0x124] sm:$0xf] %vm5431_vm1, %v6122_v31  ;;  %5520 = vst.msk [vmem:[%s9528_s27 + $0x160] sm:$0xf] %vm5431_vm1, %v6137_v45  ;;  %v6140_v58 = vpack.c.bf16 %v6876_v23, %v6876_v23 }
 0x429   : > { %v4601_v17 = vpop.f32.mrf.mxu1 }
 0x42a   : > { %5523 = vst.msk [vmem:[%s9528_s27 + $0x16c] sm:$0xf] %vm5431_vm1, %v6140_v58  ;;  %v6138_v47 = vpack.c.bf16 %v4601_v17, %v4601_v17 }
 0x42c   : > { %5521 = vst.msk [vmem:[%s9528_s27 + $0x164] sm:$0xf] %vm5431_vm1, %v6138_v47 }
 0x42f   : > { %v6847_v42 = vpop.f32.mrf.mxu0 }
 0x430   : > { %v6127_v1 = vpack.c.bf16 %v6847_v42, %v6847_v42 }
 0x431   : > { %v4469_v7 = vpop.f32.mrf.mxu0 }
 0x432   : > { %5510 = vst.msk [vmem:[%s9528_s27 + $0x138] sm:$0xf] %vm5431_vm1, %v6127_v1  ;;  %v6125_v10 = vpack.c.bf16 %v4469_v7, %v4469_v7 }
 0x433   : > { %v6848_v27 = vpop.f32.mrf.mxu0  ;;  %v6879_v22 = vpop.f32.mrf.mxu1 }
 0x434   : > { %5508 = vst.msk [vmem:[%s9528_s27 + $0x130] sm:$0xf] %vm5431_vm1, %v6125_v10  ;;  %v6128_v62 = vpack.c.bf16 %v6848_v27, %v6848_v27  ;;  %v6143_v33 = vpack.c.bf16 %v6879_v22, %v6879_v22 }
 0x435   : > { %v4472_v13 = vpop.f32.mrf.mxu0  ;;  %v4614_v53 = vpop.f32.mrf.mxu1 }
 0x436   : > { %5511 = vst.msk [vmem:[%s9528_s27 + $0x13c] sm:$0xf] %vm5431_vm1, %v6128_v62  ;;  %5526 = vst.msk [vmem:[%s9528_s27 + $0x178] sm:$0xf] %vm5431_vm1, %v6143_v33  ;;  %v6126_v34 = vpack.c.bf16 %v4472_v13, %v4472_v13  ;;  %v6141_v55 = vpack.c.bf16 %v4614_v53, %v4614_v53 }
 0x437   : > { %v6880_v40 = vpop.f32.mrf.mxu1 }
 0x438   : > { %5509 = vst.msk [vmem:[%s9528_s27 + $0x134] sm:$0xf] %vm5431_vm1, %v6126_v34  ;;  %5524 = vst.msk [vmem:[%s9528_s27 + $0x170] sm:$0xf] %vm5431_vm1, %v6141_v55  ;;  %v6144_v24 = vpack.c.bf16 %v6880_v40, %v6880_v40 }
 0x439   : > { %v4617_v21 = vpop.f32.mrf.mxu1 }
 0x43a   : > { %5527 = vst.msk [vmem:[%s9528_s27 + $0x17c] sm:$0xf] %vm5431_vm1, %v6144_v24  ;;  %v6142_v32 = vpack.c.bf16 %v4617_v21, %v4617_v21 }
 0x43c   : > { %5525 = vst.msk [vmem:[%s9528_s27 + $0x174] sm:$0xf] %vm5431_vm1, %v6142_v32 }
 0x43f   : > { %v6899_v61 = vpop.f32.mrf.mxu0 }
 0x440   : > { %v6147_v41 = vpack.c.bf16 %v6899_v61, %v6899_v61 }
 0x441   : > { %v4711_v2 = vpop.f32.mrf.mxu0 }
 0x442   : > { %5530 = vst.msk [vmem:[%s9528_s27 + $0x188] sm:$0xf] %vm5431_vm1, %v6147_v41  ;;  %v6145_v28 = vpack.c.bf16 %v4711_v2, %v4711_v2 }
 0x443   : > { %v6900_v30 = vpop.f32.mrf.mxu0  ;;  %v6931_v50 = vpop.f32.mrf.mxu1 }
 0x444   : > { %5528 = vst.msk [vmem:[%s9528_s27 + $0x180] sm:$0xf] %vm5431_vm1, %v6145_v28  ;;  %v6148_v48 = vpack.c.bf16 %v6900_v30, %v6900_v30  ;;  %v6163_v63 = vpack.c.bf16 %v6931_v50, %v6931_v50 }
 0x445   : > { %v4714_v20 = vpop.f32.mrf.mxu0  ;;  %v4856_v16 = vpop.f32.mrf.mxu1 }
 0x446   : > { %5531 = vst.msk [vmem:[%s9528_s27 + $0x18c] sm:$0xf] %vm5431_vm1, %v6148_v48  ;;  %5546 = vst.msk [vmem:[%s9528_s27 + $0x1c8] sm:$0xf] %vm5431_vm1, %v6163_v63  ;;  %v6146_v36 = vpack.c.bf16 %v4714_v20, %v4714_v20  ;;  %v6161_v59 = vpack.c.bf16 %v4856_v16, %v4856_v16 }
 0x447   : > { %v6932_v6 = vpop.f32.mrf.mxu1 }
 0x448   : > { %5529 = vst.msk [vmem:[%s9528_s27 + $0x184] sm:$0xf] %vm5431_vm1, %v6146_v36  ;;  %5544 = vst.msk [vmem:[%s9528_s27 + $0x1c0] sm:$0xf] %vm5431_vm1, %v6161_v59  ;;  %v6164_v29 = vpack.c.bf16 %v6932_v6, %v6932_v6 }
 0x449   : > { %v4859_v52 = vpop.f32.mrf.mxu1 }
 0x44a   : > { %5547 = vst.msk [vmem:[%s9528_s27 + $0x1cc] sm:$0xf] %vm5431_vm1, %v6164_v29  ;;  %v6162_v5 = vpack.c.bf16 %v4859_v52, %v4859_v52 }
 0x44c   : > { %5545 = vst.msk [vmem:[%s9528_s27 + $0x1c4] sm:$0xf] %vm5431_vm1, %v6162_v5 }
 0x44f   : > { %v6903_v46 = vpop.f32.mrf.mxu0 }
 0x450   : > { %v6151_v19 = vpack.c.bf16 %v6903_v46, %v6903_v46 }
 0x451   : > { %v4727_v37 = vpop.f32.mrf.mxu0 }
 0x452   : > { %5534 = vst.msk [vmem:[%s9528_s27 + $0x198] sm:$0xf] %vm5431_vm1, %v6151_v19  ;;  %v6149_v9 = vpack.c.bf16 %v4727_v37, %v4727_v37 }
 0x453   : > { %v6904_v60 = vpop.f32.mrf.mxu0  ;;  %v6935_v18 = vpop.f32.mrf.mxu1 }
 0x454   : > { %5532 = vst.msk [vmem:[%s9528_s27 + $0x190] sm:$0xf] %vm5431_vm1, %v6149_v9  ;;  %v6152_v4 = vpack.c.bf16 %v6904_v60, %v6904_v60  ;;  %v6167_v0 = vpack.c.bf16 %v6935_v18, %v6935_v18 }
 0x455   : > { %v4730_v43 = vpop.f32.mrf.mxu0  ;;  %v4872_v14 = vpop.f32.mrf.mxu1 }
 0x456   : > { %5535 = vst.msk [vmem:[%s9528_s27 + $0x19c] sm:$0xf] %vm5431_vm1, %v6152_v4  ;;  %5550 = vst.msk [vmem:[%s9528_s27 + $0x1d8] sm:$0xf] %vm5431_vm1, %v6167_v0  ;;  %v6150_v8 = vpack.c.bf16 %v4730_v43, %v4730_v43  ;;  %v6165_v39 = vpack.c.bf16 %v4872_v14, %v4872_v14 }
 0x457   : > { %v6936_v49 = vpop.f32.mrf.mxu1 }
 0x458   : > { %5533 = vst.msk [vmem:[%s9528_s27 + $0x194] sm:$0xf] %vm5431_vm1, %v6150_v8  ;;  %5548 = vst.msk [vmem:[%s9528_s27 + $0x1d0] sm:$0xf] %vm5431_vm1, %v6165_v39  ;;  %v6168_v15 = vpack.c.bf16 %v6936_v49, %v6936_v49 }
 0x459   : > { %v4875_v38 = vpop.f32.mrf.mxu1 }
 0x45a   : > { %5551 = vst.msk [vmem:[%s9528_s27 + $0x1dc] sm:$0xf] %vm5431_vm1, %v6168_v15  ;;  %v6166_v44 = vpack.c.bf16 %v4875_v38, %v4875_v38 }
 0x45c   : > { %5549 = vst.msk [vmem:[%s9528_s27 + $0x1d4] sm:$0xf] %vm5431_vm1, %v6166_v44 }
 0x45f   : > { %v6907_v3 = vpop.f32.mrf.mxu0 }
 0x460   : > { %v6155_v12 = vpack.c.bf16 %v6907_v3, %v6907_v3 }
 0x461   : > { %v4743_v25 = vpop.f32.mrf.mxu0 }
 0x462   : > { %5538 = vst.msk [vmem:[%s9528_s27 + $0x1a8] sm:$0xf] %vm5431_vm1, %v6155_v12  ;;  %v6153_v26 = vpack.c.bf16 %v4743_v25, %v4743_v25 }
 0x463   : > { %v6908_v54 = vpop.f32.mrf.mxu0  ;;  %v6939_v56 = vpop.f32.mrf.mxu1 }
 0x464   : > { %5536 = vst.msk [vmem:[%s9528_s27 + $0x1a0] sm:$0xf] %vm5431_vm1, %v6153_v26  ;;  %v6156_v57 = vpack.c.bf16 %v6908_v54, %v6908_v54  ;;  %v6171_v11 = vpack.c.bf16 %v6939_v56, %v6939_v56 }
 0x465   : > { %v4746_v35 = vpop.f32.mrf.mxu0  ;;  %v4888_v51 = vpop.f32.mrf.mxu1 }
 0x466   : > { %5539 = vst.msk [vmem:[%s9528_s27 + $0x1ac] sm:$0xf] %vm5431_vm1, %v6156_v57  ;;  %5554 = vst.msk [vmem:[%s9528_s27 + $0x1e8] sm:$0xf] %vm5431_vm1, %v6171_v11  ;;  %v6154_v31 = vpack.c.bf16 %v4746_v35, %v4746_v35  ;;  %v6169_v45 = vpack.c.bf16 %v4888_v51, %v4888_v51 }
 0x467   : > { %v6940_v23 = vpop.f32.mrf.mxu1 }
 0x468   : > { %5537 = vst.msk [vmem:[%s9528_s27 + $0x1a4] sm:$0xf] %vm5431_vm1, %v6154_v31  ;;  %5552 = vst.msk [vmem:[%s9528_s27 + $0x1e0] sm:$0xf] %vm5431_vm1, %v6169_v45  ;;  %v6172_v58 = vpack.c.bf16 %v6940_v23, %v6940_v23 }
 0x469   : > { %v4891_v17 = vpop.f32.mrf.mxu1 }
 0x46a   : > { %5555 = vst.msk [vmem:[%s9528_s27 + $0x1ec] sm:$0xf] %vm5431_vm1, %v6172_v58  ;;  %v6170_v47 = vpack.c.bf16 %v4891_v17, %v4891_v17 }
 0x46b   : > { %v6911_v42 = vpop.f32.mrf.mxu0 }
 0x46c   : > { %5553 = vst.msk [vmem:[%s9528_s27 + $0x1e4] sm:$0xf] %vm5431_vm1, %v6170_v47  ;;  %v6159_v1 = vpack.c.bf16 %v6911_v42, %v6911_v42 }
 0x46d   : > { %v4759_v7 = vpop.f32.mrf.mxu0 }
 0x46e   : > { %5542 = vst.msk [vmem:[%s9528_s27 + $0x1b8] sm:$0xf] %vm5431_vm1, %v6159_v1  ;;  %v6157_v10 = vpack.c.bf16 %v4759_v7, %v4759_v7 }
 0x46f   : > { %v6912_v27 = vpop.f32.mrf.mxu0 }
 0x470   : > { %5540 = vst.msk [vmem:[%s9528_s27 + $0x1b0] sm:$0xf] %vm5431_vm1, %v6157_v10  ;;  %v6160_v22 = vpack.c.bf16 %v6912_v27, %v6912_v27 }
 0x471   : > { %v4762_v62 = vpop.f32.mrf.mxu0 }
 0x472   : > { %5543 = vst.msk [vmem:[%s9528_s27 + $0x1bc] sm:$0xf] %vm5431_vm1, %v6160_v22  ;;  %v6158_v33 = vpack.c.bf16 %v4762_v62, %v4762_v62  ;;  %v6943_v13 = vpop.f32.mrf.mxu1 }
 0x473   : > { %v6175_v53 = vpack.c.bf16 %v6943_v13, %v6943_v13 }
 0x474   : > { %5541 = vst.msk [vmem:[%s9528_s27 + $0x1b4] sm:$0xf] %vm5431_vm1, %v6158_v33  ;;  %v4904_v34 = vpop.f32.mrf.mxu1 }
 0x475   : > { %5558 = vst.msk [vmem:[%s9528_s27 + $0x1f8] sm:$0xf] %vm5431_vm1, %v6175_v53  ;;  %v6173_v55 = vpack.c.bf16 %v4904_v34, %v4904_v34 }
 0x476   : > { %v6944_v40 = vpop.f32.mrf.mxu1 }
 0x477   : > { %5556 = vst.msk [vmem:[%s9528_s27 + $0x1f0] sm:$0xf] %vm5431_vm1, %v6173_v55  ;;  %v6176_v24 = vpack.c.bf16 %v6944_v40, %v6944_v40 }
 0x478   : > { %v4907_v21 = vpop.f32.mrf.mxu1 }
 0x479   : > { %5559 = vst.msk [vmem:[%s9528_s27 + $0x1fc] sm:$0xf] %vm5431_vm1, %v6176_v24  ;;  %v6174_v32 = vpack.c.bf16 %v4907_v21, %v4907_v21 }
 0x47b   : > { %5557 = vst.msk [vmem:[%s9528_s27 + $0x1f4] sm:$0xf] %vm5431_vm1, %v6174_v32 }
 0x47c PF: > { %s13_s12 = sadd.s32 1, %s7727_s12  }
 0x47d   : > { %p10_p4 = scmp.ge.s32.totalorder %s13_s12, 6  }
 0x47f   :  { %12 = sbr.rel (!%p10_p4) target bundleno = 1 (0x1), region = 68 }

// kernel: _lambda_.5
= control target key start
LH: loop header
LB: loop body
LE: loop exit
PB: predicated region body
PF: predicated region fallthrough
CT: control target
= control target key end

     0   :  { %vm22_vm0 = vcmask 523264   ;;  %v1478_v1 = vmov 0.0   ;;  %s2356_s1 = inlined_call_operand.vmem [shape: bf16[64,64], index: 1, kind: input, shape index: {}]   ;;  %s2357_s0 = inlined_call_operand.vmem [shape: bf16[512,64], index: 0, kind: input, shape index: {}]   ;;  %s2358_s2 = inlined_call_operand.vmem [shape: f32[1,64], index: 2, kind: input, shape index: {}]   ;;  %s2359_s3 = inlined_call_operand.vmem [shape: f32[512,64], index: 3, kind: input, shape index: {}]   ;;  %s2360_s4 = inlined_call_operand.vmem [shape: f32[512,64], index: 4, kind: output, shape index: {}]  }
   0x1   :  { %v1507_v0 = vld [vmem:[%s2356_s1 + $0x18] sm:$0xff]   ;;  %25 = vst.msk [vmem:[#allocation2 + $0x10] sm:$0xff] %vm22_vm0, %v1478_v1  ;;  %23 = vst.msk [vmem:[#allocation2] sm:$0xff] %vm22_vm0, %v1478_v1  ;;  %v1442_v2 = vld [vmem:[%s2356_s1 + $0x10] sm:$0xff]  }
   0x2   :  { %24 = vst.msk [vmem:[#allocation2 + $0x8] sm:$0xff] %vm22_vm0, %v1478_v1  ;;  %26 = vst.msk [vmem:[#allocation2 + $0x18] sm:$0xff] %vm22_vm0, %v1478_v1  ;;  %1360 = vmatprep.subr.bf16.mxu0 %v1507_v0  ;;  %1432 = vmatprep.subr.bf16.mxu1 %v1507_v0  ;;  %v1443_v3 = vld [vmem:[%s2356_s1 + $0x8] sm:$0xff]   ;;  %v1445_v4 = vld [vmem:[%s2357_s0] sm:$0xff]  }
   0x3   :  { %27 = vst.msk [vmem:[#allocation2 + $0x20] sm:$0xff] %vm22_vm0, %v1478_v1  ;;  %28 = vst.msk [vmem:[#allocation2 + $0x28] sm:$0xff] %vm22_vm0, %v1478_v1  ;;  %1361 = vmatpush3.bf16.msra.mxu0 %v1507_v0  ;;  %1436 = vmatpush3.bf16.msra.mxu1 %v1507_v0  ;;  %v1446_v5 = vld [vmem:[%s2357_s0 + $0x80] sm:$0xff]   ;;  %v1447_v7 = vld [vmem:[%s2357_s0 + $0x8] sm:$0xff]  }
   0x4   :  { %29 = vst.msk [vmem:[#allocation2 + $0x30] sm:$0xff] %vm22_vm0, %v1478_v1  ;;  %30 = vst.msk [vmem:[#allocation2 + $0x38] sm:$0xff] %vm22_vm0, %v1478_v1  ;;  %1362 = vmatprep.subr.bf16.mxu0 %v1442_v2  ;;  %1433 = vmatprep.subr.bf16.mxu1 %v1442_v2  ;;  %v1444_v6 = vld [vmem:[%s2356_s1] sm:$0xff]   ;;  %v1448_v8 = vld [vmem:[%s2357_s0 + $0x88] sm:$0xff]  }
   0x5   :  { %31 = vst.msk [vmem:[#allocation2 + $0x40] sm:$0xff] %vm22_vm0, %v1478_v1  ;;  %32 = vst.msk [vmem:[#allocation2 + $0x48] sm:$0xff] %vm22_vm0, %v1478_v1  ;;  %1368 = vmatprep.mubr.msk.bf16.mxu0 %vm22_vm0, %v1445_v4  ;;  %1400 = vmatprep.mubr.msk.bf16.mxu1 %vm22_vm0, %v1446_v5  ;;  %v1449_v9 = vld [vmem:[%s2357_s0 + $0x10] sm:$0xff]   ;;  %v1451_v11 = vld [vmem:[%s2357_s0 + $0x18] sm:$0xff]  }
   0x6   :  { %33 = vst.msk [vmem:[#allocation2 + $0x50] sm:$0xff] %vm22_vm0, %v1478_v1  ;;  %34 = vst.msk [vmem:[#allocation2 + $0x58] sm:$0xff] %vm22_vm0, %v1478_v1  ;;  %v1450_v10 = vld [vmem:[%s2357_s0 + $0x90] sm:$0xff]   ;;  %v1452_v12 = vld [vmem:[%s2357_s0 + $0x98] sm:$0xff]  }
   0x7   :  { %35 = vst.msk [vmem:[#allocation2 + $0x60] sm:$0xff] %vm22_vm0, %v1478_v1  ;;  %36 = vst.msk [vmem:[#allocation2 + $0x68] sm:$0xff] %vm22_vm0, %v1478_v1  ;;  %1363 = vmatpush3.bf16.msra.mxu0 %v1442_v2  ;;  %1437 = vmatpush3.bf16.msra.mxu1 %v1442_v2  ;;  %v1453_v13 = vld [vmem:[%s2357_s0 + $0x20] sm:$0xff]   ;;  %v1455_v15 = vld [vmem:[%s2357_s0 + $0x28] sm:$0xff]  }
   0x8   :  { %37 = vst.msk [vmem:[#allocation2 + $0x70] sm:$0xff] %vm22_vm0, %v1478_v1  ;;  %38 = vst.msk [vmem:[#allocation2 + $0x78] sm:$0xff] %vm22_vm0, %v1478_v1  ;;  %1364 = vmatprep.subr.bf16.mxu0 %v1443_v3  ;;  %1434 = vmatprep.subr.bf16.mxu1 %v1443_v3  ;;  %v1454_v14 = vld [vmem:[%s2357_s0 + $0xa0] sm:$0xff]   ;;  %v1456_v16 = vld [vmem:[%s2357_s0 + $0xa8] sm:$0xff]  }
   0x9   :  { %39 = vst.msk [vmem:[#allocation2 + $0x80] sm:$0xff] %vm22_vm0, %v1478_v1  ;;  %40 = vst.msk [vmem:[#allocation2 + $0x88] sm:$0xff] %vm22_vm0, %v1478_v1  ;;  %v1457_v17 = vld [vmem:[%s2357_s0 + $0x30] sm:$0xff]   ;;  %v1459_v19 = vld [vmem:[%s2357_s0 + $0x38] sm:$0xff]  }
   0xa   :  { %41 = vst.msk [vmem:[#allocation2 + $0x90] sm:$0xff] %vm22_vm0, %v1478_v1  ;;  %42 = vst.msk [vmem:[#allocation2 + $0x98] sm:$0xff] %vm22_vm0, %v1478_v1  ;;  %v1458_v18 = vld [vmem:[%s2357_s0 + $0xb0] sm:$0xff]   ;;  %v1460_v20 = vld [vmem:[%s2357_s0 + $0xb8] sm:$0xff]  }
   0xb   :  { %43 = vst.msk [vmem:[#allocation2 + $0xa0] sm:$0xff] %vm22_vm0, %v1478_v1  ;;  %44 = vst.msk [vmem:[#allocation2 + $0xa8] sm:$0xff] %vm22_vm0, %v1478_v1  ;;  %1365 = vmatpush3.bf16.msra.mxu0 %v1443_v3  ;;  %1438 = vmatpush3.bf16.msra.mxu1 %v1443_v3  ;;  %v1461_v21 = vld [vmem:[%s2357_s0 + $0x40] sm:$0xff]   ;;  %v1463_v23 = vld [vmem:[%s2357_s0 + $0x48] sm:$0xff]  }
   0xc   :  { %45 = vst.msk [vmem:[#allocation2 + $0xb0] sm:$0xff] %vm22_vm0, %v1478_v1  ;;  %46 = vst.msk [vmem:[#allocation2 + $0xb8] sm:$0xff] %vm22_vm0, %v1478_v1  ;;  %1366 = vmatprep.subr.bf16.mxu0 %v1444_v6  ;;  %1435 = vmatprep.subr.bf16.mxu1 %v1444_v6  ;;  %v1462_v22 = vld [vmem:[%s2357_s0 + $0xc0] sm:$0xff]   ;;  %v1464_v24 = vld [vmem:[%s2357_s0 + $0xc8] sm:$0xff]  }
   0xd   :  { %47 = vst.msk [vmem:[#allocation2 + $0xc0] sm:$0xff] %vm22_vm0, %v1478_v1  ;;  %48 = vst.msk [vmem:[#allocation2 + $0xc8] sm:$0xff] %vm22_vm0, %v1478_v1  ;;  %v1465_v25 = vld [vmem:[%s2357_s0 + $0x50] sm:$0xff]   ;;  %v1467_v27 = vld [vmem:[%s2357_s0 + $0x58] sm:$0xff]  }
   0xe   :  { %49 = vst.msk [vmem:[#allocation2 + $0xd0] sm:$0xff] %vm22_vm0, %v1478_v1  ;;  %50 = vst.msk [vmem:[#allocation2 + $0xd8] sm:$0xff] %vm22_vm0, %v1478_v1  ;;  %v1466_v26 = vld [vmem:[%s2357_s0 + $0xd0] sm:$0xff]   ;;  %v1468_v28 = vld [vmem:[%s2357_s0 + $0xd8] sm:$0xff]  }
   0xf   :  { %51 = vst.msk [vmem:[#allocation2 + $0xe0] sm:$0xff] %vm22_vm0, %v1478_v1  ;;  %52 = vst.msk [vmem:[#allocation2 + $0xe8] sm:$0xff] %vm22_vm0, %v1478_v1  ;;  %1367 = vmatpush3.bf16.msra.mxu0 %v1444_v6  ;;  %1439 = vmatpush3.bf16.msra.mxu1 %v1444_v6  ;;  %v1469_v29 = vld [vmem:[%s2357_s0 + $0x60] sm:$0xff]   ;;  %v1471_v31 = vld [vmem:[%s2357_s0 + $0x68] sm:$0xff]  }
  0x10   :  { %53 = vst.msk [vmem:[#allocation2 + $0xf0] sm:$0xff] %vm22_vm0, %v1478_v1  ;;  %54 = vst.msk [vmem:[#allocation2 + $0xf8] sm:$0xff] %vm22_vm0, %v1478_v1  ;;  %v1470_v30 = vld [vmem:[%s2357_s0 + $0xe0] sm:$0xff]   ;;  %v1472_v32 = vld [vmem:[%s2357_s0 + $0xe8] sm:$0xff]  }
  0x11   :  { %55 = vst.msk [vmem:[#allocation2 + $0x100] sm:$0xff] %vm22_vm0, %v1478_v1  ;;  %56 = vst.msk [vmem:[#allocation2 + $0x108] sm:$0xff] %vm22_vm0, %v1478_v1  ;;  %v1473_v33 = vld [vmem:[%s2357_s0 + $0x70] sm:$0xff]   ;;  %v1475_v35 = vld [vmem:[%s2357_s0 + $0x78] sm:$0xff]  }
  0x12   :  { %57 = vst.msk [vmem:[#allocation2 + $0x110] sm:$0xff] %vm22_vm0, %v1478_v1  ;;  %58 = vst.msk [vmem:[#allocation2 + $0x118] sm:$0xff] %vm22_vm0, %v1478_v1  ;;  %1369 = vmatmul.mubr.msk.bf16.vlgmr.msra.gmra.mxu0 %vm22_vm0, %v1447_v7  ;;  %1401 = vmatmul.mubr.msk.bf16.vlgmr.msra.gmra.mxu1 %vm22_vm0, %v1448_v8  ;;  %v1474_v34 = vld [vmem:[%s2357_s0 + $0xf0] sm:$0xff]   ;;  %v1476_v36 = vld [vmem:[%s2357_s0 + $0xf8] sm:$0xff]  }
  0x13   :  { %59 = vst.msk [vmem:[#allocation2 + $0x120] sm:$0xff] %vm22_vm0, %v1478_v1  ;;  %60 = vst.msk [vmem:[#allocation2 + $0x128] sm:$0xff] %vm22_vm0, %v1478_v1  ;;  %1372 = vmatprep.mubr.msk.bf16.mxu0 %vm22_vm0, %v1449_v9  ;;  %1404 = vmatprep.mubr.msk.bf16.mxu1 %vm22_vm0, %v1450_v10  ;;  %v89_v37 = vld [vmem:[#allocation2 + $0x10] sm:$0xff]  ;;  %v87_v41 = vld [vmem:[#allocation2] sm:$0xff] }
  0x14   :  { %61 = vst.msk [vmem:[#allocation2 + $0x130] sm:$0xff] %vm22_vm0, %v1478_v1  ;;  %62 = vst.msk [vmem:[#allocation2 + $0x138] sm:$0xff] %vm22_vm0, %v1478_v1  ;;  %v90_v47 = vld [vmem:[#allocation2 + $0x18] sm:$0xff]  ;;  %v88_v53 = vld [vmem:[#allocation2 + $0x8] sm:$0xff] }
  0x15   :  { %63 = vst.msk [vmem:[#allocation2 + $0x140] sm:$0xff] %vm22_vm0, %v1478_v1  ;;  %64 = vst.msk [vmem:[#allocation2 + $0x148] sm:$0xff] %vm22_vm0, %v1478_v1  ;;  %v93_v59 = vld [vmem:[#allocation2 + $0x30] sm:$0xff]  ;;  %v1787_v63 = vld [vmem:[%s2358_s2] ss:$0 sm:$0xff] }
  0x16   :  { %65 = vst.msk [vmem:[#allocation2 + $0x150] sm:$0xff] %vm22_vm0, %v1478_v1  ;;  %66 = vst.msk [vmem:[#allocation2 + $0x158] sm:$0xff] %vm22_vm0, %v1478_v1  ;;  %v91_v2 = vld [vmem:[#allocation2 + $0x20] sm:$0xff]  ;;  %v1061_v4 = vld [vmem:[%s2359_s3 + $0x10] sm:$0xff] }
  0x17   :  { %67 = vst.msk [vmem:[#allocation2 + $0x160] sm:$0xff] %vm22_vm0, %v1478_v1  ;;  %68 = vst.msk [vmem:[#allocation2 + $0x168] sm:$0xff] %vm22_vm0, %v1478_v1  ;;  %v1093_v5 = vld [vmem:[%s2359_s3 + $0x110] sm:$0xff]  ;;  %v94_v8 = vld [vmem:[#allocation2 + $0x38] sm:$0xff] }
  0x18   :  { %69 = vst.msk [vmem:[#allocation2 + $0x170] sm:$0xff] %vm22_vm0, %v1478_v1  ;;  %70 = vst.msk [vmem:[#allocation2 + $0x178] sm:$0xff] %vm22_vm0, %v1478_v1  ;;  %v119_v42 = vld [vmem:[#allocation2 + $0x100] sm:$0xff]  ;;  %v120_v54 = vld [vmem:[#allocation2 + $0x108] sm:$0xff] }
  0x19   :  { %71 = vst.msk [vmem:[#allocation2 + $0x180] sm:$0xff] %vm22_vm0, %v1478_v1  ;;  %72 = vst.msk [vmem:[#allocation2 + $0x188] sm:$0xff] %vm22_vm0, %v1478_v1  ;;  %v121_v38 = vld [vmem:[#allocation2 + $0x110] sm:$0xff]  ;;  %v122_v48 = vld [vmem:[#allocation2 + $0x118] sm:$0xff] }
  0x1a   :  { %73 = vst.msk [vmem:[#allocation2 + $0x190] sm:$0xff] %vm22_vm0, %v1478_v1  ;;  %74 = vst.msk [vmem:[#allocation2 + $0x198] sm:$0xff] %vm22_vm0, %v1478_v1  ;;  %1373 = vmatmul.mubr.msk.bf16.gmra.mxu0 %vm22_vm0, %v1451_v11  ;;  %1405 = vmatmul.mubr.msk.bf16.gmra.mxu1 %vm22_vm0, %v1452_v12  ;;  %v123_v3 = vld [vmem:[#allocation2 + $0x120] sm:$0xff] }
  0x1b   :  { %75 = vst.msk [vmem:[#allocation2 + $0x1a0] sm:$0xff] %vm22_vm0, %v1478_v1  ;;  %76 = vst.msk [vmem:[#allocation2 + $0x1a8] sm:$0xff] %vm22_vm0, %v1478_v1  ;;  %1376 = vmatprep.mubr.msk.bf16.mxu0 %vm22_vm0, %v1453_v13  ;;  %1408 = vmatprep.mubr.msk.bf16.mxu1 %vm22_vm0, %v1454_v14  ;;  %v125_v60 = vld [vmem:[#allocation2 + $0x130] sm:$0xff]  ;;  %v126_v13 = vld [vmem:[#allocation2 + $0x138] sm:$0xff] }
  0x1c   :  { %77 = vst.msk [vmem:[#allocation2 + $0x1b0] sm:$0xff] %vm22_vm0, %v1478_v1  ;;  %78 = vst.msk [vmem:[#allocation2 + $0x1b8] sm:$0xff] %vm22_vm0, %v1478_v1 }
  0x1d   :  { %79 = vst.msk [vmem:[#allocation2 + $0x1c0] sm:$0xff] %vm22_vm0, %v1478_v1  ;;  %80 = vst.msk [vmem:[#allocation2 + $0x1c8] sm:$0xff] %vm22_vm0, %v1478_v1 }
  0x1e   :  { %81 = vst.msk [vmem:[#allocation2 + $0x1d0] sm:$0xff] %vm22_vm0, %v1478_v1  ;;  %82 = vst.msk [vmem:[#allocation2 + $0x1d8] sm:$0xff] %vm22_vm0, %v1478_v1 }
  0x1f   :  { %83 = vst.msk [vmem:[#allocation2 + $0x1e0] sm:$0xff] %vm22_vm0, %v1478_v1  ;;  %84 = vst.msk [vmem:[#allocation2 + $0x1e8] sm:$0xff] %vm22_vm0, %v1478_v1 }
  0x20   :  { %85 = vst.msk [vmem:[#allocation2 + $0x1f0] sm:$0xff] %vm22_vm0, %v1478_v1  ;;  %86 = vst.msk [vmem:[#allocation2 + $0x1f8] sm:$0xff] %vm22_vm0, %v1478_v1 }
  0x22   :  { %1377 = vmatmul.mubr.msk.bf16.gmra.mxu0 %vm22_vm0, %v1455_v15  ;;  %1409 = vmatmul.mubr.msk.bf16.gmra.mxu1 %vm22_vm0, %v1456_v16  ;;  %v1059_v16 = vld [vmem:[%s2359_s3] sm:$0xff] }
  0x23   :  { %1380 = vmatprep.mubr.msk.bf16.mxu0 %vm22_vm0, %v1457_v17  ;;  %1412 = vmatprep.mubr.msk.bf16.mxu1 %vm22_vm0, %v1458_v18  ;;  %v1091_v17 = vld [vmem:[%s2359_s3 + $0x100] sm:$0xff] }
  0x2a   :  { %1381 = vmatmul.mubr.msk.bf16.gmra.mxu0 %vm22_vm0, %v1459_v19  ;;  %1413 = vmatmul.mubr.msk.bf16.gmra.mxu1 %vm22_vm0, %v1460_v20  ;;  %v92_v20 = vld [vmem:[#allocation2 + $0x28] sm:$0xff] }
  0x2b   :  { %1384 = vmatprep.mubr.msk.bf16.mxu0 %vm22_vm0, %v1461_v21  ;;  %1416 = vmatprep.mubr.msk.bf16.mxu1 %vm22_vm0, %v1462_v22 }
  0x32   :  { %1385 = vmatmul.mubr.msk.bf16.gmra.mxu0 %vm22_vm0, %v1463_v23  ;;  %1417 = vmatmul.mubr.msk.bf16.gmra.mxu1 %vm22_vm0, %v1464_v24 }
  0x33   :  { %1388 = vmatprep.mubr.msk.bf16.mxu0 %vm22_vm0, %v1465_v25  ;;  %1420 = vmatprep.mubr.msk.bf16.mxu1 %vm22_vm0, %v1466_v26  ;;  %v124_v25 = vld [vmem:[#allocation2 + $0x128] sm:$0xff] }
  0x3a   :  { %1389 = vmatmul.mubr.msk.bf16.gmra.mxu0 %vm22_vm0, %v1467_v27  ;;  %1421 = vmatmul.mubr.msk.bf16.gmra.mxu1 %vm22_vm0, %v1468_v28 }
  0x3b   :  { %1392 = vmatprep.mubr.msk.bf16.mxu0 %vm22_vm0, %v1469_v29  ;;  %1424 = vmatprep.mubr.msk.bf16.mxu1 %vm22_vm0, %v1470_v30  ;;  %v1062_v30 = vld [vmem:[%s2359_s3 + $0x18] sm:$0xff] }
  0x42   :  { %1393 = vmatmul.mubr.msk.bf16.gmra.mxu0 %vm22_vm0, %v1471_v31  ;;  %1425 = vmatmul.mubr.msk.bf16.gmra.mxu1 %vm22_vm0, %v1472_v32  ;;  %v1094_v31 = vld [vmem:[%s2359_s3 + $0x118] sm:$0xff]  ;;  %v97_v32 = vld [vmem:[#allocation2 + $0x50] sm:$0xff] }
  0x43   :  { %1396 = vmatprep.mubr.msk.bf16.mxu0 %vm22_vm0, %v1473_v33  ;;  %1428 = vmatprep.mubr.msk.bf16.mxu1 %vm22_vm0, %v1474_v34 }
  0x4a   :  { %1397 = vmatmul.mubr.msk.bf16.gmra.mxu0 %vm22_vm0, %v1475_v35  ;;  %1429 = vmatmul.mubr.msk.bf16.gmra.mxu1 %vm22_vm0, %v1476_v36 }
  0xd2   :  { %v1370_v39 = vpop.f32.mrf.mxu0  ;;  %v1402_v40 = vpop.f32.mrf.mxu1 }
  0xd3   :  { %v795_v43 = vadd.f32 %v1370_v39, %v89_v37  ;;  %v827_v44 = vadd.f32 %v1402_v40, %v121_v38  ;;  %v129_v39 = vld [vmem:[#allocation2 + $0x150] sm:$0xff] }
  0xd4   :  { %v538_v45 = vpop.f32.mrf.mxu0  ;;  %v666_v46 = vpop.f32.mrf.mxu1 }
  0xd5   :  { %859 = vst.msk [vmem:[#allocation2 + $0x10] sm:$0xff] %vm22_vm0, %v795_v43  ;;  %891 = vst.msk [vmem:[#allocation2 + $0x110] sm:$0xff] %vm22_vm0, %v827_v44  ;;  %v793_v49 = vadd.f32 %v538_v45, %v87_v41  ;;  %v825_v50 = vadd.f32 %v666_v46, %v119_v42  ;;  %v1060_v44 = vld [vmem:[%s2359_s3 + $0x8] sm:$0xff]  ;;  %v95_v46 = vld [vmem:[#allocation2 + $0x40] sm:$0xff] }
  0xd6   :  { %v1371_v51 = vpop.f32.mrf.mxu0  ;;  %v1403_v52 = vpop.f32.mrf.mxu1  ;;  %v1092_v45 = vld [vmem:[%s2359_s3 + $0x108] sm:$0xff] }
  0xd7   :  { %857 = vst.msk [vmem:[#allocation2] sm:$0xff] %vm22_vm0, %v793_v49  ;;  %889 = vst.msk [vmem:[#allocation2 + $0x100] sm:$0xff] %vm22_vm0, %v825_v50  ;;  %v796_v55 = vadd.f32 %v1371_v51, %v90_v47  ;;  %v828_v56 = vadd.f32 %v1403_v52, %v122_v48 }
  0xd8   :  { %v541_v57 = vpop.f32.mrf.mxu0  ;;  %v669_v58 = vpop.f32.mrf.mxu1 }
  0xd9   :  { %860 = vst.msk [vmem:[#allocation2 + $0x18] sm:$0xff] %vm22_vm0, %v796_v55  ;;  %892 = vst.msk [vmem:[#allocation2 + $0x118] sm:$0xff] %vm22_vm0, %v828_v56  ;;  %v794_v61 = vadd.f32 %v541_v57, %v88_v53  ;;  %v826_v62 = vadd.f32 %v669_v58, %v120_v54  ;;  %v127_v53 = vld [vmem:[#allocation2 + $0x140] sm:$0xff]  ;;  %v1065_v58 = vld [vmem:[%s2359_s3 + $0x30] sm:$0xff] }
  0xda   :  { %v1374_v0 = vpop.f32.mrf.mxu0  ;;  %v1406_v1 = vpop.f32.mrf.mxu1 }
  0xdb   :  { %858 = vst.msk [vmem:[#allocation2 + $0x8] sm:$0xff] %vm22_vm0, %v794_v61  ;;  %890 = vst.msk [vmem:[#allocation2 + $0x108] sm:$0xff] %vm22_vm0, %v826_v62  ;;  %v799_v6 = vadd.f32 %v1374_v0, %v93_v59  ;;  %v831_v7 = vadd.f32 %v1406_v1, %v125_v60  ;;  %v1097_v59 = vld [vmem:[%s2359_s3 + $0x130] sm:$0xff]  ;;  %v98_v60 = vld [vmem:[#allocation2 + $0x58] sm:$0xff] }
  0xdc   :  { %v926_v9 = vld [vmem:[#allocation2 + $0x10] sm:$0xff]  ;;  %v554_v11 = vpop.f32.mrf.mxu0  ;;  %v682_v12 = vpop.f32.mrf.mxu1 }
  0xdd   :  { %v958_v10 = vld [vmem:[#allocation2 + $0x110] sm:$0xff]  ;;  %v997_v14 = vadd.f32 %v1787_v63, %v926_v9  ;;  %863 = vst.msk [vmem:[#allocation2 + $0x30] sm:$0xff] %vm22_vm0, %v799_v6  ;;  %895 = vst.msk [vmem:[#allocation2 + $0x130] sm:$0xff] %vm22_vm0, %v831_v7  ;;  %v797_v18 = vadd.f32 %v554_v11, %v91_v2  ;;  %v829_v19 = vadd.f32 %v682_v12, %v123_v3  ;;  %v1063_v9 = vld [vmem:[%s2359_s3 + $0x20] sm:$0xff] }
  0xde   :  { %v1029_v15 = vadd.f32 %v1787_v63, %v958_v10  ;;  %v924_v21 = vld [vmem:[#allocation2] sm:$0xff]  ;;  %v1375_v23 = vpop.f32.mrf.mxu0  ;;  %v1407_v24 = vpop.f32.mrf.mxu1  ;;  %v96_v11 = vld [vmem:[#allocation2 + $0x48] sm:$0xff] }
  0xdf   :  { %v956_v22 = vld [vmem:[#allocation2 + $0x100] sm:$0xff]  ;;  %v1125_v26 = vadd.f32 %v1061_v4, %v997_v14  ;;  %v995_v28 = vadd.f32 %v1787_v63, %v924_v21  ;;  %861 = vst.msk [vmem:[#allocation2 + $0x20] sm:$0xff] %vm22_vm0, %v797_v18  ;;  %893 = vst.msk [vmem:[#allocation2 + $0x120] sm:$0xff] %vm22_vm0, %v829_v19  ;;  %v800_v35 = vadd.f32 %v1375_v23, %v94_v8  ;;  %v130_v4 = vld [vmem:[#allocation2 + $0x158] sm:$0xff] }
  0xe0   :  { %v1157_v27 = vadd.f32 %v1093_v5, %v1029_v15  ;;  %v1027_v29 = vadd.f32 %v1787_v63, %v956_v22  ;;  %v927_v33 = vld [vmem:[#allocation2 + $0x18] sm:$0xff]  ;;  %v832_v36 = vadd.f32 %v1407_v24, %v126_v13  ;;  %v557_v37 = vpop.f32.mrf.mxu0  ;;  %v685_v38 = vpop.f32.mrf.mxu1  ;;  %v1095_v10 = vld [vmem:[%s2359_s3 + $0x120] sm:$0xff]  ;;  %v128_v18 = vld [vmem:[#allocation2 + $0x148] sm:$0xff] }
  0xe1   :  { %v959_v34 = vld [vmem:[#allocation2 + $0x118] sm:$0xff]  ;;  %1189 = vst.msk [vmem:[%s2360_s4 + $0x10] sm:$0xff] %vm22_vm0, %v1125_v26  ;;  %v1123_v40 = vadd.f32 %v1059_v16, %v995_v28  ;;  %v998_v42 = vadd.f32 %v1787_v63, %v927_v33  ;;  %864 = vst.msk [vmem:[#allocation2 + $0x38] sm:$0xff] %vm22_vm0, %v800_v35  ;;  %v798_v49 = vadd.f32 %v557_v37, %v92_v20  ;;  %v1064_v35 = vld [vmem:[%s2359_s3 + $0x28] sm:$0xff] }
  0xe2   :  { %1221 = vst.msk [vmem:[%s2360_s4 + $0x110] sm:$0xff] %vm22_vm0, %v1157_v27  ;;  %v1155_v41 = vadd.f32 %v1091_v17, %v1027_v29  ;;  %v1030_v43 = vadd.f32 %v1787_v63, %v959_v34  ;;  %v925_v47 = vld [vmem:[#allocation2 + $0x8] sm:$0xff]  ;;  %896 = vst.msk [vmem:[#allocation2 + $0x138] sm:$0xff] %vm22_vm0, %v832_v36  ;;  %v830_v50 = vadd.f32 %v685_v38, %v124_v25  ;;  %v1378_v51 = vpop.f32.mrf.mxu0  ;;  %v1410_v52 = vpop.f32.mrf.mxu1  ;;  %v1066_v23 = vld [vmem:[%s2359_s3 + $0x38] sm:$0xff] }
  0xe3   :  { %v957_v48 = vld [vmem:[#allocation2 + $0x108] sm:$0xff]  ;;  %1187 = vst.msk [vmem:[%s2360_s4] sm:$0xff] %vm22_vm0, %v1123_v40  ;;  %v1126_v54 = vadd.f32 %v1062_v30, %v998_v42  ;;  %v996_v56 = vadd.f32 %v1787_v63, %v925_v47  ;;  %862 = vst.msk [vmem:[#allocation2 + $0x28] sm:$0xff] %vm22_vm0, %v798_v49  ;;  %v803_v0 = vadd.f32 %v1378_v51, %v97_v32  ;;  %v1098_v24 = vld [vmem:[%s2359_s3 + $0x138] sm:$0xff] }
  0xe4   :  { %1219 = vst.msk [vmem:[%s2360_s4 + $0x100] sm:$0xff] %vm22_vm0, %v1155_v41  ;;  %v1158_v55 = vadd.f32 %v1094_v31, %v1030_v43  ;;  %v1028_v57 = vadd.f32 %v1787_v63, %v957_v48  ;;  %v930_v61 = vld [vmem:[#allocation2 + $0x30] sm:$0xff]  ;;  %894 = vst.msk [vmem:[#allocation2 + $0x128] sm:$0xff] %vm22_vm0, %v830_v50  ;;  %v835_v1 = vadd.f32 %v1410_v52, %v129_v39  ;;  %v570_v2 = vpop.f32.mrf.mxu0  ;;  %v698_v3 = vpop.f32.mrf.mxu1  ;;  %v1096_v40 = vld [vmem:[%s2359_s3 + $0x128] sm:$0xff] }
  0xe5   :  { %v962_v62 = vld [vmem:[#allocation2 + $0x130] sm:$0xff]  ;;  %1190 = vst.msk [vmem:[%s2360_s4 + $0x18] sm:$0xff] %vm22_vm0, %v1126_v54  ;;  %v1124_v5 = vadd.f32 %v1060_v44, %v996_v56  ;;  %v1001_v7 = vadd.f32 %v1787_v63, %v930_v61  ;;  %867 = vst.msk [vmem:[#allocation2 + $0x50] sm:$0xff] %vm22_vm0, %v803_v0  ;;  %v801_v14 = vadd.f32 %v570_v2, %v95_v46  ;;  %v99_v43 = vld [vmem:[#allocation2 + $0x60] sm:$0xff] }
  0xe6   :  { %1222 = vst.msk [vmem:[%s2360_s4 + $0x118] sm:$0xff] %vm22_vm0, %v1158_v55  ;;  %v1156_v6 = vadd.f32 %v1092_v45, %v1028_v57  ;;  %v1033_v8 = vadd.f32 %v1787_v63, %v962_v62  ;;  %v928_v12 = vld [vmem:[#allocation2 + $0x20] sm:$0xff]  ;;  %899 = vst.msk [vmem:[#allocation2 + $0x150] sm:$0xff] %vm22_vm0, %v835_v1  ;;  %v833_v15 = vadd.f32 %v698_v3, %v127_v53  ;;  %v1379_v16 = vpop.f32.mrf.mxu0  ;;  %v1411_v17 = vpop.f32.mrf.mxu1  ;;  %v101_v29 = vld [vmem:[#allocation2 + $0x70] sm:$0xff] }
  0xe7   :  { %v960_v13 = vld [vmem:[#allocation2 + $0x120] sm:$0xff]  ;;  %1188 = vst.msk [vmem:[%s2360_s4 + $0x8] sm:$0xff] %vm22_vm0, %v1124_v5  ;;  %v1129_v19 = vadd.f32 %v1065_v58, %v1001_v7  ;;  %v999_v21 = vadd.f32 %v1787_v63, %v928_v12  ;;  %865 = vst.msk [vmem:[#allocation2 + $0x40] sm:$0xff] %vm22_vm0, %v801_v14  ;;  %v804_v25 = vadd.f32 %v1379_v16, %v98_v60  ;;  %v133_v30 = vld [vmem:[#allocation2 + $0x170] sm:$0xff] }
  0xe8   :  { %1220 = vst.msk [vmem:[%s2360_s4 + $0x108] sm:$0xff] %vm22_vm0, %v1156_v6  ;;  %v1161_v20 = vadd.f32 %v1097_v59, %v1033_v8  ;;  %v1031_v22 = vadd.f32 %v1787_v63, %v960_v13  ;;  %897 = vst.msk [vmem:[#allocation2 + $0x140] sm:$0xff] %vm22_vm0, %v833_v15  ;;  %v836_v26 = vadd.f32 %v1411_v17, %v130_v4  ;;  %v573_v27 = vpop.f32.mrf.mxu0  ;;  %v701_v28 = vpop.f32.mrf.mxu1  ;;  %v931_v33 = vld [vmem:[#allocation2 + $0x38] sm:$0xff]  ;;  %v131_v44 = vld [vmem:[#allocation2 + $0x160] sm:$0xff] }
  0xe9   :  { %1193 = vst.msk [vmem:[%s2360_s4 + $0x30] sm:$0xff] %vm22_vm0, %v1129_v19  ;;  %v1127_v31 = vadd.f32 %v1063_v9, %v999_v21  ;;  %v963_v34 = vld [vmem:[#allocation2 + $0x138] sm:$0xff]  ;;  %v802_v36 = vadd.f32 %v573_v27, %v96_v11  ;;  %v834_v37 = vadd.f32 %v701_v28, %v128_v18  ;;  %v1002_v38 = vadd.f32 %v1787_v63, %v931_v33  ;;  %v1069_v47 = vld [vmem:[%s2359_s3 + $0x50] sm:$0xff]  ;;  %v1067_v61 = vld [vmem:[%s2359_s3 + $0x40] sm:$0xff] }
  0xea   :  { %1225 = vst.msk [vmem:[%s2360_s4 + $0x130] sm:$0xff] %vm22_vm0, %v1161_v20  ;;  %v1159_v32 = vadd.f32 %v1095_v10, %v1031_v22  ;;  %v1034_v39 = vadd.f32 %v1787_v63, %v963_v34  ;;  %868 = vst.msk [vmem:[#allocation2 + $0x58] sm:$0xff] %vm22_vm0, %v804_v25  ;;  %v1382_v41 = vpop.f32.mrf.mxu0  ;;  %v1414_v42 = vpop.f32.mrf.mxu1  ;;  %v929_v45 = vld [vmem:[#allocation2 + $0x28] sm:$0xff]  ;;  %v1101_v54 = vld [vmem:[%s2359_s3 + $0x150] sm:$0xff] }
  0xeb   :  { %900 = vst.msk [vmem:[#allocation2 + $0x158] sm:$0xff] %vm22_vm0, %v836_v26  ;;  %1191 = vst.msk [vmem:[%s2360_s4 + $0x20] sm:$0xff] %vm22_vm0, %v1127_v31  ;;  %v961_v46 = vld [vmem:[#allocation2 + $0x128] sm:$0xff]  ;;  %v807_v48 = vadd.f32 %v1382_v41, %v101_v29  ;;  %v839_v49 = vadd.f32 %v1414_v42, %v133_v30  ;;  %v1130_v50 = vadd.f32 %v1066_v23, %v1002_v38  ;;  %v102_v57 = vld [vmem:[#allocation2 + $0x78] sm:$0xff] }
  0xec   :  { %1223 = vst.msk [vmem:[%s2360_s4 + $0x120] sm:$0xff] %vm22_vm0, %v1159_v32  ;;  %866 = vst.msk [vmem:[#allocation2 + $0x48] sm:$0xff] %vm22_vm0, %v802_v36  ;;  %v1162_v51 = vadd.f32 %v1098_v24, %v1034_v39  ;;  %v1000_v52 = vadd.f32 %v1787_v63, %v929_v45  ;;  %v1032_v53 = vadd.f32 %v1787_v63, %v961_v46  ;;  %v586_v55 = vpop.f32.mrf.mxu0  ;;  %v714_v56 = vpop.f32.mrf.mxu1  ;;  %v134_v58 = vld [vmem:[#allocation2 + $0x178] sm:$0xff]  ;;  %v934_v59 = vld [vmem:[#allocation2 + $0x50] sm:$0xff] }
  0xed   :  { %898 = vst.msk [vmem:[#allocation2 + $0x148] sm:$0xff] %vm22_vm0, %v834_v37  ;;  %v966_v60 = vld [vmem:[#allocation2 + $0x150] sm:$0xff]  ;;  %871 = vst.msk [vmem:[#allocation2 + $0x70] sm:$0xff] %vm22_vm0, %v807_v48  ;;  %v805_v62 = vadd.f32 %v586_v55, %v99_v43  ;;  %v837_v0 = vadd.f32 %v714_v56, %v131_v44  ;;  %v1005_v3 = vadd.f32 %v1787_v63, %v934_v59  ;;  %v1099_v5 = vld [vmem:[%s2359_s3 + $0x140] sm:$0xff] }
  0xee   :  { %903 = vst.msk [vmem:[#allocation2 + $0x170] sm:$0xff] %vm22_vm0, %v839_v49  ;;  %1194 = vst.msk [vmem:[%s2360_s4 + $0x38] sm:$0xff] %vm22_vm0, %v1130_v50  ;;  %v1128_v1 = vadd.f32 %v1064_v35, %v1000_v52  ;;  %v1160_v2 = vadd.f32 %v1096_v40, %v1032_v53  ;;  %v1037_v4 = vadd.f32 %v1787_v63, %v966_v60  ;;  %v1383_v6 = vpop.f32.mrf.mxu0  ;;  %v1415_v7 = vpop.f32.mrf.mxu1  ;;  %v100_v8 = vld [vmem:[#allocation2 + $0x68] sm:$0xff]  ;;  %v932_v10 = vld [vmem:[#allocation2 + $0x40] sm:$0xff] }
  0xef   :  { %1226 = vst.msk [vmem:[%s2360_s4 + $0x138] sm:$0xff] %vm22_vm0, %v1162_v51  ;;  %v132_v9 = vld [vmem:[#allocation2 + $0x168] sm:$0xff]  ;;  %v964_v11 = vld [vmem:[#allocation2 + $0x140] sm:$0xff]  ;;  %v1070_v12 = vld [vmem:[%s2359_s3 + $0x58] sm:$0xff]  ;;  %v808_v14 = vadd.f32 %v1383_v6, %v102_v57  ;;  %v840_v15 = vadd.f32 %v1415_v7, %v134_v58  ;;  %v1133_v17 = vadd.f32 %v1069_v47, %v1005_v3  ;;  %v1003_v19 = vadd.f32 %v1787_v63, %v932_v10 }
  0xf0   :  { %v1102_v13 = vld [vmem:[%s2359_s3 + $0x158] sm:$0xff]  ;;  %869 = vst.msk [vmem:[#allocation2 + $0x60] sm:$0xff] %vm22_vm0, %v805_v62  ;;  %901 = vst.msk [vmem:[#allocation2 + $0x160] sm:$0xff] %vm22_vm0, %v837_v0  ;;  %v105_v16 = vld [vmem:[#allocation2 + $0x90] sm:$0xff]  ;;  %v1165_v18 = vadd.f32 %v1101_v54, %v1037_v4  ;;  %v1035_v20 = vadd.f32 %v1787_v63, %v964_v11  ;;  %v589_v23 = vpop.f32.mrf.mxu0  ;;  %v717_v24 = vpop.f32.mrf.mxu1 }
  0xf1   :  { %1192 = vst.msk [vmem:[%s2360_s4 + $0x28] sm:$0xff] %vm22_vm0, %v1128_v1  ;;  %1224 = vst.msk [vmem:[%s2360_s4 + $0x128] sm:$0xff] %vm22_vm0, %v1160_v2  ;;  %v1068_v21 = vld [vmem:[%s2359_s3 + $0x48] sm:$0xff]  ;;  %v137_v25 = vld [vmem:[#allocation2 + $0x190] sm:$0xff]  ;;  %v806_v28 = vadd.f32 %v589_v23, %v100_v8  ;;  %v838_v29 = vadd.f32 %v717_v24, %v132_v9  ;;  %v1131_v31 = vadd.f32 %v1067_v61, %v1003_v19 }
  0xf2   :  { %v1100_v22 = vld [vmem:[%s2359_s3 + $0x148] sm:$0xff]  ;;  %v935_v26 = vld [vmem:[#allocation2 + $0x58] sm:$0xff]  ;;  %872 = vst.msk [vmem:[#allocation2 + $0x78] sm:$0xff] %vm22_vm0, %v808_v14  ;;  %904 = vst.msk [vmem:[#allocation2 + $0x178] sm:$0xff] %vm22_vm0, %v840_v15  ;;  %v1163_v32 = vadd.f32 %v1099_v5, %v1035_v20  ;;  %v1386_v37 = vpop.f32.mrf.mxu0  ;;  %v1418_v38 = vpop.f32.mrf.mxu1 }
  0xf3   :  { %v967_v27 = vld [vmem:[#allocation2 + $0x158] sm:$0xff]  ;;  %v103_v30 = vld [vmem:[#allocation2 + $0x80] sm:$0xff]  ;;  %1197 = vst.msk [vmem:[%s2360_s4 + $0x50] sm:$0xff] %vm22_vm0, %v1133_v17  ;;  %1229 = vst.msk [vmem:[%s2360_s4 + $0x150] sm:$0xff] %vm22_vm0, %v1165_v18  ;;  %v1006_v33 = vadd.f32 %v1787_v63, %v935_v26  ;;  %v811_v44 = vadd.f32 %v1386_v37, %v105_v16  ;;  %v843_v45 = vadd.f32 %v1418_v38, %v137_v25 }
  0xf4   :  { %v1038_v34 = vadd.f32 %v1787_v63, %v967_v27  ;;  %v933_v35 = vld [vmem:[#allocation2 + $0x48] sm:$0xff]  ;;  %v135_v39 = vld [vmem:[#allocation2 + $0x180] sm:$0xff]  ;;  %v1073_v42 = vld [vmem:[%s2359_s3 + $0x70] sm:$0xff]  ;;  %870 = vst.msk [vmem:[#allocation2 + $0x68] sm:$0xff] %vm22_vm0, %v806_v28  ;;  %v602_v51 = vpop.f32.mrf.mxu0  ;;  %v730_v52 = vpop.f32.mrf.mxu1 }
  0xf5   :  { %v965_v36 = vld [vmem:[#allocation2 + $0x148] sm:$0xff]  ;;  %v1004_v40 = vadd.f32 %v1787_v63, %v933_v35  ;;  %v1105_v43 = vld [vmem:[%s2359_s3 + $0x170] sm:$0xff]  ;;  %902 = vst.msk [vmem:[#allocation2 + $0x168] sm:$0xff] %vm22_vm0, %v838_v29  ;;  %v106_v46 = vld [vmem:[#allocation2 + $0x98] sm:$0xff]  ;;  %v1134_v47 = vadd.f32 %v1070_v12, %v1006_v33  ;;  %v809_v0 = vadd.f32 %v602_v51, %v103_v30  ;;  %v841_v1 = vadd.f32 %v730_v52, %v135_v39 }
  0xf6   :  { %v1036_v41 = vadd.f32 %v1787_v63, %v965_v36  ;;  %1195 = vst.msk [vmem:[%s2360_s4 + $0x40] sm:$0xff] %vm22_vm0, %v1131_v31  ;;  %1227 = vst.msk [vmem:[%s2360_s4 + $0x140] sm:$0xff] %vm22_vm0, %v1163_v32  ;;  %v1166_v48 = vadd.f32 %v1102_v13, %v1038_v34  ;;  %v938_v49 = vld [vmem:[#allocation2 + $0x70] sm:$0xff]  ;;  %v138_v53 = vld [vmem:[#allocation2 + $0x198] sm:$0xff]  ;;  %v1387_v2 = vpop.f32.mrf.mxu0  ;;  %v1419_v3 = vpop.f32.mrf.mxu1 }
  0xf7   :  { %v970_v50 = vld [vmem:[#allocation2 + $0x170] sm:$0xff]  ;;  %v1132_v54 = vadd.f32 %v1068_v21, %v1004_v40  ;;  %v1009_v56 = vadd.f32 %v1787_v63, %v938_v49  ;;  %v1071_v58 = vld [vmem:[%s2359_s3 + $0x60] sm:$0xff]  ;;  %875 = vst.msk [vmem:[#allocation2 + $0x90] sm:$0xff] %vm22_vm0, %v811_v44  ;;  %907 = vst.msk [vmem:[#allocation2 + $0x190] sm:$0xff] %vm22_vm0, %v843_v45  ;;  %v812_v14 = vadd.f32 %v1387_v2, %v106_v46 }
  0xf8   :  { %v1164_v55 = vadd.f32 %v1100_v22, %v1036_v41  ;;  %v1041_v57 = vadd.f32 %v1787_v63, %v970_v50  ;;  %v1103_v59 = vld [vmem:[%s2359_s3 + $0x160] sm:$0xff]  ;;  %v104_v60 = vld [vmem:[#allocation2 + $0x88] sm:$0xff]  ;;  %1198 = vst.msk [vmem:[%s2360_s4 + $0x58] sm:$0xff] %vm22_vm0, %v1134_v47  ;;  %1230 = vst.msk [vmem:[%s2360_s4 + $0x158] sm:$0xff] %vm22_vm0, %v1166_v48  ;;  %v844_v15 = vadd.f32 %v1419_v3, %v138_v53  ;;  %v605_v16 = vpop.f32.mrf.mxu0  ;;  %v733_v17 = vpop.f32.mrf.mxu1 }
  0xf9   :  { %v936_v61 = vld [vmem:[#allocation2 + $0x60] sm:$0xff]  ;;  %v136_v4 = vld [vmem:[#allocation2 + $0x188] sm:$0xff]  ;;  %1196 = vst.msk [vmem:[%s2360_s4 + $0x48] sm:$0xff] %vm22_vm0, %v1132_v54  ;;  %v1137_v5 = vadd.f32 %v1073_v42, %v1009_v56  ;;  %v1074_v9 = vld [vmem:[%s2359_s3 + $0x78] sm:$0xff]  ;;  %v810_v28 = vadd.f32 %v605_v16, %v104_v60 }
  0xfa   :  { %v968_v62 = vld [vmem:[#allocation2 + $0x160] sm:$0xff]  ;;  %1228 = vst.msk [vmem:[%s2360_s4 + $0x148] sm:$0xff] %vm22_vm0, %v1164_v55  ;;  %v1169_v6 = vadd.f32 %v1105_v43, %v1041_v57  ;;  %v1007_v7 = vadd.f32 %v1787_v63, %v936_v61  ;;  %v1106_v10 = vld [vmem:[%s2359_s3 + $0x178] sm:$0xff]  ;;  %v109_v11 = vld [vmem:[#allocation2 + $0xb0] sm:$0xff]  ;;  %v842_v29 = vadd.f32 %v733_v17, %v136_v4  ;;  %v1390_v30 = vpop.f32.mrf.mxu0  ;;  %v1422_v31 = vpop.f32.mrf.mxu1 }
  0xfb   :  { %v1039_v8 = vadd.f32 %v1787_v63, %v968_v62  ;;  %v939_v12 = vld [vmem:[#allocation2 + $0x78] sm:$0xff]  ;;  %873 = vst.msk [vmem:[#allocation2 + $0x80] sm:$0xff] %vm22_vm0, %v809_v0  ;;  %905 = vst.msk [vmem:[#allocation2 + $0x180] sm:$0xff] %vm22_vm0, %v841_v1  ;;  %v141_v18 = vld [vmem:[#allocation2 + $0x1b0] sm:$0xff]  ;;  %v815_v42 = vadd.f32 %v1390_v30, %v109_v11 }
  0xfc   :  { %v971_v13 = vld [vmem:[#allocation2 + $0x178] sm:$0xff]  ;;  %1201 = vst.msk [vmem:[%s2360_s4 + $0x70] sm:$0xff] %vm22_vm0, %v1137_v5  ;;  %1233 = vst.msk [vmem:[%s2360_s4 + $0x170] sm:$0xff] %vm22_vm0, %v1169_v6  ;;  %v1135_v19 = vadd.f32 %v1071_v58, %v1007_v7  ;;  %v1010_v21 = vadd.f32 %v1787_v63, %v939_v12  ;;  %v1072_v23 = vld [vmem:[%s2359_s3 + $0x68] sm:$0xff]  ;;  %v847_v43 = vadd.f32 %v1422_v31, %v141_v18  ;;  %v618_v44 = vpop.f32.mrf.mxu0  ;;  %v746_v45 = vpop.f32.mrf.mxu1 }
  0xfd   :  { %v1167_v20 = vadd.f32 %v1103_v59, %v1039_v8  ;;  %v1042_v22 = vadd.f32 %v1787_v63, %v971_v13  ;;  %v1104_v24 = vld [vmem:[%s2359_s3 + $0x168] sm:$0xff]  ;;  %v107_v25 = vld [vmem:[#allocation2 + $0xa0] sm:$0xff]  ;;  %876 = vst.msk [vmem:[#allocation2 + $0x98] sm:$0xff] %vm22_vm0, %v812_v14  ;;  %908 = vst.msk [vmem:[#allocation2 + $0x198] sm:$0xff] %vm22_vm0, %v844_v15 }
  0xfe   :  { %v937_v26 = vld [vmem:[#allocation2 + $0x68] sm:$0xff]  ;;  %v139_v32 = vld [vmem:[#allocation2 + $0x1a0] sm:$0xff]  ;;  %1199 = vst.msk [vmem:[%s2360_s4 + $0x60] sm:$0xff] %vm22_vm0, %v1135_v19  ;;  %v1138_v33 = vadd.f32 %v1074_v9, %v1010_v21  ;;  %v1077_v37 = vld [vmem:[%s2359_s3 + $0x90] sm:$0xff]  ;;  %v813_v53 = vadd.f32 %v618_v44, %v107_v25  ;;  %v1391_v55 = vpop.f32.mrf.mxu0  ;;  %v1423_v56 = vpop.f32.mrf.mxu1 }
  0xff   :  { %v969_v27 = vld [vmem:[#allocation2 + $0x168] sm:$0xff]  ;;  %1231 = vst.msk [vmem:[%s2360_s4 + $0x160] sm:$0xff] %vm22_vm0, %v1167_v20  ;;  %v1170_v34 = vadd.f32 %v1106_v10, %v1042_v22  ;;  %v1008_v35 = vadd.f32 %v1787_v63, %v937_v26  ;;  %v1109_v38 = vld [vmem:[%s2359_s3 + $0x190] sm:$0xff]  ;;  %v110_v39 = vld [vmem:[#allocation2 + $0xb8] sm:$0xff]  ;;  %v845_v54 = vadd.f32 %v746_v45, %v139_v32 }
 0x100   :  { %v1040_v36 = vadd.f32 %v1787_v63, %v969_v27  ;;  %v942_v40 = vld [vmem:[#allocation2 + $0x90] sm:$0xff]  ;;  %874 = vst.msk [vmem:[#allocation2 + $0x88] sm:$0xff] %vm22_vm0, %v810_v28  ;;  %906 = vst.msk [vmem:[#allocation2 + $0x188] sm:$0xff] %vm22_vm0, %v842_v29  ;;  %v142_v46 = vld [vmem:[#allocation2 + $0x1b8] sm:$0xff]  ;;  %v816_v1 = vadd.f32 %v1391_v55, %v110_v39  ;;  %v621_v6 = vpop.f32.mrf.mxu0  ;;  %v749_v7 = vpop.f32.mrf.mxu1 }
 0x101   :  { %v974_v41 = vld [vmem:[#allocation2 + $0x190] sm:$0xff]  ;;  %1202 = vst.msk [vmem:[%s2360_s4 + $0x78] sm:$0xff] %vm22_vm0, %v1138_v33  ;;  %1234 = vst.msk [vmem:[%s2360_s4 + $0x178] sm:$0xff] %vm22_vm0, %v1170_v34  ;;  %v1136_v47 = vadd.f32 %v1072_v23, %v1008_v35  ;;  %v1013_v49 = vadd.f32 %v1787_v63, %v942_v40  ;;  %v1075_v51 = vld [vmem:[%s2359_s3 + $0x80] sm:$0xff]  ;;  %v848_v2 = vadd.f32 %v1423_v56, %v142_v46 }
 0x102   :  { %v1168_v48 = vadd.f32 %v1104_v24, %v1040_v36  ;;  %v1045_v50 = vadd.f32 %v1787_v63, %v974_v41  ;;  %v1107_v52 = vld [vmem:[%s2359_s3 + $0x180] sm:$0xff]  ;;  %879 = vst.msk [vmem:[#allocation2 + $0xb0] sm:$0xff] %vm22_vm0, %v815_v42  ;;  %911 = vst.msk [vmem:[#allocation2 + $0x1b0] sm:$0xff] %vm22_vm0, %v847_v43  ;;  %v108_v57 = vld [vmem:[#allocation2 + $0xa8] sm:$0xff]  ;;  %v1394_v20 = vpop.f32.mrf.mxu0  ;;  %v1426_v21 = vpop.f32.mrf.mxu1 }
 0x103   :  { %v140_v58 = vld [vmem:[#allocation2 + $0x1a8] sm:$0xff]  ;;  %1200 = vst.msk [vmem:[%s2360_s4 + $0x68] sm:$0xff] %vm22_vm0, %v1136_v47  ;;  %v1141_v59 = vadd.f32 %v1077_v37, %v1013_v49  ;;  %v940_v61 = vld [vmem:[#allocation2 + $0x80] sm:$0xff]  ;;  %v1078_v0 = vld [vmem:[%s2359_s3 + $0x98] sm:$0xff]  ;;  %v814_v13 = vadd.f32 %v621_v6, %v108_v57 }
 0x104   :  { %1232 = vst.msk [vmem:[%s2360_s4 + $0x168] sm:$0xff] %vm22_vm0, %v1168_v48  ;;  %v1173_v60 = vadd.f32 %v1109_v38, %v1045_v50  ;;  %v972_v62 = vld [vmem:[#allocation2 + $0x180] sm:$0xff]  ;;  %v1011_v3 = vadd.f32 %v1787_v63, %v940_v61  ;;  %v1110_v5 = vld [vmem:[%s2359_s3 + $0x198] sm:$0xff]  ;;  %877 = vst.msk [vmem:[#allocation2 + $0xa0] sm:$0xff] %vm22_vm0, %v813_v53  ;;  %v846_v14 = vadd.f32 %v749_v7, %v140_v58  ;;  %v634_v34 = vpop.f32.mrf.mxu0  ;;  %v762_v35 = vpop.f32.mrf.mxu1 }
 0x105   :  { %v1043_v4 = vadd.f32 %v1787_v63, %v972_v62  ;;  %909 = vst.msk [vmem:[#allocation2 + $0x1a0] sm:$0xff] %vm22_vm0, %v845_v54  ;;  %v113_v8 = vld [vmem:[#allocation2 + $0xd0] sm:$0xff]  ;;  %1205 = vst.msk [vmem:[%s2360_s4 + $0x90] sm:$0xff] %vm22_vm0, %v1141_v59  ;;  %v943_v10 = vld [vmem:[#allocation2 + $0x98] sm:$0xff] }
 0x106   :  { %v145_v9 = vld [vmem:[#allocation2 + $0x1d0] sm:$0xff]  ;;  %1237 = vst.msk [vmem:[%s2360_s4 + $0x190] sm:$0xff] %vm22_vm0, %v1173_v60  ;;  %v975_v11 = vld [vmem:[#allocation2 + $0x198] sm:$0xff]  ;;  %v1076_v12 = vld [vmem:[%s2359_s3 + $0x88] sm:$0xff]  ;;  %v1139_v15 = vadd.f32 %v1075_v51, %v1011_v3  ;;  %v1014_v17 = vadd.f32 %v1787_v63, %v943_v10  ;;  %v819_v27 = vadd.f32 %v1394_v20, %v113_v8  ;;  %v1395_v48 = vpop.f32.mrf.mxu0  ;;  %v1427_v49 = vpop.f32.mrf.mxu1 }
 0x107   :  { %880 = vst.msk [vmem:[#allocation2 + $0xb8] sm:$0xff] %vm22_vm0, %v816_v1  ;;  %912 = vst.msk [vmem:[#allocation2 + $0x1b8] sm:$0xff] %vm22_vm0, %v848_v2  ;;  %v1171_v16 = vadd.f32 %v1107_v52, %v1043_v4  ;;  %v1046_v18 = vadd.f32 %v1787_v63, %v975_v11  ;;  %v1108_v19 = vld [vmem:[%s2359_s3 + $0x188] sm:$0xff]  ;;  %v111_v22 = vld [vmem:[#allocation2 + $0xc0] sm:$0xff]  ;;  %v851_v28 = vadd.f32 %v1426_v21, %v145_v9 }
 0x108   :  { %v143_v23 = vld [vmem:[#allocation2 + $0x1c0] sm:$0xff]  ;;  %v941_v24 = vld [vmem:[#allocation2 + $0x88] sm:$0xff]  ;;  %v1081_v26 = vld [vmem:[%s2359_s3 + $0xb0] sm:$0xff]  ;;  %878 = vst.msk [vmem:[#allocation2 + $0xa8] sm:$0xff] %vm22_vm0, %v814_v13  ;;  %v1142_v29 = vadd.f32 %v1078_v0, %v1014_v17  ;;  %v817_v41 = vadd.f32 %v634_v34, %v111_v22  ;;  %v637_v1 = vpop.f32.mrf.mxu0  ;;  %v765_v2 = vpop.f32.mrf.mxu1 }
 0x109   :  { %v973_v25 = vld [vmem:[#allocation2 + $0x188] sm:$0xff]  ;;  %910 = vst.msk [vmem:[#allocation2 + $0x1a8] sm:$0xff] %vm22_vm0, %v846_v14  ;;  %1203 = vst.msk [vmem:[%s2360_s4 + $0x80] sm:$0xff] %vm22_vm0, %v1139_v15  ;;  %v1174_v30 = vadd.f32 %v1110_v5, %v1046_v18  ;;  %v1012_v31 = vadd.f32 %v1787_v63, %v941_v24  ;;  %v1113_v33 = vld [vmem:[%s2359_s3 + $0x1b0] sm:$0xff]  ;;  %v849_v42 = vadd.f32 %v762_v35, %v143_v23 }
 0x10a   :  { %1235 = vst.msk [vmem:[%s2360_s4 + $0x180] sm:$0xff] %vm22_vm0, %v1171_v16  ;;  %v1044_v32 = vadd.f32 %v1787_v63, %v973_v25  ;;  %v114_v36 = vld [vmem:[#allocation2 + $0xd8] sm:$0xff]  ;;  %v946_v38 = vld [vmem:[#allocation2 + $0xb0] sm:$0xff]  ;;  %v1079_v40 = vld [vmem:[%s2359_s3 + $0xa0] sm:$0xff]  ;;  %v1398_v15 = vpop.f32.mrf.mxu0  ;;  %v1430_v16 = vpop.f32.mrf.mxu1 }
 0x10b   :  { %v146_v37 = vld [vmem:[#allocation2 + $0x1d8] sm:$0xff]  ;;  %v978_v39 = vld [vmem:[#allocation2 + $0x1b0] sm:$0xff]  ;;  %883 = vst.msk [vmem:[#allocation2 + $0xd0] sm:$0xff] %vm22_vm0, %v819_v27  ;;  %915 = vst.msk [vmem:[#allocation2 + $0x1d0] sm:$0xff] %vm22_vm0, %v851_v28  ;;  %v1140_v43 = vadd.f32 %v1076_v12, %v1012_v31  ;;  %v1017_v45 = vadd.f32 %v1787_v63, %v946_v38  ;;  %v820_v55 = vadd.f32 %v1395_v48, %v114_v36 }
 0x10c   :  { %1206 = vst.msk [vmem:[%s2360_s4 + $0x98] sm:$0xff] %vm22_vm0, %v1142_v29  ;;  %1238 = vst.msk [vmem:[%s2360_s4 + $0x198] sm:$0xff] %vm22_vm0, %v1174_v30  ;;  %v1172_v44 = vadd.f32 %v1108_v19, %v1044_v32  ;;  %v1049_v46 = vadd.f32 %v1787_v63, %v978_v39  ;;  %v1111_v47 = vld [vmem:[%s2359_s3 + $0x1a0] sm:$0xff]  ;;  %v112_v50 = vld [vmem:[#allocation2 + $0xc8] sm:$0xff]  ;;  %v852_v56 = vadd.f32 %v1427_v49, %v146_v37  ;;  %v650_v29 = vpop.f32.mrf.mxu0  ;;  %v778_v30 = vpop.f32.mrf.mxu1 }
 0x10d   :  { %v144_v51 = vld [vmem:[#allocation2 + $0x1c8] sm:$0xff]  ;;  %v944_v52 = vld [vmem:[#allocation2 + $0xa0] sm:$0xff]  ;;  %v1082_v54 = vld [vmem:[%s2359_s3 + $0xb8] sm:$0xff]  ;;  %881 = vst.msk [vmem:[#allocation2 + $0xc0] sm:$0xff] %vm22_vm0, %v817_v41  ;;  %v1145_v57 = vadd.f32 %v1081_v26, %v1017_v45  ;;  %v818_v6 = vadd.f32 %v637_v1, %v112_v50 }
 0x10e   :  { %v976_v53 = vld [vmem:[#allocation2 + $0x1a0] sm:$0xff]  ;;  %913 = vst.msk [vmem:[#allocation2 + $0x1c0] sm:$0xff] %vm22_vm0, %v849_v42  ;;  %1204 = vst.msk [vmem:[%s2360_s4 + $0x88] sm:$0xff] %vm22_vm0, %v1140_v43  ;;  %v1177_v58 = vadd.f32 %v1113_v33, %v1049_v46  ;;  %v1015_v59 = vadd.f32 %v1787_v63, %v944_v52  ;;  %v947_v61 = vld [vmem:[#allocation2 + $0xb8] sm:$0xff]  ;;  %v850_v7 = vadd.f32 %v765_v2, %v144_v51  ;;  %v1399_v43 = vpop.f32.mrf.mxu0 }
 0x10f   :  { %1236 = vst.msk [vmem:[%s2360_s4 + $0x188] sm:$0xff] %vm22_vm0, %v1172_v44  ;;  %v1047_v60 = vadd.f32 %v1787_v63, %v976_v53  ;;  %v979_v62 = vld [vmem:[#allocation2 + $0x1b8] sm:$0xff]  ;;  %v1018_v3 = vadd.f32 %v1787_v63, %v947_v61  ;;  %v1080_v5 = vld [vmem:[%s2359_s3 + $0xa8] sm:$0xff]  ;;  %884 = vst.msk [vmem:[#allocation2 + $0xd8] sm:$0xff] %vm22_vm0, %v820_v55  ;;  %v1431_v44 = vpop.f32.mrf.mxu1 }
 0x110   :  { %v1114_v0 = vld [vmem:[%s2359_s3 + $0x1b8] sm:$0xff]  ;;  %v1050_v4 = vadd.f32 %v1787_v63, %v979_v62  ;;  %916 = vst.msk [vmem:[#allocation2 + $0x1d8] sm:$0xff] %vm22_vm0, %v852_v56  ;;  %v117_v8 = vld [vmem:[#allocation2 + $0xf0] sm:$0xff]  ;;  %1209 = vst.msk [vmem:[%s2360_s4 + $0xb0] sm:$0xff] %vm22_vm0, %v1145_v57  ;;  %v1143_v10 = vadd.f32 %v1079_v40, %v1015_v59  ;;  %v653_v57 = vpop.f32.mrf.mxu0 }
 0x111   :  { %v149_v9 = vld [vmem:[#allocation2 + $0x1f0] sm:$0xff]  ;;  %1241 = vst.msk [vmem:[%s2360_s4 + $0x1b0] sm:$0xff] %vm22_vm0, %v1177_v58  ;;  %v1175_v11 = vadd.f32 %v1111_v47, %v1047_v60  ;;  %v945_v12 = vld [vmem:[#allocation2 + $0xa8] sm:$0xff]  ;;  %v1146_v17 = vadd.f32 %v1082_v54, %v1018_v3  ;;  %882 = vst.msk [vmem:[#allocation2 + $0xc8] sm:$0xff] %vm22_vm0, %v818_v6  ;;  %v823_v27 = vadd.f32 %v1398_v15, %v117_v8  ;;  %v781_v58 = vpop.f32.mrf.mxu1 }
 0x112   :  { %v977_v13 = vld [vmem:[#allocation2 + $0x1a8] sm:$0xff]  ;;  %v1178_v18 = vadd.f32 %v1114_v0, %v1050_v4  ;;  %v1016_v19 = vadd.f32 %v1787_v63, %v945_v12  ;;  %v1085_v21 = vld [vmem:[%s2359_s3 + $0xd0] sm:$0xff]  ;;  %914 = vst.msk [vmem:[#allocation2 + $0x1c8] sm:$0xff] %vm22_vm0, %v850_v7  ;;  %v115_v22 = vld [vmem:[#allocation2 + $0xe0] sm:$0xff]  ;;  %v855_v28 = vadd.f32 %v1430_v16, %v149_v9 }
 0x113   :  { %v1112_v14 = vld [vmem:[%s2359_s3 + $0x1a8] sm:$0xff]  ;;  %v1048_v20 = vadd.f32 %v1787_v63, %v977_v13  ;;  %v147_v23 = vld [vmem:[#allocation2 + $0x1e0] sm:$0xff]  ;;  %1207 = vst.msk [vmem:[%s2360_s4 + $0xa0] sm:$0xff] %vm22_vm0, %v1143_v10  ;;  %1239 = vst.msk [vmem:[%s2360_s4 + $0x1a0] sm:$0xff] %vm22_vm0, %v1175_v11  ;;  %v821_v41 = vadd.f32 %v650_v29, %v115_v22 }
 0x114   :  { %v950_v24 = vld [vmem:[#allocation2 + $0xd0] sm:$0xff]  ;;  %1210 = vst.msk [vmem:[%s2360_s4 + $0xb8] sm:$0xff] %vm22_vm0, %v1146_v17  ;;  %1242 = vst.msk [vmem:[%s2360_s4 + $0x1b8] sm:$0xff] %vm22_vm0, %v1178_v18  ;;  %v1144_v31 = vadd.f32 %v1080_v5, %v1016_v19  ;;  %v1083_v35 = vld [vmem:[%s2359_s3 + $0xc0] sm:$0xff]  ;;  %v853_v42 = vadd.f32 %v778_v30, %v147_v23 }
 0x115   :  { %v982_v25 = vld [vmem:[#allocation2 + $0x1d0] sm:$0xff]  ;;  %v1176_v32 = vadd.f32 %v1112_v14, %v1048_v20  ;;  %v1021_v33 = vadd.f32 %v1787_v63, %v950_v24  ;;  %v118_v36 = vld [vmem:[#allocation2 + $0xf8] sm:$0xff]  ;;  %v948_v38 = vld [vmem:[#allocation2 + $0xc0] sm:$0xff]  ;;  %887 = vst.msk [vmem:[#allocation2 + $0xf0] sm:$0xff] %vm22_vm0, %v823_v27 }
 0x116   :  { %v1117_v26 = vld [vmem:[%s2359_s3 + $0x1d0] sm:$0xff]  ;;  %v1053_v34 = vadd.f32 %v1787_v63, %v982_v25  ;;  %v150_v37 = vld [vmem:[#allocation2 + $0x1f8] sm:$0xff]  ;;  %v980_v39 = vld [vmem:[#allocation2 + $0x1c0] sm:$0xff]  ;;  %919 = vst.msk [vmem:[#allocation2 + $0x1f0] sm:$0xff] %vm22_vm0, %v855_v28  ;;  %v1019_v47 = vadd.f32 %v1787_v63, %v948_v38  ;;  %v824_v55 = vadd.f32 %v1399_v43, %v118_v36 }
 0x117   :  { %v1115_v40 = vld [vmem:[%s2359_s3 + $0x1c0] sm:$0xff]  ;;  %1208 = vst.msk [vmem:[%s2360_s4 + $0xa8] sm:$0xff] %vm22_vm0, %v1144_v31  ;;  %1240 = vst.msk [vmem:[%s2360_s4 + $0x1a8] sm:$0xff] %vm22_vm0, %v1176_v32  ;;  %v1149_v45 = vadd.f32 %v1085_v21, %v1021_v33  ;;  %v1051_v48 = vadd.f32 %v1787_v63, %v980_v39  ;;  %v1086_v49 = vld [vmem:[%s2359_s3 + $0xd8] sm:$0xff]  ;;  %v856_v56 = vadd.f32 %v1431_v44, %v150_v37 }
 0x118   :  { %v1181_v46 = vadd.f32 %v1117_v26, %v1053_v34  ;;  %v116_v50 = vld [vmem:[#allocation2 + $0xe8] sm:$0xff]  ;;  %v951_v52 = vld [vmem:[#allocation2 + $0xd8] sm:$0xff]  ;;  %885 = vst.msk [vmem:[#allocation2 + $0xe0] sm:$0xff] %vm22_vm0, %v821_v41  ;;  %917 = vst.msk [vmem:[#allocation2 + $0x1e0] sm:$0xff] %vm22_vm0, %v853_v42  ;;  %v1147_v59 = vadd.f32 %v1083_v35, %v1019_v47 }
 0x119   :  { %v148_v51 = vld [vmem:[#allocation2 + $0x1e8] sm:$0xff]  ;;  %v983_v53 = vld [vmem:[#allocation2 + $0x1d8] sm:$0xff]  ;;  %1213 = vst.msk [vmem:[%s2360_s4 + $0xd0] sm:$0xff] %vm22_vm0, %v1149_v45  ;;  %v1179_v60 = vadd.f32 %v1115_v40, %v1051_v48  ;;  %v1022_v61 = vadd.f32 %v1787_v63, %v951_v52  ;;  %888 = vst.msk [vmem:[#allocation2 + $0xf8] sm:$0xff] %vm22_vm0, %v824_v55  ;;  %v822_v4 = vadd.f32 %v653_v57, %v116_v50 }
 0x11a   :  { %v1118_v54 = vld [vmem:[%s2359_s3 + $0x1d8] sm:$0xff]  ;;  %1245 = vst.msk [vmem:[%s2360_s4 + $0x1d0] sm:$0xff] %vm22_vm0, %v1181_v46  ;;  %v1054_v62 = vadd.f32 %v1787_v63, %v983_v53  ;;  %v1084_v0 = vld [vmem:[%s2359_s3 + $0xc8] sm:$0xff]  ;;  %920 = vst.msk [vmem:[#allocation2 + $0x1f8] sm:$0xff] %vm22_vm0, %v856_v56  ;;  %v854_v5 = vadd.f32 %v781_v58, %v148_v51 }
 0x11b   :  { %v949_v1 = vld [vmem:[#allocation2 + $0xc8] sm:$0xff]  ;;  %1211 = vst.msk [vmem:[%s2360_s4 + $0xc0] sm:$0xff] %vm22_vm0, %v1147_v59  ;;  %1243 = vst.msk [vmem:[%s2360_s4 + $0x1c0] sm:$0xff] %vm22_vm0, %v1179_v60  ;;  %v1150_v6 = vadd.f32 %v1086_v49, %v1022_v61  ;;  %v1089_v10 = vld [vmem:[%s2359_s3 + $0xf0] sm:$0xff] }
 0x11c   :  { %v981_v2 = vld [vmem:[#allocation2 + $0x1c8] sm:$0xff]  ;;  %v1182_v7 = vadd.f32 %v1118_v54, %v1054_v62  ;;  %v1020_v8 = vadd.f32 %v1787_v63, %v949_v1  ;;  %886 = vst.msk [vmem:[#allocation2 + $0xe8] sm:$0xff] %vm22_vm0, %v822_v4  ;;  %918 = vst.msk [vmem:[#allocation2 + $0x1e8] sm:$0xff] %vm22_vm0, %v854_v5  ;;  %v954_v13 = vld [vmem:[#allocation2 + $0xf0] sm:$0xff] }
 0x11d   :  { %v1116_v3 = vld [vmem:[%s2359_s3 + $0x1c8] sm:$0xff]  ;;  %v1052_v9 = vadd.f32 %v1787_v63, %v981_v2  ;;  %1214 = vst.msk [vmem:[%s2360_s4 + $0xd8] sm:$0xff] %vm22_vm0, %v1150_v6  ;;  %v986_v14 = vld [vmem:[#allocation2 + $0x1f0] sm:$0xff]  ;;  %v1025_v16 = vadd.f32 %v1787_v63, %v954_v13  ;;  %v1087_v18 = vld [vmem:[%s2359_s3 + $0xe0] sm:$0xff] }
 0x11e   :  { %1246 = vst.msk [vmem:[%s2360_s4 + $0x1d8] sm:$0xff] %vm22_vm0, %v1182_v7  ;;  %v1148_v11 = vadd.f32 %v1084_v0, %v1020_v8  ;;  %v1121_v15 = vld [vmem:[%s2359_s3 + $0x1f0] sm:$0xff]  ;;  %v1057_v17 = vadd.f32 %v1787_v63, %v986_v14  ;;  %v1119_v63 = vld [vmem:[%s2359_s3 + $0x1e0] sm:$0xff]  ;;  %v1090_v26 = vld [vmem:[%s2359_s3 + $0xf8] sm:$0xff] }
 0x11f   :  { %v1180_v12 = vadd.f32 %v1116_v3, %v1052_v9  ;;  %v952_v19 = vld [vmem:[#allocation2 + $0xe0] sm:$0xff]  ;;  %v1153_v21 = vadd.f32 %v1089_v10, %v1025_v16  ;;  %v1122_v29 = vld [vmem:[%s2359_s3 + $0x1f8] sm:$0xff]  ;;  %v1088_v34 = vld [vmem:[%s2359_s3 + $0xe8] sm:$0xff] }
 0x120   :  { %1212 = vst.msk [vmem:[%s2360_s4 + $0xc8] sm:$0xff] %vm22_vm0, %v1148_v11  ;;  %v984_v20 = vld [vmem:[#allocation2 + $0x1e0] sm:$0xff]  ;;  %v1185_v22 = vadd.f32 %v1121_v15, %v1057_v17  ;;  %v955_v27 = vld [vmem:[#allocation2 + $0xf8] sm:$0xff]  ;;  %v1120_v37 = vld [vmem:[%s2359_s3 + $0x1e8] sm:$0xff] }
 0x121   :  { %1244 = vst.msk [vmem:[%s2360_s4 + $0x1c8] sm:$0xff] %vm22_vm0, %v1180_v12  ;;  %v1477_v23 = vld [vmem:[%s2358_s2] ss:$0 sm:$0xff]  ;;  %v987_v28 = vld [vmem:[#allocation2 + $0x1f8] sm:$0xff]  ;;  %1217 = vst.msk [vmem:[%s2360_s4 + $0xf0] sm:$0xff] %vm22_vm0, %v1153_v21 }
 0x122   :  { %v1023_v24 = vadd.f32 %v1477_v23, %v952_v19  ;;  %v1055_v25 = vadd.f32 %v1477_v23, %v984_v20  ;;  %1249 = vst.msk [vmem:[%s2360_s4 + $0x1f0] sm:$0xff] %vm22_vm0, %v1185_v22  ;;  %v1026_v32 = vadd.f32 %v1477_v23, %v955_v27  ;;  %v1058_v33 = vadd.f32 %v1477_v23, %v987_v28 }
 0x123   :  { %v953_v35 = vld [vmem:[#allocation2 + $0xe8] sm:$0xff] }
 0x124   :  { %v1151_v30 = vadd.f32 %v1087_v18, %v1023_v24  ;;  %v1183_v31 = vadd.f32 %v1119_v63, %v1055_v25  ;;  %v985_v36 = vld [vmem:[#allocation2 + $0x1e8] sm:$0xff]  ;;  %v1154_v38 = vadd.f32 %v1090_v26, %v1026_v32  ;;  %v1186_v39 = vadd.f32 %v1122_v29, %v1058_v33 }
 0x125   :  { %v1024_v40 = vadd.f32 %v1477_v23, %v953_v35  ;;  %v1056_v41 = vadd.f32 %v1477_v23, %v985_v36 }
 0x126   :  { %1215 = vst.msk [vmem:[%s2360_s4 + $0xe0] sm:$0xff] %vm22_vm0, %v1151_v30  ;;  %1247 = vst.msk [vmem:[%s2360_s4 + $0x1e0] sm:$0xff] %vm22_vm0, %v1183_v31 }
 0x127   :  { %1218 = vst.msk [vmem:[%s2360_s4 + $0xf8] sm:$0xff] %vm22_vm0, %v1154_v38  ;;  %1250 = vst.msk [vmem:[%s2360_s4 + $0x1f8] sm:$0xff] %vm22_vm0, %v1186_v39  ;;  %v1152_v42 = vadd.f32 %v1088_v34, %v1024_v40  ;;  %v1184_v43 = vadd.f32 %v1120_v37, %v1056_v41 }
 0x129   :  { %1216 = vst.msk [vmem:[%s2360_s4 + $0xe8] sm:$0xff] %vm22_vm0, %v1152_v42  ;;  %1248 = vst.msk [vmem:[%s2360_s4 + $0x1e8] sm:$0xff] %vm22_vm0, %v1184_v43 }

</bundles_post_ra>
